<compile_context>
chip_gen: v5e
topology: v5e:2x2
jax: 0.10.0
libtpu: 0.0.40
codegen_flags: <defaults>
</compile_context>

<pallas_src>
import math
import functools

import jax
import jax.numpy as jnp
from jax.experimental import pallas as pl
from jax.experimental.pallas import tpu as pltpu

IN_CHANNELS = 1
N_CLASSES = 5
D_MODEL = 128 * IN_CHANNELS          # d_model of both transformer encoders
N_HEADS = 8
HEAD_DIM = D_MODEL // N_HEADS
D_FF = 1024
N_LAYERS = 4
ATTN_SIZE = 128                      # AttentionLayer(128*in_channels, 128)
LN_EPS = 1e-5
CLF_PAD = 128                        # classifier output padded to 128 lanes


# --------------------------- Pallas kernels ---------------------------------

def _layernorm(y, g, b):
    mean = jnp.mean(y, axis=-1, keepdims=True)
    var = jnp.mean(jnp.square(y - mean), axis=-1, keepdims=True)
    return (y - mean) * jax.lax.rsqrt(var + LN_EPS) * g + b


def _encoder_layer_kernel(x_ref, wqkv_ref, bqkv_ref, wo_ref, bo_ref,
                          g1_ref, be1_ref, w1_ref, b1_ref,
                          w2_ref, b2_ref, g2_ref, be2_ref, o_ref,
                          *, scale):
    """Whole nn.TransformerEncoderLayer (post-norm, ReLU) for a block of seqs."""
    bb, t, d = x_ref.shape
    x = x_ref[...]                                   # (bb, t, d)
    xf = x.reshape(bb * t, d)                        # lane-dense rows

    # ---- fused QKV projection: one (rows,128) x (128,384) matmul ----
    qkv = jnp.dot(xf, wqkv_ref[...], preferred_element_type=jnp.float32)
    qkv = qkv + bqkv_ref[...]                        # (bb*t, 3d)
    q = qkv[:, 0 * d:1 * d].reshape(bb, t, d)
    k = qkv[:, 1 * d:2 * d].reshape(bb, t, d)
    v = qkv[:, 2 * d:3 * d].reshape(bb, t, d)

    # ---- multi-head attention: static loop over heads, batched over seqs ----
    heads = []
    for h in range(N_HEADS):
        sl = slice(h * HEAD_DIM, (h + 1) * HEAD_DIM)
        qh, kh, vh = q[..., sl], k[..., sl], v[..., sl]          # (bb, t, hd)
        s = jnp.einsum('bqd,bkd->bqk', qh, kh,
                       preferred_element_type=jnp.float32) * scale
        s = s - jnp.max(s, axis=-1, keepdims=True)
        p = jnp.exp(s)
        p = p * pl.reciprocal(jnp.sum(p, axis=-1, keepdims=True), approx=True)
        heads.append(jnp.einsum('bqk,bkd->bqd', p, vh,
                                preferred_element_type=jnp.float32))
    attn = jnp.concatenate(heads, axis=-1).reshape(bb * t, d)    # (rows, d)

    # ---- output projection + residual + LayerNorm 1 ----
    proj = jnp.dot(attn, wo_ref[...], preferred_element_type=jnp.float32)
    proj = proj + bo_ref[...]
    x1 = _layernorm(xf + proj, g1_ref[...], be1_ref[...])

    # ---- feed-forward (w1 -> ReLU -> w2) + residual + LayerNorm 2 ----
    ff = jnp.dot(x1, w1_ref[...], preferred_element_type=jnp.float32) + b1_ref[...]
    ff = jnp.maximum(ff, 0.0)
    ff = jnp.dot(ff, w2_ref[...], preferred_element_type=jnp.float32) + b2_ref[...]
    x2 = _layernorm(x1 + ff, g2_ref[...], be2_ref[...])

    o_ref[...] = x2.reshape(bb, t, d).astype(o_ref.dtype)


def encoder_layer(p, x):
    """One fused transformer-encoder layer.  x: (bsz, t, d) -> (bsz, t, d)."""
    bsz, t, d = x.shape
    sb = bsz // 2 if bsz % 2 == 0 else bsz      # >=2 parallel grid steps (v7x)
    nb = bsz // sb

    row_spec = pl.BlockSpec((sb, t, d), lambda i: (i, 0, 0))

    def full(shape):
        return pl.BlockSpec(shape, lambda i: tuple(0 for _ in shape))

    # Per-layer weights (~1.3 MiB f32) stay VMEM-resident; well under the
    # default scoped VMEM on all generations, so no vmem_limit override needed.
    return pl.pallas_call(
        functools.partial(_encoder_layer_kernel, scale=1.0 / math.sqrt(HEAD_DIM)),
        out_shape=jax.ShapeDtypeStruct((bsz, t, d), x.dtype),
        grid=(nb,),
        in_specs=[row_spec,
                  full((d, 3 * d)), full((1, 3 * d)),
                  full((d, d)), full((1, d)),
                  full((1, d)), full((1, d)),
                  full((d, D_FF)), full((1, D_FF)),
                  full((D_FF, d)), full((1, d)),
                  full((1, d)), full((1, d))],
        out_specs=row_spec,
        compiler_params=pltpu.CompilerParams(dimension_semantics=("parallel",)),
    )(x,
      p["wqkv"], p["bqkv"].reshape(1, 3 * d),
      p["wo"], p["bo"].reshape(1, d),
      p["ln1_g"].reshape(1, d), p["ln1_b"].reshape(1, d),
      p["w1"], p["b1"].reshape(1, D_FF),
      p["w2"], p["b2"].reshape(1, d),
      p["ln2_g"].reshape(1, d), p["ln2_b"].reshape(1, d))


def _attn_pool_kernel(x_ref, w_ref, b_ref, u_ref, o_ref):
    """physioex AttentionLayer: softmax(tanh(xW+b)·u) weighted sum over time."""
    bb, t, d = x_ref.shape
    x = x_ref[...]                                   # (bb, t, d)
    xf = x.reshape(bb * t, d)
    v = jnp.tanh(jnp.dot(xf, w_ref[...], preferred_element_type=jnp.float32)
                 + b_ref[...])                       # (bb*t, A)
    s = jnp.sum(v * u_ref[...], axis=-1, keepdims=True)         # (bb*t, 1)
    s = s.reshape(bb, t, 1)
    s = s - jnp.max(s, axis=1, keepdims=True)
    a = jnp.exp(s)
    a = a * pl.reciprocal(jnp.sum(a, axis=1, keepdims=True), approx=True)
    o_ref[...] = jnp.sum(x * a, axis=1, keepdims=True).astype(o_ref.dtype)


def attention_pool(x, w, b, u):
    bsz, t, d = x.shape
    a_dim = w.shape[1]
    sb = bsz // 2 if bsz % 2 == 0 else bsz
    nb = bsz // sb
    out = pl.pallas_call(
        _attn_pool_kernel,
        out_shape=jax.ShapeDtypeStruct((bsz, 1, d), x.dtype),
        grid=(nb,),
        in_specs=[pl.BlockSpec((sb, t, d), lambda i: (i, 0, 0)),
                  pl.BlockSpec((d, a_dim), lambda i: (0, 0)),
                  pl.BlockSpec((1, a_dim), lambda i: (0, 0)),
                  pl.BlockSpec((1, a_dim), lambda i: (0, 0))],
        out_specs=pl.BlockSpec((sb, 1, d), lambda i: (i, 0, 0)),
        compiler_params=pltpu.CompilerParams(dimension_semantics=("parallel",)),
    )(x, w, b.reshape(1, a_dim), u.reshape(1, a_dim))
    return out.reshape(bsz, d)


def _clf_kernel(x_ref, w_ref, b_ref, o_ref):
    y = jnp.dot(x_ref[...], w_ref[...], preferred_element_type=jnp.float32)
    o_ref[...] = (y + b_ref[...]).astype(o_ref.dtype)


def classifier(x, w_pad, b_pad):
    """Final Linear; output computed into a lane-dense 128-wide slab."""
    n, d = x.shape
    out = pl.pallas_call(
        _clf_kernel,
        out_shape=jax.ShapeDtypeStruct((n, CLF_PAD), x.dtype),
        grid=(1,),
        in_specs=[pl.BlockSpec((n, d), lambda i: (0, 0)),
                  pl.BlockSpec((d, CLF_PAD), lambda i: (0, 0)),
                  pl.BlockSpec((1, CLF_PAD), lambda i: (0, 0))],
        out_specs=pl.BlockSpec((n, CLF_PAD), lambda i: (0, 0)),
    )(x, w_pad, b_pad.reshape(1, CLF_PAD))
    return out[:, :N_CLASSES]


# --------------------------- Model glue (plain JAX) --------------------------

def positional_encoding(max_len, d):
    position = jnp.arange(max_len, dtype=jnp.float32)[:, None]
    div_term = jnp.exp(jnp.arange(0, d, 2, dtype=jnp.float32)
                       * (-math.log(10000.0) / d))
    pe = jnp.zeros((max_len, d), dtype=jnp.float32)
    pe = pe.at[:, 0::2].set(jnp.sin(position * div_term))
    pe = pe.at[:, 1::2].set(jnp.cos(position * div_term))
    return pe


def transformer_encoder(layers, x):
    for p in layers:
        x = encoder_layer(p, x)
    return x


def init_layer(key):
    ks = jax.random.split(key, 4)
    s = 0.02
    f32 = jnp.float32
    return {
        "wqkv": jax.random.normal(ks[0], (D_MODEL, 3 * D_MODEL), f32) * s,
        "bqkv": jnp.zeros((3 * D_MODEL,), f32),
        "wo": jax.random.normal(ks[1], (D_MODEL, D_MODEL), f32) * s,
        "bo": jnp.zeros((D_MODEL,), f32),
        "ln1_g": jnp.ones((D_MODEL,), f32),
        "ln1_b": jnp.zeros((D_MODEL,), f32),
        "w1": jax.random.normal(ks[2], (D_MODEL, D_FF), f32) * s,
        "b1": jnp.zeros((D_FF,), f32),
        "w2": jax.random.normal(ks[3], (D_FF, D_MODEL), f32) * s,
        "b2": jnp.zeros((D_MODEL,), f32),
        "ln2_g": jnp.ones((D_MODEL,), f32),
        "ln2_b": jnp.zeros((D_MODEL,), f32),
    }


def init_params(key):
    # NOTE: synthetic weights stored (in, out); a real PyTorch checkpoint
    # (out, in) would need transposing before use.
    k_ep, k_seq, k_att, k_clf = jax.random.split(key, 4)
    ka = jax.random.split(k_att, 3)
    f32 = jnp.float32
    clf_w = jnp.zeros((D_MODEL, CLF_PAD), f32)
    clf_w = clf_w.at[:, :N_CLASSES].set(
        jax.random.normal(k_clf, (D_MODEL, N_CLASSES), f32) * 0.02)
    return {
        "epoch_layers": [init_layer(k) for k in jax.random.split(k_ep, N_LAYERS)],
        "seq_layers": [init_layer(k) for k in jax.random.split(k_seq, N_LAYERS)],
        "attn_W": jax.random.normal(ka[0], (D_MODEL, ATTN_SIZE), f32) * 0.05,
        "attn_b": jax.random.normal(ka[1], (ATTN_SIZE,), f32) * 0.05,
        "attn_u": jax.random.normal(ka[2], (ATTN_SIZE,), f32) * 0.05,
        "clf_w": clf_w,
        "clf_b": jnp.zeros((CLF_PAD,), f32),
        "pe": positional_encoding(5000, D_MODEL),
    }


def net_forward(params, x):
    """x: (batch, L, nchan, T, F)  ->  logits (batch, L, n_classes)."""
    batch, L, nchan, T, F = x.shape
    xb = x.reshape(batch * L, nchan, T, F)

    # ---- EpochEncoder ----
    xb = xb[..., :128]                           # matches reference: x[..., :128]
    xb = jnp.transpose(xb, (0, 2, 1, 3)).reshape(batch * L, T, 128 * nchan)
    xb = xb + params["pe"][:T]                   # positional encoding
    xb = transformer_encoder(params["epoch_layers"], xb)
    xb = attention_pool(xb, params["attn_W"], params["attn_b"], params["attn_u"])

    # ---- SequenceEncoder ----
    xs = xb.reshape(batch, L, D_MODEL)
    xs = xs + params["pe"][:L]
    xs = transformer_encoder(params["seq_layers"], xs)
    y = classifier(xs.reshape(batch * L, D_MODEL), params["clf_w"], params["clf_b"])
    return y.reshape(batch, L, N_CLASSES)

# TODO(synk): nn.Dropout layers (p=0.1) are identity at inference and are omitted.
# TODO(synk): bf16 matmul inputs (f32 accumulate) would further speed up v6e/v7x;
#             kept f32 here to preserve the reference module's numerics exactly.


if __name__ == "__main__":
    key = jax.random.PRNGKey(0)
    k_param, k_x = jax.random.split(key)

    batch, L, nchan, T, F = 2, 4, IN_CHANNELS, 8, 130
    x = jax.random.normal(k_x, (batch, L, nchan, T, F), jnp.float32)
    params = init_params(k_param)

    fwd = jax.jit(net_forward)
    y = fwd(params, x)
    jax.block_until_ready(y)
    assert y.shape == (batch, L, N_CLASSES)
    assert bool(jnp.all(jnp.isfinite(y)))
    print("KERNEL_OK")
</pallas_src>

<mosaic_0001>
module attributes {stable_mosaic.version = 11 : i64} {
  func.func @_encoder_layer_kernel(%arg0: i32, %arg1: memref<4x8x128xf32, #tpu.memory_space<vmem>>, %arg2: memref<128x384xf32, #tpu.memory_space<vmem>>, %arg3: memref<1x384xf32, #tpu.memory_space<vmem>>, %arg4: memref<128x128xf32, #tpu.memory_space<vmem>>, %arg5: memref<1x128xf32, #tpu.memory_space<vmem>>, %arg6: memref<1x128xf32, #tpu.memory_space<vmem>>, %arg7: memref<1x128xf32, #tpu.memory_space<vmem>>, %arg8: memref<128x1024xf32, #tpu.memory_space<vmem>>, %arg9: memref<1x1024xf32, #tpu.memory_space<vmem>>, %arg10: memref<1024x128xf32, #tpu.memory_space<vmem>>, %arg11: memref<1x128xf32, #tpu.memory_space<vmem>>, %arg12: memref<1x128xf32, #tpu.memory_space<vmem>>, %arg13: memref<1x128xf32, #tpu.memory_space<vmem>>, %arg14: memref<4x8x128xf32, #tpu.memory_space<vmem>>) attributes {dimension_semantics = [#tpu.dimension_semantics<parallel>], iteration_bounds = array<i64: 2>, scalar_prefetch = 0 : i64, scratch_operands = 0 : i64, tpu.core_type = #tpu.core_type<tc>, window_params = [{transform_indices = @transform_0, window_bounds = array<i64: 4, 8, 128>}, {pipeline_mode = #tpu.pipeline_mode<synchronous>, transform_indices = @transform_1, window_bounds = array<i64: 128, 384>}, {pipeline_mode = #tpu.pipeline_mode<synchronous>, transform_indices = @transform_2, window_bounds = array<i64: 1, 384>}, {pipeline_mode = #tpu.pipeline_mode<synchronous>, transform_indices = @transform_3, window_bounds = array<i64: 128, 128>}, {pipeline_mode = #tpu.pipeline_mode<synchronous>, transform_indices = @transform_4, window_bounds = array<i64: 1, 128>}, {pipeline_mode = #tpu.pipeline_mode<synchronous>, transform_indices = @transform_5, window_bounds = array<i64: 1, 128>}, {pipeline_mode = #tpu.pipeline_mode<synchronous>, transform_indices = @transform_6, window_bounds = array<i64: 1, 128>}, {pipeline_mode = #tpu.pipeline_mode<synchronous>, transform_indices = @transform_7, window_bounds = array<i64: 128, 1024>}, {pipeline_mode = #tpu.pipeline_mode<synchronous>, transform_indices = @transform_8, window_bounds = array<i64: 1, 1024>}, {pipeline_mode = #tpu.pipeline_mode<synchronous>, transform_indices = @transform_9, window_bounds = array<i64: 1024, 128>}, {pipeline_mode = #tpu.pipeline_mode<synchronous>, transform_indices = @transform_10, window_bounds = array<i64: 1, 128>}, {pipeline_mode = #tpu.pipeline_mode<synchronous>, transform_indices = @transform_11, window_bounds = array<i64: 1, 128>}, {pipeline_mode = #tpu.pipeline_mode<synchronous>, transform_indices = @transform_12, window_bounds = array<i64: 1, 128>}, {transform_indices = @transform_13, window_bounds = array<i64: 4, 8, 128>}]} {
    %c0 = arith.constant 0 : index
    %c0_0 = arith.constant 0 : index
    %c0_1 = arith.constant 0 : index
    %0 = vector.load %arg1[%c0, %c0_0, %c0_1] : memref<4x8x128xf32, #tpu.memory_space<vmem>>, vector<4x8x128xf32>
    %1 = vector.shape_cast %0 : vector<4x8x128xf32> to vector<32x128xf32>
    %c0_2 = arith.constant 0 : index
    %c0_3 = arith.constant 0 : index
    %2 = vector.load %arg2[%c0_2, %c0_3] : memref<128x384xf32, #tpu.memory_space<vmem>>, vector<128x384xf32>
    %cst = arith.constant dense<0.000000e+00> : vector<32x384xf32>
    %3 = tpu.matmul %1, %2, %cst {dimension_numbers = #tpu.dot_dimension_numbers<[1], [0], [0], [1], [0, 0, 1, 1], [], []>} : vector<32x128xf32>, vector<128x384xf32>, vector<32x384xf32> -> vector<32x384xf32>
    %c0_4 = arith.constant 0 : index
    %c0_5 = arith.constant 0 : index
    %4 = vector.load %arg3[%c0_4, %c0_5] : memref<1x384xf32, #tpu.memory_space<vmem>>, vector<1x384xf32>
    %5 = vector.broadcast %4 : vector<1x384xf32> to vector<32x384xf32>
    %6 = arith.addf %3, %5 : vector<32x384xf32>
    %7 = vector.extract_strided_slice %6 {offsets = [0, 0], sizes = [32, 128], strides = [1, 1]} : vector<32x384xf32> to vector<32x128xf32>
    %8 = vector.shape_cast %7 : vector<32x128xf32> to vector<4x8x128xf32>
    %9 = vector.extract_strided_slice %6 {offsets = [0, 128], sizes = [32, 128], strides = [1, 1]} : vector<32x384xf32> to vector<32x128xf32>
    %10 = vector.shape_cast %9 : vector<32x128xf32> to vector<4x8x128xf32>
    %11 = vector.extract_strided_slice %6 {offsets = [0, 256], sizes = [32, 128], strides = [1, 1]} : vector<32x384xf32> to vector<32x128xf32>
    %12 = vector.shape_cast %11 : vector<32x128xf32> to vector<4x8x128xf32>
    %13 = vector.extract_strided_slice %8 {offsets = [0, 0, 0], sizes = [4, 8, 16], strides = [1, 1, 1]} : vector<4x8x128xf32> to vector<4x8x16xf32>
    %14 = vector.extract_strided_slice %10 {offsets = [0, 0, 0], sizes = [4, 8, 16], strides = [1, 1, 1]} : vector<4x8x128xf32> to vector<4x8x16xf32>
    %15 = vector.extract_strided_slice %12 {offsets = [0, 0, 0], sizes = [4, 8, 16], strides = [1, 1, 1]} : vector<4x8x128xf32> to vector<4x8x16xf32>
    "tpu.trace_start"() <{level = 10 : i32, message = "bqd,bkd->bqk"}> : () -> ()
    %cst_6 = arith.constant dense<0.000000e+00> : vector<4x8x8xf32>
    %16 = tpu.matmul %13, %14, %cst_6 {dimension_numbers = #tpu.dot_dimension_numbers<[2], [2], [1], [1], [0, 0, 0, 1, 1, 1], [0], [0]>} : vector<4x8x16xf32>, vector<4x8x16xf32>, vector<4x8x8xf32> -> vector<4x8x8xf32>
    "tpu.trace_stop"() : () -> ()
    %cst_7 = arith.constant 2.500000e-01 : f32
    %17 = vector.broadcast %cst_7 : f32 to vector<4x8x8xf32>
    %18 = arith.mulf %16, %17 : vector<4x8x8xf32>
    %cst_8 = arith.constant dense<0xFF800000> : vector<4x8xf32>
    %19 = vector.multi_reduction <maximumf>, %18, %cst_8 [2] : vector<4x8x8xf32> to vector<4x8xf32>
    %20 = vector.shape_cast %19 : vector<4x8xf32> to vector<4x8x1xf32>
    %21 = vector.broadcast %20 : vector<4x8x1xf32> to vector<4x8x8xf32>
    %22 = arith.subf %18, %21 : vector<4x8x8xf32>
    %23 = math.exp %22 : vector<4x8x8xf32>
    %cst_9 = arith.constant dense<0.000000e+00> : vector<4x8xf32>
    %24 = vector.multi_reduction <add>, %23, %cst_9 [2] : vector<4x8x8xf32> to vector<4x8xf32>
    %25 = vector.shape_cast %24 : vector<4x8xf32> to vector<4x8x1xf32>
    %26 = tpu.reciprocal %25 {approx = true} : vector<4x8x1xf32> -> vector<4x8x1xf32>
    %27 = vector.broadcast %26 : vector<4x8x1xf32> to vector<4x8x8xf32>
    %28 = arith.mulf %23, %27 : vector<4x8x8xf32>
    "tpu.trace_start"() <{level = 10 : i32, message = "bqk,bkd->bqd"}> : () -> ()
    %cst_10 = arith.constant dense<0.000000e+00> : vector<4x8x16xf32>
    %29 = tpu.matmul %28, %15, %cst_10 {dimension_numbers = #tpu.dot_dimension_numbers<[2], [1], [1], [2], [0, 0, 0, 1, 1, 2], [0], [0]>} : vector<4x8x8xf32>, vector<4x8x16xf32>, vector<4x8x16xf32> -> vector<4x8x16xf32>
    "tpu.trace_stop"() : () -> ()
    %30 = vector.extract_strided_slice %8 {offsets = [0, 0, 16], sizes = [4, 8, 16], strides = [1, 1, 1]} : vector<4x8x128xf32> to vector<4x8x16xf32>
    %31 = vector.extract_strided_slice %10 {offsets = [0, 0, 16], sizes = [4, 8, 16], strides = [1, 1, 1]} : vector<4x8x128xf32> to vector<4x8x16xf32>
    %32 = vector.extract_strided_slice %12 {offsets = [0, 0, 16], sizes = [4, 8, 16], strides = [1, 1, 1]} : vector<4x8x128xf32> to vector<4x8x16xf32>
    "tpu.trace_start"() <{level = 10 : i32, message = "bqd,bkd->bqk"}> : () -> ()
    %cst_11 = arith.constant dense<0.000000e+00> : vector<4x8x8xf32>
    %33 = tpu.matmul %30, %31, %cst_11 {dimension_numbers = #tpu.dot_dimension_numbers<[2], [2], [1], [1], [0, 0, 0, 1, 1, 1], [0], [0]>} : vector<4x8x16xf32>, vector<4x8x16xf32>, vector<4x8x8xf32> -> vector<4x8x8xf32>
    "tpu.trace_stop"() : () -> ()
    %cst_12 = arith.constant 2.500000e-01 : f32
    %34 = vector.broadcast %cst_12 : f32 to vector<4x8x8xf32>
    %35 = arith.mulf %33, %34 : vector<4x8x8xf32>
    %cst_13 = arith.constant dense<0xFF800000> : vector<4x8xf32>
    %36 = vector.multi_reduction <maximumf>, %35, %cst_13 [2] : vector<4x8x8xf32> to vector<4x8xf32>
    %37 = vector.shape_cast %36 : vector<4x8xf32> to vector<4x8x1xf32>
    %38 = vector.broadcast %37 : vector<4x8x1xf32> to vector<4x8x8xf32>
    %39 = arith.subf %35, %38 : vector<4x8x8xf32>
    %40 = math.exp %39 : vector<4x8x8xf32>
    %cst_14 = arith.constant dense<0.000000e+00> : vector<4x8xf32>
    %41 = vector.multi_reduction <add>, %40, %cst_14 [2] : vector<4x8x8xf32> to vector<4x8xf32>
    %42 = vector.shape_cast %41 : vector<4x8xf32> to vector<4x8x1xf32>
    %43 = tpu.reciprocal %42 {approx = true} : vector<4x8x1xf32> -> vector<4x8x1xf32>
    %44 = vector.broadcast %43 : vector<4x8x1xf32> to vector<4x8x8xf32>
    %45 = arith.mulf %40, %44 : vector<4x8x8xf32>
    "tpu.trace_start"() <{level = 10 : i32, message = "bqk,bkd->bqd"}> : () -> ()
    %cst_15 = arith.constant dense<0.000000e+00> : vector<4x8x16xf32>
    %46 = tpu.matmul %45, %32, %cst_15 {dimension_numbers = #tpu.dot_dimension_numbers<[2], [1], [1], [2], [0, 0, 0, 1, 1, 2], [0], [0]>} : vector<4x8x8xf32>, vector<4x8x16xf32>, vector<4x8x16xf32> -> vector<4x8x16xf32>
    "tpu.trace_stop"() : () -> ()
    %47 = vector.extract_strided_slice %8 {offsets = [0, 0, 32], sizes = [4, 8, 16], strides = [1, 1, 1]} : vector<4x8x128xf32> to vector<4x8x16xf32>
    %48 = vector.extract_strided_slice %10 {offsets = [0, 0, 32], sizes = [4, 8, 16], strides = [1, 1, 1]} : vector<4x8x128xf32> to vector<4x8x16xf32>
    %49 = vector.extract_strided_slice %12 {offsets = [0, 0, 32], sizes = [4, 8, 16], strides = [1, 1, 1]} : vector<4x8x128xf32> to vector<4x8x16xf32>
    "tpu.trace_start"() <{level = 10 : i32, message = "bqd,bkd->bqk"}> : () -> ()
    %cst_16 = arith.constant dense<0.000000e+00> : vector<4x8x8xf32>
    %50 = tpu.matmul %47, %48, %cst_16 {dimension_numbers = #tpu.dot_dimension_numbers<[2], [2], [1], [1], [0, 0, 0, 1, 1, 1], [0], [0]>} : vector<4x8x16xf32>, vector<4x8x16xf32>, vector<4x8x8xf32> -> vector<4x8x8xf32>
    "tpu.trace_stop"() : () -> ()
    %cst_17 = arith.constant 2.500000e-01 : f32
    %51 = vector.broadcast %cst_17 : f32 to vector<4x8x8xf32>
    %52 = arith.mulf %50, %51 : vector<4x8x8xf32>
    %cst_18 = arith.constant dense<0xFF800000> : vector<4x8xf32>
    %53 = vector.multi_reduction <maximumf>, %52, %cst_18 [2] : vector<4x8x8xf32> to vector<4x8xf32>
    %54 = vector.shape_cast %53 : vector<4x8xf32> to vector<4x8x1xf32>
    %55 = vector.broadcast %54 : vector<4x8x1xf32> to vector<4x8x8xf32>
    %56 = arith.subf %52, %55 : vector<4x8x8xf32>
    %57 = math.exp %56 : vector<4x8x8xf32>
    %cst_19 = arith.constant dense<0.000000e+00> : vector<4x8xf32>
    %58 = vector.multi_reduction <add>, %57, %cst_19 [2] : vector<4x8x8xf32> to vector<4x8xf32>
    %59 = vector.shape_cast %58 : vector<4x8xf32> to vector<4x8x1xf32>
    %60 = tpu.reciprocal %59 {approx = true} : vector<4x8x1xf32> -> vector<4x8x1xf32>
    %61 = vector.broadcast %60 : vector<4x8x1xf32> to vector<4x8x8xf32>
    %62 = arith.mulf %57, %61 : vector<4x8x8xf32>
    "tpu.trace_start"() <{level = 10 : i32, message = "bqk,bkd->bqd"}> : () -> ()
    %cst_20 = arith.constant dense<0.000000e+00> : vector<4x8x16xf32>
    %63 = tpu.matmul %62, %49, %cst_20 {dimension_numbers = #tpu.dot_dimension_numbers<[2], [1], [1], [2], [0, 0, 0, 1, 1, 2], [0], [0]>} : vector<4x8x8xf32>, vector<4x8x16xf32>, vector<4x8x16xf32> -> vector<4x8x16xf32>
    "tpu.trace_stop"() : () -> ()
    %64 = vector.extract_strided_slice %8 {offsets = [0, 0, 48], sizes = [4, 8, 16], strides = [1, 1, 1]} : vector<4x8x128xf32> to vector<4x8x16xf32>
    %65 = vector.extract_strided_slice %10 {offsets = [0, 0, 48], sizes = [4, 8, 16], strides = [1, 1, 1]} : vector<4x8x128xf32> to vector<4x8x16xf32>
    %66 = vector.extract_strided_slice %12 {offsets = [0, 0, 48], sizes = [4, 8, 16], strides = [1, 1, 1]} : vector<4x8x128xf32> to vector<4x8x16xf32>
    "tpu.trace_start"() <{level = 10 : i32, message = "bqd,bkd->bqk"}> : () -> ()
    %cst_21 = arith.constant dense<0.000000e+00> : vector<4x8x8xf32>
    %67 = tpu.matmul %64, %65, %cst_21 {dimension_numbers = #tpu.dot_dimension_numbers<[2], [2], [1], [1], [0, 0, 0, 1, 1, 1], [0], [0]>} : vector<4x8x16xf32>, vector<4x8x16xf32>, vector<4x8x8xf32> -> vector<4x8x8xf32>
    "tpu.trace_stop"() : () -> ()
    %cst_22 = arith.constant 2.500000e-01 : f32
    %68 = vector.broadcast %cst_22 : f32 to vector<4x8x8xf32>
    %69 = arith.mulf %67, %68 : vector<4x8x8xf32>
    %cst_23 = arith.constant dense<0xFF800000> : vector<4x8xf32>
    %70 = vector.multi_reduction <maximumf>, %69, %cst_23 [2] : vector<4x8x8xf32> to vector<4x8xf32>
    %71 = vector.shape_cast %70 : vector<4x8xf32> to vector<4x8x1xf32>
    %72 = vector.broadcast %71 : vector<4x8x1xf32> to vector<4x8x8xf32>
    %73 = arith.subf %69, %72 : vector<4x8x8xf32>
    %74 = math.exp %73 : vector<4x8x8xf32>
    %cst_24 = arith.constant dense<0.000000e+00> : vector<4x8xf32>
    %75 = vector.multi_reduction <add>, %74, %cst_24 [2] : vector<4x8x8xf32> to vector<4x8xf32>
    %76 = vector.shape_cast %75 : vector<4x8xf32> to vector<4x8x1xf32>
    %77 = tpu.reciprocal %76 {approx = true} : vector<4x8x1xf32> -> vector<4x8x1xf32>
    %78 = vector.broadcast %77 : vector<4x8x1xf32> to vector<4x8x8xf32>
    %79 = arith.mulf %74, %78 : vector<4x8x8xf32>
    "tpu.trace_start"() <{level = 10 : i32, message = "bqk,bkd->bqd"}> : () -> ()
    %cst_25 = arith.constant dense<0.000000e+00> : vector<4x8x16xf32>
    %80 = tpu.matmul %79, %66, %cst_25 {dimension_numbers = #tpu.dot_dimension_numbers<[2], [1], [1], [2], [0, 0, 0, 1, 1, 2], [0], [0]>} : vector<4x8x8xf32>, vector<4x8x16xf32>, vector<4x8x16xf32> -> vector<4x8x16xf32>
    "tpu.trace_stop"() : () -> ()
    %81 = vector.extract_strided_slice %8 {offsets = [0, 0, 64], sizes = [4, 8, 16], strides = [1, 1, 1]} : vector<4x8x128xf32> to vector<4x8x16xf32>
    %82 = vector.extract_strided_slice %10 {offsets = [0, 0, 64], sizes = [4, 8, 16], strides = [1, 1, 1]} : vector<4x8x128xf32> to vector<4x8x16xf32>
    %83 = vector.extract_strided_slice %12 {offsets = [0, 0, 64], sizes = [4, 8, 16], strides = [1, 1, 1]} : vector<4x8x128xf32> to vector<4x8x16xf32>
    "tpu.trace_start"() <{level = 10 : i32, message = "bqd,bkd->bqk"}> : () -> ()
    %cst_26 = arith.constant dense<0.000000e+00> : vector<4x8x8xf32>
    %84 = tpu.matmul %81, %82, %cst_26 {dimension_numbers = #tpu.dot_dimension_numbers<[2], [2], [1], [1], [0, 0, 0, 1, 1, 1], [0], [0]>} : vector<4x8x16xf32>, vector<4x8x16xf32>, vector<4x8x8xf32> -> vector<4x8x8xf32>
    "tpu.trace_stop"() : () -> ()
    %cst_27 = arith.constant 2.500000e-01 : f32
    %85 = vector.broadcast %cst_27 : f32 to vector<4x8x8xf32>
    %86 = arith.mulf %84, %85 : vector<4x8x8xf32>
    %cst_28 = arith.constant dense<0xFF800000> : vector<4x8xf32>
    %87 = vector.multi_reduction <maximumf>, %86, %cst_28 [2] : vector<4x8x8xf32> to vector<4x8xf32>
    %88 = vector.shape_cast %87 : vector<4x8xf32> to vector<4x8x1xf32>
    %89 = vector.broadcast %88 : vector<4x8x1xf32> to vector<4x8x8xf32>
    %90 = arith.subf %86, %89 : vector<4x8x8xf32>
    %91 = math.exp %90 : vector<4x8x8xf32>
    %cst_29 = arith.constant dense<0.000000e+00> : vector<4x8xf32>
    %92 = vector.multi_reduction <add>, %91, %cst_29 [2] : vector<4x8x8xf32> to vector<4x8xf32>
    %93 = vector.shape_cast %92 : vector<4x8xf32> to vector<4x8x1xf32>
    %94 = tpu.reciprocal %93 {approx = true} : vector<4x8x1xf32> -> vector<4x8x1xf32>
    %95 = vector.broadcast %94 : vector<4x8x1xf32> to vector<4x8x8xf32>
    %96 = arith.mulf %91, %95 : vector<4x8x8xf32>
    "tpu.trace_start"() <{level = 10 : i32, message = "bqk,bkd->bqd"}> : () -> ()
    %cst_30 = arith.constant dense<0.000000e+00> : vector<4x8x16xf32>
    %97 = tpu.matmul %96, %83, %cst_30 {dimension_numbers = #tpu.dot_dimension_numbers<[2], [1], [1], [2], [0, 0, 0, 1, 1, 2], [0], [0]>} : vector<4x8x8xf32>, vector<4x8x16xf32>, vector<4x8x16xf32> -> vector<4x8x16xf32>
    "tpu.trace_stop"() : () -> ()
    %98 = vector.extract_strided_slice %8 {offsets = [0, 0, 80], sizes = [4, 8, 16], strides = [1, 1, 1]} : vector<4x8x128xf32> to vector<4x8x16xf32>
    %99 = vector.extract_strided_slice %10 {offsets = [0, 0, 80], sizes = [4, 8, 16], strides = [1, 1, 1]} : vector<4x8x128xf32> to vector<4x8x16xf32>
    %100 = vector.extract_strided_slice %12 {offsets = [0, 0, 80], sizes = [4, 8, 16], strides = [1, 1, 1]} : vector<4x8x128xf32> to vector<4x8x16xf32>
    "tpu.trace_start"() <{level = 10 : i32, message = "bqd,bkd->bqk"}> : () -> ()
    %cst_31 = arith.constant dense<0.000000e+00> : vector<4x8x8xf32>
    %101 = tpu.matmul %98, %99, %cst_31 {dimension_numbers = #tpu.dot_dimension_numbers<[2], [2], [1], [1], [0, 0, 0, 1, 1, 1], [0], [0]>} : vector<4x8x16xf32>, vector<4x8x16xf32>, vector<4x8x8xf32> -> vector<4x8x8xf32>
    "tpu.trace_stop"() : () -> ()
    %cst_32 = arith.constant 2.500000e-01 : f32
    %102 = vector.broadcast %cst_32 : f32 to vector<4x8x8xf32>
    %103 = arith.mulf %101, %102 : vector<4x8x8xf32>
    %cst_33 = arith.constant dense<0xFF800000> : vector<4x8xf32>
    %104 = vector.multi_reduction <maximumf>, %103, %cst_33 [2] : vector<4x8x8xf32> to vector<4x8xf32>
    %105 = vector.shape_cast %104 : vector<4x8xf32> to vector<4x8x1xf32>
    %106 = vector.broadcast %105 : vector<4x8x1xf32> to vector<4x8x8xf32>
    %107 = arith.subf %103, %106 : vector<4x8x8xf32>
    %108 = math.exp %107 : vector<4x8x8xf32>
    %cst_34 = arith.constant dense<0.000000e+00> : vector<4x8xf32>
    %109 = vector.multi_reduction <add>, %108, %cst_34 [2] : vector<4x8x8xf32> to vector<4x8xf32>
    %110 = vector.shape_cast %109 : vector<4x8xf32> to vector<4x8x1xf32>
    %111 = tpu.reciprocal %110 {approx = true} : vector<4x8x1xf32> -> vector<4x8x1xf32>
    %112 = vector.broadcast %111 : vector<4x8x1xf32> to vector<4x8x8xf32>
    %113 = arith.mulf %108, %112 : vector<4x8x8xf32>
    "tpu.trace_start"() <{level = 10 : i32, message = "bqk,bkd->bqd"}> : () -> ()
    %cst_35 = arith.constant dense<0.000000e+00> : vector<4x8x16xf32>
    %114 = tpu.matmul %113, %100, %cst_35 {dimension_numbers = #tpu.dot_dimension_numbers<[2], [1], [1], [2], [0, 0, 0, 1, 1, 2], [0], [0]>} : vector<4x8x8xf32>, vector<4x8x16xf32>, vector<4x8x16xf32> -> vector<4x8x16xf32>
    "tpu.trace_stop"() : () -> ()
    %115 = vector.extract_strided_slice %8 {offsets = [0, 0, 96], sizes = [4, 8, 16], strides = [1, 1, 1]} : vector<4x8x128xf32> to vector<4x8x16xf32>
    %116 = vector.extract_strided_slice %10 {offsets = [0, 0, 96], sizes = [4, 8, 16], strides = [1, 1, 1]} : vector<4x8x128xf32> to vector<4x8x16xf32>
    %117 = vector.extract_strided_slice %12 {offsets = [0, 0, 96], sizes = [4, 8, 16], strides = [1, 1, 1]} : vector<4x8x128xf32> to vector<4x8x16xf32>
    "tpu.trace_start"() <{level = 10 : i32, message = "bqd,bkd->bqk"}> : () -> ()
    %cst_36 = arith.constant dense<0.000000e+00> : vector<4x8x8xf32>
    %118 = tpu.matmul %115, %116, %cst_36 {dimension_numbers = #tpu.dot_dimension_numbers<[2], [2], [1], [1], [0, 0, 0, 1, 1, 1], [0], [0]>} : vector<4x8x16xf32>, vector<4x8x16xf32>, vector<4x8x8xf32> -> vector<4x8x8xf32>
    "tpu.trace_stop"() : () -> ()
    %cst_37 = arith.constant 2.500000e-01 : f32
    %119 = vector.broadcast %cst_37 : f32 to vector<4x8x8xf32>
    %120 = arith.mulf %118, %119 : vector<4x8x8xf32>
    %cst_38 = arith.constant dense<0xFF800000> : vector<4x8xf32>
    %121 = vector.multi_reduction <maximumf>, %120, %cst_38 [2] : vector<4x8x8xf32> to vector<4x8xf32>
    %122 = vector.shape_cast %121 : vector<4x8xf32> to vector<4x8x1xf32>
    %123 = vector.broadcast %122 : vector<4x8x1xf32> to vector<4x8x8xf32>
    %124 = arith.subf %120, %123 : vector<4x8x8xf32>
    %125 = math.exp %124 : vector<4x8x8xf32>
    %cst_39 = arith.constant dense<0.000000e+00> : vector<4x8xf32>
    %126 = vector.multi_reduction <add>, %125, %cst_39 [2] : vector<4x8x8xf32> to vector<4x8xf32>
    %127 = vector.shape_cast %126 : vector<4x8xf32> to vector<4x8x1xf32>
    %128 = tpu.reciprocal %127 {approx = true} : vector<4x8x1xf32> -> vector<4x8x1xf32>
    %129 = vector.broadcast %128 : vector<4x8x1xf32> to vector<4x8x8xf32>
    %130 = arith.mulf %125, %129 : vector<4x8x8xf32>
    "tpu.trace_start"() <{level = 10 : i32, message = "bqk,bkd->bqd"}> : () -> ()
    %cst_40 = arith.constant dense<0.000000e+00> : vector<4x8x16xf32>
    %131 = tpu.matmul %130, %117, %cst_40 {dimension_numbers = #tpu.dot_dimension_numbers<[2], [1], [1], [2], [0, 0, 0, 1, 1, 2], [0], [0]>} : vector<4x8x8xf32>, vector<4x8x16xf32>, vector<4x8x16xf32> -> vector<4x8x16xf32>
    "tpu.trace_stop"() : () -> ()
    %132 = vector.extract_strided_slice %8 {offsets = [0, 0, 112], sizes = [4, 8, 16], strides = [1, 1, 1]} : vector<4x8x128xf32> to vector<4x8x16xf32>
    %133 = vector.extract_strided_slice %10 {offsets = [0, 0, 112], sizes = [4, 8, 16], strides = [1, 1, 1]} : vector<4x8x128xf32> to vector<4x8x16xf32>
    %134 = vector.extract_strided_slice %12 {offsets = [0, 0, 112], sizes = [4, 8, 16], strides = [1, 1, 1]} : vector<4x8x128xf32> to vector<4x8x16xf32>
    "tpu.trace_start"() <{level = 10 : i32, message = "bqd,bkd->bqk"}> : () -> ()
    %cst_41 = arith.constant dense<0.000000e+00> : vector<4x8x8xf32>
    %135 = tpu.matmul %132, %133, %cst_41 {dimension_numbers = #tpu.dot_dimension_numbers<[2], [2], [1], [1], [0, 0, 0, 1, 1, 1], [0], [0]>} : vector<4x8x16xf32>, vector<4x8x16xf32>, vector<4x8x8xf32> -> vector<4x8x8xf32>
    "tpu.trace_stop"() : () -> ()
    %cst_42 = arith.constant 2.500000e-01 : f32
    %136 = vector.broadcast %cst_42 : f32 to vector<4x8x8xf32>
    %137 = arith.mulf %135, %136 : vector<4x8x8xf32>
    %cst_43 = arith.constant dense<0xFF800000> : vector<4x8xf32>
    %138 = vector.multi_reduction <maximumf>, %137, %cst_43 [2] : vector<4x8x8xf32> to vector<4x8xf32>
    %139 = vector.shape_cast %138 : vector<4x8xf32> to vector<4x8x1xf32>
    %140 = vector.broadcast %139 : vector<4x8x1xf32> to vector<4x8x8xf32>
    %141 = arith.subf %137, %140 : vector<4x8x8xf32>
    %142 = math.exp %141 : vector<4x8x8xf32>
    %cst_44 = arith.constant dense<0.000000e+00> : vector<4x8xf32>
    %143 = vector.multi_reduction <add>, %142, %cst_44 [2] : vector<4x8x8xf32> to vector<4x8xf32>
    %144 = vector.shape_cast %143 : vector<4x8xf32> to vector<4x8x1xf32>
    %145 = tpu.reciprocal %144 {approx = true} : vector<4x8x1xf32> -> vector<4x8x1xf32>
    %146 = vector.broadcast %145 : vector<4x8x1xf32> to vector<4x8x8xf32>
    %147 = arith.mulf %142, %146 : vector<4x8x8xf32>
    "tpu.trace_start"() <{level = 10 : i32, message = "bqk,bkd->bqd"}> : () -> ()
    %cst_45 = arith.constant dense<0.000000e+00> : vector<4x8x16xf32>
    %148 = tpu.matmul %147, %134, %cst_45 {dimension_numbers = #tpu.dot_dimension_numbers<[2], [1], [1], [2], [0, 0, 0, 1, 1, 2], [0], [0]>} : vector<4x8x8xf32>, vector<4x8x16xf32>, vector<4x8x16xf32> -> vector<4x8x16xf32>
    "tpu.trace_stop"() : () -> ()
    %149 = tpu.concatenate %29, %46, %63, %80, %97, %114, %131, %148 in 2 : vector<4x8x16xf32>, vector<4x8x16xf32>, vector<4x8x16xf32>, vector<4x8x16xf32>, vector<4x8x16xf32>, vector<4x8x16xf32>, vector<4x8x16xf32>, vector<4x8x16xf32> -> vector<4x8x128xf32>
    %150 = vector.shape_cast %149 : vector<4x8x128xf32> to vector<32x128xf32>
    %c0_46 = arith.constant 0 : index
    %c0_47 = arith.constant 0 : index
    %151 = vector.load %arg4[%c0_46, %c0_47] : memref<128x128xf32, #tpu.memory_space<vmem>>, vector<128x128xf32>
    %cst_48 = arith.constant dense<0.000000e+00> : vector<32x128xf32>
    %152 = tpu.matmul %150, %151, %cst_48 {dimension_numbers = #tpu.dot_dimension_numbers<[1], [0], [0], [1], [0, 0, 1, 1], [], []>} : vector<32x128xf32>, vector<128x128xf32>, vector<32x128xf32> -> vector<32x128xf32>
    %c0_49 = arith.constant 0 : index
    %c0_50 = arith.constant 0 : index
    %153 = vector.load %arg5[%c0_49, %c0_50] : memref<1x128xf32, #tpu.memory_space<vmem>>, vector<1x128xf32>
    %154 = vector.broadcast %153 : vector<1x128xf32> to vector<32x128xf32>
    %155 = arith.addf %152, %154 : vector<32x128xf32>
    %156 = arith.addf %1, %155 : vector<32x128xf32>
    %c0_51 = arith.constant 0 : index
    %c0_52 = arith.constant 0 : index
    %157 = vector.load %arg6[%c0_51, %c0_52] : memref<1x128xf32, #tpu.memory_space<vmem>>, vector<1x128xf32>
    %c0_53 = arith.constant 0 : index
    %c0_54 = arith.constant 0 : index
    %158 = vector.load %arg7[%c0_53, %c0_54] : memref<1x128xf32, #tpu.memory_space<vmem>>, vector<1x128xf32>
    %cst_55 = arith.constant dense<0.000000e+00> : vector<32xf32>
    %159 = vector.multi_reduction <add>, %156, %cst_55 [1] : vector<32x128xf32> to vector<32xf32>
    %160 = vector.shape_cast %159 : vector<32xf32> to vector<32x1xf32>
    %cst_56 = arith.constant 1.280000e+02 : f32
    %161 = vector.broadcast %cst_56 : f32 to vector<32x1xf32>
    %162 = arith.divf %160, %161 : vector<32x1xf32>
    %163 = vector.broadcast %162 : vector<32x1xf32> to vector<32x128xf32>
    %164 = arith.subf %156, %163 : vector<32x128xf32>
    %165 = arith.mulf %164, %164 : vector<32x128xf32>
    %cst_57 = arith.constant dense<0.000000e+00> : vector<32xf32>
    %166 = vector.multi_reduction <add>, %165, %cst_57 [1] : vector<32x128xf32> to vector<32xf32>
    %167 = vector.shape_cast %166 : vector<32xf32> to vector<32x1xf32>
    %cst_58 = arith.constant 1.280000e+02 : f32
    %168 = vector.broadcast %cst_58 : f32 to vector<32x1xf32>
    %169 = arith.divf %167, %168 : vector<32x1xf32>
    %170 = vector.broadcast %162 : vector<32x1xf32> to vector<32x128xf32>
    %171 = arith.subf %156, %170 : vector<32x128xf32>
    %cst_59 = arith.constant 9.99999974E-6 : f32
    %172 = vector.broadcast %cst_59 : f32 to vector<32x1xf32>
    %173 = arith.addf %169, %172 : vector<32x1xf32>
    %174 = math.rsqrt %173 : vector<32x1xf32>
    %175 = vector.broadcast %174 : vector<32x1xf32> to vector<32x128xf32>
    %176 = arith.mulf %171, %175 : vector<32x128xf32>
    %177 = vector.broadcast %157 : vector<1x128xf32> to vector<32x128xf32>
    %178 = arith.mulf %176, %177 : vector<32x128xf32>
    %179 = vector.broadcast %158 : vector<1x128xf32> to vector<32x128xf32>
    %180 = arith.addf %178, %179 : vector<32x128xf32>
    %c0_60 = arith.constant 0 : index
    %c0_61 = arith.constant 0 : index
    %181 = vector.load %arg8[%c0_60, %c0_61] : memref<128x1024xf32, #tpu.memory_space<vmem>>, vector<128x1024xf32>
    %cst_62 = arith.constant dense<0.000000e+00> : vector<32x1024xf32>
    %182 = tpu.matmul %180, %181, %cst_62 {dimension_numbers = #tpu.dot_dimension_numbers<[1], [0], [0], [1], [0, 0, 1, 1], [], []>} : vector<32x128xf32>, vector<128x1024xf32>, vector<32x1024xf32> -> vector<32x1024xf32>
    %c0_63 = arith.constant 0 : index
    %c0_64 = arith.constant 0 : index
    %183 = vector.load %arg9[%c0_63, %c0_64] : memref<1x1024xf32, #tpu.memory_space<vmem>>, vector<1x1024xf32>
    %184 = vector.broadcast %183 : vector<1x1024xf32> to vector<32x1024xf32>
    %185 = arith.addf %182, %184 : vector<32x1024xf32>
    %cst_65 = arith.constant 0.000000e+00 : f32
    %186 = vector.broadcast %cst_65 : f32 to vector<32x1024xf32>
    %187 = arith.maximumf %185, %186 : vector<32x1024xf32>
    %c0_66 = arith.constant 0 : index
    %c0_67 = arith.constant 0 : index
    %188 = vector.load %arg10[%c0_66, %c0_67] : memref<1024x128xf32, #tpu.memory_space<vmem>>, vector<1024x128xf32>
    %cst_68 = arith.constant dense<0.000000e+00> : vector<32x128xf32>
    %189 = tpu.matmul %187, %188, %cst_68 {dimension_numbers = #tpu.dot_dimension_numbers<[1], [0], [0], [1], [0, 0, 1, 1], [], []>} : vector<32x1024xf32>, vector<1024x128xf32>, vector<32x128xf32> -> vector<32x128xf32>
    %c0_69 = arith.constant 0 : index
    %c0_70 = arith.constant 0 : index
    %190 = vector.load %arg11[%c0_69, %c0_70] : memref<1x128xf32, #tpu.memory_space<vmem>>, vector<1x128xf32>
    %191 = vector.broadcast %190 : vector<1x128xf32> to vector<32x128xf32>
    %192 = arith.addf %189, %191 : vector<32x128xf32>
    %193 = arith.addf %180, %192 : vector<32x128xf32>
    %c0_71 = arith.constant 0 : index
    %c0_72 = arith.constant 0 : index
    %194 = vector.load %arg12[%c0_71, %c0_72] : memref<1x128xf32, #tpu.memory_space<vmem>>, vector<1x128xf32>
    %c0_73 = arith.constant 0 : index
    %c0_74 = arith.constant 0 : index
    %195 = vector.load %arg13[%c0_73, %c0_74] : memref<1x128xf32, #tpu.memory_space<vmem>>, vector<1x128xf32>
    %cst_75 = arith.constant dense<0.000000e+00> : vector<32xf32>
    %196 = vector.multi_reduction <add>, %193, %cst_75 [1] : vector<32x128xf32> to vector<32xf32>
    %197 = vector.shape_cast %196 : vector<32xf32> to vector<32x1xf32>
    %cst_76 = arith.constant 1.280000e+02 : f32
    %198 = vector.broadcast %cst_76 : f32 to vector<32x1xf32>
    %199 = arith.divf %197, %198 : vector<32x1xf32>
    %200 = vector.broadcast %199 : vector<32x1xf32> to vector<32x128xf32>
    %201 = arith.subf %193, %200 : vector<32x128xf32>
    %202 = arith.mulf %201, %201 : vector<32x128xf32>
    %cst_77 = arith.constant dense<0.000000e+00> : vector<32xf32>
    %203 = vector.multi_reduction <add>, %202, %cst_77 [1] : vector<32x128xf32> to vector<32xf32>
    %204 = vector.shape_cast %203 : vector<32xf32> to vector<32x1xf32>
    %cst_78 = arith.constant 1.280000e+02 : f32
    %205 = vector.broadcast %cst_78 : f32 to vector<32x1xf32>
    %206 = arith.divf %204, %205 : vector<32x1xf32>
    %207 = vector.broadcast %199 : vector<32x1xf32> to vector<32x128xf32>
    %208 = arith.subf %193, %207 : vector<32x128xf32>
    %cst_79 = arith.constant 9.99999974E-6 : f32
    %209 = vector.broadcast %cst_79 : f32 to vector<32x1xf32>
    %210 = arith.addf %206, %209 : vector<32x1xf32>
    %211 = math.rsqrt %210 : vector<32x1xf32>
    %212 = vector.broadcast %211 : vector<32x1xf32> to vector<32x128xf32>
    %213 = arith.mulf %208, %212 : vector<32x128xf32>
    %214 = vector.broadcast %194 : vector<1x128xf32> to vector<32x128xf32>
    %215 = arith.mulf %213, %214 : vector<32x128xf32>
    %216 = vector.broadcast %195 : vector<1x128xf32> to vector<32x128xf32>
    %217 = arith.addf %215, %216 : vector<32x128xf32>
    %218 = vector.shape_cast %217 : vector<32x128xf32> to vector<4x8x128xf32>
    %c0_80 = arith.constant 0 : index
    %c0_81 = arith.constant 0 : index
    %c0_82 = arith.constant 0 : index
    %219 = vector.load %arg14[%c0_80, %c0_81, %c0_82] : memref<4x8x128xf32, #tpu.memory_space<vmem>>, vector<4x8x128xf32>
    tpu.vector_store %arg14[%c0_80, %c0_81, %c0_82], %218 {strides = array<i32>} : memref<4x8x128xf32, #tpu.memory_space<vmem>>, vector<4x8x128xf32>,
    return
  }
  func.func @transform_0(%arg0: i32) -> (i32, i32, i32) {
    %c0_i32 = arith.constant 0 : i32
    %c0_i32_0 = arith.constant 0 : i32
    %c0_i32_1 = arith.constant 0 : i32
    return %arg0, %c0_i32, %c0_i32_0 : i32, i32, i32
  }
  func.func @transform_1(%arg0: i32) -> (i32, i32) {
    %c0_i32 = arith.constant 0 : i32
    %c0_i32_0 = arith.constant 0 : i32
    %c0_i32_1 = arith.constant 0 : i32
    return %c0_i32, %c0_i32_0 : i32, i32
  }
  func.func @transform_2(%arg0: i32) -> (i32, i32) {
    %c0_i32 = arith.constant 0 : i32
    %c0_i32_0 = arith.constant 0 : i32
    %c0_i32_1 = arith.constant 0 : i32
    return %c0_i32, %c0_i32_0 : i32, i32
  }
  func.func @transform_3(%arg0: i32) -> (i32, i32) {
    %c0_i32 = arith.constant 0 : i32
    %c0_i32_0 = arith.constant 0 : i32
    %c0_i32_1 = arith.constant 0 : i32
    return %c0_i32, %c0_i32_0 : i32, i32
  }
  func.func @transform_4(%arg0: i32) -> (i32, i32) {
    %c0_i32 = arith.constant 0 : i32
    %c0_i32_0 = arith.constant 0 : i32
    %c0_i32_1 = arith.constant 0 : i32
    return %c0_i32, %c0_i32_0 : i32, i32
  }
  func.func @transform_5(%arg0: i32) -> (i32, i32) {
    %c0_i32 = arith.constant 0 : i32
    %c0_i32_0 = arith.constant 0 : i32
    %c0_i32_1 = arith.constant 0 : i32
    return %c0_i32, %c0_i32_0 : i32, i32
  }
  func.func @transform_6(%arg0: i32) -> (i32, i32) {
    %c0_i32 = arith.constant 0 : i32
    %c0_i32_0 = arith.constant 0 : i32
    %c0_i32_1 = arith.constant 0 : i32
    return %c0_i32, %c0_i32_0 : i32, i32
  }
  func.func @transform_7(%arg0: i32) -> (i32, i32) {
    %c0_i32 = arith.constant 0 : i32
    %c0_i32_0 = arith.constant 0 : i32
    %c0_i32_1 = arith.constant 0 : i32
    return %c0_i32, %c0_i32_0 : i32, i32
  }
  func.func @transform_8(%arg0: i32) -> (i32, i32) {
    %c0_i32 = arith.constant 0 : i32
    %c0_i32_0 = arith.constant 0 : i32
    %c0_i32_1 = arith.constant 0 : i32
    return %c0_i32, %c0_i32_0 : i32, i32
  }
  func.func @transform_9(%arg0: i32) -> (i32, i32) {
    %c0_i32 = arith.constant 0 : i32
    %c0_i32_0 = arith.constant 0 : i32
    %c0_i32_1 = arith.constant 0 : i32
    return %c0_i32, %c0_i32_0 : i32, i32
  }
  func.func @transform_10(%arg0: i32) -> (i32, i32) {
    %c0_i32 = arith.constant 0 : i32
    %c0_i32_0 = arith.constant 0 : i32
    %c0_i32_1 = arith.constant 0 : i32
    return %c0_i32, %c0_i32_0 : i32, i32
  }
  func.func @transform_11(%arg0: i32) -> (i32, i32) {
    %c0_i32 = arith.constant 0 : i32
    %c0_i32_0 = arith.constant 0 : i32
    %c0_i32_1 = arith.constant 0 : i32
    return %c0_i32, %c0_i32_0 : i32, i32
  }
  func.func @transform_12(%arg0: i32) -> (i32, i32) {
    %c0_i32 = arith.constant 0 : i32
    %c0_i32_0 = arith.constant 0 : i32
    %c0_i32_1 = arith.constant 0 : i32
    return %c0_i32, %c0_i32_0 : i32, i32
  }
  func.func @transform_13(%arg0: i32) -> (i32, i32, i32) {
    %c0_i32 = arith.constant 0 : i32
    %c0_i32_0 = arith.constant 0 : i32
    %c0_i32_1 = arith.constant 0 : i32
    return %arg0, %c0_i32, %c0_i32_0 : i32, i32, i32
  }
}

module attributes {stable_mosaic.version = 11 : i64} {
  func.func @_clf_kernel(%arg0: i32, %arg1: memref<8x128xf32, #tpu.memory_space<vmem>>, %arg2: memref<128x128xf32, #tpu.memory_space<vmem>>, %arg3: memref<1x128xf32, #tpu.memory_space<vmem>>, %arg4: memref<8x128xf32, #tpu.memory_space<vmem>>) attributes {dimension_semantics = [#tpu.dimension_semantics<arbitrary>], iteration_bounds = array<i64: 1>, scalar_prefetch = 0 : i64, scratch_operands = 0 : i64, tpu.core_type = #tpu.core_type<tc>, window_params = [{pipeline_mode = #tpu.pipeline_mode<synchronous>, transform_indices = @transform_0, window_bounds = array<i64: 8, 128>}, {pipeline_mode = #tpu.pipeline_mode<synchronous>, transform_indices = @transform_1, window_bounds = array<i64: 128, 128>}, {pipeline_mode = #tpu.pipeline_mode<synchronous>, transform_indices = @transform_2, window_bounds = array<i64: 1, 128>}, {pipeline_mode = #tpu.pipeline_mode<synchronous>, transform_indices = @transform_3, window_bounds = array<i64: 8, 128>}]} {
    %c0 = arith.constant 0 : index
    %c0_0 = arith.constant 0 : index
    %0 = vector.load %arg1[%c0, %c0_0] : memref<8x128xf32, #tpu.memory_space<vmem>>, vector<8x128xf32>
    %c0_1 = arith.constant 0 : index
    %c0_2 = arith.constant 0 : index
    %1 = vector.load %arg2[%c0_1, %c0_2] : memref<128x128xf32, #tpu.memory_space<vmem>>, vector<128x128xf32>
    %cst = arith.constant dense<0.000000e+00> : vector<8x128xf32>
    %2 = tpu.matmul %0, %1, %cst {dimension_numbers = #tpu.dot_dimension_numbers<[1], [0], [0], [1], [0, 0, 1, 1], [], []>} : vector<8x128xf32>, vector<128x128xf32>, vector<8x128xf32> -> vector<8x128xf32>
    %c0_3 = arith.constant 0 : index
    %c0_4 = arith.constant 0 : index
    %3 = vector.load %arg3[%c0_3, %c0_4] : memref<1x128xf32, #tpu.memory_space<vmem>>, vector<1x128xf32>
    %4 = vector.broadcast %3 : vector<1x128xf32> to vector<8x128xf32>
    %5 = arith.addf %2, %4 : vector<8x128xf32>
    %c0_5 = arith.constant 0 : index
    %c0_6 = arith.constant 0 : index
    %6 = vector.load %arg4[%c0_5, %c0_6] : memref<8x128xf32, #tpu.memory_space<vmem>>, vector<8x128xf32>
    tpu.vector_store %arg4[%c0_5, %c0_6], %5 {strides = array<i32>} : memref<8x128xf32, #tpu.memory_space<vmem>>, vector<8x128xf32>,
    return
  }
  func.func @transform_0(%arg0: i32) -> (i32, i32) {
    %c0_i32 = arith.constant 0 : i32
    %c0_i32_0 = arith.constant 0 : i32
    %c0_i32_1 = arith.constant 0 : i32
    return %c0_i32, %c0_i32_0 : i32, i32
  }
  func.func @transform_1(%arg0: i32) -> (i32, i32) {
    %c0_i32 = arith.constant 0 : i32
    %c0_i32_0 = arith.constant 0 : i32
    %c0_i32_1 = arith.constant 0 : i32
    return %c0_i32, %c0_i32_0 : i32, i32
  }
  func.func @transform_2(%arg0: i32) -> (i32, i32) {
    %c0_i32 = arith.constant 0 : i32
    %c0_i32_0 = arith.constant 0 : i32
    %c0_i32_1 = arith.constant 0 : i32
    return %c0_i32, %c0_i32_0 : i32, i32
  }
  func.func @transform_3(%arg0: i32) -> (i32, i32) {
    %c0_i32 = arith.constant 0 : i32
    %c0_i32_0 = arith.constant 0 : i32
    %c0_i32_1 = arith.constant 0 : i32
    return %c0_i32, %c0_i32_0 : i32, i32
  }
}

module attributes {stable_mosaic.version = 11 : i64} {
  func.func @_attn_pool_kernel(%arg0: i32, %arg1: memref<4x8x128xf32, #tpu.memory_space<vmem>>, %arg2: memref<128x128xf32, #tpu.memory_space<vmem>>, %arg3: memref<1x128xf32, #tpu.memory_space<vmem>>, %arg4: memref<1x128xf32, #tpu.memory_space<vmem>>, %arg5: memref<4x1x128xf32, #tpu.memory_space<vmem>>) attributes {dimension_semantics = [#tpu.dimension_semantics<parallel>], iteration_bounds = array<i64: 2>, scalar_prefetch = 0 : i64, scratch_operands = 0 : i64, tpu.core_type = #tpu.core_type<tc>, window_params = [{transform_indices = @transform_0, window_bounds = array<i64: 4, 8, 128>}, {pipeline_mode = #tpu.pipeline_mode<synchronous>, transform_indices = @transform_1, window_bounds = array<i64: 128, 128>}, {pipeline_mode = #tpu.pipeline_mode<synchronous>, transform_indices = @transform_2, window_bounds = array<i64: 1, 128>}, {pipeline_mode = #tpu.pipeline_mode<synchronous>, transform_indices = @transform_3, window_bounds = array<i64: 1, 128>}, {transform_indices = @transform_4, window_bounds = array<i64: 4, 1, 128>}]} {
    %c0 = arith.constant 0 : index
    %c0_0 = arith.constant 0 : index
    %c0_1 = arith.constant 0 : index
    %0 = vector.load %arg1[%c0, %c0_0, %c0_1] : memref<4x8x128xf32, #tpu.memory_space<vmem>>, vector<4x8x128xf32>
    %1 = vector.shape_cast %0 : vector<4x8x128xf32> to vector<32x128xf32>
    %c0_2 = arith.constant 0 : index
    %c0_3 = arith.constant 0 : index
    %2 = vector.load %arg2[%c0_2, %c0_3] : memref<128x128xf32, #tpu.memory_space<vmem>>, vector<128x128xf32>
    %cst = arith.constant dense<0.000000e+00> : vector<32x128xf32>
    %3 = tpu.matmul %1, %2, %cst {dimension_numbers = #tpu.dot_dimension_numbers<[1], [0], [0], [1], [0, 0, 1, 1], [], []>} : vector<32x128xf32>, vector<128x128xf32>, vector<32x128xf32> -> vector<32x128xf32>
    %c0_4 = arith.constant 0 : index
    %c0_5 = arith.constant 0 : index
    %4 = vector.load %arg3[%c0_4, %c0_5] : memref<1x128xf32, #tpu.memory_space<vmem>>, vector<1x128xf32>
    %5 = vector.broadcast %4 : vector<1x128xf32> to vector<32x128xf32>
    %6 = arith.addf %3, %5 : vector<32x128xf32>
    %7 = math.tanh %6 : vector<32x128xf32>
    %c0_6 = arith.constant 0 : index
    %c0_7 = arith.constant 0 : index
    %8 = vector.load %arg4[%c0_6, %c0_7] : memref<1x128xf32, #tpu.memory_space<vmem>>, vector<1x128xf32>
    %9 = vector.broadcast %8 : vector<1x128xf32> to vector<32x128xf32>
    %10 = arith.mulf %7, %9 : vector<32x128xf32>
    %cst_8 = arith.constant dense<0.000000e+00> : vector<32xf32>
    %11 = vector.multi_reduction <add>, %10, %cst_8 [1] : vector<32x128xf32> to vector<32xf32>
    %12 = vector.shape_cast %11 : vector<32xf32> to vector<32x1xf32>
    %13 = vector.shape_cast %12 : vector<32x1xf32> to vector<4x8x1xf32>
    %cst_9 = arith.constant dense<0xFF800000> : vector<4x1xf32>
    %14 = vector.multi_reduction <maximumf>, %13, %cst_9 [1] : vector<4x8x1xf32> to vector<4x1xf32>
    %15 = vector.shape_cast %14 : vector<4x1xf32> to vector<4x1x1xf32>
    %16 = vector.broadcast %15 : vector<4x1x1xf32> to vector<4x8x1xf32>
    %17 = arith.subf %13, %16 : vector<4x8x1xf32>
    %18 = math.exp %17 : vector<4x8x1xf32>
    %cst_10 = arith.constant dense<0.000000e+00> : vector<4x1xf32>
    %19 = vector.multi_reduction <add>, %18, %cst_10 [1] : vector<4x8x1xf32> to vector<4x1xf32>
    %20 = vector.shape_cast %19 : vector<4x1xf32> to vector<4x1x1xf32>
    %21 = tpu.reciprocal %20 {approx = true} : vector<4x1x1xf32> -> vector<4x1x1xf32>
    %22 = vector.broadcast %21 : vector<4x1x1xf32> to vector<4x8x1xf32>
    %23 = arith.mulf %18, %22 : vector<4x8x1xf32>
    %24 = vector.broadcast %23 : vector<4x8x1xf32> to vector<4x8x128xf32>
    %25 = arith.mulf %0, %24 : vector<4x8x128xf32>
    %cst_11 = arith.constant dense<0.000000e+00> : vector<4x128xf32>
    %26 = vector.multi_reduction <add>, %25, %cst_11 [1] : vector<4x8x128xf32> to vector<4x128xf32>
    %27 = vector.shape_cast %26 : vector<4x128xf32> to vector<4x1x128xf32>
    %c0_12 = arith.constant 0 : index
    %c0_13 = arith.constant 0 : index
    %c0_14 = arith.constant 0 : index
    %28 = vector.load %arg5[%c0_12, %c0_13, %c0_14] : memref<4x1x128xf32, #tpu.memory_space<vmem>>, vector<4x1x128xf32>
    tpu.vector_store %arg5[%c0_12, %c0_13, %c0_14], %27 {strides = array<i32>} : memref<4x1x128xf32, #tpu.memory_space<vmem>>, vector<4x1x128xf32>,
    return
  }
  func.func @transform_0(%arg0: i32) -> (i32, i32, i32) {
    %c0_i32 = arith.constant 0 : i32
    %c0_i32_0 = arith.constant 0 : i32
    %c0_i32_1 = arith.constant 0 : i32
    return %arg0, %c0_i32, %c0_i32_0 : i32, i32, i32
  }
  func.func @transform_1(%arg0: i32) -> (i32, i32) {
    %c0_i32 = arith.constant 0 : i32
    %c0_i32_0 = arith.constant 0 : i32
    %c0_i32_1 = arith.constant 0 : i32
    return %c0_i32, %c0_i32_0 : i32, i32
  }
  func.func @transform_2(%arg0: i32) -> (i32, i32) {
    %c0_i32 = arith.constant 0 : i32
    %c0_i32_0 = arith.constant 0 : i32
    %c0_i32_1 = arith.constant 0 : i32
    return %c0_i32, %c0_i32_0 : i32, i32
  }
  func.func @transform_3(%arg0: i32) -> (i32, i32) {
    %c0_i32 = arith.constant 0 : i32
    %c0_i32_0 = arith.constant 0 : i32
    %c0_i32_1 = arith.constant 0 : i32
    return %c0_i32, %c0_i32_0 : i32, i32
  }
  func.func @transform_4(%arg0: i32) -> (i32, i32, i32) {
    %c0_i32 = arith.constant 0 : i32
    %c0_i32_0 = arith.constant 0 : i32
    %c0_i32_1 = arith.constant 0 : i32
    return %arg0, %c0_i32, %c0_i32_0 : i32, i32, i32
  }
}

module attributes {stable_mosaic.version = 11 : i64} {
  func.func @_encoder_layer_kernel(%arg0: i32, %arg1: memref<1x4x128xf32, #tpu.memory_space<vmem>>, %arg2: memref<128x384xf32, #tpu.memory_space<vmem>>, %arg3: memref<1x384xf32, #tpu.memory_space<vmem>>, %arg4: memref<128x128xf32, #tpu.memory_space<vmem>>, %arg5: memref<1x128xf32, #tpu.memory_space<vmem>>, %arg6: memref<1x128xf32, #tpu.memory_space<vmem>>, %arg7: memref<1x128xf32, #tpu.memory_space<vmem>>, %arg8: memref<128x1024xf32, #tpu.memory_space<vmem>>, %arg9: memref<1x1024xf32, #tpu.memory_space<vmem>>, %arg10: memref<1024x128xf32, #tpu.memory_space<vmem>>, %arg11: memref<1x128xf32, #tpu.memory_space<vmem>>, %arg12: memref<1x128xf32, #tpu.memory_space<vmem>>, %arg13: memref<1x128xf32, #tpu.memory_space<vmem>>, %arg14: memref<1x4x128xf32, #tpu.memory_space<vmem>>) attributes {dimension_semantics = [#tpu.dimension_semantics<parallel>], iteration_bounds = array<i64: 2>, scalar_prefetch = 0 : i64, scratch_operands = 0 : i64, tpu.core_type = #tpu.core_type<tc>, window_params = [{transform_indices = @transform_0, window_bounds = array<i64: 1, 4, 128>}, {pipeline_mode = #tpu.pipeline_mode<synchronous>, transform_indices = @transform_1, window_bounds = array<i64: 128, 384>}, {pipeline_mode = #tpu.pipeline_mode<synchronous>, transform_indices = @transform_2, window_bounds = array<i64: 1, 384>}, {pipeline_mode = #tpu.pipeline_mode<synchronous>, transform_indices = @transform_3, window_bounds = array<i64: 128, 128>}, {pipeline_mode = #tpu.pipeline_mode<synchronous>, transform_indices = @transform_4, window_bounds = array<i64: 1, 128>}, {pipeline_mode = #tpu.pipeline_mode<synchronous>, transform_indices = @transform_5, window_bounds = array<i64: 1, 128>}, {pipeline_mode = #tpu.pipeline_mode<synchronous>, transform_indices = @transform_6, window_bounds = array<i64: 1, 128>}, {pipeline_mode = #tpu.pipeline_mode<synchronous>, transform_indices = @transform_7, window_bounds = array<i64: 128, 1024>}, {pipeline_mode = #tpu.pipeline_mode<synchronous>, transform_indices = @transform_8, window_bounds = array<i64: 1, 1024>}, {pipeline_mode = #tpu.pipeline_mode<synchronous>, transform_indices = @transform_9, window_bounds = array<i64: 1024, 128>}, {pipeline_mode = #tpu.pipeline_mode<synchronous>, transform_indices = @transform_10, window_bounds = array<i64: 1, 128>}, {pipeline_mode = #tpu.pipeline_mode<synchronous>, transform_indices = @transform_11, window_bounds = array<i64: 1, 128>}, {pipeline_mode = #tpu.pipeline_mode<synchronous>, transform_indices = @transform_12, window_bounds = array<i64: 1, 128>}, {transform_indices = @transform_13, window_bounds = array<i64: 1, 4, 128>}]} {
    %c0 = arith.constant 0 : index
    %c0_0 = arith.constant 0 : index
    %c0_1 = arith.constant 0 : index
    %0 = vector.load %arg1[%c0, %c0_0, %c0_1] : memref<1x4x128xf32, #tpu.memory_space<vmem>>, vector<1x4x128xf32>
    %1 = vector.shape_cast %0 : vector<1x4x128xf32> to vector<4x128xf32>
    %c0_2 = arith.constant 0 : index
    %c0_3 = arith.constant 0 : index
    %2 = vector.load %arg2[%c0_2, %c0_3] : memref<128x384xf32, #tpu.memory_space<vmem>>, vector<128x384xf32>
    %cst = arith.constant dense<0.000000e+00> : vector<4x384xf32>
    %3 = tpu.matmul %1, %2, %cst {dimension_numbers = #tpu.dot_dimension_numbers<[1], [0], [0], [1], [0, 0, 1, 1], [], []>} : vector<4x128xf32>, vector<128x384xf32>, vector<4x384xf32> -> vector<4x384xf32>
    %c0_4 = arith.constant 0 : index
    %c0_5 = arith.constant 0 : index
    %4 = vector.load %arg3[%c0_4, %c0_5] : memref<1x384xf32, #tpu.memory_space<vmem>>, vector<1x384xf32>
    %5 = vector.broadcast %4 : vector<1x384xf32> to vector<4x384xf32>
    %6 = arith.addf %3, %5 : vector<4x384xf32>
    %7 = vector.extract_strided_slice %6 {offsets = [0, 0], sizes = [4, 128], strides = [1, 1]} : vector<4x384xf32> to vector<4x128xf32>
    %8 = vector.shape_cast %7 : vector<4x128xf32> to vector<1x4x128xf32>
    %9 = vector.extract_strided_slice %6 {offsets = [0, 128], sizes = [4, 128], strides = [1, 1]} : vector<4x384xf32> to vector<4x128xf32>
    %10 = vector.shape_cast %9 : vector<4x128xf32> to vector<1x4x128xf32>
    %11 = vector.extract_strided_slice %6 {offsets = [0, 256], sizes = [4, 128], strides = [1, 1]} : vector<4x384xf32> to vector<4x128xf32>
    %12 = vector.shape_cast %11 : vector<4x128xf32> to vector<1x4x128xf32>
    %13 = vector.extract_strided_slice %8 {offsets = [0, 0, 0], sizes = [1, 4, 16], strides = [1, 1, 1]} : vector<1x4x128xf32> to vector<1x4x16xf32>
    %14 = vector.extract_strided_slice %10 {offsets = [0, 0, 0], sizes = [1, 4, 16], strides = [1, 1, 1]} : vector<1x4x128xf32> to vector<1x4x16xf32>
    %15 = vector.extract_strided_slice %12 {offsets = [0, 0, 0], sizes = [1, 4, 16], strides = [1, 1, 1]} : vector<1x4x128xf32> to vector<1x4x16xf32>
    "tpu.trace_start"() <{level = 10 : i32, message = "bqd,bkd->bqk"}> : () -> ()
    %cst_6 = arith.constant dense<0.000000e+00> : vector<1x4x4xf32>
    %16 = tpu.matmul %13, %14, %cst_6 {dimension_numbers = #tpu.dot_dimension_numbers<[2], [2], [1], [1], [0, 0, 0, 1, 1, 1], [0], [0]>} : vector<1x4x16xf32>, vector<1x4x16xf32>, vector<1x4x4xf32> -> vector<1x4x4xf32>
    "tpu.trace_stop"() : () -> ()
    %cst_7 = arith.constant 2.500000e-01 : f32
    %17 = vector.broadcast %cst_7 : f32 to vector<1x4x4xf32>
    %18 = arith.mulf %16, %17 : vector<1x4x4xf32>
    %cst_8 = arith.constant dense<0xFF800000> : vector<1x4xf32>
    %19 = vector.multi_reduction <maximumf>, %18, %cst_8 [2] : vector<1x4x4xf32> to vector<1x4xf32>
    %20 = vector.shape_cast %19 : vector<1x4xf32> to vector<1x4x1xf32>
    %21 = vector.broadcast %20 : vector<1x4x1xf32> to vector<1x4x4xf32>
    %22 = arith.subf %18, %21 : vector<1x4x4xf32>
    %23 = math.exp %22 : vector<1x4x4xf32>
    %cst_9 = arith.constant dense<0.000000e+00> : vector<1x4xf32>
    %24 = vector.multi_reduction <add>, %23, %cst_9 [2] : vector<1x4x4xf32> to vector<1x4xf32>
    %25 = vector.shape_cast %24 : vector<1x4xf32> to vector<1x4x1xf32>
    %26 = tpu.reciprocal %25 {approx = true} : vector<1x4x1xf32> -> vector<1x4x1xf32>
    %27 = vector.broadcast %26 : vector<1x4x1xf32> to vector<1x4x4xf32>
    %28 = arith.mulf %23, %27 : vector<1x4x4xf32>
    "tpu.trace_start"() <{level = 10 : i32, message = "bqk,bkd->bqd"}> : () -> ()
    %cst_10 = arith.constant dense<0.000000e+00> : vector<1x4x16xf32>
    %29 = tpu.matmul %28, %15, %cst_10 {dimension_numbers = #tpu.dot_dimension_numbers<[2], [1], [1], [2], [0, 0, 0, 1, 1, 2], [0], [0]>} : vector<1x4x4xf32>, vector<1x4x16xf32>, vector<1x4x16xf32> -> vector<1x4x16xf32>
    "tpu.trace_stop"() : () -> ()
    %30 = vector.extract_strided_slice %8 {offsets = [0, 0, 16], sizes = [1, 4, 16], strides = [1, 1, 1]} : vector<1x4x128xf32> to vector<1x4x16xf32>
    %31 = vector.extract_strided_slice %10 {offsets = [0, 0, 16], sizes = [1, 4, 16], strides = [1, 1, 1]} : vector<1x4x128xf32> to vector<1x4x16xf32>
    %32 = vector.extract_strided_slice %12 {offsets = [0, 0, 16], sizes = [1, 4, 16], strides = [1, 1, 1]} : vector<1x4x128xf32> to vector<1x4x16xf32>
    "tpu.trace_start"() <{level = 10 : i32, message = "bqd,bkd->bqk"}> : () -> ()
    %cst_11 = arith.constant dense<0.000000e+00> : vector<1x4x4xf32>
    %33 = tpu.matmul %30, %31, %cst_11 {dimension_numbers = #tpu.dot_dimension_numbers<[2], [2], [1], [1], [0, 0, 0, 1, 1, 1], [0], [0]>} : vector<1x4x16xf32>, vector<1x4x16xf32>, vector<1x4x4xf32> -> vector<1x4x4xf32>
    "tpu.trace_stop"() : () -> ()
    %cst_12 = arith.constant 2.500000e-01 : f32
    %34 = vector.broadcast %cst_12 : f32 to vector<1x4x4xf32>
    %35 = arith.mulf %33, %34 : vector<1x4x4xf32>
    %cst_13 = arith.constant dense<0xFF800000> : vector<1x4xf32>
    %36 = vector.multi_reduction <maximumf>, %35, %cst_13 [2] : vector<1x4x4xf32> to vector<1x4xf32>
    %37 = vector.shape_cast %36 : vector<1x4xf32> to vector<1x4x1xf32>
    %38 = vector.broadcast %37 : vector<1x4x1xf32> to vector<1x4x4xf32>
    %39 = arith.subf %35, %38 : vector<1x4x4xf32>
    %40 = math.exp %39 : vector<1x4x4xf32>
    %cst_14 = arith.constant dense<0.000000e+00> : vector<1x4xf32>
    %41 = vector.multi_reduction <add>, %40, %cst_14 [2] : vector<1x4x4xf32> to vector<1x4xf32>
    %42 = vector.shape_cast %41 : vector<1x4xf32> to vector<1x4x1xf32>
    %43 = tpu.reciprocal %42 {approx = true} : vector<1x4x1xf32> -> vector<1x4x1xf32>
    %44 = vector.broadcast %43 : vector<1x4x1xf32> to vector<1x4x4xf32>
    %45 = arith.mulf %40, %44 : vector<1x4x4xf32>
    "tpu.trace_start"() <{level = 10 : i32, message = "bqk,bkd->bqd"}> : () -> ()
    %cst_15 = arith.constant dense<0.000000e+00> : vector<1x4x16xf32>
    %46 = tpu.matmul %45, %32, %cst_15 {dimension_numbers = #tpu.dot_dimension_numbers<[2], [1], [1], [2], [0, 0, 0, 1, 1, 2], [0], [0]>} : vector<1x4x4xf32>, vector<1x4x16xf32>, vector<1x4x16xf32> -> vector<1x4x16xf32>
    "tpu.trace_stop"() : () -> ()
    %47 = vector.extract_strided_slice %8 {offsets = [0, 0, 32], sizes = [1, 4, 16], strides = [1, 1, 1]} : vector<1x4x128xf32> to vector<1x4x16xf32>
    %48 = vector.extract_strided_slice %10 {offsets = [0, 0, 32], sizes = [1, 4, 16], strides = [1, 1, 1]} : vector<1x4x128xf32> to vector<1x4x16xf32>
    %49 = vector.extract_strided_slice %12 {offsets = [0, 0, 32], sizes = [1, 4, 16], strides = [1, 1, 1]} : vector<1x4x128xf32> to vector<1x4x16xf32>
    "tpu.trace_start"() <{level = 10 : i32, message = "bqd,bkd->bqk"}> : () -> ()
    %cst_16 = arith.constant dense<0.000000e+00> : vector<1x4x4xf32>
    %50 = tpu.matmul %47, %48, %cst_16 {dimension_numbers = #tpu.dot_dimension_numbers<[2], [2], [1], [1], [0, 0, 0, 1, 1, 1], [0], [0]>} : vector<1x4x16xf32>, vector<1x4x16xf32>, vector<1x4x4xf32> -> vector<1x4x4xf32>
    "tpu.trace_stop"() : () -> ()
    %cst_17 = arith.constant 2.500000e-01 : f32
    %51 = vector.broadcast %cst_17 : f32 to vector<1x4x4xf32>
    %52 = arith.mulf %50, %51 : vector<1x4x4xf32>
    %cst_18 = arith.constant dense<0xFF800000> : vector<1x4xf32>
    %53 = vector.multi_reduction <maximumf>, %52, %cst_18 [2] : vector<1x4x4xf32> to vector<1x4xf32>
    %54 = vector.shape_cast %53 : vector<1x4xf32> to vector<1x4x1xf32>
    %55 = vector.broadcast %54 : vector<1x4x1xf32> to vector<1x4x4xf32>
    %56 = arith.subf %52, %55 : vector<1x4x4xf32>
    %57 = math.exp %56 : vector<1x4x4xf32>
    %cst_19 = arith.constant dense<0.000000e+00> : vector<1x4xf32>
    %58 = vector.multi_reduction <add>, %57, %cst_19 [2] : vector<1x4x4xf32> to vector<1x4xf32>
    %59 = vector.shape_cast %58 : vector<1x4xf32> to vector<1x4x1xf32>
    %60 = tpu.reciprocal %59 {approx = true} : vector<1x4x1xf32> -> vector<1x4x1xf32>
    %61 = vector.broadcast %60 : vector<1x4x1xf32> to vector<1x4x4xf32>
    %62 = arith.mulf %57, %61 : vector<1x4x4xf32>
    "tpu.trace_start"() <{level = 10 : i32, message = "bqk,bkd->bqd"}> : () -> ()
    %cst_20 = arith.constant dense<0.000000e+00> : vector<1x4x16xf32>
    %63 = tpu.matmul %62, %49, %cst_20 {dimension_numbers = #tpu.dot_dimension_numbers<[2], [1], [1], [2], [0, 0, 0, 1, 1, 2], [0], [0]>} : vector<1x4x4xf32>, vector<1x4x16xf32>, vector<1x4x16xf32> -> vector<1x4x16xf32>
    "tpu.trace_stop"() : () -> ()
    %64 = vector.extract_strided_slice %8 {offsets = [0, 0, 48], sizes = [1, 4, 16], strides = [1, 1, 1]} : vector<1x4x128xf32> to vector<1x4x16xf32>
    %65 = vector.extract_strided_slice %10 {offsets = [0, 0, 48], sizes = [1, 4, 16], strides = [1, 1, 1]} : vector<1x4x128xf32> to vector<1x4x16xf32>
    %66 = vector.extract_strided_slice %12 {offsets = [0, 0, 48], sizes = [1, 4, 16], strides = [1, 1, 1]} : vector<1x4x128xf32> to vector<1x4x16xf32>
    "tpu.trace_start"() <{level = 10 : i32, message = "bqd,bkd->bqk"}> : () -> ()
    %cst_21 = arith.constant dense<0.000000e+00> : vector<1x4x4xf32>
    %67 = tpu.matmul %64, %65, %cst_21 {dimension_numbers = #tpu.dot_dimension_numbers<[2], [2], [1], [1], [0, 0, 0, 1, 1, 1], [0], [0]>} : vector<1x4x16xf32>, vector<1x4x16xf32>, vector<1x4x4xf32> -> vector<1x4x4xf32>
    "tpu.trace_stop"() : () -> ()
    %cst_22 = arith.constant 2.500000e-01 : f32
    %68 = vector.broadcast %cst_22 : f32 to vector<1x4x4xf32>
    %69 = arith.mulf %67, %68 : vector<1x4x4xf32>
    %cst_23 = arith.constant dense<0xFF800000> : vector<1x4xf32>
    %70 = vector.multi_reduction <maximumf>, %69, %cst_23 [2] : vector<1x4x4xf32> to vector<1x4xf32>
    %71 = vector.shape_cast %70 : vector<1x4xf32> to vector<1x4x1xf32>
    %72 = vector.broadcast %71 : vector<1x4x1xf32> to vector<1x4x4xf32>
    %73 = arith.subf %69, %72 : vector<1x4x4xf32>
    %74 = math.exp %73 : vector<1x4x4xf32>
    %cst_24 = arith.constant dense<0.000000e+00> : vector<1x4xf32>
    %75 = vector.multi_reduction <add>, %74, %cst_24 [2] : vector<1x4x4xf32> to vector<1x4xf32>
    %76 = vector.shape_cast %75 : vector<1x4xf32> to vector<1x4x1xf32>
    %77 = tpu.reciprocal %76 {approx = true} : vector<1x4x1xf32> -> vector<1x4x1xf32>
    %78 = vector.broadcast %77 : vector<1x4x1xf32> to vector<1x4x4xf32>
    %79 = arith.mulf %74, %78 : vector<1x4x4xf32>
    "tpu.trace_start"() <{level = 10 : i32, message = "bqk,bkd->bqd"}> : () -> ()
    %cst_25 = arith.constant dense<0.000000e+00> : vector<1x4x16xf32>
    %80 = tpu.matmul %79, %66, %cst_25 {dimension_numbers = #tpu.dot_dimension_numbers<[2], [1], [1], [2], [0, 0, 0, 1, 1, 2], [0], [0]>} : vector<1x4x4xf32>, vector<1x4x16xf32>, vector<1x4x16xf32> -> vector<1x4x16xf32>
    "tpu.trace_stop"() : () -> ()
    %81 = vector.extract_strided_slice %8 {offsets = [0, 0, 64], sizes = [1, 4, 16], strides = [1, 1, 1]} : vector<1x4x128xf32> to vector<1x4x16xf32>
    %82 = vector.extract_strided_slice %10 {offsets = [0, 0, 64], sizes = [1, 4, 16], strides = [1, 1, 1]} : vector<1x4x128xf32> to vector<1x4x16xf32>
    %83 = vector.extract_strided_slice %12 {offsets = [0, 0, 64], sizes = [1, 4, 16], strides = [1, 1, 1]} : vector<1x4x128xf32> to vector<1x4x16xf32>
    "tpu.trace_start"() <{level = 10 : i32, message = "bqd,bkd->bqk"}> : () -> ()
    %cst_26 = arith.constant dense<0.000000e+00> : vector<1x4x4xf32>
    %84 = tpu.matmul %81, %82, %cst_26 {dimension_numbers = #tpu.dot_dimension_numbers<[2], [2], [1], [1], [0, 0, 0, 1, 1, 1], [0], [0]>} : vector<1x4x16xf32>, vector<1x4x16xf32>, vector<1x4x4xf32> -> vector<1x4x4xf32>
    "tpu.trace_stop"() : () -> ()
    %cst_27 = arith.constant 2.500000e-01 : f32
    %85 = vector.broadcast %cst_27 : f32 to vector<1x4x4xf32>
    %86 = arith.mulf %84, %85 : vector<1x4x4xf32>
    %cst_28 = arith.constant dense<0xFF800000> : vector<1x4xf32>
    %87 = vector.multi_reduction <maximumf>, %86, %cst_28 [2] : vector<1x4x4xf32> to vector<1x4xf32>
    %88 = vector.shape_cast %87 : vector<1x4xf32> to vector<1x4x1xf32>
    %89 = vector.broadcast %88 : vector<1x4x1xf32> to vector<1x4x4xf32>
    %90 = arith.subf %86, %89 : vector<1x4x4xf32>
    %91 = math.exp %90 : vector<1x4x4xf32>
    %cst_29 = arith.constant dense<0.000000e+00> : vector<1x4xf32>
    %92 = vector.multi_reduction <add>, %91, %cst_29 [2] : vector<1x4x4xf32> to vector<1x4xf32>
    %93 = vector.shape_cast %92 : vector<1x4xf32> to vector<1x4x1xf32>
    %94 = tpu.reciprocal %93 {approx = true} : vector<1x4x1xf32> -> vector<1x4x1xf32>
    %95 = vector.broadcast %94 : vector<1x4x1xf32> to vector<1x4x4xf32>
    %96 = arith.mulf %91, %95 : vector<1x4x4xf32>
    "tpu.trace_start"() <{level = 10 : i32, message = "bqk,bkd->bqd"}> : () -> ()
    %cst_30 = arith.constant dense<0.000000e+00> : vector<1x4x16xf32>
    %97 = tpu.matmul %96, %83, %cst_30 {dimension_numbers = #tpu.dot_dimension_numbers<[2], [1], [1], [2], [0, 0, 0, 1, 1, 2], [0], [0]>} : vector<1x4x4xf32>, vector<1x4x16xf32>, vector<1x4x16xf32> -> vector<1x4x16xf32>
    "tpu.trace_stop"() : () -> ()
    %98 = vector.extract_strided_slice %8 {offsets = [0, 0, 80], sizes = [1, 4, 16], strides = [1, 1, 1]} : vector<1x4x128xf32> to vector<1x4x16xf32>
    %99 = vector.extract_strided_slice %10 {offsets = [0, 0, 80], sizes = [1, 4, 16], strides = [1, 1, 1]} : vector<1x4x128xf32> to vector<1x4x16xf32>
    %100 = vector.extract_strided_slice %12 {offsets = [0, 0, 80], sizes = [1, 4, 16], strides = [1, 1, 1]} : vector<1x4x128xf32> to vector<1x4x16xf32>
    "tpu.trace_start"() <{level = 10 : i32, message = "bqd,bkd->bqk"}> : () -> ()
    %cst_31 = arith.constant dense<0.000000e+00> : vector<1x4x4xf32>
    %101 = tpu.matmul %98, %99, %cst_31 {dimension_numbers = #tpu.dot_dimension_numbers<[2], [2], [1], [1], [0, 0, 0, 1, 1, 1], [0], [0]>} : vector<1x4x16xf32>, vector<1x4x16xf32>, vector<1x4x4xf32> -> vector<1x4x4xf32>
    "tpu.trace_stop"() : () -> ()
    %cst_32 = arith.constant 2.500000e-01 : f32
    %102 = vector.broadcast %cst_32 : f32 to vector<1x4x4xf32>
    %103 = arith.mulf %101, %102 : vector<1x4x4xf32>
    %cst_33 = arith.constant dense<0xFF800000> : vector<1x4xf32>
    %104 = vector.multi_reduction <maximumf>, %103, %cst_33 [2] : vector<1x4x4xf32> to vector<1x4xf32>
    %105 = vector.shape_cast %104 : vector<1x4xf32> to vector<1x4x1xf32>
    %106 = vector.broadcast %105 : vector<1x4x1xf32> to vector<1x4x4xf32>
    %107 = arith.subf %103, %106 : vector<1x4x4xf32>
    %108 = math.exp %107 : vector<1x4x4xf32>
    %cst_34 = arith.constant dense<0.000000e+00> : vector<1x4xf32>
    %109 = vector.multi_reduction <add>, %108, %cst_34 [2] : vector<1x4x4xf32> to vector<1x4xf32>
    %110 = vector.shape_cast %109 : vector<1x4xf32> to vector<1x4x1xf32>
    %111 = tpu.reciprocal %110 {approx = true} : vector<1x4x1xf32> -> vector<1x4x1xf32>
    %112 = vector.broadcast %111 : vector<1x4x1xf32> to vector<1x4x4xf32>
    %113 = arith.mulf %108, %112 : vector<1x4x4xf32>
    "tpu.trace_start"() <{level = 10 : i32, message = "bqk,bkd->bqd"}> : () -> ()
    %cst_35 = arith.constant dense<0.000000e+00> : vector<1x4x16xf32>
    %114 = tpu.matmul %113, %100, %cst_35 {dimension_numbers = #tpu.dot_dimension_numbers<[2], [1], [1], [2], [0, 0, 0, 1, 1, 2], [0], [0]>} : vector<1x4x4xf32>, vector<1x4x16xf32>, vector<1x4x16xf32> -> vector<1x4x16xf32>
    "tpu.trace_stop"() : () -> ()
    %115 = vector.extract_strided_slice %8 {offsets = [0, 0, 96], sizes = [1, 4, 16], strides = [1, 1, 1]} : vector<1x4x128xf32> to vector<1x4x16xf32>
    %116 = vector.extract_strided_slice %10 {offsets = [0, 0, 96], sizes = [1, 4, 16], strides = [1, 1, 1]} : vector<1x4x128xf32> to vector<1x4x16xf32>
    %117 = vector.extract_strided_slice %12 {offsets = [0, 0, 96], sizes = [1, 4, 16], strides = [1, 1, 1]} : vector<1x4x128xf32> to vector<1x4x16xf32>
    "tpu.trace_start"() <{level = 10 : i32, message = "bqd,bkd->bqk"}> : () -> ()
    %cst_36 = arith.constant dense<0.000000e+00> : vector<1x4x4xf32>
    %118 = tpu.matmul %115, %116, %cst_36 {dimension_numbers = #tpu.dot_dimension_numbers<[2], [2], [1], [1], [0, 0, 0, 1, 1, 1], [0], [0]>} : vector<1x4x16xf32>, vector<1x4x16xf32>, vector<1x4x4xf32> -> vector<1x4x4xf32>
    "tpu.trace_stop"() : () -> ()
    %cst_37 = arith.constant 2.500000e-01 : f32
    %119 = vector.broadcast %cst_37 : f32 to vector<1x4x4xf32>
    %120 = arith.mulf %118, %119 : vector<1x4x4xf32>
    %cst_38 = arith.constant dense<0xFF800000> : vector<1x4xf32>
    %121 = vector.multi_reduction <maximumf>, %120, %cst_38 [2] : vector<1x4x4xf32> to vector<1x4xf32>
    %122 = vector.shape_cast %121 : vector<1x4xf32> to vector<1x4x1xf32>
    %123 = vector.broadcast %122 : vector<1x4x1xf32> to vector<1x4x4xf32>
    %124 = arith.subf %120, %123 : vector<1x4x4xf32>
    %125 = math.exp %124 : vector<1x4x4xf32>
    %cst_39 = arith.constant dense<0.000000e+00> : vector<1x4xf32>
    %126 = vector.multi_reduction <add>, %125, %cst_39 [2] : vector<1x4x4xf32> to vector<1x4xf32>
    %127 = vector.shape_cast %126 : vector<1x4xf32> to vector<1x4x1xf32>
    %128 = tpu.reciprocal %127 {approx = true} : vector<1x4x1xf32> -> vector<1x4x1xf32>
    %129 = vector.broadcast %128 : vector<1x4x1xf32> to vector<1x4x4xf32>
    %130 = arith.mulf %125, %129 : vector<1x4x4xf32>
    "tpu.trace_start"() <{level = 10 : i32, message = "bqk,bkd->bqd"}> : () -> ()
    %cst_40 = arith.constant dense<0.000000e+00> : vector<1x4x16xf32>
    %131 = tpu.matmul %130, %117, %cst_40 {dimension_numbers = #tpu.dot_dimension_numbers<[2], [1], [1], [2], [0, 0, 0, 1, 1, 2], [0], [0]>} : vector<1x4x4xf32>, vector<1x4x16xf32>, vector<1x4x16xf32> -> vector<1x4x16xf32>
    "tpu.trace_stop"() : () -> ()
    %132 = vector.extract_strided_slice %8 {offsets = [0, 0, 112], sizes = [1, 4, 16], strides = [1, 1, 1]} : vector<1x4x128xf32> to vector<1x4x16xf32>
    %133 = vector.extract_strided_slice %10 {offsets = [0, 0, 112], sizes = [1, 4, 16], strides = [1, 1, 1]} : vector<1x4x128xf32> to vector<1x4x16xf32>
    %134 = vector.extract_strided_slice %12 {offsets = [0, 0, 112], sizes = [1, 4, 16], strides = [1, 1, 1]} : vector<1x4x128xf32> to vector<1x4x16xf32>
    "tpu.trace_start"() <{level = 10 : i32, message = "bqd,bkd->bqk"}> : () -> ()
    %cst_41 = arith.constant dense<0.000000e+00> : vector<1x4x4xf32>
    %135 = tpu.matmul %132, %133, %cst_41 {dimension_numbers = #tpu.dot_dimension_numbers<[2], [2], [1], [1], [0, 0, 0, 1, 1, 1], [0], [0]>} : vector<1x4x16xf32>, vector<1x4x16xf32>, vector<1x4x4xf32> -> vector<1x4x4xf32>
    "tpu.trace_stop"() : () -> ()
    %cst_42 = arith.constant 2.500000e-01 : f32
    %136 = vector.broadcast %cst_42 : f32 to vector<1x4x4xf32>
    %137 = arith.mulf %135, %136 : vector<1x4x4xf32>
    %cst_43 = arith.constant dense<0xFF800000> : vector<1x4xf32>
    %138 = vector.multi_reduction <maximumf>, %137, %cst_43 [2] : vector<1x4x4xf32> to vector<1x4xf32>
    %139 = vector.shape_cast %138 : vector<1x4xf32> to vector<1x4x1xf32>
    %140 = vector.broadcast %139 : vector<1x4x1xf32> to vector<1x4x4xf32>
    %141 = arith.subf %137, %140 : vector<1x4x4xf32>
    %142 = math.exp %141 : vector<1x4x4xf32>
    %cst_44 = arith.constant dense<0.000000e+00> : vector<1x4xf32>
    %143 = vector.multi_reduction <add>, %142, %cst_44 [2] : vector<1x4x4xf32> to vector<1x4xf32>
    %144 = vector.shape_cast %143 : vector<1x4xf32> to vector<1x4x1xf32>
    %145 = tpu.reciprocal %144 {approx = true} : vector<1x4x1xf32> -> vector<1x4x1xf32>
    %146 = vector.broadcast %145 : vector<1x4x1xf32> to vector<1x4x4xf32>
    %147 = arith.mulf %142, %146 : vector<1x4x4xf32>
    "tpu.trace_start"() <{level = 10 : i32, message = "bqk,bkd->bqd"}> : () -> ()
    %cst_45 = arith.constant dense<0.000000e+00> : vector<1x4x16xf32>
    %148 = tpu.matmul %147, %134, %cst_45 {dimension_numbers = #tpu.dot_dimension_numbers<[2], [1], [1], [2], [0, 0, 0, 1, 1, 2], [0], [0]>} : vector<1x4x4xf32>, vector<1x4x16xf32>, vector<1x4x16xf32> -> vector<1x4x16xf32>
    "tpu.trace_stop"() : () -> ()
    %149 = tpu.concatenate %29, %46, %63, %80, %97, %114, %131, %148 in 2 : vector<1x4x16xf32>, vector<1x4x16xf32>, vector<1x4x16xf32>, vector<1x4x16xf32>, vector<1x4x16xf32>, vector<1x4x16xf32>, vector<1x4x16xf32>, vector<1x4x16xf32> -> vector<1x4x128xf32>
    %150 = vector.shape_cast %149 : vector<1x4x128xf32> to vector<4x128xf32>
    %c0_46 = arith.constant 0 : index
    %c0_47 = arith.constant 0 : index
    %151 = vector.load %arg4[%c0_46, %c0_47] : memref<128x128xf32, #tpu.memory_space<vmem>>, vector<128x128xf32>
    %cst_48 = arith.constant dense<0.000000e+00> : vector<4x128xf32>
    %152 = tpu.matmul %150, %151, %cst_48 {dimension_numbers = #tpu.dot_dimension_numbers<[1], [0], [0], [1], [0, 0, 1, 1], [], []>} : vector<4x128xf32>, vector<128x128xf32>, vector<4x128xf32> -> vector<4x128xf32>
    %c0_49 = arith.constant 0 : index
    %c0_50 = arith.constant 0 : index
    %153 = vector.load %arg5[%c0_49, %c0_50] : memref<1x128xf32, #tpu.memory_space<vmem>>, vector<1x128xf32>
    %154 = vector.broadcast %153 : vector<1x128xf32> to vector<4x128xf32>
    %155 = arith.addf %152, %154 : vector<4x128xf32>
    %156 = arith.addf %1, %155 : vector<4x128xf32>
    %c0_51 = arith.constant 0 : index
    %c0_52 = arith.constant 0 : index
    %157 = vector.load %arg6[%c0_51, %c0_52] : memref<1x128xf32, #tpu.memory_space<vmem>>, vector<1x128xf32>
    %c0_53 = arith.constant 0 : index
    %c0_54 = arith.constant 0 : index
    %158 = vector.load %arg7[%c0_53, %c0_54] : memref<1x128xf32, #tpu.memory_space<vmem>>, vector<1x128xf32>
    %cst_55 = arith.constant dense<0.000000e+00> : vector<4xf32>
    %159 = vector.multi_reduction <add>, %156, %cst_55 [1] : vector<4x128xf32> to vector<4xf32>
    %160 = vector.shape_cast %159 : vector<4xf32> to vector<4x1xf32>
    %cst_56 = arith.constant 1.280000e+02 : f32
    %161 = vector.broadcast %cst_56 : f32 to vector<4x1xf32>
    %162 = arith.divf %160, %161 : vector<4x1xf32>
    %163 = vector.broadcast %162 : vector<4x1xf32> to vector<4x128xf32>
    %164 = arith.subf %156, %163 : vector<4x128xf32>
    %165 = arith.mulf %164, %164 : vector<4x128xf32>
    %cst_57 = arith.constant dense<0.000000e+00> : vector<4xf32>
    %166 = vector.multi_reduction <add>, %165, %cst_57 [1] : vector<4x128xf32> to vector<4xf32>
    %167 = vector.shape_cast %166 : vector<4xf32> to vector<4x1xf32>
    %cst_58 = arith.constant 1.280000e+02 : f32
    %168 = vector.broadcast %cst_58 : f32 to vector<4x1xf32>
    %169 = arith.divf %167, %168 : vector<4x1xf32>
    %170 = vector.broadcast %162 : vector<4x1xf32> to vector<4x128xf32>
    %171 = arith.subf %156, %170 : vector<4x128xf32>
    %cst_59 = arith.constant 9.99999974E-6 : f32
    %172 = vector.broadcast %cst_59 : f32 to vector<4x1xf32>
    %173 = arith.addf %169, %172 : vector<4x1xf32>
    %174 = math.rsqrt %173 : vector<4x1xf32>
    %175 = vector.broadcast %174 : vector<4x1xf32> to vector<4x128xf32>
    %176 = arith.mulf %171, %175 : vector<4x128xf32>
    %177 = vector.broadcast %157 : vector<1x128xf32> to vector<4x128xf32>
    %178 = arith.mulf %176, %177 : vector<4x128xf32>
    %179 = vector.broadcast %158 : vector<1x128xf32> to vector<4x128xf32>
    %180 = arith.addf %178, %179 : vector<4x128xf32>
    %c0_60 = arith.constant 0 : index
    %c0_61 = arith.constant 0 : index
    %181 = vector.load %arg8[%c0_60, %c0_61] : memref<128x1024xf32, #tpu.memory_space<vmem>>, vector<128x1024xf32>
    %cst_62 = arith.constant dense<0.000000e+00> : vector<4x1024xf32>
    %182 = tpu.matmul %180, %181, %cst_62 {dimension_numbers = #tpu.dot_dimension_numbers<[1], [0], [0], [1], [0, 0, 1, 1], [], []>} : vector<4x128xf32>, vector<128x1024xf32>, vector<4x1024xf32> -> vector<4x1024xf32>
    %c0_63 = arith.constant 0 : index
    %c0_64 = arith.constant 0 : index
    %183 = vector.load %arg9[%c0_63, %c0_64] : memref<1x1024xf32, #tpu.memory_space<vmem>>, vector<1x1024xf32>
    %184 = vector.broadcast %183 : vector<1x1024xf32> to vector<4x1024xf32>
    %185 = arith.addf %182, %184 : vector<4x1024xf32>
    %cst_65 = arith.constant 0.000000e+00 : f32
    %186 = vector.broadcast %cst_65 : f32 to vector<4x1024xf32>
    %187 = arith.maximumf %185, %186 : vector<4x1024xf32>
    %c0_66 = arith.constant 0 : index
    %c0_67 = arith.constant 0 : index
    %188 = vector.load %arg10[%c0_66, %c0_67] : memref<1024x128xf32, #tpu.memory_space<vmem>>, vector<1024x128xf32>
    %cst_68 = arith.constant dense<0.000000e+00> : vector<4x128xf32>
    %189 = tpu.matmul %187, %188, %cst_68 {dimension_numbers = #tpu.dot_dimension_numbers<[1], [0], [0], [1], [0, 0, 1, 1], [], []>} : vector<4x1024xf32>, vector<1024x128xf32>, vector<4x128xf32> -> vector<4x128xf32>
    %c0_69 = arith.constant 0 : index
    %c0_70 = arith.constant 0 : index
    %190 = vector.load %arg11[%c0_69, %c0_70] : memref<1x128xf32, #tpu.memory_space<vmem>>, vector<1x128xf32>
    %191 = vector.broadcast %190 : vector<1x128xf32> to vector<4x128xf32>
    %192 = arith.addf %189, %191 : vector<4x128xf32>
    %193 = arith.addf %180, %192 : vector<4x128xf32>
    %c0_71 = arith.constant 0 : index
    %c0_72 = arith.constant 0 : index
    %194 = vector.load %arg12[%c0_71, %c0_72] : memref<1x128xf32, #tpu.memory_space<vmem>>, vector<1x128xf32>
    %c0_73 = arith.constant 0 : index
    %c0_74 = arith.constant 0 : index
    %195 = vector.load %arg13[%c0_73, %c0_74] : memref<1x128xf32, #tpu.memory_space<vmem>>, vector<1x128xf32>
    %cst_75 = arith.constant dense<0.000000e+00> : vector<4xf32>
    %196 = vector.multi_reduction <add>, %193, %cst_75 [1] : vector<4x128xf32> to vector<4xf32>
    %197 = vector.shape_cast %196 : vector<4xf32> to vector<4x1xf32>
    %cst_76 = arith.constant 1.280000e+02 : f32
    %198 = vector.broadcast %cst_76 : f32 to vector<4x1xf32>
    %199 = arith.divf %197, %198 : vector<4x1xf32>
    %200 = vector.broadcast %199 : vector<4x1xf32> to vector<4x128xf32>
    %201 = arith.subf %193, %200 : vector<4x128xf32>
    %202 = arith.mulf %201, %201 : vector<4x128xf32>
    %cst_77 = arith.constant dense<0.000000e+00> : vector<4xf32>
    %203 = vector.multi_reduction <add>, %202, %cst_77 [1] : vector<4x128xf32> to vector<4xf32>
    %204 = vector.shape_cast %203 : vector<4xf32> to vector<4x1xf32>
    %cst_78 = arith.constant 1.280000e+02 : f32
    %205 = vector.broadcast %cst_78 : f32 to vector<4x1xf32>
    %206 = arith.divf %204, %205 : vector<4x1xf32>
    %207 = vector.broadcast %199 : vector<4x1xf32> to vector<4x128xf32>
    %208 = arith.subf %193, %207 : vector<4x128xf32>
    %cst_79 = arith.constant 9.99999974E-6 : f32
    %209 = vector.broadcast %cst_79 : f32 to vector<4x1xf32>
    %210 = arith.addf %206, %209 : vector<4x1xf32>
    %211 = math.rsqrt %210 : vector<4x1xf32>
    %212 = vector.broadcast %211 : vector<4x1xf32> to vector<4x128xf32>
    %213 = arith.mulf %208, %212 : vector<4x128xf32>
    %214 = vector.broadcast %194 : vector<1x128xf32> to vector<4x128xf32>
    %215 = arith.mulf %213, %214 : vector<4x128xf32>
    %216 = vector.broadcast %195 : vector<1x128xf32> to vector<4x128xf32>
    %217 = arith.addf %215, %216 : vector<4x128xf32>
    %218 = vector.shape_cast %217 : vector<4x128xf32> to vector<1x4x128xf32>
    %c0_80 = arith.constant 0 : index
    %c0_81 = arith.constant 0 : index
    %c0_82 = arith.constant 0 : index
    %219 = vector.load %arg14[%c0_80, %c0_81, %c0_82] : memref<1x4x128xf32, #tpu.memory_space<vmem>>, vector<1x4x128xf32>
    tpu.vector_store %arg14[%c0_80, %c0_81, %c0_82], %218 {strides = array<i32>} : memref<1x4x128xf32, #tpu.memory_space<vmem>>, vector<1x4x128xf32>,
    return
  }
  func.func @transform_0(%arg0: i32) -> (i32, i32, i32) {
    %c0_i32 = arith.constant 0 : i32
    %c0_i32_0 = arith.constant 0 : i32
    %c0_i32_1 = arith.constant 0 : i32
    return %arg0, %c0_i32, %c0_i32_0 : i32, i32, i32
  }
  func.func @transform_1(%arg0: i32) -> (i32, i32) {
    %c0_i32 = arith.constant 0 : i32
    %c0_i32_0 = arith.constant 0 : i32
    %c0_i32_1 = arith.constant 0 : i32
    return %c0_i32, %c0_i32_0 : i32, i32
  }
  func.func @transform_2(%arg0: i32) -> (i32, i32) {
    %c0_i32 = arith.constant 0 : i32
    %c0_i32_0 = arith.constant 0 : i32
    %c0_i32_1 = arith.constant 0 : i32
    return %c0_i32, %c0_i32_0 : i32, i32
  }
  func.func @transform_3(%arg0: i32) -> (i32, i32) {
    %c0_i32 = arith.constant 0 : i32
    %c0_i32_0 = arith.constant 0 : i32
    %c0_i32_1 = arith.constant 0 : i32
    return %c0_i32, %c0_i32_0 : i32, i32
  }
  func.func @transform_4(%arg0: i32) -> (i32, i32) {
    %c0_i32 = arith.constant 0 : i32
    %c0_i32_0 = arith.constant 0 : i32
    %c0_i32_1 = arith.constant 0 : i32
    return %c0_i32, %c0_i32_0 : i32, i32
  }
  func.func @transform_5(%arg0: i32) -> (i32, i32) {
    %c0_i32 = arith.constant 0 : i32
    %c0_i32_0 = arith.constant 0 : i32
    %c0_i32_1 = arith.constant 0 : i32
    return %c0_i32, %c0_i32_0 : i32, i32
  }
  func.func @transform_6(%arg0: i32) -> (i32, i32) {
    %c0_i32 = arith.constant 0 : i32
    %c0_i32_0 = arith.constant 0 : i32
    %c0_i32_1 = arith.constant 0 : i32
    return %c0_i32, %c0_i32_0 : i32, i32
  }
  func.func @transform_7(%arg0: i32) -> (i32, i32) {
    %c0_i32 = arith.constant 0 : i32
    %c0_i32_0 = arith.constant 0 : i32
    %c0_i32_1 = arith.constant 0 : i32
    return %c0_i32, %c0_i32_0 : i32, i32
  }
  func.func @transform_8(%arg0: i32) -> (i32, i32) {
    %c0_i32 = arith.constant 0 : i32
    %c0_i32_0 = arith.constant 0 : i32
    %c0_i32_1 = arith.constant 0 : i32
    return %c0_i32, %c0_i32_0 : i32, i32
  }
  func.func @transform_9(%arg0: i32) -> (i32, i32) {
    %c0_i32 = arith.constant 0 : i32
    %c0_i32_0 = arith.constant 0 : i32
    %c0_i32_1 = arith.constant 0 : i32
    return %c0_i32, %c0_i32_0 : i32, i32
  }
  func.func @transform_10(%arg0: i32) -> (i32, i32) {
    %c0_i32 = arith.constant 0 : i32
    %c0_i32_0 = arith.constant 0 : i32
    %c0_i32_1 = arith.constant 0 : i32
    return %c0_i32, %c0_i32_0 : i32, i32
  }
  func.func @transform_11(%arg0: i32) -> (i32, i32) {
    %c0_i32 = arith.constant 0 : i32
    %c0_i32_0 = arith.constant 0 : i32
    %c0_i32_1 = arith.constant 0 : i32
    return %c0_i32, %c0_i32_0 : i32, i32
  }
  func.func @transform_12(%arg0: i32) -> (i32, i32) {
    %c0_i32 = arith.constant 0 : i32
    %c0_i32_0 = arith.constant 0 : i32
    %c0_i32_1 = arith.constant 0 : i32
    return %c0_i32, %c0_i32_0 : i32, i32
  }
  func.func @transform_13(%arg0: i32) -> (i32, i32, i32) {
    %c0_i32 = arith.constant 0 : i32
    %c0_i32_0 = arith.constant 0 : i32
    %c0_i32_1 = arith.constant 0 : i32
    return %arg0, %c0_i32, %c0_i32_0 : i32, i32, i32
  }
}

</mosaic_0001>

<bundles_post_ra>
// kernel: net_forward.19
= control target key start
LH: loop header
LB: loop body
LE: loop exit
PB: predicated region body
PF: predicated region fallthrough
CT: control target
= control target key end

     0   :  { %8 = vsyncpa [#allocation3], 0  ;;  %s226_s0 = inlined_call_operand.vmem [shape: f32[8,128], index: 0, kind: input, shape index: {}]   ;;  %s227_s1 = inlined_call_operand.hbm [shape: f32[128,128], index: 1, kind: input, shape index: {}]   ;;  %s228_s2 = inlined_call_operand.hbm [shape: f32[1,128], index: 2, kind: input, shape index: {}]   ;;  %s229_s3 = inlined_call_operand.hbm [shape: f32[8,128], index: 3, kind: output, shape index: {}]  }
   0x1   :  { %9 = vsyncpa [#allocation6], 0 }
   0x2   :  { %10 = vsyncpa [#allocation4], 0  ;;  %s17_s14 = sshll.u32 %s227_s1, 4  ;;  %s189_s15 = smov [#allocation2]   ;;  %s18_s14 = int_to_ptr.hbm [resolvable:$true] %s17_s14 }
   0x3   :  { %s19_s16 = sshll.u32 %s189_s15, 4  ;;  %s31_s19 = sshll.u32 %s228_s2, 4  ;;  %s20_s16 = int_to_ptr.vmem [resolvable:$true] %s19_s16  ;;  %s32_s19 = int_to_ptr.hbm [resolvable:$true] %s31_s19 }
   0x4   :  { %s190_s20 = smov 128   ;;  %s191_s21 = smov 8  }
   0x5   :  { %25 = dma.hbm_to_vmem [thread:$0]  %s18_s14, 2048, %s20_s16, [#allocation3], %s190_s20, %s190_s20, %s191_s21  }
   0x6   :  { %s192_s22 = smov [#allocation5]  }
   0x7   :  { %s33_s23 = sshll.u32 %s192_s22, 4  ;;  %s34_s23 = int_to_ptr.vmem [resolvable:$true] %s33_s23 }
   0x8   :  { %36 = dma.hbm_to_vmem [thread:$0]  %s32_s19, 16, %s34_s23, [#allocation6]  }
   0x9   :  { %183 = dma.done.wait [#allocation3], 2048  }
   0xa   :  { %184 = vsyncadd [#allocation3], 4294965248 }
   0xb   :  { %185 = dma.done.wait [#allocation6], 16  }
   0xc   :  { %186 = vsyncadd [#allocation6], 4294967280  ;;  %v61_v0 = vld [vmem:[#allocation2 + $0x78] sm:$0xff]  ;;  %v60_v1 = vld [vmem:[#allocation2 + $0x70] sm:$0xff]  ;;  %s193_s24 = smov [#allocation7]   ;;  %s94_s28 = sshll.u32 %s229_s3, 4  ;;  %s95_s28 = int_to_ptr.hbm [resolvable:$true] %s94_s28 }
   0xd   :  { %66 = vmatpush.msra.mxu0 %v61_v0  ;;  %v59_v2 = vld [vmem:[#allocation2 + $0x68] sm:$0xff]  ;;  %v58_v3 = vld [vmem:[#allocation2 + $0x60] sm:$0xff]  ;;  %v57_v4 = vld [vmem:[#allocation2 + $0x58] sm:$0xff]  ;;  %s92_s25 = sshll.u32 %s193_s24, 4  ;;  %s93_s25 = int_to_ptr.vmem [resolvable:$true] %s92_s25 }
   0xe   :  { %v56_v5 = vld [vmem:[#allocation2 + $0x50] sm:$0xff]  ;;  %v55_v6 = vld [vmem:[#allocation2 + $0x48] sm:$0xff]  ;;  %v54_v7 = vld [vmem:[#allocation2 + $0x40] sm:$0xff] }
   0xf   :  { %67 = vmatpush.msra.mxu0 %v60_v1  ;;  %v53_v8 = vld [vmem:[#allocation2 + $0x38] sm:$0xff]  ;;  %v52_v9 = vld [vmem:[#allocation2 + $0x30] sm:$0xff]  ;;  %v51_v10 = vld [vmem:[#allocation2 + $0x28] sm:$0xff] }
  0x10   :  { %v50_v11 = vld [vmem:[#allocation2 + $0x20] sm:$0xff]  ;;  %v49_v12 = vld [vmem:[#allocation2 + $0x18] sm:$0xff]  ;;  %v48_v13 = vld [vmem:[#allocation2 + $0x10] sm:$0xff] }
  0x11   :  { %68 = vmatpush.msra.mxu0 %v59_v2  ;;  %v47_v14 = vld [vmem:[#allocation2 + $0x8] sm:$0xff]  ;;  %v46_v15 = vld [vmem:[#allocation2] sm:$0xff] }
  0x12   :  { %v45_v16 = vld [vmem:[%s226_s0] sm:$0xff] }
  0x13   :  { %69 = vmatpush.msra.mxu0 %v58_v3  ;;  %v110_v17 = vld [vmem:[#allocation5] ss:$0 sm:$0xff] }
  0x15   :  { %70 = vmatpush.msra.mxu0 %v57_v4 }
  0x17   :  { %71 = vmatpush.msra.mxu0 %v56_v5 }
  0x19   :  { %72 = vmatpush.msra.mxu0 %v55_v6 }
  0x1b   :  { %73 = vmatpush.msra.mxu0 %v54_v7 }
  0x1d   :  { %74 = vmatpush.msra.mxu0 %v53_v8 }
  0x1f   :  { %75 = vmatpush.msra.mxu0 %v52_v9 }
  0x21   :  { %76 = vmatpush.msra.mxu0 %v51_v10 }
  0x23   :  { %77 = vmatpush.msra.mxu0 %v50_v11 }
  0x25   :  { %78 = vmatpush.msra.mxu0 %v49_v12 }
  0x27   :  { %79 = vmatpush.msra.mxu0 %v48_v13 }
  0x29   :  { %80 = vmatpush.msra.mxu0 %v47_v14 }
  0x2b   :  { %81 = vmatpush.msra.mxu0 %v46_v15 }
  0x2c   :  { %82 = vmatmul.f32.vlgmr.msra.gmra.mxu0 %v45_v16 }
  0xa9   :  { %v83_v18 = vpop.f32.mrf.mxu0 }
  0xaa   :  { %v84_v19 = vadd.f32 %v110_v17, %v83_v18 }
  0xac   :  { %86 = vst [vmem:[#allocation7] sm:$0xff] %v84_v19 }
  0xad   :  { %97 = dma.vmem_to_hbm [thread:$0]  %s93_s25, 128, %s95_s28, [#allocation4]  }
  0xae   :  { %187 = dma.done.wait [#allocation4], 128  }
  0xaf   :  { %188 = vsyncadd [#allocation4], 4294967168 }
  0xb0   :  { %102 = vsyncpa [#allocation3], 1 }
  0xb1   :  { %103 = vsyncpa [#allocation6], 1 }
  0xb2   :  { %104 = vsyncpa [#allocation4], 1 }

// kernel: net_forward.14
= control target key start
LH: loop header
LB: loop body
LE: loop exit
PB: predicated region body
PF: predicated region fallthrough
CT: control target
= control target key end

     0   :  { %9 = vsyncpa [#allocation3], 0  ;;  %s838_s0 = inlined_call_operand.vmem [shape: f32[8,8,128], index: 0, kind: input, shape index: {}]   ;;  %s839_s1 = inlined_call_operand.hbm [shape: f32[128,128], index: 1, kind: input, shape index: {}]   ;;  %s840_s2 = inlined_call_operand.hbm [shape: f32[1,128], index: 2, kind: input, shape index: {}]   ;;  %s841_s3 = inlined_call_operand.hbm [shape: f32[1,128], index: 3, kind: input, shape index: {}]   ;;  %s842_s4 = inlined_call_operand.vmem [shape: f32[8,1,128], index: 4, kind: output, shape index: {}]  }
   0x1   :  { %10 = vsyncpa [#allocation5], 0  ;;  %s766_s15 = smov 0  }
   0x2 LB: > { %s162_s18 = sshll.u32 %s840_s2, 4  ;;  %s499_s19 = sadd.s32 4294967295, %s734_s15   ;;  %s734_s15 = sphi %s766_s15, %s16_s15   ;;  %s163_s18 = int_to_ptr.hbm [resolvable:$true] %s162_s18 }
   0x3   : > { %p501_p0 = scmp.ge.s32.totalorder %s734_s15, 1  ;;  %p136_p1 = scmp.lt.s32.totalorder %s734_s15, 3 }
   0x4   : > { %p779_p2 = scmp.eq.s32.totalorder %s499_s19, 0  ;;  %s736_s22 = smov [#allocation4]  }
   0x5   : > { %p783_p3 = pnand %p501_p0, %p136_p1  ;;  %s164_s23 = sshll.u32 %s736_s22, 4  ;;  %s165_s23 = int_to_ptr.vmem [resolvable:$true] %s164_s23 }
   0x6   : > { %s147_s26 = sshll.u32 %s839_s1, 4  ;;  %s737_s27 = smov [#allocation2]   ;;  %s148_s26 = int_to_ptr.hbm [resolvable:$true] %s147_s26 }
   0x7   : > { %p575_p4 = pneg %p783_p3  ;;  %s149_s28 = sshll.u32 %s737_s27, 4  ;;  %s150_s28 = int_to_ptr.vmem [resolvable:$true] %s149_s28 }
   0x8   : > { %s174_s5 = sshll.u32 %s841_s3, 4  ;;  %s738_s6 = smov 128   ;;  %s175_s5 = int_to_ptr.hbm [resolvable:$true] %s174_s5 }
   0x9   : > { %p576_p5 = pnand %p779_p2, %p575_p4  ;;  %s739_s7 = smov 8  }
   0xa   : > { %s740_s8 = smov [#allocation6]   ;;  %198 = sbr.rel (%p783_p3) target bundleno = 376 (0x178), region = 36 }
   0xb   : > { %581 = dma.hbm_to_vmem [thread:$0]  (!%p576_p5), %s163_s18, 16, %s165_s23, [#allocation5]  }
   0xc   : > { %578 = dma.hbm_to_vmem [thread:$0]  (!%p576_p5), %s148_s26, 2048, %s150_s28, [#allocation3], %s738_s6, %s738_s6, %s739_s7  }
   0xd   : > { %s176_s9 = sshll.u32 %s740_s8, 4  ;;  %s177_s9 = int_to_ptr.vmem [resolvable:$true] %s176_s9 }
   0xe   : > { %584 = dma.hbm_to_vmem [thread:$0]  (!%p576_p5), %s175_s5, 16, %s177_s9, [#allocation5]  }
   0xf   : > { %725 = dma.done.wait (%p779_p2), [#allocation3], 2048  }
  0x10   : > { %727 = vsyncadd (%p779_p2), [#allocation3], 4294965248 }
  0x11   : > { %729 = dma.done.wait (%p779_p2), [#allocation5], 32  }
  0x12   : > { %731 = vsyncadd (%p779_p2), [#allocation5], 4294967264  ;;  %v264_v0 = vld [vmem:[#allocation2 + $0x78] sm:$0xff]  ;;  %v263_v1 = vld [vmem:[#allocation2 + $0x70] sm:$0xff]  ;;  %s510_s10 = sshll.u32 %s499_s19, 2 }
  0x13   : > { %269 = vmatpush.msra.mxu0 %v264_v0  ;;  %516 = vmatpush.msra.mxu2 %v264_v0  ;;  %v262_v2 = vld [vmem:[#allocation2 + $0x68] sm:$0xff]  ;;  %v261_v3 = vld [vmem:[#allocation2 + $0x60] sm:$0xff]  ;;  %v260_v4 = vld [vmem:[#allocation2 + $0x58] sm:$0xff]  ;;  %p235_p6 = scmp.lt.s32.totalorder %s510_s10, 7 }
  0x14   : > { %515 = vmatpush.msra.mxu1 %v264_v0  ;;  %517 = vmatpush.msra.mxu3 %v264_v0  ;;  %v259_v5 = vld [vmem:[#allocation2 + $0x50] sm:$0xff]  ;;  %v258_v6 = vld [vmem:[#allocation2 + $0x48] sm:$0xff]  ;;  %v257_v7 = vld [vmem:[#allocation2 + $0x40] sm:$0xff] }
  0x15   : > { %270 = vmatpush.msra.mxu0 %v263_v1  ;;  %519 = vmatpush.msra.mxu2 %v263_v1  ;;  %v256_v8 = vld [vmem:[#allocation2 + $0x38] sm:$0xff]  ;;  %v255_v9 = vld [vmem:[#allocation2 + $0x30] sm:$0xff]  ;;  %v254_v10 = vld [vmem:[#allocation2 + $0x28] sm:$0xff]  ;;  %s846_s10 = smov (!%p235_p6, %s510_s10), 7 }
  0x16   : > { %518 = vmatpush.msra.mxu1 %v263_v1  ;;  %520 = vmatpush.msra.mxu3 %v263_v1  ;;  %v253_v11 = vld [vmem:[#allocation2 + $0x20] sm:$0xff]  ;;  %v252_v12 = vld [vmem:[#allocation2 + $0x18] sm:$0xff]  ;;  %s511_s11 = sshll.u32 %s846_s10, 3  ;;  %v251_v13 = vld [vmem:[#allocation2 + $0x10] sm:$0xff]  ;;  %s243_s18 = scalar_lea.vmem %s842_s4, %s846_s10 }
  0x17   : > { %271 = vmatpush.msra.mxu0 %v262_v2  ;;  %522 = vmatpush.msra.mxu2 %v262_v2  ;;  %v250_v14 = vld [vmem:[#allocation2 + $0x8] sm:$0xff]  ;;  %s238_s14 = scalar_lea.vmem %s838_s0, %s511_s11  ;;  %v249_v15 = vld [vmem:[#allocation2] sm:$0xff] }
  0x18   : > { %521 = vmatpush.msra.mxu1 %v262_v2  ;;  %523 = vmatpush.msra.mxu3 %v262_v2  ;;  %v815_v16 = vld [vmem:[%s238_s14] sm:$0xff]  ;;  %v817_v17 = vld [vmem:[%s238_s14 + $0x10] sm:$0xff]  ;;  %v819_v18 = vld [vmem:[%s238_s14 + $0x8] sm:$0xff] }
  0x19   : > { %272 = vmatpush.msra.mxu0 %v261_v3  ;;  %525 = vmatpush.msra.mxu2 %v261_v3  ;;  %v821_v19 = vld [vmem:[%s238_s14 + $0x18] sm:$0xff]  ;;  %v604_v20 = vld [vmem:[#allocation4] ss:$0 sm:$0xff]  ;;  %v605_v26 = vld [vmem:[#allocation6] ss:$0 sm:$0xff] }
  0x1a   : > { %524 = vmatpush.msra.mxu1 %v261_v3  ;;  %526 = vmatpush.msra.mxu3 %v261_v3 }
  0x1b   : > { %273 = vmatpush.msra.mxu0 %v260_v4  ;;  %528 = vmatpush.msra.mxu2 %v260_v4 }
  0x1c   : > { %527 = vmatpush.msra.mxu1 %v260_v4  ;;  %529 = vmatpush.msra.mxu3 %v260_v4 }
  0x1d   : > { %274 = vmatpush.msra.mxu0 %v259_v5  ;;  %531 = vmatpush.msra.mxu2 %v259_v5 }
  0x1e   : > { %530 = vmatpush.msra.mxu1 %v259_v5  ;;  %532 = vmatpush.msra.mxu3 %v259_v5 }
  0x1f   : > { %275 = vmatpush.msra.mxu0 %v258_v6  ;;  %534 = vmatpush.msra.mxu2 %v258_v6 }
  0x20   : > { %533 = vmatpush.msra.mxu1 %v258_v6  ;;  %535 = vmatpush.msra.mxu3 %v258_v6 }
  0x21   : > { %276 = vmatpush.msra.mxu0 %v257_v7  ;;  %537 = vmatpush.msra.mxu2 %v257_v7 }
  0x22   : > { %536 = vmatpush.msra.mxu1 %v257_v7  ;;  %538 = vmatpush.msra.mxu3 %v257_v7 }
  0x23   : > { %277 = vmatpush.msra.mxu0 %v256_v8  ;;  %540 = vmatpush.msra.mxu2 %v256_v8 }
  0x24   : > { %539 = vmatpush.msra.mxu1 %v256_v8  ;;  %541 = vmatpush.msra.mxu3 %v256_v8 }
  0x25   : > { %278 = vmatpush.msra.mxu0 %v255_v9  ;;  %543 = vmatpush.msra.mxu2 %v255_v9 }
  0x26   : > { %542 = vmatpush.msra.mxu1 %v255_v9  ;;  %544 = vmatpush.msra.mxu3 %v255_v9 }
  0x27   : > { %279 = vmatpush.msra.mxu0 %v254_v10  ;;  %546 = vmatpush.msra.mxu2 %v254_v10 }
  0x28   : > { %545 = vmatpush.msra.mxu1 %v254_v10  ;;  %547 = vmatpush.msra.mxu3 %v254_v10 }
  0x29   : > { %280 = vmatpush.msra.mxu0 %v253_v11  ;;  %549 = vmatpush.msra.mxu2 %v253_v11 }
  0x2a   : > { %548 = vmatpush.msra.mxu1 %v253_v11  ;;  %550 = vmatpush.msra.mxu3 %v253_v11 }
  0x2b   : > { %281 = vmatpush.msra.mxu0 %v252_v12  ;;  %552 = vmatpush.msra.mxu2 %v252_v12 }
  0x2c   : > { %551 = vmatpush.msra.mxu1 %v252_v12  ;;  %553 = vmatpush.msra.mxu3 %v252_v12 }
  0x2d   : > { %282 = vmatpush.msra.mxu0 %v251_v13  ;;  %555 = vmatpush.msra.mxu2 %v251_v13 }
  0x2e   : > { %554 = vmatpush.msra.mxu1 %v251_v13  ;;  %556 = vmatpush.msra.mxu3 %v251_v13 }
  0x2f   : > { %283 = vmatpush.msra.mxu0 %v250_v14  ;;  %558 = vmatpush.msra.mxu2 %v250_v14 }
  0x30   : > { %557 = vmatpush.msra.mxu1 %v250_v14  ;;  %559 = vmatpush.msra.mxu3 %v250_v14 }
  0x31   : > { %284 = vmatpush.msra.mxu0 %v249_v15  ;;  %561 = vmatpush.msra.mxu2 %v249_v15 }
  0x32   : > { %285 = vmatmul.f32.vlgmr.msra.gmra.mxu0 %v815_v16  ;;  %291 = vmatmul.f32.vlgmr.msra.gmra.mxu2 %v817_v17 }
  0x33   : > { %560 = vmatpush.msra.mxu1 %v249_v15  ;;  %562 = vmatpush.msra.mxu3 %v249_v15 }
  0x34   : > { %288 = vmatmul.f32.vlgmr.msra.gmra.mxu1 %v819_v18  ;;  %294 = vmatmul.f32.vlgmr.msra.gmra.mxu3 %v821_v19 }
  0xaf   : > { %v286_v21 = vpop.f32.mrf.mxu0 }
  0xb0   : > { %v287_v22 = vadd.f32 %v604_v20, %v286_v21 }
  0xb1   : > { %v289_v23 = vpop.f32.mrf.mxu1 }
  0xb2   : > { %606 = vtanh.f32 %v287_v22  ;;  %v290_v24 = vadd.f32 %v604_v20, %v289_v23 }
  0xb4   : > { %608 = vtanh.f32 %v290_v24 }
  0xb5   : > { %v292_v25 = vpop.f32.mrf.mxu2 }
  0xb6   : > { %v293_v27 = vadd.f32 %v604_v20, %v292_v25 }
  0xb7   : > { %v295_v28 = vpop.f32.mrf.mxu3 }
  0xb8   : > { %v607_v29 = vpop.eup %606  ;;  %610 = vtanh.f32 %v293_v27  ;;  %v296_v30 = vadd.f32 %v604_v20, %v295_v28 }
  0xb9   : > { %v306_v31 = vmul.f32 %v607_v29, %v605_v26 }
  0xba   : > { %v609_v32 = vpop.eup %608  ;;  %612 = vtanh.f32 %v296_v30 }
  0xbb   : > { %310 = vadd.xlane.f32.xlu0 %v306_v31  ;;  %v307_v35 = vmul.f32 %v609_v32, %v605_v26 }
  0xbe   : > { %v611_v33 = vpop.eup %610 }
  0xbf   : > { %v308_v34 = vmul.f32 %v611_v33, %v605_v26 }
  0xc0   : > { %v613_v36 = vpop.eup %612 }
  0xc1   : > { %314 = vadd.xlane.f32.xlu1 %v308_v34  ;;  %v309_v37 = vmul.f32 %v613_v36, %v605_v26 }
  0xc3   : > { %312 = vadd.xlane.f32.xlu0 %v307_v35 }
  0xc9   : > { %316 = vadd.xlane.f32.xlu1 %v309_v37 }
 0x12e   : > { %v311_v38 = vpop.xlane.xlu0 %310 }
 0x12f   : > { %v318_v39 = vrot.slane %v311_v38, 4 }
 0x131   : > { %v319_v40 = vmax.f32 %v311_v38, %v318_v39 }
 0x133   : > { %v320_v41 = vrot.slane %v319_v40, 2 }
 0x134   : > { %v315_v42 = vpop.xlane.xlu1 %314 }
 0x135   : > { %v321_v43 = vmax.f32 %v319_v40, %v320_v41  ;;  %v330_v44 = vrot.slane %v315_v42, 4 }
 0x136   : > { %v313_v45 = vpop.xlane.xlu0 %312 }
 0x137   : > { %v322_v46 = vrot.slane %v321_v43, 1  ;;  %v331_v47 = vmax.f32 %v315_v42, %v330_v44  ;;  %v324_v48 = vrot.slane %v313_v45, 4 }
 0x139   : > { %v323_v49 = vmax.f32 %v321_v43, %v322_v46  ;;  %v332_v50 = vrot.slane %v331_v47, 2  ;;  %v325_v51 = vmax.f32 %v313_v45, %v324_v48 }
 0x13b   : > { %v342_v52 = vsub.f32 %v311_v38, %v323_v49  ;;  %v333_v53 = vmax.f32 %v331_v47, %v332_v50  ;;  %v326_v54 = vrot.slane %v325_v51, 2 }
 0x13c   : > { %v317_v55 = vpop.xlane.xlu1 %316 }
 0x13d   : > { %v346_v56 = vmul.f32 1.442695, %v342_v52  ;;  %v334_v57 = vrot.slane %v333_v53, 1  ;;  %v327_v58 = vmax.f32 %v325_v51, %v326_v54  ;;  %v336_v59 = vrot.slane %v317_v55, 4 }
 0x13f   : > { %614 = vpow2.f32 %v346_v56  ;;  %v335_v60 = vmax.f32 %v333_v53, %v334_v57  ;;  %v328_v61 = vrot.slane %v327_v58, 1  ;;  %v337_v62 = vmax.f32 %v317_v55, %v336_v59 }
 0x141   : > { %v344_v63 = vsub.f32 %v315_v42, %v335_v60  ;;  %v329_v0 = vmax.f32 %v327_v58, %v328_v61  ;;  %v338_v1 = vrot.slane %v337_v62, 2 }
 0x143   : > { %v350_v2 = vmul.f32 1.442695, %v344_v63  ;;  %v343_v3 = vsub.f32 %v313_v45, %v329_v0  ;;  %v339_v4 = vmax.f32 %v337_v62, %v338_v1 }
 0x145   : > { %v615_v5 = vpop.eup %614  ;;  %616 = vpow2.f32 %v350_v2  ;;  %v348_v6 = vmul.f32 1.442695, %v343_v3  ;;  %v340_v7 = vrot.slane %v339_v4, 1 }
 0x146   : > { %v354_v8 = vrot.slane %v615_v5, 4 }
 0x147   : > { %618 = vpow2.f32 %v348_v6  ;;  %v341_v9 = vmax.f32 %v339_v4, %v340_v7 }
 0x148   : > { %v355_v10 = vadd.f32 %v615_v5, %v354_v8 }
 0x149   : > { %v345_v11 = vsub.f32 %v317_v55, %v341_v9 }
 0x14a   : > { %v356_v12 = vrot.slane %v355_v10, 2 }
 0x14b   : > { %v617_v13 = vpop.eup %616  ;;  %v352_v14 = vmul.f32 1.442695, %v345_v11 }
 0x14c   : > { %v357_v15 = vadd.f32 %v356_v12, %v355_v10  ;;  %v366_v20 = vrot.slane %v617_v13, 4 }
 0x14d   : > { %v619_v21 = vpop.eup %618  ;;  %620 = vpow2.f32 %v352_v14 }
 0x14e   : > { %v358_v22 = vrot.slane %v357_v15, 1  ;;  %v367_v23 = vadd.f32 %v617_v13, %v366_v20  ;;  %v360_v24 = vrot.slane %v619_v21, 4 }
 0x150   : > { %v359_v25 = vadd.f32 %v358_v22, %v357_v15  ;;  %v368_v26 = vrot.slane %v367_v23, 2  ;;  %v361_v27 = vadd.f32 %v619_v21, %v360_v24 }
 0x152   : > { %622 = vrcp.f32 %v359_v25  ;;  %v369_v28 = vadd.f32 %v368_v26, %v367_v23  ;;  %v362_v29 = vrot.slane %v361_v27, 2 }
 0x153   : > { %v621_v30 = vpop.eup %620 }
 0x154   : > { %v370_v31 = vrot.slane %v369_v28, 1  ;;  %v363_v32 = vadd.f32 %v362_v29, %v361_v27  ;;  %v372_v33 = vrot.slane %v621_v30, 4 }
 0x156   : > { %v371_v34 = vadd.f32 %v370_v31, %v369_v28  ;;  %v364_v35 = vrot.slane %v363_v32, 1  ;;  %v373_v36 = vadd.f32 %v621_v30, %v372_v33 }
 0x158   : > { %v623_v37 = vpop.eup %622  ;;  %624 = vrcp.f32 %v371_v34  ;;  %v365_v38 = vadd.f32 %v364_v35, %v363_v32  ;;  %v374_v39 = vrot.slane %v373_v36, 2 }
 0x159   : > { %v382_v40 = vmul.f32 %v623_v37, %v615_v5 }
 0x15a   : > { %626 = vrcp.f32 %v365_v38  ;;  %v375_v41 = vadd.f32 %v374_v39, %v373_v36 }
 0x15b   : > { %v386_v42 = vmul.f32 %v382_v40, %v815_v16 }
 0x15c   : > { %v376_v43 = vrot.slane %v375_v41, 1 }
 0x15d   : > { %v390_v44 = vrot.slane %v386_v42, 4 }
 0x15e   : > { %v625_v45 = vpop.eup %624  ;;  %v377_v46 = vadd.f32 %v376_v43, %v375_v41 }
 0x15f   : > { %v391_v47 = vadd.f32 %v390_v44, %v386_v42  ;;  %v384_v48 = vmul.f32 %v625_v45, %v617_v13 }
 0x160   : > { %v627_v49 = vpop.eup %626  ;;  %628 = vrcp.f32 %v377_v46 }
 0x161   : > { %v392_v50 = vrot.slane %v391_v47, 2  ;;  %v388_v51 = vmul.f32 %v384_v48, %v817_v17  ;;  %v383_v52 = vmul.f32 %v627_v49, %v619_v21 }
 0x163   : > { %v393_v53 = vadd.f32 %v392_v50, %v391_v47  ;;  %v402_v54 = vrot.slane %v388_v51, 4  ;;  %v387_v55 = vmul.f32 %v383_v52, %v819_v18 }
 0x165   : > { %v394_v56 = vrot.slane %v393_v53, 1  ;;  %v403_v57 = vadd.f32 %v402_v54, %v388_v51  ;;  %v396_v16 = vrot.slane %v387_v55, 4 }
 0x166   : > { %v629_v58 = vpop.eup %628 }
 0x167   : > { %v395_v59 = vadd.f32 %v394_v56, %v393_v53  ;;  %v404_v60 = vrot.slane %v403_v57, 2  ;;  %v397_v61 = vadd.f32 %v396_v16, %v387_v55  ;;  %v385_v62 = vmul.f32 %v629_v58, %v621_v30 }
 0x169   : > { %414 = vst [vmem:[%s243_s18] sm:$0x1] %v395_v59  ;;  %v405_v63 = vadd.f32 %v404_v60, %v403_v57  ;;  %v398_v17 = vrot.slane %v397_v61, 2  ;;  %v389_v0 = vmul.f32 %v385_v62, %v821_v19 }
 0x16b   : > { %v399_v1 = vadd.f32 %v398_v17, %v397_v61  ;;  %v408_v2 = vrot.slane %v389_v0, 4  ;;  %v406_v18 = vrot.slane %v405_v63, 1 }
 0x16d   : > { %v400_v3 = vrot.slane %v399_v1, 1  ;;  %v409_v4 = vadd.f32 %v408_v2, %v389_v0  ;;  %v407_v7 = vadd.f32 %v406_v18, %v405_v63 }
 0x16f   : > { %v401_v5 = vadd.f32 %v400_v3, %v399_v1  ;;  %v410_v6 = vrot.slane %v409_v4, 2  ;;  %416 = vst [vmem:[%s243_s18 + $0x2] sm:$0x1] %v407_v7 }
 0x171   : > { %415 = vst [vmem:[%s243_s18 + $0x1] sm:$0x1] %v401_v5  ;;  %v411_v8 = vadd.f32 %v410_v6, %v409_v4 }
 0x173   : > { %v412_v9 = vrot.slane %v411_v8, 1 }
 0x175   : > { %v413_v10 = vadd.f32 %v412_v9, %v411_v8 }
 0x177   : > { %417 = vst [vmem:[%s243_s18 + $0x3] sm:$0x1] %v413_v10 }
 0x178 PF: > { %s16_s15 = sadd.s32 1, %s734_s15  }
 0x179   : > { %p13_p7 = scmp.ge.s32.totalorder %s16_s15, 4  }
 0x17b   :  { %15 = sbr.rel (!%p13_p7) target bundleno = 2 (0x2), region = 79 }
 0x180   :  { %438 = vsyncpa [#allocation3], 1 }
 0x181   :  { %440 = vsyncpa [#allocation3 + $0x1], 1 }
 0x182   :  { %441 = vsyncpa [#allocation5], 1 }

// kernel: net_forward.15
= control target key start
LH: loop header
LB: loop body
LE: loop exit
PB: predicated region body
PF: predicated region fallthrough
CT: control target
= control target key end

     0   :  { %s3152_s0 = inlined_call_operand.vmem [shape: f32[2,4,128], index: 0, kind: input, shape index: {}]   ;;  %s3153_s1 = inlined_call_operand.hbm [shape: f32[128,384], index: 1, kind: input, shape index: {}]   ;;  %s3154_s2 = inlined_call_operand.vmem [shape: f32[1,384], index: 2, kind: input, shape index: {}]   ;;  %s3155_s3 = inlined_call_operand.hbm [shape: f32[128,128], index: 3, kind: input, shape index: {}]   ;;  %s3156_s4 = inlined_call_operand.hbm [shape: f32[1,128], index: 4, kind: input, shape index: {}]   ;;  %s3157_s5 = inlined_call_operand.hbm [shape: f32[1,128], index: 5, kind: input, shape index: {}]   ;;  %s3158_s6 = inlined_call_operand.hbm [shape: f32[1,128], index: 6, kind: input, shape index: {}]   ;;  %s3159_s7 = inlined_call_operand.hbm [shape: f32[128,1024], index: 7, kind: input, shape index: {}]   ;;  %s3160_s8 = inlined_call_operand.hbm [shape: f32[1,1024], index: 8, kind: input, shape index: {}]   ;;  %s3161_s9 = inlined_call_operand.hbm [shape: f32[1024,128], index: 9, kind: input, shape index: {}]   ;;  %s3162_s10 = inlined_call_operand.hbm [shape: f32[1,128], index: 10, kind: input, shape index: {}]   ;;  %s3163_s11 = inlined_call_operand.hbm [shape: f32[1,128], index: 11, kind: input, shape index: {}]   ;;  %s3164_s12 = inlined_call_operand.hbm [shape: f32[1,128], index: 12, kind: input, shape index: {}]   ;;  %s3165_s13 = inlined_call_operand.vmem [shape: f32[2,4,128], index: 13, kind: output, shape index: {}]  }
   0x1   :  { %3167 = sst [smem:[#allocation26_spill]] %s3155_s3 }
   0x2   :  { %3168 = sst [smem:[#allocation27_spill]] %s3157_s5 }
   0x3   :  { %3169 = sst [smem:[#allocation28_spill]] %s3159_s7 }
   0x4   :  { %18 = vsyncpa [#allocation3], 0 }
   0x5   :  { %19 = vsyncpa [#allocation5], 0 }
   0x6   :  { %20 = vsyncpa [#allocation8], 0 }
   0x7   :  { %21 = vsyncpa [#allocation11], 0 }
   0x8   :  { %22 = vsyncpa [#allocation14], 0 }
   0x9   :  { %23 = vsyncpa [#allocation17], 0  ;;  %s2876_s25 = smov 0  }
   0xa LB: > { %3170 = sst [smem:[#allocation25_spill]] %s2779_s25  ;;  %s2885_s29 = sadd.s32 4294967295, %s2779_s25   ;;  %s2779_s25 = sphi %s2876_s25, %s29_s25  }
   0xb   : > { %s3171_s3 = sld [smem:[#allocation26_spill]]  ;;  %p2181_p0 = scmp.ge.s32.totalorder %s2779_s25, 1 }
   0xc   : > { %p338_p1 = scmp.lt.s32.totalorder %s2779_s25, 3  ;;  %p2320_p2 = scmp.eq.s32.totalorder %s2885_s29, 0 }
   0xd   : > { %s2781_s14 = smov [#allocation4]   ;;  %s3173_s5 = sld [smem:[#allocation27_spill]] }
   0xe   : > { %p2890_p3 = pnand %p2181_p0, %p338_p1  ;;  %s368_s15 = sshll.u32 %s2781_s14, 4  ;;  %s369_s15 = int_to_ptr.vmem [resolvable:$true] %s368_s15 }
   0xf   : > { %s2782_s20 = smov [#allocation7]   ;;  %s3175_s7 = sld [smem:[#allocation28_spill]] }
  0x10   : > { %p2286_p4 = pneg %p2890_p3  ;;  %s395_s21 = sshll.u32 %s2782_s20, 4  ;;  %s396_s21 = int_to_ptr.vmem [resolvable:$true] %s395_s21 }
  0x11   : > { %s366_s28 = sshll.u32 %s3171_s3, 4  ;;  %s2783_s26 = smov 128   ;;  %s367_s28 = int_to_ptr.hbm [resolvable:$true] %s366_s28 }
  0x12   : > { %p2901_p5 = pnand %p2320_p2, %p2286_p4  ;;  %s2784_s27 = smov 8  }
  0x13   : > { %s393_s18 = sshll.u32 %s3173_s5, 4  ;;  %s2785_s14 = smov [#allocation10]   ;;  %s394_s18 = int_to_ptr.hbm [resolvable:$true] %s393_s18 }
  0x14   : > { %2292 = dma.hbm_to_vmem [thread:$0]  (!%p2901_p5), %s367_s28, 2048, %s369_s15, [#allocation5], %s2783_s26, %s2783_s26, %s2784_s27  }
  0x15   : > { %s416_s24 = sshll.u32 %s3175_s7, 4  ;;  %s418_s16 = sshll.u32 %s2785_s14, 4  ;;  %s417_s24 = int_to_ptr.hbm [resolvable:$true] %s416_s24  ;;  %s419_s16 = int_to_ptr.vmem [resolvable:$true] %s418_s16 }
  0x16   : > { %2298 = dma.hbm_to_vmem [thread:$0]  (!%p2901_p5), %s394_s18, 16, %s396_s21, [#allocation8]  }
  0x17   : > { %s2786_s17 = smov 1024   ;;  %s2787_s3 = smov 64  }
  0x18   : > { %2304 = dma.hbm_to_vmem [thread:$0]  (!%p2901_p5), %s417_s24, 16384, %s419_s16, [#allocation11], %s2786_s17, %s2786_s17, %s2787_s3  }
  0x19   : > { %s442_s23 = sshll.u32 %s3161_s9, 4  ;;  %s2788_s5 = smov [#allocation13]   ;;  %s443_s23 = int_to_ptr.hbm [resolvable:$true] %s442_s23 }
  0x1a   : > { %s444_s7 = sshll.u32 %s2788_s5, 4  ;;  %s469_s18 = sshll.u32 %s3163_s11, 4  ;;  %s445_s7 = int_to_ptr.vmem [resolvable:$true] %s444_s7  ;;  %s470_s18 = int_to_ptr.hbm [resolvable:$true] %s469_s18 }
  0x1b   : > { %2310 = dma.hbm_to_vmem [thread:$0]  (!%p2901_p5), %s443_s23, 16384, %s445_s7, [#allocation14], %s2783_s26, %s2783_s26, %s2784_s27  }
  0x1c   : > { %s2789_s21 = smov [#allocation16]   ;;  %s349_s24 = sshll.u32 %s3153_s1, 4  ;;  %s350_s24 = int_to_ptr.hbm [resolvable:$true] %s349_s24 }
  0x1d   : > { %s471_s14 = sshll.u32 %s2789_s21, 4  ;;  %s2790_s5 = smov [#allocation2]   ;;  %s472_s14 = int_to_ptr.vmem [resolvable:$true] %s471_s14 }
  0x1e   : > { %2316 = dma.hbm_to_vmem [thread:$0]  (!%p2901_p5), %s470_s18, 16, %s472_s14, [#allocation17]  }
  0x1f   : > { %s351_s16 = sshll.u32 %s2790_s5, 4  ;;  %s381_s22 = sshll.u32 %s3156_s4, 4  ;;  %s352_s16 = int_to_ptr.vmem [resolvable:$true] %s351_s16  ;;  %s382_s22 = int_to_ptr.hbm [resolvable:$true] %s381_s22 }
  0x20   : > { %s2791_s7 = smov 384   ;;  %s2792_s26 = smov 24  }
  0x21   : > { %2289 = dma.hbm_to_vmem [thread:$0]  (!%p2901_p5), %s350_s24, 6144, %s352_s16, [#allocation3], %s2791_s7, %s2791_s7, %s2792_s26  }
  0x22   : > { %s2793_s25 = smov [#allocation6]   ;;  %s405_s15 = sshll.u32 %s3158_s6, 4  ;;  %s406_s15 = int_to_ptr.hbm [resolvable:$true] %s405_s15 }
  0x23   : > { %s383_s27 = sshll.u32 %s2793_s25, 4  ;;  %s431_s14 = sshll.u32 %s3160_s8, 4  ;;  %s384_s27 = int_to_ptr.vmem [resolvable:$true] %s383_s27  ;;  %s432_s14 = int_to_ptr.hbm [resolvable:$true] %s431_s14 }
  0x24   : > { %2295 = dma.hbm_to_vmem [thread:$0]  (!%p2901_p5), %s382_s22, 16, %s384_s27, [#allocation5]  }
  0x25   : > { %s2794_s3 = smov [#allocation9]   ;;  %s2795_s24 = smov [#allocation12]  }
  0x26   : > { %s407_s5 = sshll.u32 %s2794_s3, 4  ;;  %s433_s16 = sshll.u32 %s2795_s24, 4  ;;  %s408_s5 = int_to_ptr.vmem [resolvable:$true] %s407_s5  ;;  %s434_s16 = int_to_ptr.vmem [resolvable:$true] %s433_s16 }
  0x27   : > { %2301 = dma.hbm_to_vmem [thread:$0]  (!%p2901_p5), %s406_s15, 16, %s408_s5, [#allocation8]  }
  0x28   : > { %s457_s7 = sshll.u32 %s3162_s10, 4  ;;  %s481_s25 = sshll.u32 %s3164_s12, 4  ;;  %s458_s7 = int_to_ptr.hbm [resolvable:$true] %s457_s7  ;;  %s482_s25 = int_to_ptr.hbm [resolvable:$true] %s481_s25 }
  0x29   : > { %2307 = dma.hbm_to_vmem [thread:$0]  (!%p2901_p5), %s432_s14, 128, %s434_s16, [#allocation11]  }
  0x2a   : > { %s2796_s27 = smov [#allocation15]   ;;  %s2797_s28 = smov [#allocation18]  }
  0x2b   : > { %s459_s23 = sshll.u32 %s2796_s27, 4  ;;  %s483_s15 = sshll.u32 %s2797_s28, 4  ;;  %s460_s23 = int_to_ptr.vmem [resolvable:$true] %s459_s23  ;;  %s484_s15 = int_to_ptr.vmem [resolvable:$true] %s483_s15 }
  0x2c   : > { %2313 = dma.hbm_to_vmem [thread:$0]  (!%p2901_p5), %s458_s7, 16, %s460_s23, [#allocation14]  }
  0x2d   : > { %2319 = dma.hbm_to_vmem [thread:$0]  (!%p2901_p5), %s482_s25, 16, %s484_s15, [#allocation17]  }
  0x2e   : > { %503 = sbr.rel (%p2890_p3) target bundleno = 2341 (0x925), region = 72 }
  0x33   : > { %2754 = dma.done.wait (%p2320_p2), [#allocation3], 6144  }
  0x34   : > { %2756 = vsyncadd (%p2320_p2), [#allocation3], 4294961152 }
  0x35   : > { %2758 = dma.done.wait (%p2320_p2), [#allocation5], 2064  }
  0x36   : > { %2760 = vsyncadd (%p2320_p2), [#allocation5], 4294965232 }
  0x37   : > { %2762 = dma.done.wait (%p2320_p2), [#allocation8], 32  }
  0x38   : > { %2764 = vsyncadd (%p2320_p2), [#allocation8], 4294967264 }
  0x39   : > { %2766 = dma.done.wait (%p2320_p2), [#allocation11], 16512  }
  0x3a   : > { %2768 = vsyncadd (%p2320_p2), [#allocation11], 4294950784 }
  0x3b   : > { %2770 = dma.done.wait (%p2320_p2), [#allocation14], 16400  }
  0x3c   : > { %2772 = vsyncadd (%p2320_p2), [#allocation14], 4294950896 }
  0x3d   : > { %2774 = dma.done.wait (%p2320_p2), [#allocation17], 32  }
  0x3e   : > { %2776 = vsyncadd (%p2320_p2), [#allocation17], 4294967264  ;;  %v651_v0 = vld [vmem:[#allocation2 + $0x170] sm:$0xff]  ;;  %v648_v1 = vld [vmem:[#allocation2 + $0x158] sm:$0xff]  ;;  %p596_p6 = scmp.lt.s32.totalorder %s2885_s29, 1  ;;  %vm721_vm0 = vcmask 130048  }
  0x3f   : > { %v652_v2 = vld [vmem:[#allocation2 + $0x178] sm:$0xff]  ;;  %681 = vmatpush.msra.mxu1 %v651_v0  ;;  %v650_v3 = vld [vmem:[#allocation2 + $0x168] sm:$0xff]  ;;  %v649_v4 = vld [vmem:[#allocation2 + $0x160] sm:$0xff]  ;;  %s2798_s5 = smov 96   ;;  %s2799_s24 = smov 112   ;;  %vm765_vm1 = vcmask 1043456  }
  0x40   : > { %701 = vmatpush.msra.mxu2 %v652_v2  ;;  %661 = vmatpush.msra.mxu0 %v650_v3  ;;  %v645_v5 = vld [vmem:[#allocation2 + $0x140] sm:$0xff]  ;;  %v647_v6 = vld [vmem:[#allocation2 + $0x150] sm:$0xff]  ;;  %v646_v7 = vld [vmem:[#allocation2 + $0x148] sm:$0xff]  ;;  %s3178_s29 = smov (!%p596_p6, %s2885_s29), 1  ;;  %s2800_s16 = smov 80   ;;  %vm749_vm2 = vcmask 27648  }
  0x41   : > { %682 = vmatpush.msra.mxu1 %v648_v1  ;;  %v644_v8 = vld [vmem:[#allocation2 + $0x138] sm:$0xff]  ;;  %v642_v9 = vld [vmem:[#allocation2 + $0x128] sm:$0xff]  ;;  %v643_v10 = vld [vmem:[#allocation2 + $0x130] sm:$0xff]  ;;  %s2206_s30 = sshll.u32 %s3178_s29, 2  ;;  %s2801_s17 = smov 48   ;;  %vm761_vm3 = vcmask 31744  }
  0x42   : > { %702 = vmatpush.msra.mxu2 %v649_v4  ;;  %662 = vmatpush.msra.mxu0 %v647_v6  ;;  %v641_v11 = vld [vmem:[#allocation2 + $0x120] sm:$0xff]  ;;  %v639_v12 = vld [vmem:[#allocation2 + $0x110] sm:$0xff]  ;;  %v640_v13 = vld [vmem:[#allocation2 + $0x118] sm:$0xff]  ;;  %s599_s21 = scalar_lea.vmem %s3152_s0, %s2206_s30  ;;  %s2802_s20 = smov 64   ;;  %vm1287_vm4 = vcmask 261120   ;;  %vm1289_vm5 = vcmask 392192  }
  0x43   : > { %683 = vmatpush.msra.mxu1 %v645_v5  ;;  %v638_v14 = vld [vmem:[#allocation2 + $0x108] sm:$0xff]  ;;  %v636_v15 = vld [vmem:[#allocation2 + $0xf8] sm:$0xff]  ;;  %v637_v16 = vld [vmem:[#allocation2 + $0x100] sm:$0xff]  ;;  %s2803_s7 = smov 16   ;;  %s2804_s22 = smov 32   ;;  %vm1291_vm6 = vcmask 523264  }
  0x44   : > { %703 = vmatpush.msra.mxu2 %v646_v7  ;;  %663 = vmatpush.msra.mxu0 %v644_v8  ;;  %v635_v17 = vld [vmem:[#allocation2 + $0xf0] sm:$0xff]  ;;  %v633_v18 = vld [vmem:[#allocation2 + $0xe0] sm:$0xff]  ;;  %v634_v19 = vld [vmem:[#allocation2 + $0xe8] sm:$0xff]  ;;  %vm1293_vm7 = vcmask 654336   ;;  %vm1295_vm8 = vcmask 785408   ;;  %vm1297_vm9 = vcmask 916480   ;;  %s603_s27 = scalar_lea.vmem %s3165_s13, %s2206_s30 }
  0x45   : > { %684 = vmatpush.msra.mxu1 %v642_v9  ;;  %v632_v20 = vld [vmem:[#allocation2 + $0xd8] sm:$0xff]  ;;  %v630_v21 = vld [vmem:[#allocation2 + $0xc8] sm:$0xff]  ;;  %v631_v22 = vld [vmem:[#allocation2 + $0xd0] sm:$0xff] }
  0x46   : > { %704 = vmatpush.msra.mxu2 %v643_v10  ;;  %664 = vmatpush.msra.mxu0 %v641_v11  ;;  %v629_v23 = vld [vmem:[#allocation2 + $0xc0] sm:$0xff]  ;;  %v627_v24 = vld [vmem:[#allocation2 + $0xb0] sm:$0xff]  ;;  %v628_v25 = vld [vmem:[#allocation2 + $0xb8] sm:$0xff] }
  0x47   : > { %685 = vmatpush.msra.mxu1 %v639_v12  ;;  %v624_v26 = vld [vmem:[#allocation2 + $0x98] sm:$0xff]  ;;  %v626_v27 = vld [vmem:[#allocation2 + $0xa8] sm:$0xff]  ;;  %v621_v28 = vld [vmem:[#allocation2 + $0x80] sm:$0xff] }
  0x48   : > { %705 = vmatpush.msra.mxu2 %v640_v13  ;;  %665 = vmatpush.msra.mxu0 %v638_v14  ;;  %v625_v29 = vld [vmem:[#allocation2 + $0xa0] sm:$0xff]  ;;  %v623_v30 = vld [vmem:[#allocation2 + $0x90] sm:$0xff]  ;;  %v622_v31 = vld [vmem:[#allocation2 + $0x88] sm:$0xff] }
  0x49   : > { %686 = vmatpush.msra.mxu1 %v636_v15  ;;  %v620_v32 = vld [vmem:[#allocation2 + $0x78] sm:$0xff]  ;;  %v618_v33 = vld [vmem:[#allocation2 + $0x68] sm:$0xff]  ;;  %v619_v34 = vld [vmem:[#allocation2 + $0x70] sm:$0xff] }
  0x4a   : > { %706 = vmatpush.msra.mxu2 %v637_v16  ;;  %666 = vmatpush.msra.mxu0 %v635_v17  ;;  %v617_v35 = vld [vmem:[#allocation2 + $0x60] sm:$0xff]  ;;  %v615_v36 = vld [vmem:[#allocation2 + $0x50] sm:$0xff]  ;;  %v616_v37 = vld [vmem:[#allocation2 + $0x58] sm:$0xff] }
  0x4b   : > { %687 = vmatpush.msra.mxu1 %v633_v18  ;;  %v614_v38 = vld [vmem:[#allocation2 + $0x48] sm:$0xff]  ;;  %v612_v39 = vld [vmem:[#allocation2 + $0x38] sm:$0xff]  ;;  %v613_v40 = vld [vmem:[#allocation2 + $0x40] sm:$0xff] }
  0x4c   : > { %707 = vmatpush.msra.mxu2 %v634_v19  ;;  %667 = vmatpush.msra.mxu0 %v632_v20  ;;  %v611_v41 = vld [vmem:[#allocation2 + $0x30] sm:$0xff]  ;;  %v609_v42 = vld [vmem:[#allocation2 + $0x20] sm:$0xff]  ;;  %v610_v43 = vld [vmem:[#allocation2 + $0x28] sm:$0xff] }
  0x4d   : > { %688 = vmatpush.msra.mxu1 %v630_v21  ;;  %v608_v44 = vld [vmem:[#allocation2 + $0x18] sm:$0xff]  ;;  %v606_v45 = vld [vmem:[#allocation2 + $0x8] sm:$0xff]  ;;  %v607_v46 = vld [vmem:[#allocation2 + $0x10] sm:$0xff] }
  0x4e   : > { %708 = vmatpush.msra.mxu2 %v631_v22  ;;  %668 = vmatpush.msra.mxu0 %v629_v23  ;;  %v2990_v47 = vld [vmem:[%s599_s21] sm:$0xf] }
  0x4f   : > { %689 = vmatpush.msra.mxu1 %v627_v24  ;;  %v605_v48 = vld [vmem:[#allocation2] sm:$0xff] }
  0x50   : > { %709 = vmatpush.msra.mxu2 %v628_v25  ;;  %669 = vmatpush.msra.mxu0 %v626_v27  ;;  %v653_v49 = vld [vmem:[%s3154_s2] sm:$0x7] }
  0x51   : > { %690 = vmatpush.msra.mxu1 %v624_v26  ;;  %v656_v50 = vperm.slane %v653_v49, 1  ;;  %v655_v51 = vperm.slane %v653_v49, 0  ;;  %v657_v56 = vperm.slane %v653_v49, 2 }
  0x52   : > { %710 = vmatpush.msra.mxu2 %v625_v29  ;;  %670 = vmatpush.msra.mxu0 %v623_v30 }
  0x53   : > { %691 = vmatpush.msra.mxu1 %v621_v28 }
  0x54   : > { %711 = vmatpush.msra.mxu2 %v622_v31  ;;  %671 = vmatpush.msra.mxu0 %v620_v32 }
  0x55   : > { %692 = vmatpush.msra.mxu1 %v618_v33 }
  0x56   : > { %712 = vmatpush.msra.mxu2 %v619_v34  ;;  %672 = vmatpush.msra.mxu0 %v617_v35 }
  0x57   : > { %693 = vmatpush.msra.mxu1 %v615_v36 }
  0x58   : > { %713 = vmatpush.msra.mxu2 %v616_v37  ;;  %673 = vmatpush.msra.mxu0 %v614_v38 }
  0x59   : > { %694 = vmatpush.msra.mxu1 %v612_v39 }
  0x5a   : > { %714 = vmatpush.msra.mxu2 %v613_v40  ;;  %674 = vmatpush.msra.mxu0 %v611_v41 }
  0x5b   : > { %695 = vmatpush.msra.mxu1 %v609_v42 }
  0x5c   : > { %715 = vmatpush.msra.mxu2 %v610_v43  ;;  %675 = vmatpush.msra.mxu0 %v608_v44 }
  0x5d   : > { %696 = vmatpush.msra.mxu1 %v606_v45 }
  0x5e   : > { %716 = vmatpush.msra.mxu2 %v607_v46  ;;  %697 = vmatmul.f32.vlgmr.msra.gmra.mxu1 %v2990_v47 }
  0x5f   : > { %676 = vmatpush.msra.mxu0 %v605_v48  ;;  %717 = vmatmul.f32.vlgmr.msra.gmra.mxu2 %v2990_v47 }
  0x60   : > { %677 = vmatmul.f32.vlgmr.msra.gmra.mxu0 %v2990_v47 }
  0xdb   : > { %v698_v52 = vpop.f32.mrf.mxu1 }
  0xdc   : > { %v699_v53 = vadd.f32 %v698_v52, %v656_v50 }
  0xdd   : > { %v678_v54 = vpop.f32.mrf.mxu0 }
  0xde   : > { %858 = vrot.lane.b32.xlu2 %v699_v53, %s2798_s5  ;;  %791 = vrot.lane.b32.xlu0 %v699_v53, %s2799_s24  ;;  %v3000_v55 = vadd.f32 %v678_v54, %v655_v51 }
  0xdf   : > { %2208 = vmatpush.xpose.msk.msrb.mxu0 %vm721_vm0, %v699_v53 }
  0xe2   : > { %2209 = vmatmul.msk.f32.vlgmr.msrb.gmra.mxu0 %vm721_vm0, %v3000_v55  ;;  %v718_v57 = vpop.f32.mrf.mxu2 }
  0xe3   : > { %v3005_v58 = vadd.f32 %v718_v57, %v657_v56 }
  0xe5   : > { %2210 = vmatpush.msk.msrb.mxu2 %vm765_vm1, %v3005_v58 }
  0xe6   : > { %829 = vrot.lane.b32.xlu2 %v3005_v58, %s2799_s24  ;;  %789 = vrot.lane.b32.xlu0 %v3000_v55, %s2799_s24 }
  0xee   : > { %923 = vrot.lane.b32.xlu2 %v3000_v55, %s2800_s16  ;;  %925 = vrot.lane.b32.xlu0 %v699_v53, %s2800_s16 }
  0xf6   : > { %1059 = vrot.lane.b32.xlu2 %v699_v53, %s2801_s17  ;;  %992 = vrot.lane.b32.xlu0 %v699_v53, %s2802_s20 }
  0xfe   : > { %1057 = vrot.lane.b32.xlu2 %v3000_v55, %s2801_s17  ;;  %990 = vrot.lane.b32.xlu0 %v3000_v55, %s2802_s20 }
 0x106   : > { %1193 = vrot.lane.b32.xlu2 %v699_v53, %s2803_s7  ;;  %1126 = vrot.lane.b32.xlu0 %v699_v53, %s2804_s22 }
 0x10e   : > { %1191 = vrot.lane.b32.xlu0 %v3000_v55, %s2803_s7 }
 0x138   : > { %v859_v59 = vpop.permute.xlu2 %858 }
 0x140   : > { %v830_v60 = vpop.permute.xlu2 %829 }
 0x141   : > { %2214 = vmatpush.msk.msra.mxu3 %vm765_vm1, %v830_v60 }
 0x143   : > { %2216 = vmatpush.xpose.msk.msrb.mxu3 %vm721_vm0, %v859_v59 }
 0x148   : > { %v924_v61 = vpop.permute.xlu2 %923 }
 0x150   : > { %v792_v62 = vpop.permute.xlu0 %791  ;;  %v1060_v63 = vpop.permute.xlu2 %1059 }
 0x151   : > { %2212 = vmatpush.xpose.msk.msrb.mxu1 %vm721_vm0, %v792_v62 }
 0x158   : > { %v790_v0 = vpop.permute.xlu0 %789  ;;  %v1058_v1 = vpop.permute.xlu2 %1057 }
 0x159   : > { %2213 = vmatmul.msk.f32.vlgmr.msrb.gmra.mxu1 %vm721_vm0, %v790_v0 }
 0x15f   : > { %v745_v2 = vpop.f32.mrf.mxu0 }
 0x160   : > { %v748_v3 = vmul.f32 0.25, %v745_v2  ;;  %v926_v4 = vpop.permute.xlu0 %925  ;;  %v1194_v6 = vpop.permute.xlu2 %1193 }
 0x161   : > { %2220 = vmatpush.xpose.msk.msra.mxu1 %vm721_vm0, %v926_v4 }
 0x162   : > { %v750_v5 = vsel %vm749_vm2, %v748_v3, -inf }
 0x163   : > { %751 = vmax.xlane.f32.xlu2 %v750_v5 }
 0x164   : > { %2221 = vmatmul.msk.f32.vlgmr.msra.gmra.mxu1 %vm721_vm0, %v924_v61 }
 0x165   : > { %2228 = vmatpush.xpose.msk.msrb.mxu1 %vm721_vm0, %v1060_v63 }
 0x168   : > { %v993_v7 = vpop.permute.xlu0 %992 }
 0x169   : > { %2236 = vmatpush.xpose.msk.msra.mxu1 %vm721_vm0, %v1194_v6 }
 0x16c   : > { %2229 = vmatmul.msk.f32.vlgmr.msrb.gmra.mxu1 %vm721_vm0, %v1058_v1 }
 0x170   : > { %v991_v8 = vpop.permute.xlu0 %990 }
 0x178   : > { %v1127_v9 = vpop.permute.xlu0 %1126 }
 0x180   : > { %v1192_v10 = vpop.permute.xlu0 %1191 }
 0x181   : > { %2237 = vmatmul.msk.f32.vlgmr.msra.gmra.mxu1 %vm721_vm0, %v1192_v10 }
 0x1d6   : > { %v814_v11 = vpop.f32.mrf.mxu1  ;;  %v752_v26 = vpop.xlane.xlu2 %751 }
 0x1d7   : > { %v817_v12 = vmul.f32 0.25, %v814_v11  ;;  %v753_v27 = vsub.f32 %v748_v3, %v752_v26 }
 0x1d9   : > { %v818_v13 = vsel %vm749_vm2, %v817_v12, -inf  ;;  %v754_v28 = vmul.f32 1.442695, %v753_v27 }
 0x1da   : > { %819 = vmax.xlane.f32.xlu1 %v818_v13 }
 0x1e1   : > { %v948_v14 = vpop.f32.mrf.mxu1 }
 0x1e2   : > { %v951_v29 = vmul.f32 0.25, %v948_v14 }
 0x1e4   : > { %v952_v30 = vsel %vm749_vm2, %v951_v29, -inf }
 0x1e9   : > { %v1082_v15 = vpop.f32.mrf.mxu1 }
 0x1ea   : > { %v3038_v16 = vmul.f32 0.25, %v1082_v15 }
 0x1ec   : > { %v1086_v17 = vsel %vm749_vm2, %v3038_v16, -inf }
 0x1ed   : > { %1087 = vmax.xlane.f32.xlu2 %v1086_v17 }
 0x1f3   : > { %856 = vrot.lane.b32.xlu1 %v3000_v55, %s2798_s5 }
 0x1fe   : > { %v1216_v18 = vpop.f32.mrf.mxu1 }
 0x1ff   : > { %v1219_v19 = vmul.f32 0.25, %v1216_v18 }
 0x201   : > { %v1220_v20 = vsel %vm749_vm2, %v1219_v19, -inf }
 0x202   : > { %1221 = vmax.xlane.f32.xlu2 %v1220_v20 }
 0x24d   : > { %v820_v21 = vpop.xlane.xlu1 %819 }
 0x24e   : > { %v821_v22 = vsub.f32 %v817_v12, %v820_v21 }
 0x250   : > { %v822_v23 = vmul.f32 1.442695, %v821_v22 }
 0x252   : > { %2381 = vpow2.f32 %v822_v23 }
 0x253   : > { %2383 = vpow2.f32 %v754_v28 }
 0x258   : > { %v2382_v24 = vpop.eup %2381 }
 0x259   : > { %v824_v25 = vsel %vm749_vm2, %v2382_v24, 0.0  ;;  %v2384_v31 = vpop.eup %2383 }
 0x25a   : > { %825 = vadd.xlane.f32.xlu1 %v824_v25  ;;  %v756_v32 = vsel %vm749_vm2, %v2384_v31, 0.0 }
 0x260   : > { %v1088_v46 = vpop.xlane.xlu2 %1087 }
 0x261   : > { %v1089_v54 = vsub.f32 %v3038_v16, %v1088_v46  ;;  %v1314_v46 = vld [vmem:[#allocation4 + $0x78] sm:$0xff] }
 0x263   : > { %v1090_v56 = vmul.f32 1.442695, %v1089_v54 }
 0x265   : > { %v857_v33 = vpop.permute.xlu1 %856 }
 0x273   : > { %1124 = vrot.lane.b32.xlu1 %v3000_v55, %s2804_s22 }
 0x275   : > { %v1222_v48 = vpop.xlane.xlu2 %1221 }
 0x276   : > { %v1223_v50 = vsub.f32 %v1219_v19, %v1222_v48  ;;  %v1313_v48 = vld [vmem:[#allocation4 + $0x70] sm:$0xff] }
 0x278   : > { %v1224_v51 = vmul.f32 1.442695, %v1223_v50  ;;  %v1311_v50 = vld [vmem:[#allocation4 + $0x60] sm:$0xff] }
 0x29d   : > { %953 = vmax.xlane.f32.xlu1 %v952_v30 }
 0x2a5   : > { %757 = vadd.xlane.f32.xlu1 %v756_v32 }
 0x2cd   : > { %v826_v34 = vpop.xlane.xlu1 %825 }
 0x2ce   : > { %2385 = vrcp.f32 %v826_v34 }
 0x2d4   : > { %v2386_v35 = vpop.eup %2385 }
 0x2d5   : > { %v828_v36 = vmul.f32 %v2386_v35, %v2382_v24 }
 0x2d7   : > { %2215 = vmatmul.msk.f32.vlgmr.msra.gmra.mxu3 %vm761_vm3, %v828_v36 }
 0x2d8   : > { %2224 = vmatpush.xpose.msk.msra.mxu3 %vm721_vm0, %v993_v7 }
 0x2df   : > { %2217 = vmatmul.msk.f32.vlgmr.msrb.gmra.mxu3 %vm721_vm0, %v857_v33 }
 0x2e0   : > { %2232 = vmatpush.xpose.msk.msrb.mxu3 %vm721_vm0, %v1127_v9 }
 0x2e5   : > { %v1125_v37 = vpop.permute.xlu1 %1124 }
 0x2e7   : > { %2225 = vmatmul.msk.f32.vlgmr.msra.gmra.mxu3 %vm721_vm0, %v991_v8 }
 0x2e8   : > { %1319 = vmatpush.msra.mxu3 %v1314_v46  ;;  %v1462_v46 = vld [vmem:[#allocation10 + $0x298] sm:$0xff] }
 0x2ea   : > { %1320 = vmatpush.msra.mxu3 %v1313_v48 }
 0x2ef   : > { %2233 = vmatmul.msk.f32.vlgmr.msrb.gmra.mxu3 %vm721_vm0, %v1125_v37 }
 0x310   : > { %v954_v38 = vpop.xlane.xlu1 %953 }
 0x311   : > { %v955_v39 = vsub.f32 %v951_v29, %v954_v38 }
 0x313   : > { %v956_v40 = vmul.f32 1.442695, %v955_v39 }
 0x315   : > { %2387 = vpow2.f32 %v956_v40 }
 0x318   : > { %v758_v41 = vpop.xlane.xlu1 %757 }
 0x319   : > { %2389 = vrcp.f32 %v758_v41 }
 0x31a   : > { %2391 = vpow2.f32 %v1224_v51  ;;  %v1310_v51 = vld [vmem:[#allocation4 + $0x58] sm:$0xff] }
 0x31b   : > { %v2388_v42 = vpop.eup %2387  ;;  %2393 = vpow2.f32 %v1090_v56  ;;  %v1308_v56 = vld [vmem:[#allocation4 + $0x48] sm:$0xff] }
 0x31c   : > { %v958_v43 = vsel %vm749_vm2, %v2388_v42, 0.0 }
 0x31d   : > { %959 = vadd.xlane.f32.xlu2 %v958_v43 }
 0x31f   : > { %v2390_v44 = vpop.eup %2389 }
 0x320   : > { %v760_v45 = vmul.f32 %v2390_v44, %v2384_v31  ;;  %v3062_v57 = vpop.eup %2391 }
 0x321   : > { %v1226_v62 = vsel %vm749_vm2, %v3062_v57, 0.0  ;;  %v2394_v63 = vpop.eup %2393 }
 0x322   : > { %2211 = vmatmul.msk.f32.vlgmr.msrb.gmra.mxu2 %vm761_vm3, %v760_v45  ;;  %v1092_v2 = vsel %vm749_vm2, %v2394_v63, 0.0 }
 0x335   : > { %963 = vrot.lane.b32.xlu2 %v3005_v58, %s2800_s16 }
 0x35a   : > { %v853_v49 = vpop.f32.mrf.mxu3 }
 0x362   : > { %v881_v52 = vpop.f32.mrf.mxu3 }
 0x363   : > { %v884_v53 = vmul.f32 0.25, %v881_v52 }
 0x365   : > { %v885_v55 = vsel %vm749_vm2, %v884_v53, -inf }
 0x366   : > { %886 = vmax.xlane.f32.xlu0 %v885_v55  ;;  %v1309_v55 = vld [vmem:[#allocation4 + $0x50] sm:$0xff] }
 0x36a   : > { %v1015_v59 = vpop.f32.mrf.mxu3 }
 0x36b   : > { %v1018_v60 = vmul.f32 0.25, %v1015_v59  ;;  %v1306_v59 = vld [vmem:[#allocation4 + $0x38] sm:$0xff] }
 0x36d   : > { %v1019_v61 = vsel %vm749_vm2, %v1018_v60, -inf }
 0x36e   : > { %1020 = vmax.xlane.f32.xlu1 %v1019_v61  ;;  %1227 = vadd.xlane.f32.xlu0 %v1226_v62  ;;  %v1304_v61 = vld [vmem:[#allocation4 + $0x28] sm:$0xff]  ;;  %v1303_v62 = vld [vmem:[#allocation4 + $0x20] sm:$0xff] }
 0x372   : > { %v1149_v0 = vpop.f32.mrf.mxu3 }
 0x373   : > { %v1152_v1 = vmul.f32 0.25, %v1149_v0  ;;  %v1301_v0 = vld [vmem:[#allocation4 + $0x10] sm:$0xff] }
 0x375   : > { %v1153_v3 = vsel %vm749_vm2, %v1152_v1, -inf }
 0x376   : > { %1093 = vadd.xlane.f32.xlu1 %v1092_v2  ;;  %1154 = vmax.xlane.f32.xlu0 %v1153_v3  ;;  %v1299_v2 = vld [vmem:[#allocation4] sm:$0xff] }
 0x38a   : > { %1097 = vrot.lane.b32.xlu0 %v3005_v58, %s2801_s17 }
 0x38f   : > { %896 = vrot.lane.b32.xlu1 %v3005_v58, %s2798_s5 }
 0x390   : > { %v960_v4 = vpop.xlane.xlu2 %959 }
 0x391   : > { %2395 = vrcp.f32 %v960_v4 }
 0x397   : > { %v2396_v5 = vpop.eup %2395  ;;  %1030 = vrot.lane.b32.xlu1 %v3005_v58, %s2802_s20 }
 0x398   : > { %v962_v6 = vmul.f32 %v2396_v5, %v2388_v42  ;;  %v964_v7 = vpop.permute.xlu2 %963 }
 0x399   : > { %2222 = vmatpush.msk.msra.mxu2 %vm765_vm1, %v964_v7 }
 0x39a   : > { %2223 = vmatmul.msk.f32.vlgmr.msra.gmra.mxu2 %vm761_vm3, %v962_v6 }
 0x39f   : > { %1231 = vrot.lane.b32.xlu1 %v3005_v58, %s2803_s7 }
 0x3a5   : > { %v3092_v33 = vpop.f32.mrf.mxu2 }
 0x3a7   : > { %1259 = vrot.lane.b32.xlu1 %v853_v49, %s2803_s7  ;;  %v1312_v49 = vld [vmem:[#allocation4 + $0x68] sm:$0xff] }
 0x3a8   : > { %1321 = vmatpush.msra.mxu3 %v1312_v49  ;;  %v1451_v49 = vld [vmem:[#allocation10 + $0x240] sm:$0xff] }
 0x3aa   : > { %1322 = vmatpush.msra.mxu3 %v1311_v50  ;;  %v1452_v50 = vld [vmem:[#allocation10 + $0x248] sm:$0xff] }
 0x3ac   : > { %1323 = vmatpush.msra.mxu3 %v1310_v51  ;;  %v1453_v51 = vld [vmem:[#allocation10 + $0x250] sm:$0xff] }
 0x3ae   : > { %1324 = vmatpush.msra.mxu3 %v1309_v55  ;;  %v1445_v55 = vld [vmem:[#allocation10 + $0x210] sm:$0xff] }
 0x3b0   : > { %1325 = vmatpush.msra.mxu3 %v1308_v56  ;;  %v1446_v56 = vld [vmem:[#allocation10 + $0x218] sm:$0xff] }
 0x3d9   : > { %v887_v8 = vpop.xlane.xlu0 %886 }
 0x3da   : > { %v888_v9 = vsub.f32 %v884_v53, %v887_v8 }
 0x3dc   : > { %v889_v10 = vmul.f32 1.442695, %v888_v9 }
 0x3de   : > { %2397 = vpow2.f32 %v889_v10 }
 0x3e1   : > { %v1021_v11 = vpop.xlane.xlu1 %1020  ;;  %v1228_v12 = vpop.xlane.xlu0 %1227 }
 0x3e2   : > { %v1022_v13 = vsub.f32 %v1018_v60, %v1021_v11  ;;  %v1305_v60 = vld [vmem:[#allocation4 + $0x30] sm:$0xff] }
 0x3e4   : > { %v2398_v14 = vpop.eup %2397  ;;  %v1023_v15 = vmul.f32 1.442695, %v1022_v13 }
 0x3e5   : > { %v891_v16 = vsel %vm749_vm2, %v2398_v14, 0.0 }
 0x3e6   : > { %2399 = vpow2.f32 %v1023_v15  ;;  %892 = vadd.xlane.f32.xlu0 %v891_v16 }
 0x3e9   : > { %v1155_v17 = vpop.xlane.xlu0 %1154  ;;  %v1094_v22 = vpop.xlane.xlu1 %1093 }
 0x3ea   : > { %v1156_v18 = vsub.f32 %v1152_v1, %v1155_v17  ;;  %v1300_v1 = vld [vmem:[#allocation4 + $0x8] sm:$0xff]  ;;  %v2375_v17 = vld [vmem:[#allocation6] ss:$0 sm:$0xff] }
 0x3ec   : > { %v2400_v19 = vpop.eup %2399  ;;  %v1157_v20 = vmul.f32 1.442695, %v1156_v18 }
 0x3ed   : > { %v1025_v21 = vsel %vm749_vm2, %v2400_v19, 0.0 }
 0x3ee   : > { %2401 = vpow2.f32 %v1157_v20  ;;  %1026 = vadd.xlane.f32.xlu0 %v1025_v21 }
 0x3ef   : > { %2403 = vrcp.f32 %v1094_v22  ;;  %v2805_v22 = vmov 128.0  }
 0x3f0   : > { %2405 = vrcp.f32 %v1228_v12 }
 0x3f4   : > { %v2402_v23 = vpop.eup %2401 }
 0x3f5   : > { %v1159_v24 = vsel %vm749_vm2, %v2402_v23, 0.0  ;;  %v2404_v25 = vpop.eup %2403 }
 0x3f6   : > { %1160 = vadd.xlane.f32.xlu2 %v1159_v24  ;;  %v1096_v26 = vmul.f32 %v2404_v25, %v2394_v63  ;;  %v2406_v30 = vpop.eup %2405  ;;  %v1302_v63 = vld [vmem:[#allocation4 + $0x18] sm:$0xff]  ;;  %v1500_v24 = vld [vmem:[#allocation10 + $0x3c8] sm:$0xff] }
 0x3f7   : > { %v1230_v31 = vmul.f32 %v2406_v30, %v3062_v57  ;;  %v1307_v57 = vld [vmem:[#allocation4 + $0x40] sm:$0xff]  ;;  %v1501_v25 = vld [vmem:[#allocation10 + $0x3d0] sm:$0xff]  ;;  %1545 = vmatpush.msrb.mxu1 %v1500_v24  ;;  %v1396_v24 = vld [vmem:[#allocation10 + $0x88] sm:$0xff] }
 0x3f8   : > { %1326 = vmatpush.msra.mxu3 %v1307_v57  ;;  %v1494_v30 = vld [vmem:[#allocation10 + $0x398] sm:$0xff] }
 0x3fa   : > { %1327 = vmatpush.msra.mxu3 %v1306_v59  ;;  %v1435_v59 = vld [vmem:[#allocation10 + $0x1c0] sm:$0xff] }
 0x3fc   : > { %v1098_v27 = vpop.permute.xlu0 %1097  ;;  %1328 = vmatpush.msra.mxu3 %v1305_v60  ;;  %v1436_v60 = vld [vmem:[#allocation10 + $0x1c8] sm:$0xff] }
 0x3fd   : > { %2230 = vmatpush.msk.msrb.mxu2 %vm765_vm1, %v1098_v27  ;;  %v1491_v27 = vld [vmem:[#allocation10 + $0x380] sm:$0xff] }
 0x3fe   : > { %2231 = vmatmul.msk.f32.vlgmr.msrb.gmra.mxu2 %vm761_vm3, %v1096_v26  ;;  %1329 = vmatpush.msra.mxu3 %v1304_v61  ;;  %v1502_v26 = vld [vmem:[#allocation10 + $0x3d8] sm:$0xff]  ;;  %v1437_v61 = vld [vmem:[#allocation10 + $0x1d0] sm:$0xff] }
 0x400   : > { %1330 = vmatpush.msra.mxu3 %v1303_v62  ;;  %v1438_v62 = vld [vmem:[#allocation10 + $0x1d8] sm:$0xff] }
 0x401   : > { %v897_v28 = vpop.permute.xlu1 %896 }
 0x402   : > { %2218 = vmatpush.msk.msra.mxu0 %vm765_vm1, %v897_v28  ;;  %1164 = vrot.lane.b32.xlu0 %v3005_v58, %s2804_s22  ;;  %v1492_v28 = vld [vmem:[#allocation10 + $0x388] sm:$0xff] }
 0x403   : > { %1331 = vmatpush.msra.mxu3 %v1302_v63  ;;  %1546 = vmatpush.msrb.mxu1 %v1492_v28  ;;  %v1427_v63 = vld [vmem:[#allocation10 + $0x180] sm:$0xff]  ;;  %v1388_v28 = vld [vmem:[#allocation10 + $0x48] sm:$0xff] }
 0x405   : > { %1332 = vmatpush.msra.mxu3 %v1301_v0  ;;  %v1428_v0 = vld [vmem:[#allocation10 + $0x188] sm:$0xff] }
 0x407   : > { %1333 = vmatpush.msra.mxu3 %v1300_v1  ;;  %v1429_v1 = vld [vmem:[#allocation10 + $0x190] sm:$0xff] }
 0x409   : > { %v1031_v29 = vpop.permute.xlu1 %1030  ;;  %1334 = vmatpush.msra.mxu3 %v1299_v2  ;;  %v1430_v2 = vld [vmem:[#allocation10 + $0x198] sm:$0xff] }
 0x40a   : > { %2226 = vmatpush.msk.msrb.mxu0 %vm765_vm1, %v1031_v29  ;;  %v1493_v29 = vld [vmem:[#allocation10 + $0x390] sm:$0xff] }
 0x40b   : > { %1585 = vmatpush.msrb.mxu3 %v1502_v26  ;;  %v1398_v26 = vld [vmem:[#allocation10 + $0x98] sm:$0xff] }
 0x40d   : > { %1586 = vmatpush.msrb.mxu3 %v1494_v30  ;;  %v1379_v30 = vld [vmem:[#allocation10] sm:$0xff] }
 0x411   : > { %v1232_v32 = vpop.permute.xlu1 %1231 }
 0x412   : > { %2238 = vmatpush.msk.msra.mxu2 %vm765_vm1, %v1232_v32  ;;  %v1484_v32 = vld [vmem:[#allocation10 + $0x348] sm:$0xff] }
 0x413   : > { %2239 = vmatmul.msk.f32.vlgmr.msra.gmra.mxu2 %vm761_vm3, %v1230_v31  ;;  %1547 = vmatpush.msrb.mxu1 %v1484_v32  ;;  %v1382_v32 = vld [vmem:[#allocation10 + $0x18] sm:$0xff] }
 0x414   : > { %1565 = vmatpush.msrb.mxu2 %v1501_v25  ;;  %v1397_v25 = vld [vmem:[#allocation10 + $0x90] sm:$0xff] }
 0x416   : > { %1566 = vmatpush.msrb.mxu2 %v1493_v29  ;;  %v1389_v29 = vld [vmem:[#allocation10 + $0x50] sm:$0xff] }
 0x419   : > { %v1260_v4 = vpop.permute.xlu1 %1259 }
 0x41a   : > { %v1286_v6 = vsel %vm721_vm0, %v3092_v33, %v1260_v4  ;;  %v1485_v33 = vld [vmem:[#allocation10 + $0x350] sm:$0xff]  ;;  %v1419_v4 = vld [vmem:[#allocation10 + $0x140] sm:$0xff] }
 0x41b   : > { %1567 = vmatpush.msrb.mxu2 %v1485_v33  ;;  %v1503_v33 = vld [vmem:[#allocation10 + $0x3e0] sm:$0xff] }
 0x41d   : > { %v987_v34 = vpop.f32.mrf.mxu2 }
 0x41e   : > { %1267 = vrot.lane.b32.xlu1 %v987_v34, %s2801_s17  ;;  %v1486_v34 = vld [vmem:[#allocation10 + $0x358] sm:$0xff] }
 0x41f   : > { %1587 = vmatpush.msrb.mxu3 %v1486_v34  ;;  %v1504_v34 = vld [vmem:[#allocation10 + $0x3e8] sm:$0xff] }
 0x459   : > { %v893_v35 = vpop.xlane.xlu0 %892 }
 0x45a   : > { %2407 = vrcp.f32 %v893_v35  ;;  %v1475_v35 = vld [vmem:[#allocation10 + $0x300] sm:$0xff] }
 0x460   : > { %v2408_v58 = vpop.eup %2407 }
 0x461   : > { %v895_v36 = vmul.f32 %v2408_v58, %v2398_v14  ;;  %v1027_v37 = vpop.xlane.xlu0 %1026  ;;  %v1476_v58 = vld [vmem:[#allocation10 + $0x308] sm:$0xff] }
 0x462   : > { %2409 = vrcp.f32 %v1027_v37  ;;  %v1478_v37 = vld [vmem:[#allocation10 + $0x318] sm:$0xff]  ;;  %1548 = vmatpush.msrb.mxu1 %v1476_v58 }
 0x463   : > { %2219 = vmatmul.msk.f32.vlgmr.msra.gmra.mxu0 %vm761_vm3, %v895_v36  ;;  %v1477_v36 = vld [vmem:[#allocation10 + $0x310] sm:$0xff]  ;;  %1588 = vmatpush.msrb.mxu3 %v1478_v37  ;;  %v1506_v58 = vld [vmem:[#allocation10 + $0x3f8] sm:$0xff]  ;;  %v1496_v37 = vld [vmem:[#allocation10 + $0x3a8] sm:$0xff] }
 0x464   : > { %1568 = vmatpush.msrb.mxu2 %v1477_v36  ;;  %v1495_v36 = vld [vmem:[#allocation10 + $0x3a0] sm:$0xff] }
 0x468   : > { %v2410_v38 = vpop.eup %2409 }
 0x469   : > { %v1029_v39 = vmul.f32 %v2410_v38, %v2400_v19  ;;  %v1161_v40 = vpop.xlane.xlu2 %1160 }
 0x46a   : > { %2411 = vrcp.f32 %v1161_v40  ;;  %v1468_v40 = vld [vmem:[#allocation10 + $0x2c8] sm:$0xff] }
 0x46b   : > { %2227 = vmatmul.msk.f32.vlgmr.msrb.gmra.mxu0 %vm761_vm3, %v1029_v39  ;;  %2413 = vrcp.f32 %v2805_v22  ;;  %v1467_v39 = vld [vmem:[#allocation10 + $0x2c0] sm:$0xff]  ;;  %1549 = vmatpush.msrb.mxu1 %v1468_v40 }
 0x46c   : > { %v1487_v40 = vld [vmem:[#allocation10 + $0x360] sm:$0xff] }
 0x470   : > { %v2412_v41 = vpop.eup %2411 }
 0x471   : > { %v1163_v42 = vmul.f32 %v2412_v41, %v2402_v23  ;;  %v1499_v23 = vld [vmem:[#allocation10 + $0x3c0] sm:$0xff]  ;;  %v3111_v31 = vpop.eup %2413  ;;  %v1469_v41 = vld [vmem:[#allocation10 + $0x2d0] sm:$0xff] }
 0x472   : > { %v1346_v38 = vmul.f32 128.0, %v3111_v31  ;;  %1569 = vmatpush.msrb.mxu2 %v1469_v41  ;;  %vm1350_vm10 = vweird.f32 %v3111_v31  ;;  %v1488_v41 = vld [vmem:[#allocation10 + $0x368] sm:$0xff] }
 0x474   : > { %v1165_v43 = vpop.permute.xlu0 %1164  ;;  %v1347_v48 = vsub.f32 1.0, %v1346_v38  ;;  %v1497_v38 = vld [vmem:[#allocation10 + $0x3b0] sm:$0xff] }
 0x475   : > { %2234 = vmatpush.msk.msra.mxu0 %vm765_vm1, %v1165_v43  ;;  %v1459_v43 = vld [vmem:[#allocation10 + $0x280] sm:$0xff] }
 0x476   : > { %2235 = vmatmul.msk.f32.vlgmr.msra.gmra.mxu0 %vm761_vm3, %v1163_v42  ;;  %v1470_v42 = vld [vmem:[#allocation10 + $0x2d8] sm:$0xff]  ;;  %v1348_v57 = vmul.f32 %v3111_v31, %v1347_v48 }
 0x477   : > { %1525 = vmatpush.msrb.mxu0 %v1499_v23  ;;  %1589 = vmatpush.msrb.mxu3 %v1470_v42  ;;  %v1395_v23 = vld [vmem:[#allocation10 + $0x80] sm:$0xff]  ;;  %v1489_v42 = vld [vmem:[#allocation10 + $0x370] sm:$0xff]  ;;  %v1482_v48 = vld [vmem:[#allocation10 + $0x338] sm:$0xff] }
 0x479   : > { %1526 = vmatpush.msrb.mxu0 %v1491_v27  ;;  %1590 = vmatpush.msrb.mxu3 %v1462_v46  ;;  %v1387_v27 = vld [vmem:[#allocation10 + $0x40] sm:$0xff]  ;;  %v1481_v46 = vld [vmem:[#allocation10 + $0x330] sm:$0xff] }
 0x481   : > { %v1121_v44 = vpop.f32.mrf.mxu2 }
 0x482   : > { %1275 = vrot.lane.b32.xlu1 %v1121_v44, %s2800_s16  ;;  %v1460_v44 = vld [vmem:[#allocation10 + $0x288] sm:$0xff] }
 0x483   : > { %1550 = vmatpush.msrb.mxu1 %v1460_v44  ;;  %v1479_v44 = vld [vmem:[#allocation10 + $0x320] sm:$0xff] }
 0x485   : > { %1551 = vmatpush.msrb.mxu1 %v1452_v50  ;;  %v1472_v50 = vld [vmem:[#allocation10 + $0x2e8] sm:$0xff] }
 0x490   : > { %v1268_v5 = vpop.permute.xlu1 %1267 }
 0x496   : > { %v1255_v45 = vpop.f32.mrf.mxu2 }
 0x497   : > { %1283 = vrot.lane.b32.xlu2 %v1255_v45, %s2799_s24  ;;  %v1461_v45 = vld [vmem:[#allocation10 + $0x290] sm:$0xff] }
 0x498   : > { %1570 = vmatpush.msrb.mxu2 %v1461_v45  ;;  %v1480_v45 = vld [vmem:[#allocation10 + $0x328] sm:$0xff] }
 0x49a   : > { %1571 = vmatpush.msrb.mxu2 %v1453_v51  ;;  %v1473_v51 = vld [vmem:[#allocation10 + $0x2f0] sm:$0xff] }
 0x49c   : > { %1572 = vmatpush.msrb.mxu2 %v1445_v55  ;;  %v1465_v55 = vld [vmem:[#allocation10 + $0x2b0] sm:$0xff] }
 0x49e   : > { %1573 = vmatpush.msrb.mxu2 %v1437_v61  ;;  %v1458_v61 = vld [vmem:[#allocation10 + $0x278] sm:$0xff] }
 0x4a0   : > { %1574 = vmatpush.msrb.mxu2 %v1429_v1  ;;  %v1450_v1 = vld [vmem:[#allocation10 + $0x238] sm:$0xff] }
 0x4e0   : > { %v920_v52 = vpop.f32.mrf.mxu0 }
 0x4e1   : > { %1263 = vrot.lane.b32.xlu0 %v920_v52, %s2804_s22  ;;  %v1454_v52 = vld [vmem:[#allocation10 + $0x258] sm:$0xff] }
 0x4e2   : > { %1591 = vmatpush.msrb.mxu3 %v1454_v52  ;;  %v1474_v52 = vld [vmem:[#allocation10 + $0x2f8] sm:$0xff] }
 0x4e4   : > { %1592 = vmatpush.msrb.mxu3 %v1446_v56  ;;  %v1466_v56 = vld [vmem:[#allocation10 + $0x2b8] sm:$0xff] }
 0x4e6   : > { %1593 = vmatpush.msrb.mxu3 %v1438_v62  ;;  %v1447_v62 = vld [vmem:[#allocation10 + $0x220] sm:$0xff] }
 0x4e8   : > { %v1054_v53 = vpop.f32.mrf.mxu0  ;;  %1594 = vmatpush.msrb.mxu3 %v1430_v2  ;;  %v1439_v2 = vld [vmem:[#allocation10 + $0x1e0] sm:$0xff] }
 0x4e9   : > { %1271 = vrot.lane.b32.xlu0 %v1054_v53, %s2802_s20  ;;  %v1443_v53 = vld [vmem:[#allocation10 + $0x200] sm:$0xff] }
 0x4f1   : > { %v1284_v14 = vpop.permute.xlu2 %1283 }
 0x4f3   : > { %v1188_v54 = vpop.f32.mrf.mxu0 }
 0x4f4   : > { %1279 = vrot.lane.b32.xlu0 %v1188_v54, %s2798_s5  ;;  %v1276_v11 = vpop.permute.xlu1 %1275  ;;  %v1444_v54 = vld [vmem:[#allocation10 + $0x208] sm:$0xff] }
 0x4f5   : > { %1552 = vmatpush.msrb.mxu1 %v1444_v54  ;;  %v1464_v54 = vld [vmem:[#allocation10 + $0x2a8] sm:$0xff] }
 0x4f7   : > { %1553 = vmatpush.msrb.mxu1 %v1436_v60  ;;  %v1457_v60 = vld [vmem:[#allocation10 + $0x270] sm:$0xff] }
 0x4f9   : > { %1554 = vmatpush.msrb.mxu1 %v1428_v0  ;;  %v1449_v0 = vld [vmem:[#allocation10 + $0x230] sm:$0xff] }
 0x553   : > { %v1264_v3 = vpop.permute.xlu0 %1263 }
 0x554   : > { %v1288_v8 = vsel %vm1287_vm4, %v1286_v6, %v1264_v3  ;;  %v1349_v3 = vadd.f32 %v3111_v31, %v1348_v57  ;;  %v1421_v6 = vld [vmem:[#allocation10 + $0x150] sm:$0xff]  ;;  %v1455_v57 = vld [vmem:[#allocation10 + $0x260] sm:$0xff] }
 0x555   : > { %v1290_v9 = vsel %vm1289_vm5, %v1288_v8, %v1268_v5  ;;  %v1420_v5 = vld [vmem:[#allocation10 + $0x148] sm:$0xff]  ;;  %v1411_v8 = vld [vmem:[#allocation10 + $0x100] sm:$0xff]  ;;  %1575 = vmatpush.msrb.mxu2 %v1421_v6 }
 0x556   : > { %1555 = vmatpush.msrb.mxu1 %v1420_v5  ;;  %v1442_v5 = vld [vmem:[#allocation10 + $0x1f8] sm:$0xff]  ;;  %v1431_v6 = vld [vmem:[#allocation10 + $0x1a0] sm:$0xff] }
 0x55b   : > { %v1272_v7 = vpop.permute.xlu0 %1271 }
 0x55c   : > { %v1292_v10 = vsel %vm1291_vm6, %v1290_v9, %v1272_v7  ;;  %v1422_v7 = vld [vmem:[#allocation10 + $0x158] sm:$0xff]  ;;  %v1412_v9 = vld [vmem:[#allocation10 + $0x108] sm:$0xff] }
 0x55d   : > { %v1294_v12 = vsel %vm1293_vm7, %v1292_v10, %v1276_v11  ;;  %v1413_v10 = vld [vmem:[#allocation10 + $0x110] sm:$0xff]  ;;  %v1414_v11 = vld [vmem:[#allocation10 + $0x118] sm:$0xff]  ;;  %1595 = vmatpush.msrb.mxu3 %v1422_v7  ;;  %1556 = vmatpush.msrb.mxu1 %v1412_v9  ;;  %v1432_v7 = vld [vmem:[#allocation10 + $0x1a8] sm:$0xff] }
 0x55e   : > { %1576 = vmatpush.msrb.mxu2 %v1413_v10  ;;  %v1434_v9 = vld [vmem:[#allocation10 + $0x1b8] sm:$0xff]  ;;  %v1423_v10 = vld [vmem:[#allocation10 + $0x160] sm:$0xff] }
 0x55f   : > { %1596 = vmatpush.msrb.mxu3 %v1414_v11  ;;  %v1424_v11 = vld [vmem:[#allocation10 + $0x168] sm:$0xff] }
 0x566   : > { %v1280_v13 = vpop.permute.xlu0 %1279 }
 0x567   : > { %v1296_v15 = vsel %vm1295_vm8, %v1294_v12, %v1280_v13  ;;  %v3118_v12 = vsel %vm1350_vm10, %v3111_v31, %v1349_v3  ;;  %v1403_v13 = vld [vmem:[#allocation10 + $0xc0] sm:$0xff]  ;;  %v1381_v31 = vld [vmem:[#allocation10 + $0x10] sm:$0xff]  ;;  %v1440_v3 = vld [vmem:[#allocation10 + $0x1e8] sm:$0xff] }
 0x568   : > { %v1298_v16 = vsel %vm1297_vm9, %v1296_v15, %v1284_v14  ;;  %v1404_v14 = vld [vmem:[#allocation10 + $0xc8] sm:$0xff]  ;;  %v1405_v15 = vld [vmem:[#allocation10 + $0xd0] sm:$0xff] }
 0x569   : > { %1335 = vmatmul.f32.vlgmr.msra.gmra.mxu3 %v1298_v16  ;;  %v1406_v16 = vld [vmem:[#allocation10 + $0xd8] sm:$0xff]  ;;  %1557 = vmatpush.msrb.mxu1 %v1404_v14 }
 0x56a   : > { %1577 = vmatpush.msrb.mxu2 %v1405_v15  ;;  %1597 = vmatpush.msrb.mxu3 %v1406_v16  ;;  %v1426_v14 = vld [vmem:[#allocation10 + $0x178] sm:$0xff]  ;;  %v1415_v15 = vld [vmem:[#allocation10 + $0x120] sm:$0xff]  ;;  %v1416_v16 = vld [vmem:[#allocation10 + $0x128] sm:$0xff] }
 0x56b   : > { %1558 = vmatpush.msrb.mxu1 %v1396_v24  ;;  %v1410_v24 = vld [vmem:[#allocation10 + $0xf8] sm:$0xff] }
 0x56c   : > { %1578 = vmatpush.msrb.mxu2 %v1397_v25  ;;  %1598 = vmatpush.msrb.mxu3 %v1398_v26  ;;  %v1399_v25 = vld [vmem:[#allocation10 + $0xa0] sm:$0xff]  ;;  %v1400_v26 = vld [vmem:[#allocation10 + $0xa8] sm:$0xff] }
 0x56d   : > { %1559 = vmatpush.msrb.mxu1 %v1388_v28  ;;  %v1401_v28 = vld [vmem:[#allocation10 + $0xb0] sm:$0xff] }
 0x56e   : > { %1579 = vmatpush.msrb.mxu2 %v1389_v29  ;;  %v1402_v29 = vld [vmem:[#allocation10 + $0xb8] sm:$0xff] }
 0x570   : > { %1580 = vmatpush.msrb.mxu2 %v1381_v31  ;;  %v1393_v31 = vld [vmem:[#allocation10 + $0x70] sm:$0xff] }
 0x5ec   : > { %v1336_v18 = vpop.f32.mrf.mxu3 }
 0x5ed   : > { %v1337_v19 = vadd.f32 %v2375_v17, %v1336_v18 }
 0x5ef   : > { %v3107_v20 = vadd.f32 %v1337_v19, %v2990_v47  ;;  %v1483_v47 = vld [vmem:[#allocation10 + $0x340] sm:$0xff] }
 0x5f0   : > { %1527 = vmatpush.msrb.mxu0 %v1483_v47  ;;  %v1380_v47 = vld [vmem:[#allocation10 + $0x8] sm:$0xff] }
 0x5f1   : > { %v1342_v21 = vsel %vm765_vm1, %v3107_v20, 0.0  ;;  %1560 = vmatpush.msrb.mxu1 %v1380_v47  ;;  %v1392_v47 = vld [vmem:[#allocation10 + $0x68] sm:$0xff] }
 0x5f2   : > { %1343 = vadd.xlane.f32.xlu1 %v1342_v21  ;;  %1528 = vmatpush.msrb.mxu0 %v1475_v35  ;;  %v1505_v35 = vld [vmem:[#allocation10 + $0x3f0] sm:$0xff] }
 0x5f3   : > { %1625 = vmatpush.msra.mxu1 %v1504_v34  ;;  %1645 = vmatpush.msra.mxu2 %v1505_v35  ;;  %v1383_v34 = vld [vmem:[#allocation10 + $0x20] sm:$0xff]  ;;  %v1384_v35 = vld [vmem:[#allocation10 + $0x28] sm:$0xff] }
 0x5f4   : > { %1529 = vmatpush.msrb.mxu0 %v1467_v39  ;;  %v1498_v39 = vld [vmem:[#allocation10 + $0x3b8] sm:$0xff] }
 0x5f5   : > { %1626 = vmatpush.msra.mxu1 %v1496_v37  ;;  %1646 = vmatpush.msra.mxu2 %v1497_v38 }
 0x5f6   : > { %1530 = vmatpush.msrb.mxu0 %v1459_v43  ;;  %v1490_v43 = vld [vmem:[#allocation10 + $0x378] sm:$0xff] }
 0x5f7   : > { %1627 = vmatpush.msra.mxu1 %v1488_v41  ;;  %1647 = vmatpush.msra.mxu2 %v1489_v42 }
 0x5f8   : > { %1531 = vmatpush.msrb.mxu0 %v1451_v49  ;;  %v1471_v49 = vld [vmem:[#allocation10 + $0x2e0] sm:$0xff] }
 0x5f9   : > { %1628 = vmatpush.msra.mxu1 %v1480_v45  ;;  %1648 = vmatpush.msra.mxu2 %v1481_v46  ;;  %v2377_v45 = vld [vmem:[#allocation9] ss:$0 sm:$0xff] }
 0x5fa   : > { %1532 = vmatpush.msrb.mxu0 %v1443_v53  ;;  %v1463_v53 = vld [vmem:[#allocation10 + $0x2a0] sm:$0xff] }
 0x5fb   : > { %1629 = vmatpush.msra.mxu1 %v1472_v50  ;;  %1649 = vmatpush.msra.mxu2 %v1473_v51  ;;  %v1708_v50 = vld [vmem:[#allocation13 + $0x78] sm:$0xff] }
 0x5fc   : > { %1533 = vmatpush.msrb.mxu0 %v1435_v59  ;;  %v1456_v59 = vld [vmem:[#allocation10 + $0x268] sm:$0xff]  ;;  %v1724_v51 = vld [vmem:[#allocation13 + $0xf8] sm:$0xff] }
 0x5fd   : > { %1630 = vmatpush.msra.mxu1 %v1464_v54  ;;  %1650 = vmatpush.msra.mxu2 %v1465_v55  ;;  %v1707_v54 = vld [vmem:[#allocation13 + $0x70] sm:$0xff] }
 0x5fe   : > { %1534 = vmatpush.msrb.mxu0 %v1427_v63  ;;  %v1448_v63 = vld [vmem:[#allocation10 + $0x228] sm:$0xff]  ;;  %v1723_v55 = vld [vmem:[#allocation13 + $0xf0] sm:$0xff] }
 0x5ff   : > { %1631 = vmatpush.msra.mxu1 %v1456_v59  ;;  %1651 = vmatpush.msra.mxu2 %v1457_v60  ;;  %v1722_v59 = vld [vmem:[#allocation13 + $0xe8] sm:$0xff] }
 0x600   : > { %1535 = vmatpush.msrb.mxu0 %v1419_v4  ;;  %v1441_v4 = vld [vmem:[#allocation10 + $0x1f0] sm:$0xff] }
 0x601   : > { %1632 = vmatpush.msra.mxu1 %v1448_v63  ;;  %1652 = vmatpush.msra.mxu2 %v1449_v0  ;;  %v1738_v60 = vld [vmem:[#allocation13 + $0x168] sm:$0xff]  ;;  %v1721_v63 = vld [vmem:[#allocation13 + $0xe0] sm:$0xff] }
 0x602   : > { %1536 = vmatpush.msrb.mxu0 %v1411_v8  ;;  %v1433_v8 = vld [vmem:[#allocation10 + $0x1b0] sm:$0xff]  ;;  %v1737_v0 = vld [vmem:[#allocation13 + $0x160] sm:$0xff] }
 0x603   : > { %1633 = vmatpush.msra.mxu1 %v1440_v3  ;;  %1653 = vmatpush.msra.mxu2 %v1441_v4  ;;  %v1720_v3 = vld [vmem:[#allocation13 + $0xd8] sm:$0xff] }
 0x604   : > { %1537 = vmatpush.msrb.mxu0 %v1403_v13  ;;  %v1425_v13 = vld [vmem:[#allocation10 + $0x170] sm:$0xff]  ;;  %v1736_v4 = vld [vmem:[#allocation13 + $0x158] sm:$0xff] }
 0x605   : > { %1634 = vmatpush.msra.mxu1 %v1432_v7  ;;  %1654 = vmatpush.msra.mxu2 %v1433_v8  ;;  %v1719_v7 = vld [vmem:[#allocation13 + $0xd0] sm:$0xff] }
 0x606   : > { %1538 = vmatpush.msrb.mxu0 %v1395_v23  ;;  %v1409_v23 = vld [vmem:[#allocation10 + $0xf0] sm:$0xff]  ;;  %v1735_v8 = vld [vmem:[#allocation13 + $0x150] sm:$0xff] }
 0x607   : > { %1635 = vmatpush.msra.mxu1 %v1424_v11  ;;  %1655 = vmatpush.msra.mxu2 %v1425_v13  ;;  %v1718_v11 = vld [vmem:[#allocation13 + $0xc8] sm:$0xff] }
 0x608   : > { %1539 = vmatpush.msrb.mxu0 %v1387_v27  ;;  %v1734_v13 = vld [vmem:[#allocation13 + $0x148] sm:$0xff] }
 0x609   : > { %1636 = vmatpush.msra.mxu1 %v1416_v16  ;;  %v1717_v16 = vld [vmem:[#allocation13 + $0xc0] sm:$0xff] }
 0x60a   : > { %1540 = vmatpush.msrb.mxu0 %v1379_v30  ;;  %v1391_v30 = vld [vmem:[#allocation10 + $0x60] sm:$0xff] }
 0x60c   : > { %1605 = vmatpush.msra.mxu0 %v1503_v33 }
 0x60e   : > { %1606 = vmatpush.msra.mxu0 %v1495_v36  ;;  %v1386_v36 = vld [vmem:[#allocation10 + $0x38] sm:$0xff] }
 0x610   : > { %1607 = vmatpush.msra.mxu0 %v1487_v40 }
 0x612   : > { %1608 = vmatpush.msra.mxu0 %v1479_v44 }
 0x614   : > { %1609 = vmatpush.msra.mxu0 %v1471_v49 }
 0x616   : > { %1610 = vmatpush.msra.mxu0 %v1463_v53  ;;  %v1756_v53 = vld [vmem:[#allocation13 + $0x1f8] sm:$0xff] }
 0x618   : > { %1611 = vmatpush.msra.mxu0 %v1455_v57  ;;  %v1706_v57 = vld [vmem:[#allocation13 + $0x68] sm:$0xff] }
 0x61a   : > { %1612 = vmatpush.msra.mxu0 %v1447_v62  ;;  %v1705_v62 = vld [vmem:[#allocation13 + $0x60] sm:$0xff] }
 0x61c   : > { %1613 = vmatpush.msra.mxu0 %v1439_v2  ;;  %v1704_v2 = vld [vmem:[#allocation13 + $0x58] sm:$0xff] }
 0x61e   : > { %1614 = vmatpush.msra.mxu0 %v1431_v6  ;;  %v1703_v6 = vld [vmem:[#allocation13 + $0x50] sm:$0xff] }
 0x620   : > { %1615 = vmatpush.msra.mxu0 %v1423_v10  ;;  %v1702_v10 = vld [vmem:[#allocation13 + $0x48] sm:$0xff] }
 0x622   : > { %1616 = vmatpush.msra.mxu0 %v1415_v15  ;;  %v1701_v15 = vld [vmem:[#allocation13 + $0x40] sm:$0xff] }
 0x665   : > { %v1344_v17 = vpop.xlane.xlu1 %1343 }
 0x666   : > { %v1352_v18 = vmul.f32 %v3118_v12, %v1344_v17  ;;  %v1417_v17 = vld [vmem:[#allocation10 + $0x130] sm:$0xff] }
 0x667   : > { %1656 = vmatpush.msra.mxu2 %v1417_v17  ;;  %v1733_v17 = vld [vmem:[#allocation13 + $0x140] sm:$0xff] }
 0x668   : > { %v3122_v19 = vsub.f32 %v3107_v20, %v1352_v18  ;;  %v1390_v20 = vld [vmem:[#allocation10 + $0x58] sm:$0xff] }
 0x669   : > { %1599 = vmatpush.msrb.mxu3 %v1390_v20  ;;  %v1418_v18 = vld [vmem:[#allocation10 + $0x138] sm:$0xff]  ;;  %1657 = vmatpush.msra.mxu2 %v1409_v23  ;;  %v1732_v23 = vld [vmem:[#allocation13 + $0x138] sm:$0xff] }
 0x66a   : > { %v1354_v21 = vmul.f32 %v3122_v19, %v3122_v19 }
 0x66b   : > { %1600 = vmatpush.msrb.mxu3 %v1382_v32  ;;  %v1394_v32 = vld [vmem:[#allocation10 + $0x78] sm:$0xff]  ;;  %1658 = vmatpush.msra.mxu2 %v1401_v28 }
 0x66c   : > { %v1355_v22 = vsel %vm765_vm1, %v1354_v21, 0.0  ;;  %v1407_v21 = vld [vmem:[#allocation10 + $0xe0] sm:$0xff]  ;;  %v1747_v28 = vld [vmem:[#allocation13 + $0x1b0] sm:$0xff] }
 0x66d   : > { %1356 = vadd.xlane.f32.xlu0 %v1355_v22  ;;  %1665 = vmatpush.msra.mxu3 %v1506_v58  ;;  %v1408_v22 = vld [vmem:[#allocation10 + $0xe8] sm:$0xff]  ;;  %v1385_v58 = vld [vmem:[#allocation10 + $0x30] sm:$0xff] }
 0x66e   : > { %1617 = vmatpush.msra.mxu0 %v1407_v21  ;;  %1637 = vmatpush.msra.mxu1 %v1408_v22  ;;  %v1700_v21 = vld [vmem:[#allocation13 + $0x38] sm:$0xff] }
 0x66f   : > { %1666 = vmatpush.msra.mxu3 %v1498_v39  ;;  %1659 = vmatpush.msra.mxu2 %v1393_v31  ;;  %v1716_v22 = vld [vmem:[#allocation13 + $0xb8] sm:$0xff]  ;;  %v1697_v31 = vld [vmem:[#allocation13 + $0x20] sm:$0xff] }
 0x670   : > { %1618 = vmatpush.msra.mxu0 %v1399_v25  ;;  %1638 = vmatpush.msra.mxu1 %v1400_v26  ;;  %v1699_v25 = vld [vmem:[#allocation13 + $0x30] sm:$0xff] }
 0x671   : > { %1667 = vmatpush.msra.mxu3 %v1490_v43  ;;  %1660 = vmatpush.msra.mxu2 %v1385_v58  ;;  %v2376_v43 = vld [vmem:[#allocation7] ss:$0 sm:$0xff]  ;;  %v1712_v58 = vld [vmem:[#allocation13 + $0x98] sm:$0xff] }
 0x672   : > { %1619 = vmatpush.msra.mxu0 %v1391_v30  ;;  %1639 = vmatpush.msra.mxu1 %v1392_v47  ;;  %v1715_v26 = vld [vmem:[#allocation13 + $0xb0] sm:$0xff]  ;;  %v1730_v30 = vld [vmem:[#allocation13 + $0x128] sm:$0xff] }
 0x673   : > { %1668 = vmatpush.msra.mxu3 %v1482_v48  ;;  %v1746_v47 = vld [vmem:[#allocation13 + $0x1a8] sm:$0xff] }
 0x674   : > { %1620 = vmatpush.msra.mxu0 %v1383_v34  ;;  %1640 = vmatpush.msra.mxu1 %v1384_v35  ;;  %v1745_v34 = vld [vmem:[#allocation13 + $0x1a0] sm:$0xff]  ;;  %v1696_v35 = vld [vmem:[#allocation13 + $0x18] sm:$0xff] }
 0x675   : > { %1669 = vmatpush.msra.mxu3 %v1474_v52  ;;  %v1740_v52 = vld [vmem:[#allocation13 + $0x178] sm:$0xff] }
 0x677   : > { %1670 = vmatpush.msra.mxu3 %v1466_v56  ;;  %v1755_v56 = vld [vmem:[#allocation13 + $0x1f0] sm:$0xff] }
 0x679   : > { %1671 = vmatpush.msra.mxu3 %v1458_v61  ;;  %v1754_v61 = vld [vmem:[#allocation13 + $0x1e8] sm:$0xff] }
 0x67b   : > { %1672 = vmatpush.msra.mxu3 %v1450_v1  ;;  %v1753_v1 = vld [vmem:[#allocation13 + $0x1e0] sm:$0xff] }
 0x67d   : > { %1673 = vmatpush.msra.mxu3 %v1442_v5  ;;  %v1752_v5 = vld [vmem:[#allocation13 + $0x1d8] sm:$0xff] }
 0x67f   : > { %1674 = vmatpush.msra.mxu3 %v1434_v9  ;;  %v1751_v9 = vld [vmem:[#allocation13 + $0x1d0] sm:$0xff] }
 0x681   : > { %1675 = vmatpush.msra.mxu3 %v1426_v14  ;;  %v1750_v14 = vld [vmem:[#allocation13 + $0x1c8] sm:$0xff] }
 0x683   : > { %1676 = vmatpush.msra.mxu3 %v1418_v18  ;;  %v1749_v18 = vld [vmem:[#allocation13 + $0x1c0] sm:$0xff] }
 0x685   : > { %1677 = vmatpush.msra.mxu3 %v1410_v24  ;;  %v1748_v24 = vld [vmem:[#allocation13 + $0x1b8] sm:$0xff] }
 0x687   : > { %1678 = vmatpush.msra.mxu3 %v1402_v29  ;;  %v1698_v29 = vld [vmem:[#allocation13 + $0x28] sm:$0xff] }
 0x689   : > { %1679 = vmatpush.msra.mxu3 %v1394_v32  ;;  %v1713_v32 = vld [vmem:[#allocation13 + $0xa0] sm:$0xff] }
 0x68b   : > { %1680 = vmatpush.msra.mxu3 %v1386_v36  ;;  %v1728_v36 = vld [vmem:[#allocation13 + $0x118] sm:$0xff] }
 0x6e0   : > { %v1357_v27 = vpop.xlane.xlu0 %1356 }
 0x6e1   : > { %v1358_v20 = vmul.f32 %v1357_v27, %v3118_v12  ;;  %v1731_v27 = vld [vmem:[#allocation13 + $0x130] sm:$0xff] }
 0x6e3   : > { %v1359_v33 = vadd.f32 1e-05, %v1358_v20  ;;  %v1714_v20 = vld [vmem:[#allocation13 + $0xa8] sm:$0xff] }
 0x6e5   : > { %2415 = vrsqrt.f32 %v1359_v33  ;;  %vm1366_vm12 = vweird.f32 %v1359_v33 }
 0x6eb   : > { %v2416_v37 = vpop.eup %2415 }
 0x6ec   : > { %v1361_v38 = vmul.f32 %v2416_v37, %v1359_v33  ;;  %vm1367_vm11 = vweird.f32 %v2416_v37  ;;  %v1729_v33 = vld [vmem:[#allocation13 + $0x120] sm:$0xff] }
 0x6ed   : > { %vm1368_vm13 = vmor %vm1366_vm12, %vm1367_vm11 }
 0x6ee   : > { %v1362_v39 = vmul.f32 %v2416_v37, %v1361_v38  ;;  %v1695_v38 = vld [vmem:[#allocation13 + $0x10] sm:$0xff] }
 0x6f0   : > { %v1363_v40 = vmul.f32 0.5, %v1362_v39  ;;  %v1711_v39 = vld [vmem:[#allocation13 + $0x90] sm:$0xff] }
 0x6f2   : > { %v1364_v41 = vsub.f32 1.5, %v1363_v40  ;;  %v1727_v40 = vld [vmem:[#allocation13 + $0x110] sm:$0xff] }
 0x6f4   : > { %v1365_v42 = vmul.f32 %v2416_v37, %v1364_v41  ;;  %v1743_v41 = vld [vmem:[#allocation13 + $0x190] sm:$0xff] }
 0x6f6   : > { %v1369_v44 = vsel %vm1368_vm13, %v2416_v37, %v1365_v42  ;;  %v1744_v37 = vld [vmem:[#allocation13 + $0x198] sm:$0xff]  ;;  %v1694_v42 = vld [vmem:[#allocation13 + $0x8] sm:$0xff] }
 0x6f7   : > { %v1370_v46 = vmul.f32 %v1369_v44, %v3122_v19  ;;  %v1739_v19 = vld [vmem:[#allocation13 + $0x170] sm:$0xff]  ;;  %v1726_v44 = vld [vmem:[#allocation13 + $0x108] sm:$0xff] }
 0x6f9   : > { %v1374_v48 = vmul.f32 %v2376_v43, %v1370_v46  ;;  %v1710_v43 = vld [vmem:[#allocation13 + $0x88] sm:$0xff]  ;;  %v1693_v46 = vld [vmem:[#allocation13] sm:$0xff] }
 0x6fb   : > { %v3129_v49 = vadd.f32 %v2377_v45, %v1374_v48  ;;  %v1742_v45 = vld [vmem:[#allocation13 + $0x188] sm:$0xff]  ;;  %v1709_v48 = vld [vmem:[#allocation13 + $0x80] sm:$0xff] }
 0x6fd   : > { %1541 = vmatmul.f32.vlgmr.msrb.gmra.mxu0 %v3129_v49  ;;  %1561 = vmatmul.f32.vlgmr.msrb.gmra.mxu1 %v3129_v49 }
 0x6fe   : > { %1581 = vmatmul.f32.vlgmr.msrb.gmra.mxu2 %v3129_v49  ;;  %1601 = vmatmul.f32.vlgmr.msrb.gmra.mxu3 %v3129_v49 }
 0x6ff   : > { %1825 = vmatpush.msrb.mxu0 %v1708_v50  ;;  %1845 = vmatpush.msrb.mxu1 %v1724_v51  ;;  %v1772_v50 = vld [vmem:[#allocation13 + $0x278] sm:$0xff] }
 0x700   : > { %1865 = vmatpush.msrb.mxu2 %v1740_v52  ;;  %1885 = vmatpush.msrb.mxu3 %v1756_v53  ;;  %v1788_v51 = vld [vmem:[#allocation13 + $0x2f8] sm:$0xff]  ;;  %v1725_v52 = vld [vmem:[#allocation13 + $0x100] sm:$0xff] }
 0x701   : > { %1826 = vmatpush.msrb.mxu0 %v1707_v54  ;;  %1846 = vmatpush.msrb.mxu1 %v1723_v55  ;;  %v1741_v53 = vld [vmem:[#allocation13 + $0x180] sm:$0xff]  ;;  %v1771_v54 = vld [vmem:[#allocation13 + $0x270] sm:$0xff] }
 0x702   : > { %1866 = vmatpush.msrb.mxu2 %v1739_v19  ;;  %1886 = vmatpush.msrb.mxu3 %v1755_v56  ;;  %v1787_v55 = vld [vmem:[#allocation13 + $0x2f0] sm:$0xff]  ;;  %v1804_v19 = vld [vmem:[#allocation13 + $0x378] sm:$0xff] }
 0x703   : > { %1827 = vmatpush.msrb.mxu0 %v1706_v57  ;;  %1847 = vmatpush.msrb.mxu1 %v1722_v59  ;;  %v1820_v56 = vld [vmem:[#allocation13 + $0x3f8] sm:$0xff]  ;;  %v1770_v57 = vld [vmem:[#allocation13 + $0x268] sm:$0xff] }
 0x704   : > { %1867 = vmatpush.msrb.mxu2 %v1738_v60  ;;  %1887 = vmatpush.msrb.mxu3 %v1754_v61  ;;  %v1786_v59 = vld [vmem:[#allocation13 + $0x2e8] sm:$0xff]  ;;  %v1803_v60 = vld [vmem:[#allocation13 + $0x370] sm:$0xff] }
 0x705   : > { %1621 = vmatmul.f32.vlgmr.msra.gmra.mxu0 %v3129_v49  ;;  %1641 = vmatmul.f32.vlgmr.msra.gmra.mxu1 %v3129_v49  ;;  %v1819_v61 = vld [vmem:[#allocation13 + $0x3f0] sm:$0xff] }
 0x706   : > { %1661 = vmatmul.f32.vlgmr.msra.gmra.mxu2 %v3129_v49  ;;  %1681 = vmatmul.f32.vlgmr.msra.gmra.mxu3 %v3129_v49 }
 0x707   : > { %1828 = vmatpush.msrb.mxu0 %v1705_v62  ;;  %1848 = vmatpush.msrb.mxu1 %v1721_v63  ;;  %v1769_v62 = vld [vmem:[#allocation13 + $0x260] sm:$0xff] }
 0x708   : > { %1868 = vmatpush.msrb.mxu2 %v1737_v0  ;;  %1888 = vmatpush.msrb.mxu3 %v1753_v1  ;;  %v1785_v63 = vld [vmem:[#allocation13 + $0x2e0] sm:$0xff]  ;;  %v1802_v0 = vld [vmem:[#allocation13 + $0x368] sm:$0xff] }
 0x709   : > { %1829 = vmatpush.msrb.mxu0 %v1704_v2  ;;  %1849 = vmatpush.msrb.mxu1 %v1720_v3  ;;  %v1818_v1 = vld [vmem:[#allocation13 + $0x3e8] sm:$0xff]  ;;  %v1768_v2 = vld [vmem:[#allocation13 + $0x258] sm:$0xff] }
 0x70a   : > { %1869 = vmatpush.msrb.mxu2 %v1736_v4  ;;  %1889 = vmatpush.msrb.mxu3 %v1752_v5  ;;  %v1784_v3 = vld [vmem:[#allocation13 + $0x2d8] sm:$0xff]  ;;  %v1801_v4 = vld [vmem:[#allocation13 + $0x360] sm:$0xff] }
 0x70b   : > { %1830 = vmatpush.msrb.mxu0 %v1703_v6  ;;  %1850 = vmatpush.msrb.mxu1 %v1719_v7  ;;  %v1817_v5 = vld [vmem:[#allocation13 + $0x3e0] sm:$0xff]  ;;  %v1767_v6 = vld [vmem:[#allocation13 + $0x250] sm:$0xff] }
 0x70c   : > { %1870 = vmatpush.msrb.mxu2 %v1735_v8  ;;  %1890 = vmatpush.msrb.mxu3 %v1751_v9  ;;  %v1783_v7 = vld [vmem:[#allocation13 + $0x2d0] sm:$0xff]  ;;  %v1800_v8 = vld [vmem:[#allocation13 + $0x358] sm:$0xff] }
 0x70d   : > { %1831 = vmatpush.msrb.mxu0 %v1702_v10  ;;  %1851 = vmatpush.msrb.mxu1 %v1718_v11  ;;  %v1816_v9 = vld [vmem:[#allocation13 + $0x3d8] sm:$0xff]  ;;  %v1766_v10 = vld [vmem:[#allocation13 + $0x248] sm:$0xff] }
 0x70e   : > { %1871 = vmatpush.msrb.mxu2 %v1734_v13  ;;  %1891 = vmatpush.msrb.mxu3 %v1750_v14  ;;  %v1782_v11 = vld [vmem:[#allocation13 + $0x2c8] sm:$0xff]  ;;  %v1799_v13 = vld [vmem:[#allocation13 + $0x350] sm:$0xff] }
 0x70f   : > { %1832 = vmatpush.msrb.mxu0 %v1701_v15  ;;  %1852 = vmatpush.msrb.mxu1 %v1717_v16  ;;  %v1815_v14 = vld [vmem:[#allocation13 + $0x3d0] sm:$0xff]  ;;  %v1765_v15 = vld [vmem:[#allocation13 + $0x240] sm:$0xff] }
 0x710   : > { %1872 = vmatpush.msrb.mxu2 %v1733_v17  ;;  %1892 = vmatpush.msrb.mxu3 %v1749_v18  ;;  %v1781_v16 = vld [vmem:[#allocation13 + $0x2c0] sm:$0xff]  ;;  %v1764_v17 = vld [vmem:[#allocation13 + $0x238] sm:$0xff] }
 0x711   : > { %1833 = vmatpush.msrb.mxu0 %v1700_v21  ;;  %1853 = vmatpush.msrb.mxu1 %v1716_v22  ;;  %v1780_v18 = vld [vmem:[#allocation13 + $0x2b8] sm:$0xff]  ;;  %v1763_v21 = vld [vmem:[#allocation13 + $0x230] sm:$0xff] }
 0x712   : > { %1873 = vmatpush.msrb.mxu2 %v1732_v23  ;;  %1893 = vmatpush.msrb.mxu3 %v1748_v24  ;;  %v1779_v22 = vld [vmem:[#allocation13 + $0x2b0] sm:$0xff]  ;;  %v1798_v23 = vld [vmem:[#allocation13 + $0x348] sm:$0xff] }
 0x713   : > { %1834 = vmatpush.msrb.mxu0 %v1699_v25  ;;  %1854 = vmatpush.msrb.mxu1 %v1715_v26  ;;  %v1814_v24 = vld [vmem:[#allocation13 + $0x3c8] sm:$0xff] }
 0x714   : > { %1874 = vmatpush.msrb.mxu2 %v1731_v27  ;;  %1894 = vmatpush.msrb.mxu3 %v1747_v28  ;;  %v1762_v25 = vld [vmem:[#allocation13 + $0x228] sm:$0xff]  ;;  %v1797_v27 = vld [vmem:[#allocation13 + $0x340] sm:$0xff] }
 0x715   : > { %1835 = vmatpush.msrb.mxu0 %v1698_v29  ;;  %1855 = vmatpush.msrb.mxu1 %v1714_v20  ;;  %v1778_v26 = vld [vmem:[#allocation13 + $0x2a8] sm:$0xff]  ;;  %v1813_v28 = vld [vmem:[#allocation13 + $0x3c0] sm:$0xff] }
 0x716   : > { %1875 = vmatpush.msrb.mxu2 %v1730_v30  ;;  %1895 = vmatpush.msrb.mxu3 %v1746_v47  ;;  %v1761_v29 = vld [vmem:[#allocation13 + $0x220] sm:$0xff]  ;;  %v1796_v30 = vld [vmem:[#allocation13 + $0x338] sm:$0xff] }
 0x717   : > { %1836 = vmatpush.msrb.mxu0 %v1697_v31  ;;  %1856 = vmatpush.msrb.mxu1 %v1713_v32  ;;  %v1777_v20 = vld [vmem:[#allocation13 + $0x2a0] sm:$0xff]  ;;  %v1812_v47 = vld [vmem:[#allocation13 + $0x3b8] sm:$0xff] }
 0x718   : > { %1876 = vmatpush.msrb.mxu2 %v1729_v33  ;;  %1896 = vmatpush.msrb.mxu3 %v1745_v34  ;;  %v1760_v31 = vld [vmem:[#allocation13 + $0x218] sm:$0xff]  ;;  %v1795_v33 = vld [vmem:[#allocation13 + $0x330] sm:$0xff] }
 0x719   : > { %1837 = vmatpush.msrb.mxu0 %v1696_v35  ;;  %1857 = vmatpush.msrb.mxu1 %v1712_v58  ;;  %v1776_v32 = vld [vmem:[#allocation13 + $0x298] sm:$0xff]  ;;  %v1811_v34 = vld [vmem:[#allocation13 + $0x3b0] sm:$0xff] }
 0x71a   : > { %1877 = vmatpush.msrb.mxu2 %v1728_v36  ;;  %1897 = vmatpush.msrb.mxu3 %v1744_v37  ;;  %v1759_v35 = vld [vmem:[#allocation13 + $0x210] sm:$0xff]  ;;  %v1794_v36 = vld [vmem:[#allocation13 + $0x328] sm:$0xff] }
 0x71b   : > { %1838 = vmatpush.msrb.mxu0 %v1695_v38  ;;  %1858 = vmatpush.msrb.mxu1 %v1711_v39  ;;  %v1775_v58 = vld [vmem:[#allocation13 + $0x290] sm:$0xff]  ;;  %v1810_v37 = vld [vmem:[#allocation13 + $0x3a8] sm:$0xff] }
 0x71c   : > { %1878 = vmatpush.msrb.mxu2 %v1727_v40  ;;  %1898 = vmatpush.msrb.mxu3 %v1743_v41  ;;  %v1758_v38 = vld [vmem:[#allocation13 + $0x208] sm:$0xff]  ;;  %v1793_v40 = vld [vmem:[#allocation13 + $0x320] sm:$0xff] }
 0x71d   : > { %1839 = vmatpush.msrb.mxu0 %v1694_v42  ;;  %1859 = vmatpush.msrb.mxu1 %v1710_v43  ;;  %v1774_v39 = vld [vmem:[#allocation13 + $0x288] sm:$0xff]  ;;  %v1809_v41 = vld [vmem:[#allocation13 + $0x3a0] sm:$0xff] }
 0x71e   : > { %1879 = vmatpush.msrb.mxu2 %v1726_v44  ;;  %1899 = vmatpush.msrb.mxu3 %v1742_v45  ;;  %v1757_v42 = vld [vmem:[#allocation13 + $0x200] sm:$0xff]  ;;  %v1792_v44 = vld [vmem:[#allocation13 + $0x318] sm:$0xff] }
 0x71f   : > { %1840 = vmatpush.msrb.mxu0 %v1693_v46  ;;  %1860 = vmatpush.msrb.mxu1 %v1709_v48  ;;  %v1773_v43 = vld [vmem:[#allocation13 + $0x280] sm:$0xff]  ;;  %v1808_v45 = vld [vmem:[#allocation13 + $0x398] sm:$0xff]  ;;  %v1791_v46 = vld [vmem:[#allocation13 + $0x310] sm:$0xff] }
 0x720   : > { %1880 = vmatpush.msrb.mxu2 %v1725_v52  ;;  %1900 = vmatpush.msrb.mxu3 %v1741_v53  ;;  %v1807_v48 = vld [vmem:[#allocation13 + $0x390] sm:$0xff]  ;;  %v1789_v52 = vld [vmem:[#allocation13 + $0x300] sm:$0xff] }
 0x721   : > { %1905 = vmatpush.msra.mxu0 %v1772_v50  ;;  %1925 = vmatpush.msra.mxu1 %v1788_v51  ;;  %v1790_v50 = vld [vmem:[#allocation13 + $0x308] sm:$0xff]  ;;  %v1805_v53 = vld [vmem:[#allocation13 + $0x380] sm:$0xff] }
 0x722   : > { %1945 = vmatpush.msra.mxu2 %v1804_v19  ;;  %1965 = vmatpush.msra.mxu3 %v1820_v56  ;;  %v1806_v51 = vld [vmem:[#allocation13 + $0x388] sm:$0xff] }
 0x723   : > { %1906 = vmatpush.msra.mxu0 %v1771_v54  ;;  %1926 = vmatpush.msra.mxu1 %v1787_v55  ;;  %v1507_v54 = vld [vmem:[#allocation12] sm:$0xff] }
 0x724   : > { %1946 = vmatpush.msra.mxu2 %v1803_v60  ;;  %1966 = vmatpush.msra.mxu3 %v1819_v61  ;;  %v1509_v55 = vperm.slane %v1507_v54, 0  ;;  %v1510_v19 = vperm.slane %v1507_v54, 1 }
 0x725   : > { %1907 = vmatpush.msra.mxu0 %v1770_v57  ;;  %1927 = vmatpush.msra.mxu1 %v1786_v59 }
 0x726   : > { %1947 = vmatpush.msra.mxu2 %v1802_v0  ;;  %1967 = vmatpush.msra.mxu3 %v1818_v1  ;;  %v1512_v0 = vperm.slane %v1507_v54, 3  ;;  %v1513_v1 = vperm.slane %v1507_v54, 4 }
 0x727   : > { %1908 = vmatpush.msra.mxu0 %v1769_v62  ;;  %1928 = vmatpush.msra.mxu1 %v1785_v63  ;;  %v1511_v63 = vperm.slane %v1507_v54, 2 }
 0x728   : > { %1948 = vmatpush.msra.mxu2 %v1801_v4  ;;  %1968 = vmatpush.msra.mxu3 %v1817_v5 }
 0x729   : > { %1909 = vmatpush.msra.mxu0 %v1768_v2  ;;  %1929 = vmatpush.msra.mxu1 %v1784_v3  ;;  %v1514_v2 = vperm.slane %v1507_v54, 5 }
 0x72a   : > { %1949 = vmatpush.msra.mxu2 %v1800_v8  ;;  %1969 = vmatpush.msra.mxu3 %v1816_v9 }
 0x72b   : > { %1910 = vmatpush.msra.mxu0 %v1767_v6  ;;  %1930 = vmatpush.msra.mxu1 %v1783_v7 }
 0x72c   : > { %1950 = vmatpush.msra.mxu2 %v1799_v13  ;;  %1970 = vmatpush.msra.mxu3 %v1815_v14 }
 0x72d   : > { %1911 = vmatpush.msra.mxu0 %v1766_v10  ;;  %1931 = vmatpush.msra.mxu1 %v1782_v11 }
 0x72e   : > { %1951 = vmatpush.msra.mxu2 %v1798_v23  ;;  %1971 = vmatpush.msra.mxu3 %v1814_v24 }
 0x72f   : > { %1912 = vmatpush.msra.mxu0 %v1765_v15  ;;  %1932 = vmatpush.msra.mxu1 %v1781_v16  ;;  %v1515_v16 = vperm.slane %v1507_v54, 6 }
 0x730   : > { %1952 = vmatpush.msra.mxu2 %v1797_v27  ;;  %1972 = vmatpush.msra.mxu3 %v1813_v28 }
 0x731   : > { %1913 = vmatpush.msra.mxu0 %v1764_v17  ;;  %1933 = vmatpush.msra.mxu1 %v1780_v18  ;;  %v1516_v17 = vperm.slane %v1507_v54, 7 }
 0x732   : > { %1953 = vmatpush.msra.mxu2 %v1796_v30  ;;  %1973 = vmatpush.msra.mxu3 %v1812_v47 }
 0x733   : > { %1914 = vmatpush.msra.mxu0 %v1763_v21  ;;  %1934 = vmatpush.msra.mxu1 %v1779_v22 }
 0x734   : > { %1954 = vmatpush.msra.mxu2 %v1795_v33  ;;  %1974 = vmatpush.msra.mxu3 %v1811_v34 }
 0x735   : > { %1915 = vmatpush.msra.mxu0 %v1762_v25  ;;  %1935 = vmatpush.msra.mxu1 %v1778_v26  ;;  %v2378_v26 = vld [vmem:[#allocation15] ss:$0 sm:$0xff] }
 0x736   : > { %1955 = vmatpush.msra.mxu2 %v1794_v36  ;;  %1975 = vmatpush.msra.mxu3 %v1810_v37 }
 0x737   : > { %1916 = vmatpush.msra.mxu0 %v1761_v29  ;;  %1936 = vmatpush.msra.mxu1 %v1777_v20 }
 0x738   : > { %1956 = vmatpush.msra.mxu2 %v1793_v40  ;;  %1976 = vmatpush.msra.mxu3 %v1809_v41 }
 0x739   : > { %1917 = vmatpush.msra.mxu0 %v1760_v31  ;;  %1937 = vmatpush.msra.mxu1 %v1776_v32 }
 0x73a   : > { %1957 = vmatpush.msra.mxu2 %v1792_v44  ;;  %1977 = vmatpush.msra.mxu3 %v1808_v45 }
 0x73b   : > { %1918 = vmatpush.msra.mxu0 %v1759_v35  ;;  %1938 = vmatpush.msra.mxu1 %v1775_v58 }
 0x73c   : > { %1958 = vmatpush.msra.mxu2 %v1791_v46  ;;  %1978 = vmatpush.msra.mxu3 %v1807_v48 }
 0x73d   : > { %1919 = vmatpush.msra.mxu0 %v1758_v38  ;;  %1939 = vmatpush.msra.mxu1 %v1774_v39 }
 0x73e   : > { %1959 = vmatpush.msra.mxu2 %v1790_v50  ;;  %1979 = vmatpush.msra.mxu3 %v1806_v51 }
 0x73f   : > { %1920 = vmatpush.msra.mxu0 %v1757_v42  ;;  %1940 = vmatpush.msra.mxu1 %v1773_v43 }
 0x740   : > { %1960 = vmatpush.msra.mxu2 %v1789_v52  ;;  %1980 = vmatpush.msra.mxu3 %v1805_v53 }
 0x77a   : > { %v1542_v56 = vpop.f32.mrf.mxu0  ;;  %v1562_v57 = vpop.f32.mrf.mxu1 }
 0x77b   : > { %v1543_v59 = vadd.f32 %v1542_v56, %v1509_v55  ;;  %v1563_v60 = vadd.f32 %v1562_v57, %v1510_v19  ;;  %v2379_v56 = vld [vmem:[#allocation16] ss:$0 sm:$0xff] }
 0x77d   : > { %v1685_v61 = vmax.f32 %v1543_v59, 0.0  ;;  %v1686_v62 = vmax.f32 %v1563_v60, 0.0  ;;  %v2380_v59 = vld [vmem:[#allocation18] ss:$0 sm:$0xff] }
 0x77f   : > { %1841 = vmatmul.f32.vlgmr.msrb.gmra.mxu0 %v1685_v61  ;;  %1861 = vmatmul.f32.vlgmr.msrb.gmra.mxu1 %v1686_v62 }
 0x781   : > { %v1582_v3 = vpop.f32.mrf.mxu2  ;;  %v1602_v4 = vpop.f32.mrf.mxu3 }
 0x782   : > { %v1583_v5 = vadd.f32 %v1582_v3, %v1511_v63  ;;  %v1603_v6 = vadd.f32 %v1602_v4, %v1512_v0  ;;  %v1622_v7 = vpop.f32.mrf.mxu0  ;;  %v1642_v8 = vpop.f32.mrf.mxu1 }
 0x783   : > { %v1623_v9 = vadd.f32 %v1622_v7, %v1513_v1  ;;  %v1643_v10 = vadd.f32 %v1642_v8, %v1514_v2 }
 0x784   : > { %v1687_v11 = vmax.f32 %v1583_v5, 0.0  ;;  %v1688_v13 = vmax.f32 %v1603_v6, 0.0 }
 0x785   : > { %v1689_v14 = vmax.f32 %v1623_v9, 0.0  ;;  %v1690_v15 = vmax.f32 %v1643_v10, 0.0 }
 0x786   : > { %1881 = vmatmul.f32.vlgmr.msrb.gmra.mxu2 %v1687_v11  ;;  %1901 = vmatmul.f32.vlgmr.msrb.gmra.mxu3 %v1688_v13 }
 0x787   : > { %1921 = vmatmul.f32.vlgmr.msra.gmra.mxu0 %v1689_v14  ;;  %1941 = vmatmul.f32.vlgmr.msra.gmra.mxu1 %v1690_v15 }
 0x789   : > { %v1662_v18 = vpop.f32.mrf.mxu2  ;;  %v1682_v21 = vpop.f32.mrf.mxu3 }
 0x78a   : > { %v1663_v22 = vadd.f32 %v1662_v18, %v1515_v16  ;;  %v1683_v23 = vadd.f32 %v1682_v21, %v1516_v17 }
 0x78c   : > { %v1691_v24 = vmax.f32 %v1663_v22, 0.0  ;;  %v1692_v25 = vmax.f32 %v1683_v23, 0.0 }
 0x78e   : > { %1961 = vmatmul.f32.vlgmr.msra.gmra.mxu2 %v1691_v24  ;;  %1981 = vmatmul.f32.vlgmr.msra.gmra.mxu3 %v1692_v25 }
 0x7fc   : > { %v1842_v27 = vpop.f32.mrf.mxu0  ;;  %v1862_v29 = vpop.f32.mrf.mxu1 }
 0x7fd   : > { %v1843_v28 = vadd.f32 %v2378_v26, %v1842_v27 }
 0x7ff   : > { %v1863_v20 = vadd.f32 %v1862_v29, %v1843_v28 }
 0x804   : > { %v1922_v33 = vpop.f32.mrf.mxu0  ;;  %v1942_v35 = vpop.f32.mrf.mxu1 }
 0x809   : > { %v1882_v30 = vpop.f32.mrf.mxu2  ;;  %v1902_v47 = vpop.f32.mrf.mxu3 }
 0x80a   : > { %v1883_v31 = vadd.f32 %v1882_v30, %v1863_v20 }
 0x80c   : > { %v1903_v32 = vadd.f32 %v1902_v47, %v1883_v31 }
 0x80e   : > { %v1923_v34 = vadd.f32 %v1922_v33, %v1903_v32 }
 0x810   : > { %v1943_v58 = vadd.f32 %v1942_v35, %v1923_v34 }
 0x811   : > { %v1962_v36 = vpop.f32.mrf.mxu2  ;;  %v1982_v38 = vpop.f32.mrf.mxu3 }
 0x812   : > { %v1963_v37 = vadd.f32 %v1962_v36, %v1943_v58 }
 0x814   : > { %v1983_v39 = vadd.f32 %v1982_v38, %v1963_v37 }
 0x816   : > { %v1985_v40 = vadd.f32 %v1983_v39, %v3129_v49 }
 0x818   : > { %v1988_v41 = vsel %vm765_vm1, %v1985_v40, 0.0 }
 0x819   : > { %1989 = vadd.xlane.f32.xlu2 %v1988_v41 }
 0x88c   : > { %v1990_v42 = vpop.xlane.xlu2 %1989 }
 0x88d   : > { %v1991_v43 = vmul.f32 %v1990_v42, %v3118_v12 }
 0x88f   : > { %v1992_v44 = vsub.f32 %v1985_v40, %v1991_v43 }
 0x891   : > { %v1993_v45 = vmul.f32 %v1992_v44, %v1992_v44 }
 0x893   : > { %v1994_v46 = vsel %vm765_vm1, %v1993_v45, 0.0 }
 0x894   : > { %1995 = vadd.xlane.f32.xlu1 %v1994_v46 }
 0x907   : > { %v1996_v48 = vpop.xlane.xlu1 %1995 }
 0x908   : > { %v1997_v50 = vmul.f32 %v1996_v48, %v3118_v12 }
 0x90a   : > { %v1998_v51 = vadd.f32 1e-05, %v1997_v50 }
 0x90c   : > { %2417 = vrsqrt.f32 %v1998_v51  ;;  %vm2005_vm15 = vweird.f32 %v1998_v51 }
 0x912   : > { %v2418_v52 = vpop.eup %2417 }
 0x913   : > { %v2000_v53 = vmul.f32 %v2418_v52, %v1998_v51  ;;  %vm2006_vm14 = vweird.f32 %v2418_v52 }
 0x914   : > { %vm2007_vm0 = vmor %vm2005_vm15, %vm2006_vm14 }
 0x915   : > { %v2001_v49 = vmul.f32 %v2418_v52, %v2000_v53 }
 0x917   : > { %v2002_v54 = vmul.f32 0.5, %v2001_v49 }
 0x919   : > { %v2003_v55 = vsub.f32 1.5, %v2002_v54 }
 0x91b   : > { %v2004_v19 = vmul.f32 %v2418_v52, %v2003_v55 }
 0x91d   : > { %v2008_v57 = vsel %vm2007_vm0, %v2418_v52, %v2004_v19 }
 0x91e   : > { %v2009_v60 = vmul.f32 %v2008_v57, %v1992_v44 }
 0x920   : > { %v2013_v61 = vmul.f32 %v2379_v56, %v2009_v60 }
 0x922   : > { %v2017_v12 = vadd.f32 %v2380_v59, %v2013_v61 }
 0x924   : > { %2018 = vst [vmem:[%s603_s27] sm:$0xf] %v2017_v12 }
 0x925 PF: > { %s3176_s23 = sld [smem:[#allocation25_spill]] }
 0x92b   : > { %s29_s25 = sadd.s32 1, %s3176_s23  }
 0x92c   : > { %p26_p7 = scmp.ge.s32.totalorder %s29_s25, 4  }
 0x92e   :  { %28 = sbr.rel (!%p26_p7) target bundleno = 10 (0xa), region = 147 }
 0x933   :  { %2038 = vsyncpa [#allocation3], 1 }
 0x934   :  { %2040 = vsyncpa [#allocation3 + $0x1], 1 }
 0x935   :  { %2041 = vsyncpa [#allocation5], 1 }
 0x936   :  { %2042 = vsyncpa [#allocation8], 1 }
 0x937   :  { %2043 = vsyncpa [#allocation11], 1 }
 0x938   :  { %2044 = vsyncpa [#allocation14], 1 }
 0x939   :  { %2045 = vsyncpa [#allocation17], 1 }

// kernel: net_forward.10
= control target key start
LH: loop header
LB: loop body
LE: loop exit
PB: predicated region body
PF: predicated region fallthrough
CT: control target
= control target key end

     0   :  { %s6099_s0 = inlined_call_operand.vmem [shape: f32[8,8,128], index: 0, kind: input, shape index: {}]   ;;  %s6100_s1 = inlined_call_operand.hbm [shape: f32[128,384], index: 1, kind: input, shape index: {}]   ;;  %s6101_s2 = inlined_call_operand.vmem [shape: f32[1,384], index: 2, kind: input, shape index: {}]   ;;  %s6102_s3 = inlined_call_operand.hbm [shape: f32[128,128], index: 3, kind: input, shape index: {}]   ;;  %s6103_s4 = inlined_call_operand.hbm [shape: f32[1,128], index: 4, kind: input, shape index: {}]   ;;  %s6104_s5 = inlined_call_operand.hbm [shape: f32[1,128], index: 5, kind: input, shape index: {}]   ;;  %s6105_s6 = inlined_call_operand.hbm [shape: f32[1,128], index: 6, kind: input, shape index: {}]   ;;  %s6106_s7 = inlined_call_operand.hbm [shape: f32[128,1024], index: 7, kind: input, shape index: {}]   ;;  %s6107_s8 = inlined_call_operand.hbm [shape: f32[1,1024], index: 8, kind: input, shape index: {}]   ;;  %s6108_s9 = inlined_call_operand.hbm [shape: f32[1024,128], index: 9, kind: input, shape index: {}]   ;;  %s6109_s10 = inlined_call_operand.hbm [shape: f32[1,128], index: 10, kind: input, shape index: {}]   ;;  %s6110_s11 = inlined_call_operand.hbm [shape: f32[1,128], index: 11, kind: input, shape index: {}]   ;;  %s6111_s12 = inlined_call_operand.hbm [shape: f32[1,128], index: 12, kind: input, shape index: {}]   ;;  %s6112_s13 = inlined_call_operand.vmem [shape: f32[8,8,128], index: 13, kind: output, shape index: {}]  }
   0x1   :  { %6114 = sst [smem:[#allocation25_spill]] %s6102_s3 }
   0x2   :  { %6115 = sst [smem:[#allocation26_spill]] %s6104_s5 }
   0x3   :  { %6116 = sst [smem:[#allocation27_spill]] %s6106_s7 }
   0x4   :  { %6117 = sst [smem:[#allocation28_spill]] %s6112_s13 }
   0x5   :  { %18 = vsyncpa [#allocation3], 0 }
   0x6   :  { %19 = vsyncpa [#allocation5], 0 }
   0x7   :  { %20 = vsyncpa [#allocation8], 0 }
   0x8   :  { %21 = vsyncpa [#allocation11], 0 }
   0x9   :  { %22 = vsyncpa [#allocation14], 0 }
   0xa   :  { %23 = vsyncpa [#allocation17], 0  ;;  %s5191_s25 = smov 0  }
   0xb LB: > { %s6118_s3 = sld [smem:[#allocation25_spill]]  ;;  %s6113_s29 = sadd.s32 4294967295, %s5094_s25   ;;  %s5094_s25 = sphi %s5191_s25, %s29_s25  }
   0xc   : > { %p4202_p0 = scmp.ge.s32.totalorder %s5094_s25, 1  ;;  %p338_p1 = scmp.lt.s32.totalorder %s5094_s25, 3 }
   0xd   : > { %p5204_p2 = scmp.eq.s32.totalorder %s6113_s29, 0  ;;  %s5096_s15 = smov [#allocation4]  }
   0xe   : > { %p5208_p3 = pnand %p4202_p0, %p338_p1  ;;  %s368_s16 = sshll.u32 %s5096_s15, 4  ;;  %s369_s16 = int_to_ptr.vmem [resolvable:$true] %s368_s16 }
   0xf   : > { %s6121_s5 = sld [smem:[#allocation26_spill]]  ;;  %s5097_s21 = smov [#allocation7]  }
  0x10   : > { %p4389_p4 = pneg %p5208_p3  ;;  %s395_s22 = sshll.u32 %s5097_s21, 4  ;;  %s396_s22 = int_to_ptr.vmem [resolvable:$true] %s395_s22 }
  0x11   : > { %s366_s28 = sshll.u32 %s6118_s3, 4  ;;  %s6123_s7 = sld [smem:[#allocation27_spill]]  ;;  %s367_s28 = int_to_ptr.hbm [resolvable:$true] %s366_s28 }
  0x12   : > { %p5219_p5 = pnand %p5204_p2, %p4389_p4  ;;  %s5098_s27 = smov 128  }
  0x13   : > { %s5099_s15 = smov 8   ;;  %s5100_s17 = smov [#allocation10]  }
  0x14   : > { %4395 = dma.hbm_to_vmem [thread:$0]  (!%p5219_p5), %s367_s28, 2048, %s369_s16, [#allocation5], %s5098_s27, %s5098_s27, %s5099_s15  }
  0x15   : > { %s393_s19 = sshll.u32 %s6121_s5, 4  ;;  %s418_s18 = sshll.u32 %s5100_s17, 4  ;;  %s394_s19 = int_to_ptr.hbm [resolvable:$true] %s393_s19  ;;  %s419_s18 = int_to_ptr.vmem [resolvable:$true] %s418_s18 }
  0x16   : > { %4401 = dma.hbm_to_vmem [thread:$0]  (!%p5219_p5), %s394_s19, 16, %s396_s22, [#allocation8]  }
  0x17   : > { %s416_s26 = sshll.u32 %s6123_s7, 4  ;;  %s5101_s29 = smov 1024   ;;  %s417_s26 = int_to_ptr.hbm [resolvable:$true] %s416_s26 }
  0x18   : > { %s5102_s3 = smov 64   ;;  %s442_s24 = sshll.u32 %s6108_s9, 4  ;;  %s443_s24 = int_to_ptr.hbm [resolvable:$true] %s442_s24 }
  0x19   : > { %4407 = dma.hbm_to_vmem [thread:$0]  (!%p5219_p5), %s417_s26, 16384, %s419_s18, [#allocation11], %s5101_s29, %s5101_s29, %s5102_s3  }
  0x1a   : > { %s5103_s5 = smov [#allocation13]   ;;  %s469_s19 = sshll.u32 %s6110_s11, 4  ;;  %s470_s19 = int_to_ptr.hbm [resolvable:$true] %s469_s19 }
  0x1b   : > { %s444_s7 = sshll.u32 %s5103_s5, 4  ;;  %s5104_s22 = smov [#allocation16]   ;;  %s445_s7 = int_to_ptr.vmem [resolvable:$true] %s444_s7 }
  0x1c   : > { %4413 = dma.hbm_to_vmem [thread:$0]  (!%p5219_p5), %s443_s24, 16384, %s445_s7, [#allocation14], %s5098_s27, %s5098_s27, %s5099_s15  }
  0x1d   : > { %s471_s17 = sshll.u32 %s5104_s22, 4  ;;  %s349_s29 = sshll.u32 %s6100_s1, 4  ;;  %s472_s17 = int_to_ptr.vmem [resolvable:$true] %s471_s17  ;;  %s350_s29 = int_to_ptr.hbm [resolvable:$true] %s349_s29 }
  0x1e   : > { %4419 = dma.hbm_to_vmem [thread:$0]  (!%p5219_p5), %s470_s19, 16, %s472_s17, [#allocation17]  }
  0x1f   : > { %s5105_s5 = smov [#allocation2]   ;;  %s381_s23 = sshll.u32 %s6103_s4, 4  ;;  %s382_s23 = int_to_ptr.hbm [resolvable:$true] %s381_s23 }
  0x20   : > { %s351_s26 = sshll.u32 %s5105_s5, 4  ;;  %s5106_s7 = smov 384   ;;  %s352_s26 = int_to_ptr.vmem [resolvable:$true] %s351_s26 }
  0x21   : > { %s5107_s27 = smov 24   ;;  %s5108_s13 = smov [#allocation6]  }
  0x22   : > { %4392 = dma.hbm_to_vmem [thread:$0]  (!%p5219_p5), %s350_s29, 6144, %s352_s26, [#allocation3], %s5106_s7, %s5106_s7, %s5107_s27  }
  0x23   : > { %s383_s15 = sshll.u32 %s5108_s13, 4  ;;  %s405_s16 = sshll.u32 %s6105_s6, 4  ;;  %s384_s15 = int_to_ptr.vmem [resolvable:$true] %s383_s15  ;;  %s406_s16 = int_to_ptr.hbm [resolvable:$true] %s405_s16 }
  0x24   : > { %4398 = dma.hbm_to_vmem [thread:$0]  (!%p5219_p5), %s382_s23, 16, %s384_s15, [#allocation5]  }
  0x25   : > { %s431_s17 = sshll.u32 %s6107_s8, 4  ;;  %s5109_s3 = smov [#allocation9]   ;;  %s432_s17 = int_to_ptr.hbm [resolvable:$true] %s431_s17 }
  0x26   : > { %s407_s5 = sshll.u32 %s5109_s3, 4  ;;  %s5110_s29 = smov [#allocation12]   ;;  %s408_s5 = int_to_ptr.vmem [resolvable:$true] %s407_s5 }
  0x27   : > { %4404 = dma.hbm_to_vmem [thread:$0]  (!%p5219_p5), %s406_s16, 16, %s408_s5, [#allocation8]  }
  0x28   : > { %s433_s26 = sshll.u32 %s5110_s29, 4  ;;  %s457_s7 = sshll.u32 %s6109_s10, 4  ;;  %s434_s26 = int_to_ptr.vmem [resolvable:$true] %s433_s26  ;;  %s458_s7 = int_to_ptr.hbm [resolvable:$true] %s457_s7 }
  0x29   : > { %4410 = dma.hbm_to_vmem [thread:$0]  (!%p5219_p5), %s432_s17, 128, %s434_s26, [#allocation11]  }
  0x2a   : > { %s481_s13 = sshll.u32 %s6111_s12, 4  ;;  %s5111_s15 = smov [#allocation15]   ;;  %s482_s13 = int_to_ptr.hbm [resolvable:$true] %s481_s13 }
  0x2b   : > { %s459_s24 = sshll.u32 %s5111_s15, 4  ;;  %s5112_s28 = smov [#allocation18]   ;;  %s460_s24 = int_to_ptr.vmem [resolvable:$true] %s459_s24 }
  0x2c   : > { %4416 = dma.hbm_to_vmem [thread:$0]  (!%p5219_p5), %s458_s7, 16, %s460_s24, [#allocation14]  }
  0x2d   : > { %s483_s16 = sshll.u32 %s5112_s28, 4  ;;  %505 = sbr.rel (%p5208_p3) target bundleno = 4826 (0x12da), region = 72  ;;  %s484_s16 = int_to_ptr.vmem [resolvable:$true] %s483_s16 }
  0x2e   : > { %4422 = dma.hbm_to_vmem [thread:$0]  (!%p5219_p5), %s482_s13, 16, %s484_s16, [#allocation17]  }
  0x32   : > { %5069 = dma.done.wait (%p5204_p2), [#allocation3], 6144  }
  0x33   : > { %5071 = vsyncadd (%p5204_p2), [#allocation3], 4294961152 }
  0x34   : > { %5073 = dma.done.wait (%p5204_p2), [#allocation5], 2064  }
  0x35   : > { %5075 = vsyncadd (%p5204_p2), [#allocation5], 4294965232 }
  0x36   : > { %5077 = dma.done.wait (%p5204_p2), [#allocation8], 32  }
  0x37   : > { %5079 = vsyncadd (%p5204_p2), [#allocation8], 4294967264 }
  0x38   : > { %5081 = dma.done.wait (%p5204_p2), [#allocation11], 16512  }
  0x39   : > { %5083 = vsyncadd (%p5204_p2), [#allocation11], 4294950784 }
  0x3a   : > { %5085 = dma.done.wait (%p5204_p2), [#allocation14], 16400  }
  0x3b   : > { %5087 = vsyncadd (%p5204_p2), [#allocation14], 4294950896 }
  0x3c   : > { %5089 = dma.done.wait (%p5204_p2), [#allocation17], 32  }
  0x3d   : > { %5091 = vsyncadd (%p5204_p2), [#allocation17], 4294967264  ;;  %v662_v0 = vld [vmem:[#allocation2 + $0x170] sm:$0xff]  ;;  %v659_v1 = vld [vmem:[#allocation2 + $0x158] sm:$0xff]  ;;  %s6124_s30 = sadd.s32 4294967295, %s5094_s25   ;;  %vm759_vm0 = vcmask 130048  }
  0x3e   : > { %v661_v2 = vld [vmem:[#allocation2 + $0x168] sm:$0xff]  ;;  %701 = vmatpush.msra.mxu1 %v662_v0  ;;  %v658_v3 = vld [vmem:[#allocation2 + $0x150] sm:$0xff]  ;;  %v656_v4 = vld [vmem:[#allocation2 + $0x140] sm:$0xff]  ;;  %s4227_s14 = sshll.u32 %s6124_s30, 2  ;;  %s5113_s29 = smov 112   ;;  %vm868_vm1 = vcmask 64512  }
  0x3f   : > { %672 = vmatpush.msra.mxu0 %v661_v2  ;;  %v655_v5 = vld [vmem:[#allocation2 + $0x138] sm:$0xff]  ;;  %v653_v6 = vld [vmem:[#allocation2 + $0x128] sm:$0xff]  ;;  %v652_v7 = vld [vmem:[#allocation2 + $0x120] sm:$0xff]  ;;  %p601_p6 = scmp.lt.s32.totalorder %s4227_s14, 7  ;;  %s5114_s26 = smov 96   ;;  %vm2973_vm2 = vcmask 261120  }
  0x40   : > { %702 = vmatpush.msra.mxu1 %v659_v1  ;;  %v650_v8 = vld [vmem:[#allocation2 + $0x110] sm:$0xff]  ;;  %v649_v9 = vld [vmem:[#allocation2 + $0x108] sm:$0xff]  ;;  %v647_v10 = vld [vmem:[#allocation2 + $0xf8] sm:$0xff]  ;;  %s5115_s18 = smov 80   ;;  %s5116_s21 = smov 64   ;;  %vm2978_vm3 = vcmask 392192  }
  0x41   : > { %673 = vmatpush.msra.mxu0 %v658_v3  ;;  %v646_v11 = vld [vmem:[#allocation2 + $0xf0] sm:$0xff]  ;;  %v644_v12 = vld [vmem:[#allocation2 + $0xe0] sm:$0xff]  ;;  %v643_v13 = vld [vmem:[#allocation2 + $0xd8] sm:$0xff]  ;;  %s6127_s14 = smov (!%p601_p6, %s4227_s14), 7  ;;  %s5117_s7 = smov 48   ;;  %vm2983_vm4 = vcmask 523264  }
  0x42   : > { %703 = vmatpush.msra.mxu1 %v656_v4  ;;  %v641_v14 = vld [vmem:[#allocation2 + $0xc8] sm:$0xff]  ;;  %v640_v15 = vld [vmem:[#allocation2 + $0xc0] sm:$0xff]  ;;  %v638_v16 = vld [vmem:[#allocation2 + $0xb0] sm:$0xff]  ;;  %s4228_s20 = sshll.u32 %s6127_s14, 3  ;;  %s5118_s23 = smov 32   ;;  %vm2988_vm5 = vcmask 654336  }
  0x43   : > { %674 = vmatpush.msra.mxu0 %v655_v5  ;;  %v637_v17 = vld [vmem:[#allocation2 + $0xa8] sm:$0xff]  ;;  %v635_v18 = vld [vmem:[#allocation2 + $0x98] sm:$0xff]  ;;  %v634_v19 = vld [vmem:[#allocation2 + $0x90] sm:$0xff]  ;;  %s5308_s17 = scalar_lea.vmem %s6099_s0, %s4228_s20  ;;  %s5119_s27 = smov 16   ;;  %vm2993_vm6 = vcmask 785408   ;;  %vm2998_vm7 = vcmask 916480  }
  0x44   : > { %704 = vmatpush.msra.mxu1 %v653_v6  ;;  %v632_v20 = vld [vmem:[#allocation2 + $0x80] sm:$0xff]  ;;  %v631_v21 = vld [vmem:[#allocation2 + $0x78] sm:$0xff]  ;;  %v629_v22 = vld [vmem:[#allocation2 + $0x68] sm:$0xff]  ;;  %s6125_s24 = sld [smem:[#allocation28_spill]] }
  0x45   : > { %675 = vmatpush.msra.mxu0 %v652_v7  ;;  %v628_v23 = vld [vmem:[#allocation2 + $0x60] sm:$0xff]  ;;  %v626_v24 = vld [vmem:[#allocation2 + $0x50] sm:$0xff]  ;;  %v625_v25 = vld [vmem:[#allocation2 + $0x48] sm:$0xff] }
  0x46   : > { %705 = vmatpush.msra.mxu1 %v650_v8  ;;  %v623_v26 = vld [vmem:[#allocation2 + $0x38] sm:$0xff]  ;;  %v622_v27 = vld [vmem:[#allocation2 + $0x30] sm:$0xff]  ;;  %v620_v28 = vld [vmem:[#allocation2 + $0x20] sm:$0xff] }
  0x47   : > { %676 = vmatpush.msra.mxu0 %v649_v9  ;;  %v619_v29 = vld [vmem:[#allocation2 + $0x18] sm:$0xff]  ;;  %v617_v30 = vld [vmem:[#allocation2 + $0x8] sm:$0xff]  ;;  %v616_v31 = vld [vmem:[#allocation2] sm:$0xff] }
  0x48   : > { %706 = vmatpush.msra.mxu1 %v647_v10  ;;  %v5311_v32 = vld [vmem:[%s5308_s17] sm:$0xff]  ;;  %v5316_v33 = vld [vmem:[%s5308_s17 + $0x8] sm:$0xff]  ;;  %v5321_v34 = vld [vmem:[%s5308_s17 + $0x10] sm:$0xff] }
  0x49   : > { %677 = vmatpush.msra.mxu0 %v646_v11  ;;  %v5326_v35 = vld [vmem:[%s5308_s17 + $0x18] sm:$0xff]  ;;  %v5333_v36 = vld [vmem:[%s6101_s2] sm:$0x7]  ;;  %v657_v45 = vld [vmem:[#allocation2 + $0x148] sm:$0xff] }
  0x4a   : > { %707 = vmatpush.msra.mxu1 %v644_v12  ;;  %v667_v37 = vperm.slane %v5333_v36, 1  ;;  %v666_v38 = vperm.slane %v5333_v36, 0  ;;  %v663_v39 = vld [vmem:[#allocation2 + $0x178] sm:$0xff]  ;;  %v660_v40 = vld [vmem:[#allocation2 + $0x160] sm:$0xff]  ;;  %v654_v46 = vld [vmem:[#allocation2 + $0x130] sm:$0xff]  ;;  %s6088_s28 = scalar_lea.vmem %s6125_s24, %s4228_s20 }
  0x4b   : > { %678 = vmatpush.msra.mxu0 %v643_v13  ;;  %730 = vmatpush.msra.mxu2 %v663_v39  ;;  %v651_v47 = vld [vmem:[#allocation2 + $0x118] sm:$0xff]  ;;  %v648_v48 = vld [vmem:[#allocation2 + $0x100] sm:$0xff]  ;;  %v645_v52 = vld [vmem:[#allocation2 + $0xe8] sm:$0xff] }
  0x4c   : > { %708 = vmatpush.msra.mxu1 %v641_v14  ;;  %v642_v54 = vld [vmem:[#allocation2 + $0xd0] sm:$0xff]  ;;  %v639_v55 = vld [vmem:[#allocation2 + $0xb8] sm:$0xff]  ;;  %v636_v56 = vld [vmem:[#allocation2 + $0xa0] sm:$0xff] }
  0x4d   : > { %679 = vmatpush.msra.mxu0 %v640_v15  ;;  %731 = vmatpush.msra.mxu2 %v660_v40  ;;  %v633_v60 = vld [vmem:[#allocation2 + $0x88] sm:$0xff]  ;;  %v630_v62 = vld [vmem:[#allocation2 + $0x70] sm:$0xff]  ;;  %v627_v63 = vld [vmem:[#allocation2 + $0x58] sm:$0xff] }
  0x4e   : > { %709 = vmatpush.msra.mxu1 %v638_v16  ;;  %v624_v0 = vld [vmem:[#allocation2 + $0x40] sm:$0xff]  ;;  %v621_v4 = vld [vmem:[#allocation2 + $0x28] sm:$0xff]  ;;  %v618_v6 = vld [vmem:[#allocation2 + $0x10] sm:$0xff] }
  0x4f   : > { %680 = vmatpush.msra.mxu0 %v637_v17  ;;  %732 = vmatpush.msra.mxu2 %v657_v45 }
  0x50   : > { %710 = vmatpush.msra.mxu1 %v635_v18 }
  0x51   : > { %681 = vmatpush.msra.mxu0 %v634_v19  ;;  %733 = vmatpush.msra.mxu2 %v654_v46  ;;  %v5386_v19 = vperm.slane %v5333_v36, 2 }
  0x52   : > { %711 = vmatpush.msra.mxu1 %v632_v20 }
  0x53   : > { %682 = vmatpush.msra.mxu0 %v631_v21  ;;  %734 = vmatpush.msra.mxu2 %v651_v47 }
  0x54   : > { %712 = vmatpush.msra.mxu1 %v629_v22 }
  0x55   : > { %683 = vmatpush.msra.mxu0 %v628_v23  ;;  %735 = vmatpush.msra.mxu2 %v648_v48 }
  0x56   : > { %713 = vmatpush.msra.mxu1 %v626_v24 }
  0x57   : > { %684 = vmatpush.msra.mxu0 %v625_v25  ;;  %736 = vmatpush.msra.mxu2 %v645_v52 }
  0x58   : > { %714 = vmatpush.msra.mxu1 %v623_v26 }
  0x59   : > { %685 = vmatpush.msra.mxu0 %v622_v27  ;;  %737 = vmatpush.msra.mxu2 %v642_v54 }
  0x5a   : > { %715 = vmatpush.msra.mxu1 %v620_v28 }
  0x5b   : > { %686 = vmatpush.msra.mxu0 %v619_v29  ;;  %738 = vmatpush.msra.mxu2 %v639_v55 }
  0x5c   : > { %716 = vmatpush.msra.mxu1 %v617_v30 }
  0x5d   : > { %687 = vmatpush.msra.mxu0 %v616_v31  ;;  %717 = vmatmul.f32.vlgmr.msra.gmra.mxu1 %v5311_v32 }
  0x5e   : > { %688 = vmatmul.f32.vlgmr.msra.gmra.mxu0 %v5311_v32  ;;  %739 = vmatpush.msra.mxu2 %v636_v56 }
  0x60   : > { %740 = vmatpush.msra.mxu2 %v633_v60 }
  0x62   : > { %741 = vmatpush.msra.mxu2 %v630_v62 }
  0x64   : > { %742 = vmatpush.msra.mxu2 %v627_v63 }
  0x65   : > { %720 = vmatmul.f32.gmra.mxu1 %v5316_v33 }
  0x66   : > { %691 = vmatmul.f32.gmra.mxu0 %v5316_v33  ;;  %743 = vmatpush.msra.mxu2 %v624_v0 }
  0x68   : > { %744 = vmatpush.msra.mxu2 %v621_v4 }
  0x6a   : > { %745 = vmatpush.msra.mxu2 %v618_v6 }
  0x6b   : > { %746 = vmatmul.f32.vlgmr.msra.gmra.mxu2 %v5311_v32 }
  0x6d   : > { %723 = vmatmul.f32.gmra.mxu1 %v5321_v34 }
  0x6e   : > { %694 = vmatmul.f32.gmra.mxu0 %v5321_v34 }
  0x73   : > { %749 = vmatmul.f32.gmra.mxu2 %v5316_v33 }
  0x75   : > { %726 = vmatmul.f32.gmra.mxu1 %v5326_v35 }
  0x76   : > { %697 = vmatmul.f32.gmra.mxu0 %v5326_v35 }
  0x7b   : > { %752 = vmatmul.f32.gmra.mxu2 %v5321_v34 }
  0x83   : > { %755 = vmatmul.f32.gmra.mxu2 %v5326_v35 }
  0xda   : > { %v718_v41 = vpop.f32.mrf.mxu1 }
  0xdb   : > { %v689_v42 = vpop.f32.mrf.mxu0  ;;  %v5337_v43 = vadd.f32 %v718_v41, %v667_v37 }
  0xdc   : > { %v5339_v44 = vadd.f32 %v689_v42, %v666_v38 }
  0xdd   : > { %1007 = vrot.lane.b32.xlu2 %v5337_v43, %s5113_s29  ;;  %4231 = vmatpush.xpose.msk.msra.mxu3 %vm759_vm0, %v5337_v43 }
  0xde   : > { %1005 = vrot.lane.b32.xlu0 %v5339_v44, %s5113_s29 }
  0xe0   : > { %4232 = vmatmul.msk.f32.vlgmr.msra.gmra.mxu3 %vm759_vm0, %v5339_v44 }
  0xe2   : > { %v721_v49 = vpop.f32.mrf.mxu1 }
  0xe3   : > { %v692_v50 = vpop.f32.mrf.mxu0  ;;  %v5349_v51 = vadd.f32 %v721_v49, %v667_v37 }
  0xe4   : > { %v5351_v53 = vadd.f32 %v692_v50, %v666_v38 }
  0xe5   : > { %4233 = vmatpush.xpose.msk.msrb.mxu3 %vm759_vm0, %v5349_v51 }
  0xe8   : > { %4234 = vmatmul.msk.f32.vlgmr.msrb.gmra.mxu3 %vm759_vm0, %v5351_v53 }
  0xea   : > { %v724_v57 = vpop.f32.mrf.mxu1 }
  0xeb   : > { %v695_v58 = vpop.f32.mrf.mxu0  ;;  %v5357_v59 = vadd.f32 %v724_v57, %v667_v37 }
  0xec   : > { %v5359_v61 = vadd.f32 %v695_v58, %v666_v38 }
  0xed   : > { %4235 = vmatpush.xpose.msk.msra.mxu3 %vm759_vm0, %v5357_v59  ;;  %1063 = vrot.lane.b32.xlu2 %v5357_v59, %s5113_s29 }
  0xee   : > { %v747_v22 = vpop.f32.mrf.mxu2 }
  0xef   : > { %v5389_v23 = vadd.f32 %v747_v22, %v5386_v19 }
  0xf0   : > { %4236 = vmatmul.msk.f32.vlgmr.msra.gmra.mxu3 %vm759_vm0, %v5359_v61 }
  0xf2   : > { %v727_v1 = vpop.f32.mrf.mxu1 }
  0xf3   : > { %v698_v2 = vpop.f32.mrf.mxu0  ;;  %v5367_v3 = vadd.f32 %v727_v1, %v667_v37 }
  0xf4   : > { %v5369_v5 = vadd.f32 %v698_v2, %v666_v38 }
  0xf5   : > { %4237 = vmatpush.xpose.msk.msrb.mxu3 %vm759_vm0, %v5367_v3 }
  0xf6   : > { %v750_v25 = vpop.f32.mrf.mxu2 }
  0xf7   : > { %v5396_v26 = vadd.f32 %v750_v25, %v5386_v19 }
  0xf8   : > { %4238 = vmatmul.msk.f32.vlgmr.msrb.gmra.mxu3 %vm759_vm0, %v5369_v5 }
  0xf9   : > { %931 = vmatpush.msra.mxu3 %v5389_v23 }
  0xfb   : > { %954 = vmatpush.msrb.mxu3 %v5396_v26 }
  0xfe   : > { %v753_v49 = vpop.f32.mrf.mxu2 }
  0xff   : > { %v5415_v58 = vadd.f32 %v753_v49, %v5386_v19 }
 0x106   : > { %v756_v50 = vpop.f32.mrf.mxu2 }
 0x107   : > { %v5420_v1 = vadd.f32 %v756_v50, %v5386_v19 }
 0x137   : > { %v1008_v7 = vpop.permute.xlu2 %1007 }
 0x138   : > { %4243 = vmatpush.xpose.msk.msrb.mxu2 %vm759_vm0, %v1008_v7 }
 0x147   : > { %v1064_v8 = vpop.permute.xlu2 %1063 }
 0x148   : > { %4247 = vmatpush.xpose.msk.msra.mxu2 %vm759_vm0, %v1064_v8 }
 0x150   : > { %v1006_v9 = vpop.permute.xlu0 %1005 }
 0x151   : > { %4244 = vmatmul.msk.f32.vlgmr.msrb.gmra.mxu2 %vm759_vm0, %v1006_v9 }
 0x163   : > { %v783_v10 = vpop.f32.mrf.mxu3 }
 0x164   : > { %v864_v11 = vmul.f32 0.25, %v783_v10 }
 0x166   : > { %v869_v12 = vsel %vm868_vm1, %v864_v11, -inf }
 0x167   : > { %870 = vmax.xlane.f32.xlu0 %v869_v12 }
 0x16b   : > { %v809_v13 = vpop.f32.mrf.mxu3 }
 0x16c   : > { %v865_v14 = vmul.f32 0.25, %v809_v13 }
 0x16e   : > { %v872_v15 = vsel %vm868_vm1, %v865_v14, -inf }
 0x16f   : > { %873 = vmax.xlane.f32.xlu0 %v872_v15 }
 0x173   : > { %v835_v16 = vpop.f32.mrf.mxu3 }
 0x174   : > { %v866_v17 = vmul.f32 0.25, %v835_v16 }
 0x176   : > { %v875_v18 = vsel %vm868_vm1, %v866_v17, -inf }
 0x177   : > { %876 = vmax.xlane.f32.xlu1 %v875_v18 }
 0x17b   : > { %v861_v20 = vpop.f32.mrf.mxu3 }
 0x17c   : > { %v867_v21 = vmul.f32 0.25, %v861_v20 }
 0x17e   : > { %v878_v24 = vsel %vm868_vm1, %v867_v21, -inf }
 0x17f   : > { %879 = vmax.xlane.f32.xlu1 %v878_v24 }
 0x183   : > { %1033 = vrot.lane.b32.xlu0 %v5351_v53, %s5113_s29 }
 0x198   : > { %1035 = vrot.lane.b32.xlu1 %v5349_v51, %s5113_s29 }
 0x1d4   : > { %v1030_v52 = vpop.f32.mrf.mxu2 }
 0x1d5   : > { %v1117_v54 = vmul.f32 0.25, %v1030_v52 }
 0x1d7   : > { %v1121_v55 = vsel %vm868_vm1, %v1117_v54, -inf }
 0x1da   : > { %v871_v27 = vpop.xlane.xlu0 %870 }
 0x1db   : > { %v881_v28 = vsub.f32 %v864_v11, %v871_v27 }
 0x1dd   : > { %v885_v29 = vmul.f32 1.442695, %v881_v28 }
 0x1df   : > { %4584 = vpow2.f32 %v885_v29 }
 0x1e2   : > { %v874_v30 = vpop.xlane.xlu0 %873 }
 0x1e3   : > { %v882_v31 = vsub.f32 %v865_v14, %v874_v30 }
 0x1e5   : > { %v4585_v32 = vpop.eup %4584  ;;  %v887_v33 = vmul.f32 1.442695, %v882_v31 }
 0x1e6   : > { %v893_v34 = vsel %vm868_vm1, %v4585_v32, 0.0 }
 0x1e7   : > { %4586 = vpow2.f32 %v887_v33  ;;  %894 = vadd.xlane.f32.xlu2 %v893_v34 }
 0x1ea   : > { %v877_v35 = vpop.xlane.xlu1 %876 }
 0x1eb   : > { %v883_v36 = vsub.f32 %v866_v17, %v877_v35  ;;  %v5448_v35 = vpack.i.bf16 %v5420_v1, %v5415_v58 }
 0x1ed   : > { %v4587_v37 = vpop.eup %4586  ;;  %v889_v38 = vmul.f32 1.442695, %v883_v36 }
 0x1ee   : > { %v896_v39 = vsel %vm868_vm1, %v4587_v37, 0.0 }
 0x1ef   : > { %4588 = vpow2.f32 %v889_v38  ;;  %897 = vadd.xlane.f32.xlu2 %v896_v39 }
 0x1f2   : > { %v880_v40 = vpop.xlane.xlu1 %879 }
 0x1f3   : > { %v884_v41 = vsub.f32 %v867_v21, %v880_v40 }
 0x1f5   : > { %v4589_v42 = vpop.eup %4588  ;;  %v891_v45 = vmul.f32 1.442695, %v884_v41  ;;  %v1034_v60 = vpop.permute.xlu0 %1033 }
 0x1f6   : > { %v899_v46 = vsel %vm868_vm1, %v4589_v42, 0.0 }
 0x1f7   : > { %4590 = vpow2.f32 %v891_v45  ;;  %900 = vadd.xlane.f32.xlu0 %v899_v46 }
 0x1fd   : > { %v4591_v47 = vpop.eup %4590 }
 0x1fe   : > { %v902_v48 = vsel %vm868_vm1, %v4591_v47, 0.0 }
 0x1ff   : > { %903 = vadd.xlane.f32.xlu1 %v902_v48 }
 0x207   : > { %1061 = vrot.lane.b32.xlu2 %v5359_v61, %s5113_s29 }
 0x20a   : > { %v1036_v2 = vpop.permute.xlu1 %1035 }
 0x20b   : > { %1089 = vrot.lane.b32.xlu0 %v5369_v5, %s5113_s29 }
 0x218   : > { %1091 = vrot.lane.b32.xlu1 %v5367_v3, %s5113_s29 }
 0x235   : > { %1122 = vmax.xlane.f32.xlu0 %v1121_v55 }
 0x249   : > { %1329 = vrot.lane.b32.xlu0 %v5359_v61, %s5114_s26 }
 0x25a   : > { %v895_v56 = vpop.xlane.xlu2 %894 }
 0x25b   : > { %4592 = vrcp.f32 %v895_v56 }
 0x261   : > { %v4593_v57 = vpop.eup %4592 }
 0x262   : > { %v909_v62 = vmul.f32 %v4593_v57, %v4585_v32  ;;  %v898_v63 = vpop.xlane.xlu2 %897 }
 0x263   : > { %4594 = vrcp.f32 %v898_v63 }
 0x264   : > { %4239 = vmatmul.msk.f32.vlgmr.msra.gmra.mxu3 %vm868_vm1, %v909_v62 }
 0x265   : > { %977 = vmatpush.msra.mxu3 %v5415_v58 }
 0x269   : > { %v4595_v0 = vpop.eup %4594 }
 0x26a   : > { %v910_v4 = vmul.f32 %v4595_v0, %v4587_v37  ;;  %v1062_v6 = vpop.permute.xlu2 %1061  ;;  %v901_v7 = vpop.xlane.xlu0 %900 }
 0x26b   : > { %4596 = vrcp.f32 %v901_v7  ;;  %4248 = vmatmul.msk.f32.vlgmr.msra.gmra.mxu2 %vm759_vm0, %v1062_v6 }
 0x26c   : > { %4240 = vmatmul.msk.f32.vlgmr.msrb.gmra.mxu3 %vm868_vm1, %v910_v4 }
 0x26d   : > { %1000 = vmatpush.msrb.mxu3 %v5420_v1 }
 0x271   : > { %v4597_v8 = vpop.eup %4596 }
 0x272   : > { %v911_v9 = vmul.f32 %v4597_v8, %v4589_v42  ;;  %v904_v10 = vpop.xlane.xlu1 %903 }
 0x273   : > { %4598 = vrcp.f32 %v904_v10 }
 0x274   : > { %4241 = vmatmul.msk.f32.vlgmr.msra.gmra.mxu3 %vm868_vm1, %v911_v9 }
 0x275   : > { %4245 = vmatpush.xpose.msk.msra.mxu3 %vm759_vm0, %v1036_v2 }
 0x279   : > { %v4599_v11 = vpop.eup %4598 }
 0x27a   : > { %v912_v12 = vmul.f32 %v4599_v11, %v4591_v47 }
 0x27c   : > { %4242 = vmatmul.msk.f32.vlgmr.msrb.gmra.mxu3 %vm868_vm1, %v912_v12 }
 0x27d   : > { %v1090_v14 = vpop.permute.xlu0 %1089 }
 0x284   : > { %4246 = vmatmul.msk.f32.vlgmr.msra.gmra.mxu3 %vm759_vm0, %v1034_v60 }
 0x28a   : > { %v1092_v13 = vpop.permute.xlu1 %1091 }
 0x28b   : > { %4249 = vmatpush.xpose.msk.msrb.mxu3 %vm759_vm0, %v1092_v13 }
 0x28e   : > { %4250 = vmatmul.msk.f32.vlgmr.msrb.gmra.mxu3 %vm759_vm0, %v1090_v14 }
 0x2a8   : > { %v1123_v15 = vpop.xlane.xlu0 %1122 }
 0x2a9   : > { %v1133_v16 = vsub.f32 %v1117_v54, %v1123_v15 }
 0x2ab   : > { %v1137_v17 = vmul.f32 1.442695, %v1133_v16 }
 0x2ad   : > { %4600 = vpow2.f32 %v1137_v17 }
 0x2b3   : > { %v5431_v18 = vpop.eup %4600 }
 0x2b4   : > { %v1145_v19 = vsel %vm868_vm1, %v5431_v18, 0.0 }
 0x2b5   : > { %1146 = vadd.xlane.f32.xlu0 %v1145_v19 }
 0x2bb   : > { %v1330_v2 = vpop.permute.xlu0 %1329 }
 0x2e7   : > { %v5435_v20 = vpop.f32.mrf.mxu3 }
 0x2ee   : > { %v1086_v21 = vpop.f32.mrf.mxu2 }
 0x2ef   : > { %v1119_v22 = vmul.f32 0.25, %v1086_v21  ;;  %v5437_v24 = vpop.f32.mrf.mxu3 }
 0x2f1   : > { %v1127_v25 = vsel %vm868_vm1, %v1119_v22, -inf }
 0x2f2   : > { %1128 = vmax.xlane.f32.xlu2 %v1127_v25 }
 0x2f7   : > { %v5440_v27 = vpop.f32.mrf.mxu3 }
 0x2ff   : > { %v5442_v28 = vpop.f32.mrf.mxu3 }
 0x307   : > { %v1058_v29 = vpop.f32.mrf.mxu3 }
 0x308   : > { %v1118_v30 = vmul.f32 0.25, %v1058_v29 }
 0x30a   : > { %v1124_v31 = vsel %vm868_vm1, %v1118_v30, -inf }
 0x30b   : > { %1125 = vmax.xlane.f32.xlu2 %v1124_v31 }
 0x311   : > { %v1114_v32 = vpop.f32.mrf.mxu3 }
 0x312   : > { %v1120_v33 = vmul.f32 0.25, %v1114_v32 }
 0x314   : > { %v1130_v34 = vsel %vm868_vm1, %v1120_v33, -inf }
 0x315   : > { %1131 = vmax.xlane.f32.xlu1 %v1130_v34 }
 0x323   : > { %4479 = vrot.lane.b32.xlu2 %v5448_v35, %s5113_s29 }
 0x328   : > { %v1147_v6 = vpop.xlane.xlu0 %1146 }
 0x32b   : > { %1359 = vrot.lane.b32.xlu2 %v5367_v3, %s5114_s26 }
 0x365   : > { %v1129_v36 = vpop.xlane.xlu2 %1128 }
 0x366   : > { %v1135_v37 = vsub.f32 %v1119_v22, %v1129_v36 }
 0x368   : > { %v1141_v38 = vmul.f32 1.442695, %v1135_v37 }
 0x36a   : > { %4602 = vpow2.f32 %v1141_v38 }
 0x370   : > { %v4603_v39 = vpop.eup %4602 }
 0x371   : > { %v1151_v40 = vsel %vm868_vm1, %v4603_v39, 0.0 }
 0x372   : > { %1152 = vadd.xlane.f32.xlu1 %v1151_v40 }
 0x37e   : > { %v1126_v41 = vpop.xlane.xlu2 %1125 }
 0x37f   : > { %v1134_v42 = vsub.f32 %v1118_v30, %v1126_v41 }
 0x381   : > { %v1139_v45 = vmul.f32 1.442695, %v1134_v42 }
 0x383   : > { %4604 = vpow2.f32 %v1139_v45 }
 0x386   : > { %v4480_v46 = vpop.permute.xlu2 %4479 }
 0x387   : > { %v4482_v47 = vunpack.i.h.bf16 %v4480_v46  ;;  %v4481_v48 = vunpack.i.l.bf16 %v4480_v46 }
 0x388   : > { %v1132_v49 = vpop.xlane.xlu1 %1131 }
 0x389   : > { %v4605_v50 = vpop.eup %4604  ;;  %v1136_v52 = vsub.f32 %v1120_v33, %v1132_v49  ;;  %1241 = vmatpush.msrb.mxu2 %v4481_v48  ;;  %1268 = vmatpush.msra.mxu3 %v4482_v47 }
 0x38a   : > { %v1148_v54 = vsel %vm868_vm1, %v4605_v50, 0.0 }
 0x38b   : > { %v1143_v55 = vmul.f32 1.442695, %v1136_v52  ;;  %1149 = vadd.xlane.f32.xlu2 %v1148_v54  ;;  %1331 = vrot.lane.b32.xlu1 %v5357_v59, %s5114_s26 }
 0x38d   : > { %4606 = vpow2.f32 %v1143_v55 }
 0x38e   : > { %v1360_v56 = vpop.permute.xlu2 %1359 }
 0x38f   : > { %4261 = vmatpush.xpose.msk.msrb.mxu3 %vm759_vm0, %v1360_v56 }
 0x393   : > { %v4607_v57 = vpop.eup %4606  ;;  %1357 = vrot.lane.b32.xlu1 %v5369_v5, %s5114_s26 }
 0x394   : > { %v1154_v60 = vsel %vm868_vm1, %v4607_v57, 0.0 }
 0x395   : > { %1155 = vadd.xlane.f32.xlu0 %v1154_v60 }
 0x39b   : > { %1166 = vrot.lane.b32.xlu1 %v5389_v23, %s5113_s29 }
 0x3a3   : > { %1275 = vrot.lane.b32.xlu1 %v5337_v43, %s5114_s26 }
 0x3a9   : > { %1303 = vrot.lane.b32.xlu0 %v5349_v51, %s5114_s26 }
 0x3ab   : > { %1193 = vrot.lane.b32.xlu1 %v5396_v26, %s5113_s29 }
 0x3b3   : > { %1273 = vrot.lane.b32.xlu1 %v5339_v44, %s5114_s26 }
 0x3bb   : > { %1301 = vrot.lane.b32.xlu1 %v5351_v53, %s5114_s26 }
 0x3e5   : > { %v1153_v62 = vpop.xlane.xlu1 %1152 }
 0x3e6   : > { %4608 = vrcp.f32 %v1153_v62 }
 0x3e7   : > { %4610 = vrcp.f32 %v1147_v6 }
 0x3ec   : > { %v4609_v63 = vpop.eup %4608 }
 0x3ed   : > { %v1163_v0 = vmul.f32 %v4609_v63, %v4603_v39  ;;  %v4611_v9 = vpop.eup %4610 }
 0x3ee   : > { %v1161_v11 = vmul.f32 %v4611_v9, %v5431_v18 }
 0x3ef   : > { %4253 = vmatmul.msk.f32.vlgmr.msrb.gmra.mxu2 %vm868_vm1, %v1163_v0 }
 0x3fd   : > { %v1332_v4 = vpop.permute.xlu1 %1331 }
 0x3fe   : > { %4259 = vmatpush.xpose.msk.msra.mxu2 %vm759_vm0, %v1332_v4  ;;  %v1150_v14 = vpop.xlane.xlu2 %1149 }
 0x401   : > { %4260 = vmatmul.msk.f32.vlgmr.msra.gmra.mxu2 %vm759_vm0, %v1330_v2 }
 0x405   : > { %v1358_v7 = vpop.permute.xlu1 %1357 }
 0x408   : > { %v1156_v8 = vpop.xlane.xlu0 %1155 }
 0x409   : > { %4612 = vrcp.f32 %v1156_v8 }
 0x40a   : > { %4614 = vrcp.f32 %v1150_v14 }
 0x40d   : > { %v1167_v10 = vpop.permute.xlu1 %1166 }
 0x40e   : > { %1187 = vmatpush.msrb.mxu0 %v1167_v10 }
 0x40f   : > { %v4613_v12 = vpop.eup %4612  ;;  %4251 = vmatmul.msk.f32.vlgmr.msrb.gmra.mxu0 %vm868_vm1, %v1161_v11 }
 0x410   : > { %v1164_v13 = vmul.f32 %v4613_v12, %v4607_v57  ;;  %v4615_v16 = vpop.eup %4614 }
 0x411   : > { %v1162_v19 = vmul.f32 %v4615_v16, %v4605_v50 }
 0x412   : > { %4254 = vmatmul.msk.f32.vlgmr.msra.gmra.mxu3 %vm868_vm1, %v1164_v13 }
 0x415   : > { %v1276_v15 = vpop.permute.xlu1 %1275 }
 0x416   : > { %4255 = vmatpush.xpose.msk.msra.mxu0 %vm759_vm0, %v1276_v15 }
 0x41a   : > { %4262 = vmatmul.msk.f32.vlgmr.msrb.gmra.mxu3 %vm759_vm0, %v1358_v7 }
 0x41b   : > { %v1304_v21 = vpop.permute.xlu0 %1303 }
 0x41d   : > { %v1194_v17 = vpop.permute.xlu1 %1193 }
 0x41e   : > { %1214 = vmatpush.msrb.mxu1 %v1194_v17 }
 0x41f   : > { %4252 = vmatmul.msk.f32.vlgmr.msrb.gmra.mxu1 %vm868_vm1, %v1162_v19 }
 0x420   : > { %4257 = vmatpush.xpose.msk.msra.mxu1 %vm759_vm0, %v1304_v21 }
 0x425   : > { %v1274_v18 = vpop.permute.xlu1 %1273 }
 0x426   : > { %4256 = vmatmul.msk.f32.vlgmr.msra.gmra.mxu0 %vm759_vm0, %v1274_v18 }
 0x42d   : > { %v1302_v22 = vpop.permute.xlu1 %1301 }
 0x42e   : > { %4258 = vmatmul.msk.f32.vlgmr.msra.gmra.mxu1 %vm759_vm0, %v1302_v22 }
 0x472   : > { %v5486_v25 = vpop.f32.mrf.mxu2 }
 0x484   : > { %v1354_v29 = vpop.f32.mrf.mxu2 }
 0x485   : > { %v1387_v30 = vmul.f32 0.25, %v1354_v29 }
 0x487   : > { %v1395_v31 = vsel %vm868_vm1, %v1387_v30, -inf }
 0x488   : > { %1396 = vmax.xlane.f32.xlu2 %v1395_v31 }
 0x48c   : > { %v5491_v33 = vpop.f32.mrf.mxu0 }
 0x495   : > { %v5489_v32 = vpop.f32.mrf.mxu3 }
 0x49c   : > { %v5494_v38 = vpop.f32.mrf.mxu1 }
 0x49d   : > { %v1382_v34 = vpop.f32.mrf.mxu3 }
 0x49e   : > { %v1388_v36 = vmul.f32 0.25, %v1382_v34 }
 0x4a0   : > { %v1398_v37 = vsel %vm868_vm1, %v1388_v36, -inf }
 0x4a1   : > { %1399 = vmax.xlane.f32.xlu1 %v1398_v37 }
 0x4a3   : > { %v1298_v39 = vpop.f32.mrf.mxu0 }
 0x4a4   : > { %v1385_v40 = vmul.f32 0.25, %v1298_v39 }
 0x4a6   : > { %v1389_v41 = vsel %vm868_vm1, %v1385_v40, -inf }
 0x4a7   : > { %1390 = vmax.xlane.f32.xlu2 %v1389_v41 }
 0x4ab   : > { %v1326_v42 = vpop.f32.mrf.mxu1 }
 0x4ac   : > { %v1386_v45 = vmul.f32 0.25, %v1326_v42 }
 0x4ae   : > { %v1392_v46 = vsel %vm868_vm1, %v1386_v45, -inf }
 0x4af   : > { %1393 = vmax.xlane.f32.xlu0 %v1392_v46 }
 0x4ba   : > { %1595 = vrot.lane.b32.xlu1 %v5357_v59, %s5115_s18 }
 0x4bf   : > { %4484 = vrot.lane.b32.xlu2 %v5448_v35, %s5114_s26 }
 0x4c2   : > { %1623 = vrot.lane.b32.xlu1 %v5367_v3, %s5115_s18 }
 0x4c3   : > { %1593 = vrot.lane.b32.xlu0 %v5359_v61, %s5115_s18 }
 0x4cb   : > { %1621 = vrot.lane.b32.xlu0 %v5369_v5, %s5115_s18 }
 0x4d3   : > { %1433 = vrot.lane.b32.xlu0 %v5389_v23, %s5114_s26 }
 0x4db   : > { %1539 = vrot.lane.b32.xlu0 %v5337_v43, %s5115_s18 }
 0x4e3   : > { %1537 = vrot.lane.b32.xlu0 %v5339_v44, %s5115_s18 }
 0x4eb   : > { %1567 = vrot.lane.b32.xlu0 %v5349_v51, %s5115_s18 }
 0x4f3   : > { %1565 = vrot.lane.b32.xlu0 %v5351_v53, %s5115_s18 }
 0x4fb   : > { %v1397_v47 = vpop.xlane.xlu2 %1396 }
 0x4fc   : > { %v1403_v48 = vsub.f32 %v1387_v30, %v1397_v47 }
 0x4fe   : > { %v1409_v49 = vmul.f32 1.442695, %v1403_v48 }
 0x500   : > { %4616 = vpow2.f32 %v1409_v49 }
 0x506   : > { %v4617_v50 = vpop.eup %4616 }
 0x507   : > { %v1419_v52 = vsel %vm868_vm1, %v4617_v50, 0.0 }
 0x508   : > { %1420 = vadd.xlane.f32.xlu2 %v1419_v52 }
 0x514   : > { %v1400_v54 = vpop.xlane.xlu1 %1399 }
 0x515   : > { %v1404_v57 = vsub.f32 %v1388_v36, %v1400_v54 }
 0x517   : > { %v1411_v62 = vmul.f32 1.442695, %v1404_v57 }
 0x51a   : > { %v1391_v55 = vpop.xlane.xlu2 %1390 }
 0x51b   : > { %v1401_v56 = vsub.f32 %v1385_v40, %v1391_v55 }
 0x51d   : > { %v1405_v60 = vmul.f32 1.442695, %v1401_v56 }
 0x51f   : > { %4618 = vpow2.f32 %v1405_v60 }
 0x520   : > { %4620 = vpow2.f32 %v1411_v62 }
 0x522   : > { %v4485_v63 = vpop.permute.xlu2 %4484  ;;  %v1394_v0 = vpop.xlane.xlu0 %1393 }
 0x523   : > { %v4487_v2 = vunpack.i.h.bf16 %v4485_v63  ;;  %v4486_v4 = vunpack.i.l.bf16 %v4485_v63  ;;  %v1402_v6 = vsub.f32 %v1386_v45, %v1394_v0 }
 0x525   : > { %v4619_v7 = vpop.eup %4618  ;;  %v1407_v8 = vmul.f32 1.442695, %v1402_v6  ;;  %1506 = vmatpush.msrb.mxu2 %v4486_v4  ;;  %1532 = vmatpush.msra.mxu3 %v4487_v2 }
 0x526   : > { %v1413_v9 = vsel %vm868_vm1, %v4619_v7, 0.0  ;;  %v4621_v10 = vpop.eup %4620 }
 0x527   : > { %4622 = vpow2.f32 %v1407_v8  ;;  %1414 = vadd.xlane.f32.xlu2 %v1413_v9  ;;  %v1422_v14 = vsel %vm868_vm1, %v4621_v10, 0.0 }
 0x52c   : > { %v1596_v11 = vpop.permute.xlu1 %1595 }
 0x52d   : > { %v4623_v12 = vpop.eup %4622  ;;  %4271 = vmatpush.xpose.msk.msra.mxu2 %vm759_vm0, %v1596_v11 }
 0x52e   : > { %v1416_v13 = vsel %vm868_vm1, %v4623_v12, 0.0 }
 0x52f   : > { %1417 = vadd.xlane.f32.xlu1 %v1416_v13  ;;  %1423 = vadd.xlane.f32.xlu2 %v1422_v14 }
 0x534   : > { %v1624_v15 = vpop.permute.xlu1 %1623 }
 0x535   : > { %v1594_v16 = vpop.permute.xlu0 %1593  ;;  %4273 = vmatpush.xpose.msk.msrb.mxu3 %vm759_vm0, %v1624_v15 }
 0x53d   : > { %v1622_v17 = vpop.permute.xlu0 %1621 }
 0x545   : > { %v1434_v19 = vpop.permute.xlu0 %1433 }
 0x546   : > { %1454 = vmatpush.msrb.mxu0 %v1434_v19 }
 0x547   : > { %1459 = vrot.lane.b32.xlu2 %v5396_v26, %s5114_s26 }
 0x54d   : > { %v1540_v21 = vpop.permute.xlu0 %1539 }
 0x54e   : > { %4267 = vmatpush.xpose.msk.msra.mxu0 %vm759_vm0, %v1540_v21 }
 0x555   : > { %v1538_v31 = vpop.permute.xlu0 %1537 }
 0x55d   : > { %v1568_v42 = vpop.permute.xlu0 %1567 }
 0x565   : > { %v1566_v48 = vpop.permute.xlu0 %1565 }
 0x57b   : > { %v1421_v18 = vpop.xlane.xlu2 %1420 }
 0x57c   : > { %4624 = vrcp.f32 %v1421_v18 }
 0x582   : > { %v4625_v22 = vpop.eup %4624 }
 0x583   : > { %v1431_v29 = vmul.f32 %v4625_v22, %v4617_v50 }
 0x585   : > { %4265 = vmatmul.msk.f32.vlgmr.msrb.gmra.mxu2 %vm868_vm1, %v1431_v29 }
 0x58d   : > { %4272 = vmatmul.msk.f32.vlgmr.msra.gmra.mxu2 %vm759_vm0, %v1594_v16 }
 0x59a   : > { %v1415_v30 = vpop.xlane.xlu2 %1414 }
 0x59b   : > { %4626 = vrcp.f32 %v1415_v30 }
 0x5a1   : > { %v4627_v34 = vpop.eup %4626 }
 0x5a2   : > { %v1429_v36 = vmul.f32 %v4627_v34, %v4619_v7  ;;  %v1424_v37 = vpop.xlane.xlu2 %1423  ;;  %v1418_v39 = vpop.xlane.xlu1 %1417 }
 0x5a3   : > { %4628 = vrcp.f32 %v1424_v37 }
 0x5a4   : > { %4630 = vrcp.f32 %v1418_v39  ;;  %4263 = vmatmul.msk.f32.vlgmr.msrb.gmra.mxu0 %vm868_vm1, %v1429_v36 }
 0x5a9   : > { %v4629_v40 = vpop.eup %4628 }
 0x5aa   : > { %v4631_v41 = vpop.eup %4630  ;;  %v1432_v45 = vmul.f32 %v4629_v40, %v4621_v10  ;;  %v1460_v46 = vpop.permute.xlu2 %1459 }
 0x5ab   : > { %v1430_v47 = vmul.f32 %v4631_v41, %v4623_v12  ;;  %1480 = vmatpush.msrb.mxu1 %v1460_v46 }
 0x5ac   : > { %4266 = vmatmul.msk.f32.vlgmr.msra.gmra.mxu3 %vm868_vm1, %v1432_v45  ;;  %4268 = vmatmul.msk.f32.vlgmr.msra.gmra.mxu0 %vm759_vm0, %v1538_v31 }
 0x5ad   : > { %4264 = vmatmul.msk.f32.vlgmr.msrb.gmra.mxu1 %vm868_vm1, %v1430_v47 }
 0x5ae   : > { %4269 = vmatpush.xpose.msk.msra.mxu1 %vm759_vm0, %v1568_v42 }
 0x5b4   : > { %4274 = vmatmul.msk.f32.vlgmr.msrb.gmra.mxu3 %vm759_vm0, %v1622_v17 }
 0x5b5   : > { %4270 = vmatmul.msk.f32.vlgmr.msra.gmra.mxu1 %vm759_vm0, %v1566_v48 }
 0x608   : > { %v5536_v49 = vpop.f32.mrf.mxu2 }
 0x610   : > { %v1618_v50 = vpop.f32.mrf.mxu2 }
 0x611   : > { %v1651_v52 = vmul.f32 0.25, %v1618_v50 }
 0x613   : > { %v1659_v54 = vsel %vm868_vm1, %v1651_v52, -inf }
 0x614   : > { %1660 = vmax.xlane.f32.xlu1 %v1659_v54 }
 0x621   : > { %v5539_v55 = vpop.f32.mrf.mxu0 }
 0x629   : > { %v1562_v56 = vpop.f32.mrf.mxu0 }
 0x62a   : > { %v5541_v57 = vpop.f32.mrf.mxu1  ;;  %v1649_v60 = vmul.f32 0.25, %v1562_v56 }
 0x62c   : > { %v1653_v62 = vsel %vm868_vm1, %v1649_v60, -inf }
 0x62d   : > { %1654 = vmax.xlane.f32.xlu0 %v1653_v62 }
 0x62f   : > { %v5544_v63 = vpop.f32.mrf.mxu3 }
 0x632   : > { %v1590_v0 = vpop.f32.mrf.mxu1 }
 0x633   : > { %v1650_v2 = vmul.f32 0.25, %v1590_v0 }
 0x635   : > { %v1656_v4 = vsel %vm868_vm1, %v1650_v2, -inf }
 0x636   : > { %1657 = vmax.xlane.f32.xlu1 %v1656_v4 }
 0x637   : > { %v1646_v6 = vpop.f32.mrf.mxu3 }
 0x638   : > { %v1652_v7 = vmul.f32 0.25, %v1646_v6 }
 0x63a   : > { %v1662_v8 = vsel %vm868_vm1, %v1652_v7, -inf }
 0x63b   : > { %1663 = vmax.xlane.f32.xlu2 %v1662_v8 }
 0x641   : > { %1859 = vrot.lane.b32.xlu0 %v5357_v59, %s5116_s21 }
 0x649   : > { %1697 = vrot.lane.b32.xlu0 %v5389_v23, %s5115_s18 }
 0x651   : > { %1887 = vrot.lane.b32.xlu0 %v5367_v3, %s5116_s21 }
 0x659   : > { %1803 = vrot.lane.b32.xlu0 %v5337_v43, %s5116_s21 }
 0x661   : > { %1801 = vrot.lane.b32.xlu0 %v5339_v44, %s5116_s21 }
 0x669   : > { %1829 = vrot.lane.b32.xlu0 %v5351_v53, %s5116_s21 }
 0x671   : > { %2039 = vrot.lane.b32.xlu0 %v5420_v1, %s5116_s21 }
 0x687   : > { %v1661_v9 = vpop.xlane.xlu1 %1660 }
 0x688   : > { %v1667_v10 = vsub.f32 %v1651_v52, %v1661_v9 }
 0x68a   : > { %v1673_v11 = vmul.f32 1.442695, %v1667_v10 }
 0x68c   : > { %4632 = vpow2.f32 %v1673_v11 }
 0x692   : > { %v4633_v12 = vpop.eup %4632 }
 0x693   : > { %v1683_v13 = vsel %vm868_vm1, %v4633_v12, 0.0 }
 0x694   : > { %1684 = vadd.xlane.f32.xlu1 %v1683_v13 }
 0x6a0   : > { %v1655_v14 = vpop.xlane.xlu0 %1654 }
 0x6a1   : > { %v1665_v15 = vsub.f32 %v1649_v60, %v1655_v14 }
 0x6a3   : > { %v1669_v16 = vmul.f32 1.442695, %v1665_v15 }
 0x6a5   : > { %4634 = vpow2.f32 %v1669_v16 }
 0x6a9   : > { %v1658_v39 = vpop.xlane.xlu1 %1657 }
 0x6aa   : > { %v1666_v40 = vsub.f32 %v1650_v2, %v1658_v39 }
 0x6ab   : > { %v4635_v17 = vpop.eup %4634 }
 0x6ac   : > { %v1677_v19 = vsel %vm868_vm1, %v4635_v17, 0.0  ;;  %v1671_v41 = vmul.f32 1.442695, %v1666_v40 }
 0x6ad   : > { %1678 = vadd.xlane.f32.xlu2 %v1677_v19 }
 0x6ae   : > { %v1664_v21 = vpop.xlane.xlu2 %1663 }
 0x6af   : > { %v1668_v18 = vsub.f32 %v1652_v7, %v1664_v21 }
 0x6b1   : > { %v1675_v22 = vmul.f32 1.442695, %v1668_v18 }
 0x6b3   : > { %4636 = vpow2.f32 %v1675_v22  ;;  %v1860_v29 = vpop.permute.xlu0 %1859 }
 0x6b4   : > { %4638 = vpow2.f32 %v1671_v41 }
 0x6b9   : > { %v4637_v30 = vpop.eup %4636 }
 0x6ba   : > { %v1686_v31 = vsel %vm868_vm1, %v4637_v30, 0.0  ;;  %v4639_v42 = vpop.eup %4638 }
 0x6bb   : > { %v1698_v34 = vpop.permute.xlu0 %1697  ;;  %1687 = vadd.xlane.f32.xlu1 %v1686_v31  ;;  %v1680_v45 = vsel %vm868_vm1, %v4639_v42, 0.0 }
 0x6bc   : > { %1718 = vmatpush.msrb.mxu0 %v1698_v34 }
 0x6c3   : > { %v1888_v36 = vpop.permute.xlu0 %1887 }
 0x6c5   : > { %1857 = vrot.lane.b32.xlu2 %v5359_v61, %s5116_s21 }
 0x6cb   : > { %v1804_v37 = vpop.permute.xlu0 %1803 }
 0x6cc   : > { %4279 = vmatpush.xpose.msk.msra.mxu0 %vm759_vm0, %v1804_v37  ;;  %v5609_v37 = vpack.i.bf16 %v5389_v23, %v5415_v58 }
 0x6cd   : > { %1885 = vrot.lane.b32.xlu2 %v5369_v5, %s5116_s21 }
 0x6d3   : > { %v1802_v52 = vpop.permute.xlu0 %1801 }
 0x6d4   : > { %4489 = vrot.lane.b32.xlu1 %v5448_v35, %s5115_s18 }
 0x6d5   : > { %1723 = vrot.lane.b32.xlu2 %v5396_v26, %s5115_s18 }
 0x6db   : > { %v1830_v0 = vpop.permute.xlu0 %1829 }
 0x6dd   : > { %1831 = vrot.lane.b32.xlu2 %v5349_v51, %s5116_s21 }
 0x6e3   : > { %v2040_v11 = vpop.permute.xlu0 %2039 }
 0x6fe   : > { %1681 = vadd.xlane.f32.xlu1 %v1680_v45 }
 0x707   : > { %v1685_v54 = vpop.xlane.xlu1 %1684 }
 0x720   : > { %v1679_v46 = vpop.xlane.xlu2 %1678 }
 0x721   : > { %4640 = vrcp.f32 %v1679_v46 }
 0x722   : > { %4642 = vrcp.f32 %v1685_v54 }
 0x727   : > { %v4641_v47 = vpop.eup %4640 }
 0x728   : > { %v1693_v48 = vmul.f32 %v4641_v47, %v4635_v17  ;;  %v1858_v50 = vpop.permute.xlu2 %1857  ;;  %v4643_v2 = vpop.eup %4642 }
 0x729   : > { %v1695_v9 = vmul.f32 %v4643_v2, %v4633_v12 }
 0x72a   : > { %4275 = vmatmul.msk.f32.vlgmr.msrb.gmra.mxu0 %vm868_vm1, %v1693_v48 }
 0x72e   : > { %v1688_v60 = vpop.xlane.xlu1 %1687 }
 0x72f   : > { %4644 = vrcp.f32 %v1688_v60 }
 0x730   : > { %v1886_v35 = vpop.permute.xlu2 %1885 }
 0x732   : > { %4280 = vmatmul.msk.f32.vlgmr.msra.gmra.mxu0 %vm759_vm0, %v1802_v52 }
 0x735   : > { %v4645_v4 = vpop.eup %4644 }
 0x736   : > { %v1696_v10 = vmul.f32 %v4645_v4, %v4637_v30 }
 0x738   : > { %v1724_v56 = vpop.permute.xlu2 %1723 }
 0x739   : > { %1744 = vmatpush.msrb.mxu1 %v1724_v56 }
 0x740   : > { %v1832_v62 = vpop.permute.xlu2 %1831 }
 0x741   : > { %4281 = vmatpush.xpose.msk.msra.mxu1 %vm759_vm0, %v1832_v62 }
 0x746   : > { %v4490_v6 = vpop.permute.xlu1 %4489 }
 0x747   : > { %v4492_v7 = vunpack.i.h.bf16 %v4490_v6  ;;  %v4491_v8 = vunpack.i.l.bf16 %v4490_v6 }
 0x749   : > { %1770 = vmatpush.msrb.mxu2 %v4491_v8  ;;  %1796 = vmatpush.msra.mxu3 %v4492_v7 }
 0x74a   : > { %4277 = vmatmul.msk.f32.vlgmr.msrb.gmra.mxu2 %vm868_vm1, %v1695_v9  ;;  %4278 = vmatmul.msk.f32.vlgmr.msra.gmra.mxu3 %vm868_vm1, %v1696_v10 }
 0x74b   : > { %4283 = vmatpush.xpose.msk.msra.mxu2 %vm759_vm0, %v1860_v29  ;;  %4285 = vmatpush.xpose.msk.msrb.mxu3 %vm759_vm0, %v1888_v36 }
 0x74f   : > { %2060 = vmatpush.msra.mxu3 %v2040_v11 }
 0x752   : > { %4284 = vmatmul.msk.f32.vlgmr.msra.gmra.mxu2 %vm759_vm0, %v1858_v50  ;;  %4286 = vmatmul.msk.f32.vlgmr.msrb.gmra.mxu3 %vm759_vm0, %v1886_v35 }
 0x771   : > { %v1682_v13 = vpop.xlane.xlu1 %1681 }
 0x772   : > { %4646 = vrcp.f32 %v1682_v13 }
 0x778   : > { %v4647_v12 = vpop.eup %4646 }
 0x779   : > { %v1694_v14 = vmul.f32 %v4647_v12, %v4639_v42 }
 0x77b   : > { %4276 = vmatmul.msk.f32.vlgmr.msrb.gmra.mxu1 %vm868_vm1, %v1694_v14 }
 0x783   : > { %4282 = vmatmul.msk.f32.vlgmr.msra.gmra.mxu1 %vm759_vm0, %v1830_v0 }
 0x7a7   : > { %v5588_v15 = vpop.f32.mrf.mxu0 }
 0x7af   : > { %v1826_v16 = vpop.f32.mrf.mxu0 }
 0x7b0   : > { %v1913_v17 = vmul.f32 0.25, %v1826_v16 }
 0x7b2   : > { %v1917_v19 = vsel %vm868_vm1, %v1913_v17, -inf }
 0x7b3   : > { %1918 = vmax.xlane.f32.xlu2 %v1917_v19 }
 0x7cb   : > { %2123 = vrot.lane.b32.xlu2 %v5357_v59, %s5117_s7 }
 0x7cd   : > { %v5593_v21 = vpop.f32.mrf.mxu2  ;;  %v5595_v18 = vpop.f32.mrf.mxu3 }
 0x7d3   : > { %2067 = vrot.lane.b32.xlu2 %v5337_v43, %s5117_s7 }
 0x7d5   : > { %v1882_v22 = vpop.f32.mrf.mxu2  ;;  %v1910_v29 = vpop.f32.mrf.mxu3 }
 0x7d6   : > { %v1915_v30 = vmul.f32 0.25, %v1882_v22  ;;  %v1916_v31 = vmul.f32 0.25, %v1910_v29 }
 0x7d8   : > { %v1926_v34 = vsel %vm868_vm1, %v1916_v31, -inf  ;;  %v1923_v36 = vsel %vm868_vm1, %v1915_v30, -inf }
 0x7d9   : > { %1927 = vmax.xlane.f32.xlu0 %v1926_v34  ;;  %1924 = vmax.xlane.f32.xlu1 %v1923_v36 }
 0x7db   : > { %1987 = vrot.lane.b32.xlu2 %v5396_v26, %s5116_s21 }
 0x7e3   : > { %2095 = vrot.lane.b32.xlu2 %v5349_v51, %s5117_s7 }
 0x7ed   : > { %2065 = vrot.lane.b32.xlu0 %v5339_v44, %s5117_s7 }
 0x7f2   : > { %4494 = vrot.lane.b32.xlu1 %v5609_v37, %s5116_s21 }
 0x7f8   : > { %v5617_v56 = vpop.f32.mrf.mxu1 }
 0x7fa   : > { %2121 = vrot.lane.b32.xlu1 %v5359_v61, %s5117_s7 }
 0x800   : > { %v1854_v0 = vpop.f32.mrf.mxu1 }
 0x801   : > { %v1914_v2 = vmul.f32 0.25, %v1854_v0 }
 0x803   : > { %v1920_v4 = vsel %vm868_vm1, %v1914_v2, -inf }
 0x826   : > { %v1919_v39 = vpop.xlane.xlu2 %1918 }
 0x827   : > { %v1929_v40 = vsub.f32 %v1913_v17, %v1919_v39 }
 0x829   : > { %v1933_v41 = vmul.f32 1.442695, %v1929_v40 }
 0x82b   : > { %4648 = vpow2.f32 %v1933_v41 }
 0x82e   : > { %v2124_v42 = vpop.permute.xlu2 %2123 }
 0x831   : > { %v4649_v45 = vpop.eup %4648 }
 0x832   : > { %v1941_v46 = vsel %vm868_vm1, %v4649_v45, 0.0 }
 0x833   : > { %1942 = vadd.xlane.f32.xlu1 %v1941_v46 }
 0x836   : > { %v2068_v47 = vpop.permute.xlu2 %2067 }
 0x83e   : > { %v1988_v48 = vpop.permute.xlu2 %1987 }
 0x83f   : > { %2008 = vmatpush.msrb.mxu1 %v1988_v48 }
 0x846   : > { %v2096_v50 = vpop.permute.xlu2 %2095 }
 0x847   : > { %4293 = vmatpush.xpose.msk.msra.mxu1 %vm759_vm0, %v2096_v50 }
 0x84c   : > { %v1925_v35 = vpop.xlane.xlu1 %1924  ;;  %v1928_v9 = vpop.xlane.xlu0 %1927 }
 0x84d   : > { %v1931_v52 = vsub.f32 %v1915_v30, %v1925_v35  ;;  %v1932_v10 = vsub.f32 %v1916_v31, %v1928_v9 }
 0x84f   : > { %v1937_v54 = vmul.f32 1.442695, %v1931_v52  ;;  %v1939_v11 = vmul.f32 1.442695, %v1932_v10 }
 0x851   : > { %4650 = vpow2.f32 %v1937_v54 }
 0x852   : > { %4652 = vpow2.f32 %v1939_v11 }
 0x857   : > { %v4651_v60 = vpop.eup %4650 }
 0x858   : > { %v1947_v62 = vsel %vm868_vm1, %v4651_v60, 0.0  ;;  %v4653_v12 = vpop.eup %4652 }
 0x859   : > { %1948 = vadd.xlane.f32.xlu1 %v1947_v62  ;;  %v1950_v14 = vsel %vm868_vm1, %v4653_v12, 0.0 }
 0x85f   : > { %v2066_v22 = vpop.permute.xlu0 %2065 }
 0x861   : > { %1921 = vmax.xlane.f32.xlu1 %v1920_v4 }
 0x864   : > { %v4495_v6 = vpop.permute.xlu1 %4494 }
 0x865   : > { %v4497_v7 = vunpack.i.h.bf16 %v4495_v6  ;;  %v4496_v8 = vunpack.i.l.bf16 %v4495_v6 }
 0x867   : > { %1982 = vmatpush.msrb.mxu0 %v4497_v7  ;;  %2034 = vmatpush.msrb.mxu2 %v4496_v8 }
 0x869   : > { %4291 = vmatpush.xpose.msk.msra.mxu0 %vm759_vm0, %v2068_v47  ;;  %4295 = vmatpush.xpose.msk.msra.mxu2 %vm759_vm0, %v2124_v42 }
 0x86c   : > { %v2122_v13 = vpop.permute.xlu1 %2121 }
 0x87a   : > { %2151 = vrot.lane.b32.xlu1 %v5367_v3, %s5117_s7 }
 0x8a4   : > { %1951 = vadd.xlane.f32.xlu1 %v1950_v14 }
 0x8a6   : > { %v1943_v16 = vpop.xlane.xlu1 %1942 }
 0x8a7   : > { %4654 = vrcp.f32 %v1943_v16 }
 0x8ad   : > { %v4655_v17 = vpop.eup %4654 }
 0x8ae   : > { %v1957_v19 = vmul.f32 %v4655_v17, %v4649_v45  ;;  %v4503_v45 = vpack.i.bf16 %v5396_v26, %v5420_v1 }
 0x8b0   : > { %4287 = vmatmul.msk.f32.vlgmr.msrb.gmra.mxu0 %vm868_vm1, %v1957_v19 }
 0x8b8   : > { %4292 = vmatmul.msk.f32.vlgmr.msra.gmra.mxu0 %vm759_vm0, %v2066_v22 }
 0x8bd   : > { %2149 = vrot.lane.b32.xlu1 %v5369_v5, %s5117_s7 }
 0x8cc   : > { %v1949_v29 = vpop.xlane.xlu1 %1948 }
 0x8cd   : > { %4656 = vrcp.f32 %v1949_v29 }
 0x8d3   : > { %v4657_v30 = vpop.eup %4656 }
 0x8d4   : > { %v1959_v31 = vmul.f32 %v4657_v30, %v4651_v60  ;;  %v1922_v34 = vpop.xlane.xlu1 %1921 }
 0x8d5   : > { %v1930_v36 = vsub.f32 %v1914_v2, %v1922_v34 }
 0x8d6   : > { %4289 = vmatmul.msk.f32.vlgmr.msrb.gmra.mxu2 %vm868_vm1, %v1959_v31 }
 0x8d7   : > { %v1935_v39 = vmul.f32 1.442695, %v1930_v36 }
 0x8d9   : > { %4658 = vpow2.f32 %v1935_v39 }
 0x8de   : > { %4296 = vmatmul.msk.f32.vlgmr.msra.gmra.mxu2 %vm759_vm0, %v2122_v13 }
 0x8df   : > { %v4659_v40 = vpop.eup %4658 }
 0x8e0   : > { %v1944_v41 = vsel %vm868_vm1, %v4659_v40, 0.0 }
 0x8e1   : > { %1945 = vadd.xlane.f32.xlu0 %v1944_v41 }
 0x8ec   : > { %v2152_v42 = vpop.permute.xlu1 %2151 }
 0x8ed   : > { %4297 = vmatpush.xpose.msk.msrb.mxu3 %vm759_vm0, %v2152_v42 }
 0x8f5   : > { %2093 = vrot.lane.b32.xlu0 %v5351_v53, %s5117_s7 }
 0x8fd   : > { %4504 = vrot.lane.b32.xlu0 %v4503_v45, %s5117_s7 }
 0x917   : > { %v1952_v46 = vpop.xlane.xlu1 %1951 }
 0x918   : > { %4660 = vrcp.f32 %v1952_v46 }
 0x91e   : > { %v4661_v47 = vpop.eup %4660 }
 0x91f   : > { %v1960_v48 = vmul.f32 %v4661_v47, %v4653_v12 }
 0x921   : > { %4290 = vmatmul.msk.f32.vlgmr.msra.gmra.mxu3 %vm868_vm1, %v1960_v48 }
 0x92d   : > { %v5640_v50 = vpop.f32.mrf.mxu0 }
 0x92f   : > { %v2150_v35 = vpop.permute.xlu1 %2149 }
 0x930   : > { %4298 = vmatmul.msk.f32.vlgmr.msrb.gmra.mxu3 %vm759_vm0, %v2150_v35 }
 0x935   : > { %v2090_v52 = vpop.f32.mrf.mxu0 }
 0x936   : > { %v2177_v54 = vmul.f32 0.25, %v2090_v52 }
 0x938   : > { %v2181_v60 = vsel %vm868_vm1, %v2177_v54, -inf }
 0x939   : > { %2182 = vmax.xlane.f32.xlu2 %v2181_v60  ;;  %v4513_v60 = vpack.i.bf16 %v5420_v1, %v5396_v26 }
 0x951   : > { %2387 = vrot.lane.b32.xlu2 %v5357_v59, %s5118_s23 }
 0x954   : > { %v1946_v62 = vpop.xlane.xlu0 %1945 }
 0x955   : > { %4662 = vrcp.f32 %v1946_v62 }
 0x959   : > { %v5646_v0 = vpop.f32.mrf.mxu2 }
 0x95b   : > { %v4663_v2 = vpop.eup %4662 }
 0x95c   : > { %v1958_v4 = vmul.f32 %v4663_v2, %v4659_v40 }
 0x95e   : > { %4288 = vmatmul.msk.f32.vlgmr.msrb.gmra.mxu1 %vm868_vm1, %v1958_v4 }
 0x961   : > { %v2146_v6 = vpop.f32.mrf.mxu2 }
 0x962   : > { %v2179_v7 = vmul.f32 0.25, %v2146_v6 }
 0x964   : > { %v2187_v8 = vsel %vm868_vm1, %v2179_v7, -inf }
 0x965   : > { %2188 = vmax.xlane.f32.xlu1 %v2187_v8 }
 0x967   : > { %v2094_v9 = vpop.permute.xlu0 %2093 }
 0x968   : > { %4294 = vmatmul.msk.f32.vlgmr.msra.gmra.mxu1 %vm759_vm0, %v2094_v9 }
 0x96f   : > { %v4505_v10 = vpop.permute.xlu0 %4504 }
 0x970   : > { %v4507_v11 = vunpack.i.h.bf16 %v4505_v10  ;;  %v4506_v13 = vunpack.i.l.bf16 %v4505_v10 }
 0x972   : > { %2272 = vmatpush.msrb.mxu1 %v4507_v11  ;;  %2324 = vmatpush.msra.mxu3 %v4506_v13 }
 0x97e   : > { %4499 = vrot.lane.b32.xlu1 %v5609_v37, %s5117_s7 }
 0x986   : > { %2331 = vrot.lane.b32.xlu1 %v5337_v43, %s5118_s23 }
 0x9a4   : > { %v5655_v17 = vpop.f32.mrf.mxu3 }
 0x9ac   : > { %v2183_v12 = vpop.xlane.xlu2 %2182 }
 0x9ad   : > { %v2193_v14 = vsub.f32 %v2177_v54, %v2183_v12 }
 0x9af   : > { %v2197_v16 = vmul.f32 1.442695, %v2193_v14 }
 0x9b1   : > { %4664 = vpow2.f32 %v2197_v16 }
 0x9b3   : > { %v2174_v29 = vpop.f32.mrf.mxu3 }
 0x9b4   : > { %v2180_v30 = vmul.f32 0.25, %v2174_v29  ;;  %v2388_v52 = vpop.permute.xlu2 %2387 }
 0x9b6   : > { %v2190_v31 = vsel %vm868_vm1, %v2180_v30, -inf }
 0x9b7   : > { %v4665_v19 = vpop.eup %4664 }
 0x9b8   : > { %v2205_v22 = vsel %vm868_vm1, %v4665_v19, 0.0 }
 0x9b9   : > { %2206 = vadd.xlane.f32.xlu0 %v2205_v22 }
 0x9c1   : > { %2191 = vmax.xlane.f32.xlu0 %v2190_v31 }
 0x9d5   : > { %2329 = vrot.lane.b32.xlu0 %v5339_v44, %s5118_s23 }
 0x9d8   : > { %v2189_v37 = vpop.xlane.xlu1 %2188 }
 0x9d9   : > { %v2195_v34 = vsub.f32 %v2179_v7, %v2189_v37 }
 0x9db   : > { %v2201_v36 = vmul.f32 1.442695, %v2195_v34  ;;  %v5661_v39 = vpop.f32.mrf.mxu1 }
 0x9dd   : > { %4666 = vpow2.f32 %v2201_v36 }
 0x9e3   : > { %v4667_v40 = vpop.eup %4666 }
 0x9e4   : > { %v2211_v41 = vsel %vm868_vm1, %v4667_v40, 0.0 }
 0x9e5   : > { %v2118_v42 = vpop.f32.mrf.mxu1  ;;  %2212 = vadd.xlane.f32.xlu1 %v2211_v41 }
 0x9e6   : > { %v2178_v45 = vmul.f32 0.25, %v2118_v42 }
 0x9e8   : > { %v2184_v46 = vsel %vm868_vm1, %v2178_v45, -inf }
 0x9e9   : > { %2185 = vmax.xlane.f32.xlu2 %v2184_v46 }
 0x9f0   : > { %v4500_v47 = vpop.permute.xlu1 %4499 }
 0x9f1   : > { %v4502_v48 = vunpack.i.h.bf16 %v4500_v47  ;;  %v4501_v35 = vunpack.i.l.bf16 %v4500_v47 }
 0x9f3   : > { %2246 = vmatpush.msrb.mxu0 %v4502_v48  ;;  %2298 = vmatpush.msrb.mxu2 %v4501_v35 }
 0x9f5   : > { %4307 = vmatpush.xpose.msk.msra.mxu2 %vm759_vm0, %v2388_v52 }
 0x9f8   : > { %v2332_v54 = vpop.permute.xlu1 %2331 }
 0x9f9   : > { %4303 = vmatpush.xpose.msk.msra.mxu0 %vm759_vm0, %v2332_v54 }
 0x9fe   : > { %2415 = vrot.lane.b32.xlu1 %v5367_v3, %s5118_s23 }
 0xa01   : > { %2385 = vrot.lane.b32.xlu2 %v5359_v61, %s5118_s23 }
 0xa06   : > { %2357 = vrot.lane.b32.xlu1 %v5351_v53, %s5118_s23 }
 0xa0e   : > { %4514 = vrot.lane.b32.xlu1 %v4513_v60, %s5118_s23 }
 0xa2c   : > { %v2207_v62 = vpop.xlane.xlu0 %2206 }
 0xa2d   : > { %4668 = vrcp.f32 %v2207_v62 }
 0xa33   : > { %v4669_v2 = vpop.eup %4668 }
 0xa34   : > { %v2221_v4 = vmul.f32 %v4669_v2, %v4665_v19  ;;  %v2192_v6 = vpop.xlane.xlu0 %2191 }
 0xa35   : > { %v2196_v7 = vsub.f32 %v2180_v30, %v2192_v6 }
 0xa36   : > { %4299 = vmatmul.msk.f32.vlgmr.msrb.gmra.mxu0 %vm868_vm1, %v2221_v4 }
 0xa37   : > { %v2203_v8 = vmul.f32 1.442695, %v2196_v7 }
 0xa39   : > { %4670 = vpow2.f32 %v2203_v8 }
 0xa3f   : > { %v4671_v9 = vpop.eup %4670 }
 0xa40   : > { %v2214_v10 = vsel %vm868_vm1, %v4671_v9, 0.0 }
 0xa41   : > { %2215 = vadd.xlane.f32.xlu2 %v2214_v10 }
 0xa47   : > { %v2330_v11 = vpop.permute.xlu0 %2329 }
 0xa48   : > { %4304 = vmatmul.msk.f32.vlgmr.msra.gmra.mxu0 %vm759_vm0, %v2330_v11 }
 0xa58   : > { %v2213_v13 = vpop.xlane.xlu1 %2212 }
 0xa59   : > { %2359 = vrot.lane.b32.xlu2 %v5349_v51, %s5118_s23  ;;  %4672 = vrcp.f32 %v2213_v13 }
 0xa5c   : > { %v2186_v12 = vpop.xlane.xlu2 %2185 }
 0xa5d   : > { %v2194_v14 = vsub.f32 %v2178_v45, %v2186_v12 }
 0xa5f   : > { %v4673_v16 = vpop.eup %4672  ;;  %v2199_v19 = vmul.f32 1.442695, %v2194_v14 }
 0xa60   : > { %v2223_v22 = vmul.f32 %v4673_v16, %v4667_v40 }
 0xa61   : > { %4674 = vpow2.f32 %v2199_v19 }
 0xa62   : > { %4301 = vmatmul.msk.f32.vlgmr.msrb.gmra.mxu2 %vm868_vm1, %v2223_v22 }
 0xa64   : > { %v2386_v31 = vpop.permute.xlu2 %2385 }
 0xa67   : > { %v4675_v29 = vpop.eup %4674 }
 0xa68   : > { %v2208_v30 = vsel %vm868_vm1, %v4675_v29, 0.0 }
 0xa69   : > { %2209 = vadd.xlane.f32.xlu0 %v2208_v30 }
 0xa6a   : > { %4308 = vmatmul.msk.f32.vlgmr.msra.gmra.mxu2 %vm759_vm0, %v2386_v31 }
 0xa70   : > { %v2416_v37 = vpop.permute.xlu1 %2415 }
 0xa71   : > { %4309 = vmatpush.xpose.msk.msrb.mxu3 %vm759_vm0, %v2416_v37 }
 0xa78   : > { %v2358_v34 = vpop.permute.xlu1 %2357 }
 0xa7d   : > { %2413 = vrot.lane.b32.xlu0 %v5369_v5, %s5118_s23 }
 0xa80   : > { %v4515_v40 = vpop.permute.xlu1 %4514 }
 0xa81   : > { %v4517_v46 = vunpack.i.h.bf16 %v4515_v40  ;;  %v4516_v2 = vunpack.i.l.bf16 %v4515_v40 }
 0xab3   : > { %v5687_v47 = vpop.f32.mrf.mxu0 }
 0xab4   : > { %v2216_v36 = vpop.xlane.xlu2 %2215 }
 0xab5   : > { %4676 = vrcp.f32 %v2216_v36 }
 0xabb   : > { %v4677_v41 = vpop.eup %4676 }
 0xabc   : > { %v2224_v42 = vmul.f32 %v4677_v41, %v4671_v9  ;;  %v2360_v45 = vpop.permute.xlu2 %2359 }
 0xabd   : > { %4305 = vmatpush.xpose.msk.msra.mxu1 %vm759_vm0, %v2360_v45 }
 0xabe   : > { %4302 = vmatmul.msk.f32.vlgmr.msra.gmra.mxu3 %vm868_vm1, %v2224_v42 }
 0xabf   : > { %2588 = vmatpush.msra.mxu3 %v4517_v46 }
 0xac5   : > { %v2354_v48 = vpop.f32.mrf.mxu0 }
 0xac6   : > { %v2441_v35 = vmul.f32 0.25, %v2354_v48 }
 0xac8   : > { %v2445_v52 = vsel %vm868_vm1, %v2441_v35, -inf }
 0xac9   : > { %2446 = vmax.xlane.f32.xlu2 %v2445_v52 }
 0xadc   : > { %v2210_v54 = vpop.xlane.xlu0 %2209 }
 0xadd   : > { %4678 = vrcp.f32 %v2210_v54 }
 0xae1   : > { %2595 = vrot.lane.b32.xlu2 %v5337_v43, %s5119_s27  ;;  %v4508_v43 = vpack.i.bf16 %v5415_v58, %v5389_v23 }
 0xae3   : > { %v4679_v60 = vpop.eup %4678 }
 0xae4   : > { %v2222_v62 = vmul.f32 %v4679_v60, %v4675_v29 }
 0xae5   : > { %v5694_v4 = vpop.f32.mrf.mxu2 }
 0xae6   : > { %4300 = vmatmul.msk.f32.vlgmr.msrb.gmra.mxu1 %vm868_vm1, %v2222_v62 }
 0xae7   : > { %2536 = vmatpush.msrb.mxu1 %v4516_v2 }
 0xaed   : > { %v2410_v6 = vpop.f32.mrf.mxu2 }
 0xaee   : > { %v2443_v7 = vmul.f32 0.25, %v2410_v6  ;;  %4306 = vmatmul.msk.f32.vlgmr.msra.gmra.mxu1 %vm759_vm0, %v2358_v34 }
 0xaef   : > { %v2414_v8 = vpop.permute.xlu0 %2413 }
 0xaf0   : > { %4310 = vmatmul.msk.f32.vlgmr.msrb.gmra.mxu3 %vm759_vm0, %v2414_v8  ;;  %v2451_v9 = vsel %vm868_vm1, %v2443_v7, -inf }
 0xaf1   : > { %2452 = vmax.xlane.f32.xlu0 %v2451_v9 }
 0xb05   : > { %4509 = vrot.lane.b32.xlu0 %v4508_v43, %s5118_s23 }
 0xb0d   : > { %2593 = vrot.lane.b32.xlu0 %v5339_v44, %s5119_s27 }
 0xb15   : > { %2651 = vrot.lane.b32.xlu0 %v5357_v59, %s5119_s27 }
 0xb3c   : > { %v2447_v10 = vpop.xlane.xlu2 %2446 }
 0xb3d   : > { %v2457_v11 = vsub.f32 %v2441_v35, %v2447_v10 }
 0xb3f   : > { %v2461_v13 = vmul.f32 1.442695, %v2457_v11 }
 0xb41   : > { %4680 = vpow2.f32 %v2461_v13  ;;  %v5712_v44 = vpop.f32.mrf.mxu3 }
 0xb44   : > { %v2596_v46 = vpop.permute.xlu2 %2595 }
 0xb47   : > { %v4681_v12 = vpop.eup %4680 }
 0xb48   : > { %v2469_v14 = vsel %vm868_vm1, %v4681_v12, 0.0 }
 0xb49   : > { %2470 = vadd.xlane.f32.xlu0 %v2469_v14 }
 0xb5d   : > { %2621 = vrot.lane.b32.xlu0 %v5351_v53, %s5119_s27 }
 0xb63   : > { %v5710_v22 = vpop.f32.mrf.mxu1 }
 0xb64   : > { %v2453_v16 = vpop.xlane.xlu0 %2452 }
 0xb65   : > { %v2459_v19 = vsub.f32 %v2443_v7, %v2453_v16 }
 0xb67   : > { %v2465_v29 = vmul.f32 1.442695, %v2459_v19 }
 0xb69   : > { %4682 = vpow2.f32 %v2465_v29 }
 0xb6b   : > { %v2382_v31 = vpop.f32.mrf.mxu1 }
 0xb6c   : > { %v2442_v34 = vmul.f32 0.25, %v2382_v31 }
 0xb6e   : > { %v2448_v45 = vsel %vm868_vm1, %v2442_v34, -inf }
 0xb6f   : > { %v4683_v59 = vpop.eup %4682 }
 0xb70   : > { %v2475_v30 = vsel %vm868_vm1, %v4683_v59, 0.0 }
 0xb71   : > { %2476 = vadd.xlane.f32.xlu1 %v2475_v30 }
 0xb73   : > { %v2438_v37 = vpop.f32.mrf.mxu3 }
 0xb74   : > { %v2444_v36 = vmul.f32 0.25, %v2438_v37 }
 0xb76   : > { %v2454_v40 = vsel %vm868_vm1, %v2444_v36, -inf }
 0xb77   : > { %2455 = vmax.xlane.f32.xlu2 %v2454_v40  ;;  %v4510_v53 = vpop.permute.xlu0 %4509 }
 0xb78   : > { %v4512_v41 = vunpack.i.h.bf16 %v4510_v53  ;;  %v4511_v42 = vunpack.i.l.bf16 %v4510_v53 }
 0xb79   : > { %2449 = vmax.xlane.f32.xlu1 %v2448_v45 }
 0xb7a   : > { %2510 = vmatpush.msrb.mxu0 %v4511_v42  ;;  %2562 = vmatpush.msrb.mxu2 %v4512_v41 }
 0xb7c   : > { %4315 = vmatpush.xpose.msk.msra.mxu0 %vm759_vm0, %v2596_v46 }
 0xb7f   : > { %v2594_v48 = vpop.permute.xlu0 %2593 }
 0xb87   : > { %v2652_v35 = vpop.permute.xlu0 %2651 }
 0xb88   : > { %4319 = vmatpush.xpose.msk.msra.mxu2 %vm759_vm0, %v2652_v35 }
 0xb8f   : > { %2649 = vrot.lane.b32.xlu2 %v5359_v61, %s5119_s27 }
 0xb92   : > { %2623 = vrot.lane.b32.xlu1 %v5349_v51, %s5119_s27 }
 0xbbc   : > { %v2471_v52 = vpop.xlane.xlu0 %2470 }
 0xbbd   : > { %4684 = vrcp.f32 %v2471_v52 }
 0xbc3   : > { %v4685_v54 = vpop.eup %4684 }
 0xbc4   : > { %v2485_v60 = vmul.f32 %v4685_v54, %v4681_v12 }
 0xbc6   : > { %4311 = vmatmul.msk.f32.vlgmr.msrb.gmra.mxu0 %vm868_vm1, %v2485_v60 }
 0xbce   : > { %4316 = vmatmul.msk.f32.vlgmr.msra.gmra.mxu0 %vm759_vm0, %v2594_v48 }
 0xbcf   : > { %v2622_v46 = vpop.permute.xlu0 %2621 }
 0xbe4   : > { %v2477_v62 = vpop.xlane.xlu1 %2476 }
 0xbe5   : > { %4686 = vrcp.f32 %v2477_v62 }
 0xbea   : > { %v2456_v2 = vpop.xlane.xlu2 %2455 }
 0xbeb   : > { %v4687_v6 = vpop.eup %4686  ;;  %v2460_v7 = vsub.f32 %v2444_v36, %v2456_v2 }
 0xbec   : > { %v2487_v8 = vmul.f32 %v4687_v6, %v4683_v59  ;;  %v2450_v9 = vpop.xlane.xlu1 %2449 }
 0xbed   : > { %v2467_v43 = vmul.f32 1.442695, %v2460_v7  ;;  %v2458_v61 = vsub.f32 %v2442_v34, %v2450_v9 }
 0xbee   : > { %4313 = vmatmul.msk.f32.vlgmr.msrb.gmra.mxu2 %vm868_vm1, %v2487_v8 }
 0xbef   : > { %4688 = vpow2.f32 %v2467_v43  ;;  %v2463_v51 = vmul.f32 1.442695, %v2458_v61 }
 0xbf1   : > { %4690 = vpow2.f32 %v2463_v51 }
 0xbf2   : > { %v2650_v11 = vpop.permute.xlu2 %2649 }
 0xbf5   : > { %v4689_v10 = vpop.eup %4688 }
 0xbf6   : > { %4320 = vmatmul.msk.f32.vlgmr.msra.gmra.mxu2 %vm759_vm0, %v2650_v11  ;;  %v2478_v13 = vsel %vm868_vm1, %v4689_v10, 0.0 }
 0xbf7   : > { %v4691_v12 = vpop.eup %4690  ;;  %2479 = vadd.xlane.f32.xlu1 %v2478_v13 }
 0xbf8   : > { %v2472_v14 = vsel %vm868_vm1, %v4691_v12, 0.0 }
 0xbf9   : > { %2473 = vadd.xlane.f32.xlu2 %v2472_v14 }
 0xc04   : > { %v2624_v16 = vpop.permute.xlu1 %2623 }
 0xc05   : > { %4317 = vmatpush.xpose.msk.msra.mxu1 %vm759_vm0, %v2624_v16  ;;  %v4518_v16 = vpack.i.bf16 %v5396_v26, %v5389_v23  ;;  %v4538_v23 = vpack.i.bf16 %v5661_v39, %v5640_v50 }
 0xc10   : > { %2677 = vrot.lane.b32.xlu1 %v5369_v5, %s5119_s27 }
 0xc11   : > { %2679 = vrot.lane.b32.xlu2 %v5367_v3, %s5119_s27 }
 0xc43   : > { %v2512_v19 = vpop.f32.mrf.mxu0 }
 0xc4b   : > { %v2618_v29 = vpop.f32.mrf.mxu0 }
 0xc4c   : > { %v2705_v59 = vmul.f32 0.25, %v2618_v29  ;;  %v4523_v29 = vpack.i.bf16 %v5494_v38, %v5491_v33 }
 0xc4e   : > { %v2709_v30 = vsel %vm868_vm1, %v2705_v59, -inf }
 0xc4f   : > { %2710 = vmax.xlane.f32.xlu0 %v2709_v30  ;;  %v4533_v30 = vpack.i.bf16 %v5617_v56, %v5588_v15 }
 0xc6a   : > { %v2480_v31 = vpop.xlane.xlu1 %2479 }
 0xc6b   : > { %4692 = vrcp.f32 %v2480_v31 }
 0xc6c   : > { %v2474_v37 = vpop.xlane.xlu2 %2473 }
 0xc6d   : > { %4694 = vrcp.f32 %v2474_v37 }
 0xc71   : > { %v4693_v34 = vpop.eup %4692  ;;  %v5735_v36 = vpop.f32.mrf.mxu2 }
 0xc72   : > { %v2488_v40 = vmul.f32 %v4693_v34, %v4689_v10 }
 0xc73   : > { %v4695_v53 = vpop.eup %4694 }
 0xc74   : > { %v2486_v41 = vmul.f32 %v4695_v53, %v4691_v12  ;;  %v2680_v5 = vpop.permute.xlu2 %2679  ;;  %4314 = vmatmul.msk.f32.vlgmr.msra.gmra.mxu3 %vm868_vm1, %v2488_v40 }
 0xc75   : > { %4321 = vmatpush.xpose.msk.msrb.mxu3 %vm759_vm0, %v2680_v5 }
 0xc76   : > { %4312 = vmatmul.msk.f32.vlgmr.msrb.gmra.mxu1 %vm868_vm1, %v2486_v41 }
 0xc79   : > { %v2674_v3 = vpop.f32.mrf.mxu2 }
 0xc7a   : > { %v2707_v42 = vmul.f32 0.25, %v2674_v3  ;;  %v4543_v3 = vpack.i.bf16 %v5710_v22, %v5687_v47 }
 0xc7c   : > { %v2715_v45 = vsel %vm868_vm1, %v2707_v42, -inf }
 0xc7d   : > { %2716 = vmax.xlane.f32.xlu1 %v2715_v45  ;;  %v4573_v45 = vpack.i.bf16 %v5655_v17, %v5646_v0 }
 0xc7e   : > { %4318 = vmatmul.msk.f32.vlgmr.msra.gmra.mxu1 %vm759_vm0, %v2622_v46 }
 0xc82   : > { %v2678_v48 = vpop.permute.xlu1 %2677 }
 0xc83   : > { %4322 = vmatmul.msk.f32.vlgmr.msrb.gmra.mxu3 %vm759_vm0, %v2678_v48 }
 0xcc2   : > { %v2711_v35 = vpop.xlane.xlu0 %2710 }
 0xcc3   : > { %v2721_v54 = vsub.f32 %v2705_v59, %v2711_v35  ;;  %v4528_v59 = vpack.i.bf16 %v5541_v57, %v5539_v55 }
 0xcc5   : > { %v2725_v60 = vmul.f32 1.442695, %v2721_v54  ;;  %v3018_v54 = vld [vmem:[#allocation4 + $0x78] sm:$0xff] }
 0xcc7   : > { %4696 = vpow2.f32 %v2725_v60  ;;  %v3017_v60 = vld [vmem:[#allocation4 + $0x70] sm:$0xff] }
 0xccd   : > { %v4697_v61 = vpop.eup %4696 }
 0xcce   : > { %v2733_v10 = vsel %vm868_vm1, %v4697_v61, 0.0 }
 0xcf0   : > { %v2717_v62 = vpop.xlane.xlu1 %2716 }
 0xcf1   : > { %v2723_v7 = vsub.f32 %v2707_v42, %v2717_v62  ;;  %v4553_v42 = vpack.i.bf16 %v5489_v32, %v5486_v25  ;;  %v3016_v62 = vld [vmem:[#allocation4 + $0x68] sm:$0xff] }
 0xcf3   : > { %v2538_v52 = vpop.f32.mrf.mxu1  ;;  %v2729_v43 = vmul.f32 1.442695, %v2723_v7  ;;  %v4568_v7 = vpack.i.bf16 %v5595_v18, %v5593_v21  ;;  %v3006_v21 = vld [vmem:[#allocation4 + $0x18] sm:$0xff]  ;;  %v3005_v18 = vld [vmem:[#allocation4 + $0x10] sm:$0xff] }
 0xcf4   : > { %v4548_v26 = vpack.i.bf16 %v2538_v52, %v2512_v19 }
 0xcf5   : > { %4698 = vpow2.f32 %v2729_v43  ;;  %v3012_v43 = vld [vmem:[#allocation4 + $0x48] sm:$0xff] }
 0xcf7   : > { %v5743_v8 = vpop.f32.mrf.mxu3 }
 0xcfb   : > { %v2646_v2 = vpop.f32.mrf.mxu1  ;;  %v4699_v12 = vpop.eup %4698 }
 0xcfc   : > { %v2706_v6 = vmul.f32 0.25, %v2646_v2  ;;  %v2739_v14 = vsel %vm868_vm1, %v4699_v12, 0.0  ;;  %v3015_v2 = vld [vmem:[#allocation4 + $0x60] sm:$0xff] }
 0xcfe   : > { %v2712_v9 = vsel %vm868_vm1, %v2706_v6, -inf }
 0xcff   : > { %2713 = vmax.xlane.f32.xlu2 %v2712_v9  ;;  %v3013_v9 = vld [vmem:[#allocation4 + $0x50] sm:$0xff] }
 0xd06   : > { %v2702_v51 = vpop.f32.mrf.mxu3 }
 0xd07   : > { %v2708_v11 = vmul.f32 0.25, %v2702_v51  ;;  %2734 = vadd.xlane.f32.xlu2 %v2733_v10  ;;  %v3010_v51 = vld [vmem:[#allocation4 + $0x38] sm:$0xff]  ;;  %v3009_v10 = vld [vmem:[#allocation4 + $0x30] sm:$0xff] }
 0xd09   : > { %v2718_v13 = vsel %vm868_vm1, %v2708_v11, -inf }
 0xd0a   : > { %2719 = vmax.xlane.f32.xlu0 %v2718_v13  ;;  %v3007_v13 = vld [vmem:[#allocation4 + $0x20] sm:$0xff] }
 0xd0f   : > { %2740 = vadd.xlane.f32.xlu2 %v2739_v14  ;;  %v3004_v14 = vld [vmem:[#allocation4 + $0x8] sm:$0xff] }
 0xd1e   : > { %4519 = vrot.lane.b32.xlu0 %v4518_v16, %s5119_s27  ;;  %v3003_v16 = vld [vmem:[#allocation4] sm:$0xff] }
 0xd26   : > { %4524 = vrot.lane.b32.xlu0 %v4523_v29, %s5119_s27 }
 0xd27   : > { %2805 = vrot.lane.b32.xlu2 %v5415_v58, %s5119_s27  ;;  %v4558_v58 = vpack.i.bf16 %v5544_v63, %v5536_v49 }
 0xd2e   : > { %4529 = vrot.lane.b32.xlu0 %v4528_v59, %s5118_s23 }
 0xd2f   : > { %4534 = vrot.lane.b32.xlu2 %v4533_v30, %s5117_s7 }
 0xd36   : > { %4539 = vrot.lane.b32.xlu0 %v4538_v23, %s5116_s21 }
 0xd37   : > { %4549 = vrot.lane.b32.xlu2 %v4548_v26, %s5114_s26 }
 0xd3f   : > { %4559 = vrot.lane.b32.xlu2 %v4558_v58, %s5118_s23 }
 0xd47   : > { %2929 = vrot.lane.b32.xlu2 %v5694_v4, %s5115_s18 }
 0xd4f   : > { %2931 = vrot.lane.b32.xlu2 %v5712_v44, %s5115_s18 }
 0xd72   : > { %v2714_v33 = vpop.xlane.xlu2 %2713 }
 0xd73   : > { %v2722_v38 = vsub.f32 %v2706_v6, %v2714_v33  ;;  %v3014_v6 = vld [vmem:[#allocation4 + $0x58] sm:$0xff] }
 0xd75   : > { %v2727_v55 = vmul.f32 1.442695, %v2722_v38 }
 0xd77   : > { %4700 = vpow2.f32 %v2727_v55 }
 0xd7a   : > { %v2735_v57 = vpop.xlane.xlu2 %2734 }
 0xd7d   : > { %v4701_v15 = vpop.eup %4700  ;;  %v2720_v56 = vpop.xlane.xlu0 %2719 }
 0xd7e   : > { %v2724_v50 = vsub.f32 %v2708_v11, %v2720_v56  ;;  %v2736_v39 = vsel %vm868_vm1, %v4701_v15, 0.0  ;;  %v3008_v11 = vld [vmem:[#allocation4 + $0x28] sm:$0xff] }
 0xd7f   : > { %2737 = vadd.xlane.f32.xlu1 %v2736_v39 }
 0xd80   : > { %v2731_v49 = vmul.f32 1.442695, %v2724_v50 }
 0xd82   : > { %4702 = vpow2.f32 %v2731_v49  ;;  %v2741_v63 = vpop.xlane.xlu2 %2740 }
 0xd83   : > { %4704 = vrcp.f32 %v2741_v63 }
 0xd84   : > { %4706 = vrcp.f32 %v2735_v57 }
 0xd88   : > { %v4703_v19 = vpop.eup %4702 }
 0xd89   : > { %v4705_v4 = vpop.eup %4704  ;;  %v2742_v44 = vsel %vm868_vm1, %v4703_v19, 0.0 }
 0xd8a   : > { %v2751_v31 = vmul.f32 %v4705_v4, %v4699_v12  ;;  %v2806_v37 = vpop.permute.xlu2 %2805  ;;  %2743 = vadd.xlane.f32.xlu1 %v2742_v44  ;;  %v4707_v34 = vpop.eup %4706 }
 0xd8b   : > { %2826 = vmatpush.msrb.mxu2 %v2806_v37  ;;  %v2749_v5 = vmul.f32 %v4707_v34, %v4697_v61  ;;  %v3011_v61 = vld [vmem:[#allocation4 + $0x40] sm:$0xff] }
 0xd8c   : > { %4325 = vmatmul.msk.f32.vlgmr.msrb.gmra.mxu2 %vm868_vm1, %v2751_v31 }
 0xd90   : > { %v4520_v40 = vpop.permute.xlu0 %4519 }
 0xd91   : > { %v4522_v53 = vunpack.i.h.bf16 %v4520_v40  ;;  %v4521_v41 = vunpack.i.l.bf16 %v4520_v40 }
 0xd92   : > { %v4535_v59 = vpop.permute.xlu2 %4534 }
 0xd93   : > { %2774 = vmatpush.msrb.mxu0 %v4521_v41  ;;  %2800 = vmatpush.msrb.mxu1 %v4522_v53  ;;  %v4536_v55 = vunpack.i.l.bf16 %v4535_v59  ;;  %v4537_v53 = vunpack.i.h.bf16 %v4535_v59 }
 0xd94   : > { %4323 = vmatmul.msk.f32.vlgmr.msrb.gmra.mxu0 %vm868_vm1, %v2749_v5 }
 0xd95   : > { %3023 = vmatpush.msra.mxu0 %v3018_v54 }
 0xd97   : > { %3024 = vmatpush.msra.mxu0 %v3017_v60 }
 0xd99   : > { %3025 = vmatpush.msra.mxu0 %v3016_v62 }
 0xd9a   : > { %v4550_v57 = vpop.permute.xlu2 %4549 }
 0xd9b   : > { %3026 = vmatpush.msra.mxu0 %v3015_v2 }
 0xd9d   : > { %3027 = vmatpush.msra.mxu0 %v3014_v6 }
 0xd9f   : > { %3028 = vmatpush.msra.mxu0 %v3013_v9 }
 0xda1   : > { %3029 = vmatpush.msra.mxu0 %v3012_v43 }
 0xda3   : > { %2831 = vrot.lane.b32.xlu1 %v5420_v1, %s5119_s27  ;;  %3030 = vmatpush.msra.mxu0 %v3011_v61 }
 0xda5   : > { %3031 = vmatpush.msra.mxu0 %v3010_v51 }
 0xda7   : > { %3032 = vmatpush.msra.mxu0 %v3009_v10 }
 0xda9   : > { %3033 = vmatpush.msra.mxu0 %v3008_v11 }
 0xdab   : > { %4544 = vrot.lane.b32.xlu1 %v4543_v3, %s5115_s18  ;;  %3034 = vmatpush.msra.mxu0 %v3007_v13 }
 0xdad   : > { %3035 = vmatpush.msra.mxu0 %v3006_v21 }
 0xdaf   : > { %3036 = vmatpush.msra.mxu0 %v3005_v18 }
 0xdb1   : > { %3037 = vmatpush.msra.mxu0 %v3004_v14 }
 0xdb3   : > { %4554 = vrot.lane.b32.xlu1 %v4553_v42, %s5119_s27  ;;  %3038 = vmatpush.msra.mxu0 %v3003_v16  ;;  %v4560_v42 = vpop.permute.xlu2 %4559 }
 0xdb4   : > { %v4562_v11 = vunpack.i.h.bf16 %v4560_v42 }
 0xdbb   : > { %4574 = vrot.lane.b32.xlu1 %v4573_v45, %s5116_s21  ;;  %v2930_v62 = vpop.permute.xlu2 %2929 }
 0xdc3   : > { %v2932_v16 = vpop.permute.xlu2 %2931 }
 0xdf2   : > { %v2738_v46 = vpop.xlane.xlu1 %2737 }
 0xdf3   : > { %4708 = vrcp.f32 %v2738_v46 }
 0xdf9   : > { %v4709_v48 = vpop.eup %4708 }
 0xdfa   : > { %v2750_v35 = vmul.f32 %v4709_v48, %v4701_v15 }
 0xdfc   : > { %4324 = vmatmul.msk.f32.vlgmr.msrb.gmra.mxu1 %vm868_vm1, %v2750_v35 }
 0xdfd   : > { %v2744_v1 = vpop.xlane.xlu1 %2743 }
 0xdfe   : > { %4710 = vrcp.f32 %v2744_v1  ;;  %v4552_v1 = vunpack.i.h.bf16 %v4550_v57 }
 0xe04   : > { %v4711_v22 = vpop.eup %4710 }
 0xe05   : > { %v2752_v25 = vmul.f32 %v4711_v22, %v4703_v19 }
 0xe0f   : > { %v2828_v47 = vpop.f32.mrf.mxu2 }
 0xe10   : > { %2961 = vrot.lane.b32.xlu1 %v2828_v47, %s5113_s29  ;;  %v4561_v47 = vunpack.i.l.bf16 %v4560_v42  ;;  %v3279_v42 = vld [vmem:[#allocation10 + $0x3c0] sm:$0xff] }
 0xe11   : > { %v2776_v0 = vpop.f32.mrf.mxu0  ;;  %3305 = vmatpush.msra.mxu1 %v3279_v42  ;;  %v3184_v42 = vld [vmem:[#allocation10 + $0xc8] sm:$0xff] }
 0xe15   : > { %v2832_v32 = vpop.permute.xlu1 %2831 }
 0xe16   : > { %2852 = vmatpush.msra.mxu3 %v2832_v32 }
 0xe17   : > { %4326 = vmatmul.msk.f32.vlgmr.msra.gmra.mxu3 %vm868_vm1, %v2752_v25 }
 0xe1d   : > { %v4545_v30 = vpop.permute.xlu1 %4544 }
 0xe1e   : > { %v4546_v15 = vunpack.i.l.bf16 %v4545_v30  ;;  %v4547_v41 = vunpack.i.h.bf16 %v4545_v30  ;;  %v4578_v30 = vld [vmem:[#allocation6] ss:$0 sm:$0xff] }
 0xe25   : > { %v4555_v63 = vpop.permute.xlu1 %4554 }
 0xe26   : > { %v4556_v5 = vunpack.i.l.bf16 %v4555_v63  ;;  %v4557_v2 = vunpack.i.h.bf16 %v4555_v63 }
 0xe28   : > { %v2972_v51 = vsel %vm759_vm0, %v5442_v28, %v4557_v2 }
 0xe29   : > { %v2977_v13 = vsel %vm2973_vm2, %v2972_v51, %v4562_v11  ;;  %v3266_v51 = vld [vmem:[#allocation10 + $0x358] sm:$0xff]  ;;  %v3256_v11 = vld [vmem:[#allocation10 + $0x308] sm:$0xff] }
 0xe2d   : > { %v4575_v22 = vpop.permute.xlu1 %4574 }
 0xe2e   : > { %v4577_v18 = vunpack.i.h.bf16 %v4575_v22 }
 0xe79   : > { %v2802_v17 = vpop.f32.mrf.mxu1 }
 0xe7a   : > { %v4563_v52 = vpack.i.bf16 %v2802_v17, %v2776_v0 }
 0xe7c   : > { %4564 = vrot.lane.b32.xlu0 %v4563_v52, %s5113_s29  ;;  %v4576_v52 = vunpack.i.l.bf16 %v4575_v22  ;;  %v3274_v22 = vld [vmem:[#allocation10 + $0x398] sm:$0xff] }
 0xe82   : > { %v2962_v9 = vpop.permute.xlu1 %2961 }
 0xe84   : > { %4569 = vrot.lane.b32.xlu0 %v4568_v7, %s5117_s7 }
 0xe8c   : > { %2945 = vrot.lane.b32.xlu0 %v5735_v36, %s5114_s26  ;;  %v4525_v36 = vpop.permute.xlu0 %4524 }
 0xe8d   : > { %v4526_v23 = vunpack.i.l.bf16 %v4525_v36  ;;  %v4527_v56 = vunpack.i.h.bf16 %v4525_v36 }
 0xe8f   : > { %v2970_v44 = vsel %vm759_vm0, %v5437_v24, %v4527_v56  ;;  %v2971_v24 = vsel %vm759_vm0, %v5440_v27, %v4556_v5 }
 0xe90   : > { %v2976_v0 = vsel %vm2973_vm2, %v2971_v24, %v4561_v47  ;;  %v3273_v47 = vld [vmem:[#allocation10 + $0x390] sm:$0xff] }
 0xe94   : > { %2947 = vrot.lane.b32.xlu0 %v5743_v8, %s5114_s26  ;;  %v4530_v29 = vpop.permute.xlu0 %4529  ;;  %v2969_v8 = vsel %vm759_vm0, %v5435_v20, %v4526_v23  ;;  %v4551_v20 = vunpack.i.l.bf16 %v4550_v57 }
 0xe95   : > { %v4531_v26 = vunpack.i.l.bf16 %v4530_v29  ;;  %v4532_v39 = vunpack.i.h.bf16 %v4530_v29 }
 0xe97   : > { %v2974_v33 = vsel %vm2973_vm2, %v2969_v8, %v4531_v26  ;;  %v2975_v37 = vsel %vm2973_vm2, %v2970_v44, %v4532_v39 }
 0xe98   : > { %v2979_v50 = vsel %vm2978_vm3, %v2974_v33, %v4536_v55  ;;  %v2980_v45 = vsel %vm2978_vm3, %v2975_v37, %v4537_v53  ;;  %v4731_v55 = vld [vmem:[%s5308_s17 + $0x8] sm:$0xff] }
 0xe9a   : > { %v2854_v12 = vpop.f32.mrf.mxu3 }
 0xe9b   : > { %2963 = vrot.lane.b32.xlu1 %v2854_v12, %s5113_s29 }
 0xe9c   : > { %v4540_v58 = vpop.permute.xlu0 %4539 }
 0xe9d   : > { %v4541_v38 = vunpack.i.l.bf16 %v4540_v58  ;;  %v4542_v34 = vunpack.i.h.bf16 %v4540_v58  ;;  %v4730_v58 = vld [vmem:[%s5308_s17] sm:$0xff] }
 0xe9f   : > { %v2984_v49 = vsel %vm2983_vm4, %v2979_v50, %v4541_v38  ;;  %v2985_v46 = vsel %vm2983_vm4, %v2980_v45, %v4542_v34  ;;  %v4732_v50 = vld [vmem:[%s5308_s17 + $0x10] sm:$0xff] }
 0xea0   : > { %v2989_v19 = vsel %vm2988_vm5, %v2984_v49, %v4546_v15  ;;  %v2990_v35 = vsel %vm2988_vm5, %v2985_v46, %v4547_v41  ;;  %v3280_v45 = vld [vmem:[#allocation10 + $0x3c8] sm:$0xff]  ;;  %v3281_v46 = vld [vmem:[#allocation10 + $0x3d0] sm:$0xff] }
 0xea1   : > { %v2994_v40 = vsel %vm2993_vm6, %v2989_v19, %v4551_v20  ;;  %v2995_v17 = vsel %vm2993_vm6, %v2990_v35, %v4552_v1  ;;  %v4733_v19 = vld [vmem:[%s5308_s17 + $0x18] sm:$0xff]  ;;  %3334 = vmatpush.msra.mxu2 %v3280_v45  ;;  %v3271_v35 = vld [vmem:[#allocation10 + $0x380] sm:$0xff]  ;;  %v3272_v1 = vld [vmem:[#allocation10 + $0x388] sm:$0xff]  ;;  %3363 = vmatpush.msrb.mxu3 %v3281_v46 }
 0xea2   : > { %3306 = vmatpush.msra.mxu1 %v3271_v35  ;;  %v3185_v45 = vld [vmem:[#allocation10 + $0xd0] sm:$0xff]  ;;  %v3186_v46 = vld [vmem:[#allocation10 + $0xd8] sm:$0xff] }
 0xea3   : > { %3335 = vmatpush.msra.mxu2 %v3272_v1  ;;  %3364 = vmatpush.msrb.mxu3 %v3273_v47  ;;  %v3177_v35 = vld [vmem:[#allocation10 + $0x90] sm:$0xff]  ;;  %v3178_v1 = vld [vmem:[#allocation10 + $0x98] sm:$0xff]  ;;  %v3167_v47 = vld [vmem:[#allocation10 + $0x40] sm:$0xff] }
 0xeee   : > { %v4565_v4 = vpop.permute.xlu0 %4564 }
 0xeef   : > { %v4566_v31 = vunpack.i.l.bf16 %v4565_v4  ;;  %v4567_v48 = vunpack.i.h.bf16 %v4565_v4  ;;  %v5120_v4 = vmov 128.0  }
 0xef0   : > { %4712 = vrcp.f32 %v5120_v4  ;;  %v3200_v4 = vld [vmem:[#allocation10 + $0x148] sm:$0xff] }
 0xef1   : > { %v2999_v3 = vsel %vm2998_vm7, %v2994_v40, %v4566_v31  ;;  %v3000_v60 = vsel %vm2998_vm7, %v2995_v17, %v4567_v48  ;;  %v3282_v48 = vld [vmem:[#allocation10 + $0x3d8] sm:$0xff] }
 0xef2   : > { %3039 = vmatmul.f32.vlgmr.msra.gmra.mxu0 %v2999_v3 }
 0xef3   : > { %3392 = vmatpush.msrb.mxu0 %v3282_v48  ;;  %v3176_v48 = vld [vmem:[#allocation10 + $0x88] sm:$0xff] }
 0xef5   : > { %3393 = vmatpush.msrb.mxu0 %v3274_v22  ;;  %v3168_v22 = vld [vmem:[#allocation10 + $0x48] sm:$0xff] }
 0xef6   : > { %v4570_v25 = vpop.permute.xlu0 %4569  ;;  %v4713_v44 = vpop.eup %4712 }
 0xef7   : > { %v4571_v32 = vunpack.i.l.bf16 %v4570_v25  ;;  %v4572_v10 = vunpack.i.h.bf16 %v4570_v25  ;;  %v3067_v31 = vmul.f32 128.0, %v4713_v44  ;;  %vm3071_vm8 = vweird.f32 %v4713_v44  ;;  %3394 = vmatpush.msrb.mxu0 %v3266_v51  ;;  %v3286_v51 = vld [vmem:[#allocation10 + $0x3f8] sm:$0xff] }
 0xef9   : > { %v2981_v54 = vsel %vm2978_vm3, %v2976_v0, %v4571_v32  ;;  %v2982_v21 = vsel %vm2978_vm3, %v2977_v13, %v4572_v10  ;;  %v3068_v37 = vsub.f32 1.0, %v3067_v31  ;;  %v3255_v10 = vld [vmem:[#allocation10 + $0x300] sm:$0xff]  ;;  %v3257_v13 = vld [vmem:[#allocation10 + $0x310] sm:$0xff]  ;;  %v3202_v31 = vld [vmem:[#allocation10 + $0x158] sm:$0xff] }
 0xefa   : > { %3042 = vmatmul.f32.gmra.mxu0 %v3000_v60  ;;  %v2986_v27 = vsel %vm2983_vm4, %v2981_v54, %v4576_v52  ;;  %v2987_v12 = vsel %vm2983_vm4, %v2982_v21, %v4577_v18  ;;  %v3258_v21 = vld [vmem:[#allocation10 + $0x318] sm:$0xff]  ;;  %v3247_v18 = vld [vmem:[#allocation10 + $0x2c0] sm:$0xff] }
 0xefb   : > { %v2991_v7 = vsel %vm2988_vm5, %v2986_v27, %v2930_v62  ;;  %v2992_v36 = vsel %vm2988_vm5, %v2987_v12, %v2932_v16  ;;  %v3069_v34 = vmul.f32 %v4713_v44, %v3068_v37  ;;  %3395 = vmatpush.msrb.mxu0 %v3258_v21  ;;  %v3248_v12 = vld [vmem:[#allocation10 + $0x2c8] sm:$0xff]  ;;  %v3250_v16 = vld [vmem:[#allocation10 + $0x2d8] sm:$0xff]  ;;  %v3191_v37 = vld [vmem:[#allocation10 + $0x100] sm:$0xff] }
 0xefc   : > { %v3278_v21 = vld [vmem:[#allocation10 + $0x3b8] sm:$0xff] }
 0xefd   : > { %v3070_v40 = vadd.f32 %v4713_v44, %v3069_v34  ;;  %3396 = vmatpush.msrb.mxu0 %v3250_v16  ;;  %v3192_v34 = vld [vmem:[#allocation10 + $0x108] sm:$0xff] }
 0xefe   : > { %v2946_v6 = vpop.permute.xlu0 %2945 }
 0xeff   : > { %v2996_v43 = vsel %vm2993_vm6, %v2991_v7, %v2946_v6  ;;  %v5837_v53 = vsel %vm3071_vm8, %v4713_v44, %v3070_v40  ;;  %v3201_v44 = vld [vmem:[#allocation10 + $0x150] sm:$0xff] }
 0xf00   : > { %v3001_v61 = vsel %vm2998_vm7, %v2996_v43, %v2962_v9  ;;  %v3263_v9 = vld [vmem:[#allocation10 + $0x340] sm:$0xff]  ;;  %v3264_v43 = vld [vmem:[#allocation10 + $0x348] sm:$0xff]  ;;  %v3193_v40 = vld [vmem:[#allocation10 + $0x110] sm:$0xff] }
 0xf01   : > { %3307 = vmatpush.msra.mxu1 %v3263_v9  ;;  %3336 = vmatpush.msra.mxu2 %v3264_v43  ;;  %v3283_v9 = vld [vmem:[#allocation10 + $0x3e0] sm:$0xff]  ;;  %v3284_v43 = vld [vmem:[#allocation10 + $0x3e8] sm:$0xff] }
 0xf02   : > { %3045 = vmatmul.f32.gmra.mxu0 %v3001_v61  ;;  %v3265_v61 = vld [vmem:[#allocation10 + $0x350] sm:$0xff] }
 0xf03   : > { %3365 = vmatpush.msrb.mxu3 %v3265_v61  ;;  %3308 = vmatpush.msra.mxu1 %v3255_v10  ;;  %v3285_v61 = vld [vmem:[#allocation10 + $0x3f0] sm:$0xff]  ;;  %v3275_v10 = vld [vmem:[#allocation10 + $0x3a0] sm:$0xff] }
 0xf04   : > { %3337 = vmatpush.msra.mxu2 %v3256_v11  ;;  %v3276_v11 = vld [vmem:[#allocation10 + $0x3a8] sm:$0xff] }
 0xf05   : > { %3366 = vmatpush.msrb.mxu3 %v3257_v13  ;;  %3309 = vmatpush.msra.mxu1 %v3247_v18  ;;  %v3277_v13 = vld [vmem:[#allocation10 + $0x3b0] sm:$0xff]  ;;  %v3267_v18 = vld [vmem:[#allocation10 + $0x360] sm:$0xff] }
 0xf06   : > { %v2948_v14 = vpop.permute.xlu0 %2947  ;;  %3338 = vmatpush.msra.mxu2 %v3248_v12  ;;  %v3268_v12 = vld [vmem:[#allocation10 + $0x368] sm:$0xff] }
 0xf07   : > { %v2997_v29 = vsel %vm2993_vm6, %v2992_v36, %v2948_v14  ;;  %v3249_v14 = vld [vmem:[#allocation10 + $0x2d0] sm:$0xff]  ;;  %v3239_v36 = vld [vmem:[#allocation10 + $0x280] sm:$0xff] }
 0xf08   : > { %3367 = vmatpush.msrb.mxu3 %v3249_v14  ;;  %3310 = vmatpush.msra.mxu1 %v3239_v36  ;;  %v3269_v14 = vld [vmem:[#allocation10 + $0x370] sm:$0xff]  ;;  %v3270_v36 = vld [vmem:[#allocation10 + $0x378] sm:$0xff] }
 0xf0d   : > { %v2964_v59 = vpop.permute.xlu1 %2963 }
 0xf0e   : > { %v3002_v28 = vsel %vm2998_vm7, %v2997_v29, %v2964_v59  ;;  %v3240_v29 = vld [vmem:[#allocation10 + $0x288] sm:$0xff]  ;;  %v3241_v59 = vld [vmem:[#allocation10 + $0x290] sm:$0xff] }
 0xf0f   : > { %3048 = vmatmul.f32.gmra.mxu0 %v3002_v28  ;;  %3339 = vmatpush.msra.mxu2 %v3240_v29  ;;  %v3242_v28 = vld [vmem:[#allocation10 + $0x298] sm:$0xff] }
 0xf10   : > { %3368 = vmatpush.msrb.mxu3 %v3241_v59  ;;  %3397 = vmatpush.msrb.mxu0 %v3242_v28  ;;  %v3259_v59 = vld [vmem:[#allocation10 + $0x320] sm:$0xff]  ;;  %v3260_v28 = vld [vmem:[#allocation10 + $0x328] sm:$0xff] }
 0xf6f   : > { %v3040_v23 = vpop.f32.mrf.mxu0 }
 0xf70   : > { %v3041_v26 = vadd.f32 %v4578_v30, %v3040_v23  ;;  %v3232_v23 = vld [vmem:[#allocation10 + $0x248] sm:$0xff] }
 0xf71   : > { %3340 = vmatpush.msra.mxu2 %v3232_v23  ;;  %v3262_v23 = vld [vmem:[#allocation10 + $0x338] sm:$0xff] }
 0xf72   : > { %v3052_v8 = vadd.f32 %v4730_v58, %v3041_v26  ;;  %v3233_v26 = vld [vmem:[#allocation10 + $0x250] sm:$0xff]  ;;  %v3234_v58 = vld [vmem:[#allocation10 + $0x258] sm:$0xff] }
 0xf73   : > { %3369 = vmatpush.msrb.mxu3 %v3233_v26  ;;  %3398 = vmatpush.msrb.mxu0 %v3234_v58 }
 0xf74   : > { %3058 = vadd.xlane.f32.xlu2 %v3052_v8 }
 0xf77   : > { %v3043_v33 = vpop.f32.mrf.mxu0 }
 0xf78   : > { %v3044_v38 = vadd.f32 %v4578_v30, %v3043_v33  ;;  %v3224_v33 = vld [vmem:[#allocation10 + $0x208] sm:$0xff] }
 0xf79   : > { %3341 = vmatpush.msra.mxu2 %v3224_v33  ;;  %v3252_v33 = vld [vmem:[#allocation10 + $0x2e8] sm:$0xff] }
 0xf7a   : > { %v3053_v57 = vadd.f32 %v4731_v55, %v3044_v38  ;;  %v3225_v38 = vld [vmem:[#allocation10 + $0x210] sm:$0xff]  ;;  %v3226_v55 = vld [vmem:[#allocation10 + $0x218] sm:$0xff] }
 0xf7b   : > { %3370 = vmatpush.msrb.mxu3 %v3225_v38  ;;  %3399 = vmatpush.msrb.mxu0 %v3226_v55  ;;  %v3253_v38 = vld [vmem:[#allocation10 + $0x2f0] sm:$0xff] }
 0xf7c   : > { %3060 = vadd.xlane.f32.xlu0 %v3053_v57 }
 0xf7f   : > { %v3046_v15 = vpop.f32.mrf.mxu0 }
 0xf80   : > { %v3047_v56 = vadd.f32 %v4578_v30, %v3046_v15  ;;  %v3216_v15 = vld [vmem:[#allocation10 + $0x1c8] sm:$0xff] }
 0xf81   : > { %3342 = vmatpush.msra.mxu2 %v3216_v15  ;;  %v3243_v15 = vld [vmem:[#allocation10 + $0x2a0] sm:$0xff] }
 0xf82   : > { %v3054_v39 = vadd.f32 %v4732_v50, %v3047_v56  ;;  %v3217_v56 = vld [vmem:[#allocation10 + $0x1d0] sm:$0xff]  ;;  %v3218_v50 = vld [vmem:[#allocation10 + $0x1d8] sm:$0xff] }
 0xf83   : > { %3371 = vmatpush.msrb.mxu3 %v3217_v56  ;;  %3400 = vmatpush.msrb.mxu0 %v3218_v50  ;;  %v3244_v56 = vld [vmem:[#allocation10 + $0x2a8] sm:$0xff] }
 0xf84   : > { %3062 = vadd.xlane.f32.xlu1 %v3054_v39 }
 0xf8c   : > { %v3049_v49 = vpop.f32.mrf.mxu0 }
 0xf8d   : > { %v3050_v63 = vadd.f32 %v4578_v30, %v3049_v49  ;;  %v3231_v30 = vld [vmem:[#allocation10 + $0x240] sm:$0xff]  ;;  %v3208_v49 = vld [vmem:[#allocation10 + $0x188] sm:$0xff] }
 0xf8e   : > { %3311 = vmatpush.msra.mxu1 %v3231_v30  ;;  %3343 = vmatpush.msra.mxu2 %v3208_v49  ;;  %v3261_v30 = vld [vmem:[#allocation10 + $0x330] sm:$0xff]  ;;  %v3246_v49 = vld [vmem:[#allocation10 + $0x2b8] sm:$0xff] }
 0xf8f   : > { %v3055_v20 = vadd.f32 %v4733_v19, %v3050_v63  ;;  %v3209_v63 = vld [vmem:[#allocation10 + $0x190] sm:$0xff]  ;;  %v3210_v19 = vld [vmem:[#allocation10 + $0x198] sm:$0xff] }
 0xf90   : > { %3372 = vmatpush.msrb.mxu3 %v3209_v63  ;;  %3401 = vmatpush.msrb.mxu0 %v3210_v19  ;;  %v3235_v63 = vld [vmem:[#allocation10 + $0x260] sm:$0xff]  ;;  %v3236_v19 = vld [vmem:[#allocation10 + $0x268] sm:$0xff] }
 0xf91   : > { %3064 = vadd.xlane.f32.xlu2 %v3055_v20  ;;  %3344 = vmatpush.msra.mxu2 %v3200_v4 }
 0xf92   : > { %3373 = vmatpush.msrb.mxu3 %v3201_v44  ;;  %3402 = vmatpush.msrb.mxu0 %v3202_v31  ;;  %v3238_v31 = vld [vmem:[#allocation10 + $0x278] sm:$0xff] }
 0xf93   : > { %3345 = vmatpush.msra.mxu2 %v3192_v34  ;;  %v3227_v34 = vld [vmem:[#allocation10 + $0x220] sm:$0xff] }
 0xf94   : > { %3374 = vmatpush.msrb.mxu3 %v3193_v40  ;;  %v3228_v40 = vld [vmem:[#allocation10 + $0x228] sm:$0xff] }
 0xf95   : > { %3346 = vmatpush.msra.mxu2 %v3184_v42  ;;  %v3230_v42 = vld [vmem:[#allocation10 + $0x238] sm:$0xff] }
 0xf96   : > { %3375 = vmatpush.msrb.mxu3 %v3185_v45 }
 0xf97   : > { %3347 = vmatpush.msra.mxu2 %v3176_v48  ;;  %v3220_v48 = vld [vmem:[#allocation10 + $0x1e8] sm:$0xff] }
 0xf98   : > { %3376 = vmatpush.msrb.mxu3 %v3177_v35  ;;  %v3221_v35 = vld [vmem:[#allocation10 + $0x1f0] sm:$0xff] }
 0xf99   : > { %3348 = vmatpush.msra.mxu2 %v3168_v22 }
 0xfe7   : > { %v3059_v41 = vpop.xlane.xlu2 %3058 }
 0xfe8   : > { %v3073_v5 = vmul.f32 %v5837_v53, %v3059_v41  ;;  %v3194_v41 = vld [vmem:[#allocation10 + $0x118] sm:$0xff] }
 0xfe9   : > { %3403 = vmatpush.msrb.mxu0 %v3194_v41  ;;  %v3229_v41 = vld [vmem:[#allocation10 + $0x230] sm:$0xff] }
 0xfea   : > { %v5840_v3 = vsub.f32 %v3052_v8, %v3073_v5  ;;  %v3223_v8 = vld [vmem:[#allocation10 + $0x200] sm:$0xff] }
 0xfeb   : > { %3312 = vmatpush.msra.mxu1 %v3223_v8  ;;  %v3183_v5 = vld [vmem:[#allocation10 + $0xc0] sm:$0xff]  ;;  %3404 = vmatpush.msrb.mxu0 %v3186_v46 }
 0xfec   : > { %v3081_v24 = vmul.f32 %v5840_v3, %v5840_v3  ;;  %v3251_v8 = vld [vmem:[#allocation10 + $0x2e0] sm:$0xff] }
 0xfed   : > { %3405 = vmatpush.msrb.mxu0 %v3178_v1  ;;  %v5878_v1 = vld [vmem:[#allocation7] ss:$0 sm:$0xff] }
 0xfee   : > { %3085 = vadd.xlane.f32.xlu0 %v3081_v24  ;;  %v3175_v24 = vld [vmem:[#allocation10 + $0x80] sm:$0xff] }
 0xfef   : > { %v3061_v25 = vpop.xlane.xlu0 %3060 }
 0xff0   : > { %v3074_v32 = vmul.f32 %v5837_v53, %v3061_v25  ;;  %v3169_v25 = vld [vmem:[#allocation10 + $0x50] sm:$0xff] }
 0xff1   : > { %3377 = vmatpush.msrb.mxu3 %v3169_v25  ;;  %v3222_v25 = vld [vmem:[#allocation10 + $0x1f8] sm:$0xff] }
 0xff2   : > { %v5845_v0 = vsub.f32 %v3053_v57, %v3074_v32  ;;  %v3215_v57 = vld [vmem:[#allocation10 + $0x1c0] sm:$0xff]  ;;  %v3170_v32 = vld [vmem:[#allocation10 + $0x58] sm:$0xff] }
 0xff3   : > { %3313 = vmatpush.msra.mxu1 %v3215_v57  ;;  %3406 = vmatpush.msrb.mxu0 %v3170_v32  ;;  %v3254_v57 = vld [vmem:[#allocation10 + $0x2f8] sm:$0xff]  ;;  %v3211_v32 = vld [vmem:[#allocation10 + $0x1a0] sm:$0xff] }
 0xff4   : > { %v3082_v17 = vmul.f32 %v5845_v0, %v5845_v0 }
 0xff6   : > { %3087 = vadd.xlane.f32.xlu1 %v3082_v17  ;;  %v3159_v17 = vld [vmem:[#allocation10] sm:$0xff] }
 0xff7   : > { %v3063_v52 = vpop.xlane.xlu1 %3062 }
 0xff8   : > { %v3075_v54 = vmul.f32 %v5837_v53, %v3063_v52  ;;  %v3160_v52 = vld [vmem:[#allocation10 + $0x8] sm:$0xff] }
 0xff9   : > { %3349 = vmatpush.msra.mxu2 %v3160_v52  ;;  %v5887_v52 = vld [vmem:[#allocation9] ss:$0 sm:$0xff] }
 0xffa   : > { %v5850_v60 = vsub.f32 %v3054_v39, %v3075_v54  ;;  %v3207_v39 = vld [vmem:[#allocation10 + $0x180] sm:$0xff]  ;;  %v3161_v54 = vld [vmem:[#allocation10 + $0x10] sm:$0xff] }
 0xffb   : > { %3314 = vmatpush.msra.mxu1 %v3207_v39  ;;  %3378 = vmatpush.msrb.mxu3 %v3161_v54  ;;  %v3245_v39 = vld [vmem:[#allocation10 + $0x2b0] sm:$0xff] }
 0xffc   : > { %v3083_v27 = vmul.f32 %v5850_v60, %v5850_v60  ;;  %3450 = vmatpush.msrb.mxu2 %v3284_v43  ;;  %v3204_v43 = vld [vmem:[#allocation10 + $0x168] sm:$0xff] }
 0xffd   : > { %3479 = vmatpush.msra.mxu3 %v3285_v61  ;;  %v3205_v61 = vld [vmem:[#allocation10 + $0x170] sm:$0xff] }
 0xffe   : > { %3089 = vadd.xlane.f32.xlu2 %v3083_v27  ;;  %v3162_v27 = vld [vmem:[#allocation10 + $0x18] sm:$0xff]  ;;  %3451 = vmatpush.msrb.mxu2 %v3276_v11  ;;  %v3195_v11 = vld [vmem:[#allocation10 + $0x120] sm:$0xff] }
 0xfff   : > { %3407 = vmatpush.msrb.mxu0 %v3162_v27  ;;  %3480 = vmatpush.msra.mxu3 %v3277_v13  ;;  %v3196_v13 = vld [vmem:[#allocation10 + $0x128] sm:$0xff] }
0x1000   : > { %3452 = vmatpush.msrb.mxu2 %v3268_v12  ;;  %v3198_v12 = vld [vmem:[#allocation10 + $0x138] sm:$0xff] }
0x1001   : > { %3508 = vmatpush.msra.mxu0 %v3286_v51  ;;  %3481 = vmatpush.msra.mxu3 %v3269_v14 }
0x1002   : > { %3453 = vmatpush.msrb.mxu2 %v3260_v28 }
0x1003   : > { %3509 = vmatpush.msra.mxu0 %v3278_v21  ;;  %3482 = vmatpush.msra.mxu3 %v3261_v30  ;;  %v3189_v30 = vld [vmem:[#allocation10 + $0xf0] sm:$0xff] }
0x1004   : > { %v3065_v62 = vpop.xlane.xlu2 %3064  ;;  %3454 = vmatpush.msrb.mxu2 %v3252_v33  ;;  %v3180_v33 = vld [vmem:[#allocation10 + $0xa8] sm:$0xff] }
0x1005   : > { %v3076_v2 = vmul.f32 %v5837_v53, %v3065_v62  ;;  %3510 = vmatpush.msra.mxu0 %v3270_v36  ;;  %3483 = vmatpush.msra.mxu3 %v3253_v38  ;;  %v3187_v36 = vld [vmem:[#allocation10 + $0xe0] sm:$0xff] }
0x1006   : > { %3455 = vmatpush.msrb.mxu2 %v3244_v56 }
0x1007   : > { %v5855_v6 = vsub.f32 %v3055_v20, %v3076_v2  ;;  %v3199_v20 = vld [vmem:[#allocation10 + $0x140] sm:$0xff]  ;;  %3511 = vmatpush.msra.mxu0 %v3262_v23  ;;  %3484 = vmatpush.msra.mxu3 %v3245_v39  ;;  %v3190_v23 = vld [vmem:[#allocation10 + $0xf8] sm:$0xff]  ;;  %v3172_v39 = vld [vmem:[#allocation10 + $0x68] sm:$0xff] }
0x1008   : > { %3315 = vmatpush.msra.mxu1 %v3199_v20  ;;  %v3237_v20 = vld [vmem:[#allocation10 + $0x270] sm:$0xff]  ;;  %3456 = vmatpush.msrb.mxu2 %v3236_v19 }
0x1009   : > { %v3084_v7 = vmul.f32 %v5855_v6, %v5855_v6  ;;  %3512 = vmatpush.msra.mxu0 %v3254_v57  ;;  %3485 = vmatpush.msra.mxu3 %v3237_v20  ;;  %v3181_v57 = vld [vmem:[#allocation10 + $0xb0] sm:$0xff]  ;;  %v3174_v20 = vld [vmem:[#allocation10 + $0x78] sm:$0xff] }
0x100a   : > { %3316 = vmatpush.msra.mxu1 %v3191_v37  ;;  %3457 = vmatpush.msrb.mxu2 %v3228_v40  ;;  %v3173_v19 = vld [vmem:[#allocation10 + $0x70] sm:$0xff] }
0x100b   : > { %3091 = vadd.xlane.f32.xlu0 %v3084_v7  ;;  %3513 = vmatpush.msra.mxu0 %v3246_v49  ;;  %v3165_v40 = vld [vmem:[#allocation10 + $0x30] sm:$0xff] }
0x100c   : > { %3317 = vmatpush.msra.mxu1 %v3183_v5  ;;  %3486 = vmatpush.msra.mxu3 %v3229_v41  ;;  %v3166_v41 = vld [vmem:[#allocation10 + $0x38] sm:$0xff] }
0x100d   : > { %3514 = vmatpush.msra.mxu0 %v3238_v31  ;;  %3458 = vmatpush.msrb.mxu2 %v3220_v48  ;;  %v3164_v31 = vld [vmem:[#allocation10 + $0x28] sm:$0xff] }
0x100e   : > { %3318 = vmatpush.msra.mxu1 %v3175_v24  ;;  %v3219_v24 = vld [vmem:[#allocation10 + $0x1e0] sm:$0xff]  ;;  %3487 = vmatpush.msra.mxu3 %v3221_v35 }
0x100f   : > { %3515 = vmatpush.msra.mxu0 %v3230_v42 }
0x1010   : > { %3319 = vmatpush.msra.mxu1 %v3167_v47 }
0x1011   : > { %3516 = vmatpush.msra.mxu0 %v3222_v25 }
0x1012   : > { %3320 = vmatpush.msra.mxu1 %v3159_v17  ;;  %v3212_v17 = vld [vmem:[#allocation10 + $0x1a8] sm:$0xff] }
0x1013   : > { %3459 = vmatpush.msrb.mxu2 %v3212_v17 }
0x1014   : > { %3421 = vmatpush.msrb.mxu1 %v3283_v9  ;;  %v3203_v9 = vld [vmem:[#allocation10 + $0x160] sm:$0xff] }
0x1015   : > { %3460 = vmatpush.msrb.mxu2 %v3204_v43  ;;  %v3616_v43 = vld [vmem:[#allocation13 + $0x178] sm:$0xff] }
0x1016   : > { %3422 = vmatpush.msrb.mxu1 %v3275_v10  ;;  %v3206_v10 = vld [vmem:[#allocation10 + $0x178] sm:$0xff] }
0x1017   : > { %3461 = vmatpush.msrb.mxu2 %v3196_v13  ;;  %v3614_v13 = vld [vmem:[#allocation13 + $0x168] sm:$0xff] }
0x1018   : > { %3423 = vmatpush.msrb.mxu1 %v3267_v18  ;;  %v3197_v18 = vld [vmem:[#allocation10 + $0x130] sm:$0xff] }
0x101a   : > { %3424 = vmatpush.msrb.mxu1 %v3259_v59 }
0x101c   : > { %3425 = vmatpush.msrb.mxu1 %v3251_v8  ;;  %v3179_v8 = vld [vmem:[#allocation10 + $0xa0] sm:$0xff] }
0x101e   : > { %3426 = vmatpush.msrb.mxu1 %v3243_v15  ;;  %v3182_v15 = vld [vmem:[#allocation10 + $0xb8] sm:$0xff] }
0x1020   : > { %3427 = vmatpush.msrb.mxu1 %v3235_v63 }
0x1022   : > { %3428 = vmatpush.msrb.mxu1 %v3227_v34 }
0x1024   : > { %3429 = vmatpush.msrb.mxu1 %v3219_v24 }
0x1026   : > { %3430 = vmatpush.msrb.mxu1 %v3211_v32 }
0x1028   : > { %3431 = vmatpush.msrb.mxu1 %v3203_v9  ;;  %v3630_v9 = vld [vmem:[#allocation13 + $0x1e8] sm:$0xff] }
0x102a   : > { %3432 = vmatpush.msrb.mxu1 %v3195_v11  ;;  %v3598_v11 = vld [vmem:[#allocation13 + $0xe8] sm:$0xff] }
0x102c   : > { %3433 = vmatpush.msrb.mxu1 %v3187_v36  ;;  %v3627_v36 = vld [vmem:[#allocation13 + $0x1d0] sm:$0xff] }
0x102e   : > { %3434 = vmatpush.msrb.mxu1 %v3179_v8  ;;  %v3577_v8 = vld [vmem:[#allocation13 + $0x40] sm:$0xff] }
0x1061   : > { %v3086_v62 = vpop.xlane.xlu0 %3085 }
0x1062   : > { %v3093_v2 = vmul.f32 %v3086_v62, %v5837_v53  ;;  %v3213_v62 = vld [vmem:[#allocation10 + $0x1b0] sm:$0xff] }
0x1063   : > { %3488 = vmatpush.msra.mxu3 %v3213_v62  ;;  %v3632_v62 = vld [vmem:[#allocation13 + $0x1f8] sm:$0xff] }
0x1064   : > { %v5860_v7 = vadd.f32 1e-05, %v3093_v2  ;;  %v3214_v2 = vld [vmem:[#allocation10 + $0x1b8] sm:$0xff] }
0x1065   : > { %3517 = vmatpush.msra.mxu0 %v3214_v2  ;;  %3489 = vmatpush.msra.mxu3 %v3205_v61  ;;  %v3583_v2 = vld [vmem:[#allocation13 + $0x70] sm:$0xff] }
0x1066   : > { %4714 = vrsqrt.f32 %v5860_v7  ;;  %vm3107_vm10 = vweird.f32 %v5860_v7  ;;  %v3615_v61 = vld [vmem:[#allocation13 + $0x170] sm:$0xff] }
0x1067   : > { %3518 = vmatpush.msra.mxu0 %v3206_v10  ;;  %3490 = vmatpush.msra.mxu3 %v3197_v18  ;;  %v3629_v10 = vld [vmem:[#allocation13 + $0x1e0] sm:$0xff]  ;;  %v3628_v18 = vld [vmem:[#allocation13 + $0x1d8] sm:$0xff] }
0x1069   : > { %v3088_v16 = vpop.xlane.xlu1 %3087  ;;  %3519 = vmatpush.msra.mxu0 %v3198_v12  ;;  %3491 = vmatpush.msra.mxu3 %v3189_v30  ;;  %v3597_v12 = vld [vmem:[#allocation13 + $0xe0] sm:$0xff]  ;;  %v3626_v30 = vld [vmem:[#allocation13 + $0x1c8] sm:$0xff] }
0x106a   : > { %v3094_v29 = vmul.f32 %v3088_v16, %v5837_v53 }
0x106b   : > { %3520 = vmatpush.msra.mxu0 %v3190_v23  ;;  %3492 = vmatpush.msra.mxu3 %v3181_v57  ;;  %v3595_v23 = vld [vmem:[#allocation13 + $0xd0] sm:$0xff]  ;;  %v3624_v57 = vld [vmem:[#allocation13 + $0x1b8] sm:$0xff] }
0x106c   : > { %v5864_v26 = vpop.eup %4714  ;;  %v5866_v58 = vadd.f32 1e-05, %v3094_v29  ;;  %v3188_v29 = vld [vmem:[#allocation10 + $0xe8] sm:$0xff] }
0x106d   : > { %v3102_v55 = vmul.f32 %v5864_v26, %v5860_v7  ;;  %vm3108_vm9 = vweird.f32 %v5864_v26  ;;  %3462 = vmatpush.msrb.mxu2 %v3188_v29  ;;  %3521 = vmatpush.msra.mxu0 %v3182_v15  ;;  %v3596_v29 = vld [vmem:[#allocation13 + $0xd8] sm:$0xff]  ;;  %v3593_v15 = vld [vmem:[#allocation13 + $0xc0] sm:$0xff] }
0x106e   : > { %4716 = vrsqrt.f32 %v5866_v58  ;;  %vm3109_vm11 = vmor %vm3107_vm10, %vm3108_vm9  ;;  %vm3117_vm13 = vweird.f32 %v5866_v58  ;;  %3493 = vmatpush.msra.mxu3 %v3173_v19  ;;  %v3574_v19 = vld [vmem:[#allocation13 + $0x28] sm:$0xff] }
0x106f   : > { %v3103_v50 = vmul.f32 %v5864_v26, %v3102_v55  ;;  %3463 = vmatpush.msrb.mxu2 %v3180_v33  ;;  %3522 = vmatpush.msra.mxu0 %v3174_v20  ;;  %v3625_v33 = vld [vmem:[#allocation13 + $0x1c0] sm:$0xff]  ;;  %v3622_v20 = vld [vmem:[#allocation13 + $0x1a8] sm:$0xff] }
0x1070   : > { %3494 = vmatpush.msra.mxu3 %v3165_v40  ;;  %v3620_v40 = vld [vmem:[#allocation13 + $0x198] sm:$0xff] }
0x1071   : > { %v3104_v4 = vmul.f32 0.5, %v3103_v50  ;;  %v3090_v44 = vpop.xlane.xlu2 %3089  ;;  %v3171_v50 = vld [vmem:[#allocation10 + $0x60] sm:$0xff]  ;;  %3464 = vmatpush.msrb.mxu2 %v3172_v39  ;;  %3523 = vmatpush.msra.mxu0 %v3166_v41  ;;  %v3623_v39 = vld [vmem:[#allocation13 + $0x1b0] sm:$0xff] }
0x1072   : > { %v3095_v37 = vmul.f32 %v3090_v44, %v5837_v53  ;;  %v3163_v44 = vld [vmem:[#allocation10 + $0x20] sm:$0xff]  ;;  %3435 = vmatpush.msrb.mxu1 %v3171_v50  ;;  %v3575_v50 = vld [vmem:[#allocation13 + $0x30] sm:$0xff] }
0x1073   : > { %v3105_v5 = vsub.f32 1.5, %v3104_v4  ;;  %3465 = vmatpush.msrb.mxu2 %v3164_v31  ;;  %v3573_v31 = vld [vmem:[#allocation13 + $0x20] sm:$0xff]  ;;  %v3571_v41 = vld [vmem:[#allocation13 + $0x10] sm:$0xff] }
0x1074   : > { %v5874_v45 = vpop.eup %4716  ;;  %v5876_v46 = vadd.f32 1e-05, %v3095_v37  ;;  %3436 = vmatpush.msrb.mxu1 %v3163_v44  ;;  %v3607_v44 = vld [vmem:[#allocation13 + $0x130] sm:$0xff] }
0x1075   : > { %v3106_v47 = vmul.f32 %v5864_v26, %v3105_v5  ;;  %v3112_v22 = vmul.f32 %v5874_v45, %v5866_v58  ;;  %vm3118_vm12 = vweird.f32 %v5874_v45 }
0x1076   : > { %4718 = vrsqrt.f32 %v5876_v46  ;;  %vm3119_vm14 = vmor %vm3117_vm13, %vm3118_vm12  ;;  %vm3127_vm0 = vweird.f32 %v5876_v46 }
0x1077   : > { %v3110_v54 = vsel %vm3109_vm11, %v5864_v26, %v3106_v47  ;;  %v3113_v27 = vmul.f32 %v5874_v45, %v3112_v22 }
0x1078   : > { %v3141_v7 = vmul.f32 %v3110_v54, %v5840_v3 }
0x1079   : > { %v3114_v51 = vmul.f32 0.5, %v3113_v27  ;;  %v3584_v27 = vld [vmem:[#allocation13 + $0x78] sm:$0xff] }
0x107a   : > { %v3148_v21 = vmul.f32 %v5878_v1, %v3141_v7  ;;  %v3631_v7 = vld [vmem:[#allocation13 + $0x1f0] sm:$0xff] }
0x107b   : > { %v3115_v14 = vsub.f32 1.5, %v3114_v51  ;;  %v3581_v51 = vld [vmem:[#allocation13 + $0x60] sm:$0xff] }
0x107c   : > { %v5894_v3 = vpop.eup %4718  ;;  %v5897_v16 = vadd.f32 %v5887_v52, %v3148_v21  ;;  %v3580_v21 = vld [vmem:[#allocation13 + $0x58] sm:$0xff] }
0x107d   : > { %v3116_v59 = vmul.f32 %v5874_v45, %v3115_v14  ;;  %v3122_v28 = vmul.f32 %v5894_v3, %v5876_v46  ;;  %vm3128_vm15 = vweird.f32 %v5894_v3  ;;  %v3613_v14 = vld [vmem:[#allocation13 + $0x160] sm:$0xff] }
0x107e   : > { %3321 = vmatmul.f32.vlgmr.msra.gmra.mxu1 %v5897_v16  ;;  %3350 = vmatmul.f32.vlgmr.msra.gmra.mxu2 %v5897_v16  ;;  %v3092_v26 = vpop.xlane.xlu0 %3091  ;;  %vm3129_vm1 = vmor %vm3127_vm0, %vm3128_vm15 }
0x107f   : > { %v3120_v38 = vsel %vm3119_vm14, %v5874_v45, %v3116_v59  ;;  %v3123_v58 = vmul.f32 %v5894_v3, %v3122_v28  ;;  %3379 = vmatmul.f32.vlgmr.msrb.gmra.mxu3 %v5897_v16  ;;  %3408 = vmatmul.f32.vlgmr.msrb.gmra.mxu0 %v5897_v16  ;;  %v3096_v55 = vmul.f32 %v3092_v26, %v5837_v53  ;;  %v3612_v59 = vld [vmem:[#allocation13 + $0x158] sm:$0xff]  ;;  %v3578_v28 = vld [vmem:[#allocation13 + $0x48] sm:$0xff]  ;;  %v3611_v26 = vld [vmem:[#allocation13 + $0x150] sm:$0xff] }
0x1080   : > { %v3142_v56 = vmul.f32 %v3120_v38, %v5845_v0  ;;  %3701 = vmatpush.msra.mxu1 %v3584_v27  ;;  %3788 = vmatpush.msrb.mxu0 %v3632_v62  ;;  %v3594_v38 = vld [vmem:[#allocation13 + $0xc8] sm:$0xff]  ;;  %v3603_v27 = vld [vmem:[#allocation13 + $0x110] sm:$0xff] }
0x1081   : > { %v3124_v49 = vmul.f32 0.5, %v3123_v58  ;;  %v3100_v63 = vadd.f32 1e-05, %v3096_v55  ;;  %3759 = vmatpush.msrb.mxu3 %v3616_v43  ;;  %v3610_v58 = vld [vmem:[#allocation13 + $0x148] sm:$0xff]  ;;  %v3576_v55 = vld [vmem:[#allocation13 + $0x38] sm:$0xff]  ;;  %v3647_v43 = vld [vmem:[#allocation13 + $0x270] sm:$0xff] }
0x1082   : > { %v3149_v4 = vmul.f32 %v5878_v1, %v3142_v56  ;;  %3702 = vmatpush.msra.mxu1 %v3583_v2  ;;  %3789 = vmatpush.msrb.mxu0 %v3631_v7  ;;  %v3609_v56 = vld [vmem:[#allocation13 + $0x140] sm:$0xff]  ;;  %v3586_v62 = vld [vmem:[#allocation13 + $0x88] sm:$0xff] }
0x1083   : > { %v3125_v37 = vsub.f32 1.5, %v3124_v49  ;;  %4720 = vrsqrt.f32 %v3100_v63  ;;  %vm3137_vm3 = vweird.f32 %v3100_v63  ;;  %3760 = vmatpush.msrb.mxu3 %v3615_v61  ;;  %v3592_v49 = vld [vmem:[#allocation13 + $0xb8] sm:$0xff]  ;;  %v3602_v2 = vld [vmem:[#allocation13 + $0x108] sm:$0xff]  ;;  %v3585_v7 = vld [vmem:[#allocation13 + $0x80] sm:$0xff] }
0x1084   : > { %v5916_v0 = vadd.f32 %v5887_v52, %v3149_v4  ;;  %3790 = vmatpush.msrb.mxu0 %v3630_v9  ;;  %v3591_v4 = vld [vmem:[#allocation13 + $0xb0] sm:$0xff]  ;;  %v3648_v9 = vld [vmem:[#allocation13 + $0x278] sm:$0xff]  ;;  %v3646_v61 = vld [vmem:[#allocation13 + $0x268] sm:$0xff] }
0x1085   : > { %v3126_v34 = vmul.f32 %v5894_v3, %v3125_v37  ;;  %3761 = vmatpush.msrb.mxu3 %v3614_v13  ;;  %v3621_v37 = vld [vmem:[#allocation13 + $0x1a0] sm:$0xff]  ;;  %v3680_v13 = vld [vmem:[#allocation13 + $0x378] sm:$0xff] }
0x1086   : > { %3324 = vmatmul.f32.gmra.mxu1 %v5916_v0  ;;  %3353 = vmatmul.f32.gmra.mxu2 %v5916_v0 }
0x1087   : > { %v3130_v5 = vsel %vm3129_vm1, %v5894_v3, %v3126_v34  ;;  %3382 = vmatmul.f32.gmra.mxu3 %v5916_v0  ;;  %3411 = vmatmul.f32.gmra.mxu0 %v5916_v0  ;;  %v3579_v3 = vld [vmem:[#allocation13 + $0x50] sm:$0xff]  ;;  %v3572_v34 = vld [vmem:[#allocation13 + $0x18] sm:$0xff] }
0x1088   : > { %v3143_v42 = vmul.f32 %v3130_v5, %v5850_v60  ;;  %3791 = vmatpush.msrb.mxu0 %v3629_v10  ;;  %3762 = vmatpush.msrb.mxu3 %v3613_v14  ;;  %v3590_v5 = vld [vmem:[#allocation13 + $0xa8] sm:$0xff]  ;;  %v3645_v10 = vld [vmem:[#allocation13 + $0x260] sm:$0xff]  ;;  %v3679_v14 = vld [vmem:[#allocation13 + $0x370] sm:$0xff] }
0x1089   : > { %v4721_v45 = vpop.eup %4720 }
0x108a   : > { %v3150_v46 = vmul.f32 %v5878_v1, %v3143_v42  ;;  %v3132_v24 = vmul.f32 %v4721_v45, %v3100_v63  ;;  %vm3138_vm2 = vweird.f32 %v4721_v45  ;;  %3792 = vmatpush.msrb.mxu0 %v3628_v18  ;;  %3763 = vmatpush.msrb.mxu3 %v3612_v59  ;;  %v3608_v63 = vld [vmem:[#allocation13 + $0x138] sm:$0xff]  ;;  %v3606_v42 = vld [vmem:[#allocation13 + $0x128] sm:$0xff] }
0x108b   : > { %vm3139_vm4 = vmor %vm3137_vm3, %vm3138_vm2  ;;  %v3644_v18 = vld [vmem:[#allocation13 + $0x258] sm:$0xff]  ;;  %v3678_v59 = vld [vmem:[#allocation13 + $0x368] sm:$0xff] }
0x108c   : > { %v5928_v48 = vadd.f32 %v5887_v52, %v3150_v46  ;;  %v3133_v35 = vmul.f32 %v4721_v45, %v3132_v24  ;;  %3793 = vmatpush.msrb.mxu0 %v3627_v36  ;;  %3764 = vmatpush.msrb.mxu3 %v3611_v26  ;;  %v3570_v46 = vld [vmem:[#allocation13 + $0x8] sm:$0xff]  ;;  %v3589_v24 = vld [vmem:[#allocation13 + $0xa0] sm:$0xff]  ;;  %v3643_v36 = vld [vmem:[#allocation13 + $0x250] sm:$0xff] }
0x108d   : > { %v3677_v26 = vld [vmem:[#allocation13 + $0x360] sm:$0xff] }
0x108e   : > { %v3134_v47 = vmul.f32 0.5, %v3133_v35  ;;  %3327 = vmatmul.f32.gmra.mxu1 %v5928_v48  ;;  %3356 = vmatmul.f32.gmra.mxu2 %v5928_v48  ;;  %v3605_v35 = vld [vmem:[#allocation13 + $0x120] sm:$0xff] }
0x108f   : > { %3385 = vmatmul.f32.gmra.mxu3 %v5928_v48  ;;  %3414 = vmatmul.f32.gmra.mxu0 %v5928_v48 }
0x1090   : > { %v3135_v60 = vsub.f32 1.5, %v3134_v47  ;;  %3794 = vmatpush.msrb.mxu0 %v3626_v30  ;;  %3765 = vmatpush.msrb.mxu3 %v3610_v58  ;;  %v3618_v47 = vld [vmem:[#allocation13 + $0x188] sm:$0xff]  ;;  %v3676_v58 = vld [vmem:[#allocation13 + $0x358] sm:$0xff] }
0x1091   : > { %v3642_v30 = vld [vmem:[#allocation13 + $0x248] sm:$0xff] }
0x1092   : > { %v3136_v22 = vmul.f32 %v4721_v45, %v3135_v60  ;;  %3795 = vmatpush.msrb.mxu0 %v3625_v33  ;;  %3766 = vmatpush.msrb.mxu3 %v3609_v56  ;;  %v3569_v60 = vld [vmem:[#allocation13] sm:$0xff]  ;;  %v3659_v56 = vld [vmem:[#allocation13 + $0x2d0] sm:$0xff] }
0x1093   : > { %v3641_v33 = vld [vmem:[#allocation13 + $0x240] sm:$0xff] }
0x1094   : > { %v3140_v25 = vsel %vm3139_vm4, %v4721_v45, %v3136_v22  ;;  %3796 = vmatpush.msrb.mxu0 %v3624_v57  ;;  %3767 = vmatpush.msrb.mxu3 %v3608_v63  ;;  %v3619_v45 = vld [vmem:[#allocation13 + $0x190] sm:$0xff]  ;;  %v3588_v22 = vld [vmem:[#allocation13 + $0x98] sm:$0xff]  ;;  %v5982_v57 = vld [vmem:[#allocation13 + $0x3c0] sm:$0xff] }
0x1095   : > { %v3144_v32 = vmul.f32 %v3140_v25, %v5855_v6  ;;  %v3582_v6 = vld [vmem:[#allocation13 + $0x68] sm:$0xff]  ;;  %v3604_v25 = vld [vmem:[#allocation13 + $0x118] sm:$0xff]  ;;  %v3639_v63 = vld [vmem:[#allocation13 + $0x230] sm:$0xff] }
0x1096   : > { %3703 = vmatpush.msra.mxu1 %v3582_v6  ;;  %3797 = vmatpush.msrb.mxu0 %v3623_v39  ;;  %v3601_v6 = vld [vmem:[#allocation13 + $0x100] sm:$0xff]  ;;  %v5985_v39 = vld [vmem:[#allocation13 + $0x3b8] sm:$0xff] }
0x1097   : > { %v3151_v17 = vmul.f32 %v5878_v1, %v3144_v32  ;;  %v3600_v1 = vld [vmem:[#allocation13 + $0xf8] sm:$0xff]  ;;  %3768 = vmatpush.msrb.mxu3 %v3607_v44  ;;  %v3617_v32 = vld [vmem:[#allocation13 + $0x180] sm:$0xff]  ;;  %v5994_v44 = vld [vmem:[#allocation13 + $0x3b0] sm:$0xff] }
0x1098   : > { %3730 = vmatpush.msra.mxu2 %v3600_v1  ;;  %3704 = vmatpush.msra.mxu1 %v3581_v51  ;;  %v5959_v1 = vld [vmem:[#allocation13 + $0x3f8] sm:$0xff]  ;;  %v5965_v51 = vld [vmem:[#allocation13 + $0x3e8] sm:$0xff] }
0x1099   : > { %v5937_v54 = vadd.f32 %v5887_v52, %v3151_v17  ;;  %v3599_v52 = vld [vmem:[#allocation13 + $0xf0] sm:$0xff]  ;;  %3798 = vmatpush.msrb.mxu0 %v3622_v20  ;;  %3769 = vmatpush.msrb.mxu3 %v3606_v42  ;;  %v3674_v20 = vld [vmem:[#allocation13 + $0x348] sm:$0xff] }
0x109a   : > { %3731 = vmatpush.msra.mxu2 %v3599_v52  ;;  %3705 = vmatpush.msra.mxu1 %v3580_v21  ;;  %v3587_v17 = vld [vmem:[#allocation13 + $0x90] sm:$0xff]  ;;  %v5968_v21 = vld [vmem:[#allocation13 + $0x3e0] sm:$0xff] }
0x109b   : > { %3330 = vmatmul.f32.gmra.mxu1 %v5937_v54  ;;  %3359 = vmatmul.f32.gmra.mxu2 %v5937_v54  ;;  %v5962_v52 = vld [vmem:[#allocation13 + $0x3f0] sm:$0xff] }
0x109c   : > { %3388 = vmatmul.f32.gmra.mxu3 %v5937_v54  ;;  %3417 = vmatmul.f32.gmra.mxu0 %v5937_v54 }
0x109d   : > { %3732 = vmatpush.msra.mxu2 %v3598_v11  ;;  %3706 = vmatpush.msra.mxu1 %v3579_v3  ;;  %v3664_v11 = vld [vmem:[#allocation13 + $0x2f8] sm:$0xff] }
0x109e   : > { %3799 = vmatpush.msrb.mxu0 %v3621_v37  ;;  %3770 = vmatpush.msrb.mxu3 %v3605_v35  ;;  %v5971_v3 = vld [vmem:[#allocation13 + $0x3d8] sm:$0xff]  ;;  %v3657_v37 = vld [vmem:[#allocation13 + $0x2c0] sm:$0xff] }
0x109f   : > { %3733 = vmatpush.msra.mxu2 %v3597_v12  ;;  %3707 = vmatpush.msra.mxu1 %v3578_v28  ;;  %v3663_v12 = vld [vmem:[#allocation13 + $0x2f0] sm:$0xff] }
0x10a0   : > { %3800 = vmatpush.msrb.mxu0 %v3620_v40  ;;  %3771 = vmatpush.msrb.mxu3 %v3604_v25  ;;  %v5974_v28 = vld [vmem:[#allocation13 + $0x3d0] sm:$0xff]  ;;  %v3636_v25 = vld [vmem:[#allocation13 + $0x218] sm:$0xff] }
0x10a1   : > { %3734 = vmatpush.msra.mxu2 %v3596_v29  ;;  %3708 = vmatpush.msra.mxu1 %v3577_v8  ;;  %v3662_v29 = vld [vmem:[#allocation13 + $0x2e8] sm:$0xff] }
0x10a2   : > { %3801 = vmatpush.msrb.mxu0 %v3619_v45  ;;  %3772 = vmatpush.msrb.mxu3 %v3603_v27  ;;  %v5977_v8 = vld [vmem:[#allocation13 + $0x3c8] sm:$0xff]  ;;  %v3637_v45 = vld [vmem:[#allocation13 + $0x220] sm:$0xff] }
0x10a3   : > { %3437 = vmatmul.f32.vlgmr.msrb.gmra.mxu1 %v5897_v16  ;;  %3466 = vmatmul.f32.vlgmr.msrb.gmra.mxu2 %v5897_v16 }
0x10a4   : > { %3495 = vmatmul.f32.vlgmr.msra.gmra.mxu3 %v5897_v16  ;;  %3524 = vmatmul.f32.vlgmr.msra.gmra.mxu0 %v5897_v16 }
0x10a5   : > { %3735 = vmatpush.msra.mxu2 %v3595_v23  ;;  %3709 = vmatpush.msra.mxu1 %v3576_v55  ;;  %v3661_v23 = vld [vmem:[#allocation13 + $0x2e0] sm:$0xff]  ;;  %v5980_v55 = vld [vmem:[#allocation12] sm:$0xff] }
0x10a6   : > { %3802 = vmatpush.msrb.mxu0 %v3618_v47  ;;  %3773 = vmatpush.msrb.mxu3 %v3602_v2  ;;  %v6002_v47 = vld [vmem:[#allocation13 + $0x3a0] sm:$0xff]  ;;  %v6011_v2 = vld [vmem:[#allocation13 + $0x398] sm:$0xff] }
0x10a7   : > { %3736 = vmatpush.msra.mxu2 %v3594_v38  ;;  %3710 = vmatpush.msra.mxu1 %v3575_v50  ;;  %v3660_v38 = vld [vmem:[#allocation13 + $0x2d8] sm:$0xff]  ;;  %v3675_v50 = vld [vmem:[#allocation13 + $0x350] sm:$0xff] }
0x10a8   : > { %3803 = vmatpush.msrb.mxu0 %v3617_v32  ;;  %3774 = vmatpush.msrb.mxu3 %v3601_v6  ;;  %v3655_v32 = vld [vmem:[#allocation13 + $0x2b0] sm:$0xff]  ;;  %v3654_v6 = vld [vmem:[#allocation13 + $0x2a8] sm:$0xff] }
0x10a9   : > { %3737 = vmatpush.msra.mxu2 %v3593_v15  ;;  %3711 = vmatpush.msra.mxu1 %v3574_v19  ;;  %v3640_v15 = vld [vmem:[#allocation13 + $0x238] sm:$0xff]  ;;  %v3658_v19 = vld [vmem:[#allocation13 + $0x2c8] sm:$0xff] }
0x10aa   : > { %3904 = vmatpush.msra.mxu0 %v5959_v1  ;;  %3875 = vmatpush.msra.mxu3 %v3680_v13  ;;  %v3634_v13 = vld [vmem:[#allocation13 + $0x208] sm:$0xff] }
0x10ab   : > { %3440 = vmatmul.f32.gmra.mxu1 %v5916_v0  ;;  %3469 = vmatmul.f32.gmra.mxu2 %v5916_v0 }
0x10ac   : > { %3498 = vmatmul.f32.gmra.mxu3 %v5916_v0  ;;  %3527 = vmatmul.f32.gmra.mxu0 %v5916_v0 }
0x10ad   : > { %3738 = vmatpush.msra.mxu2 %v3592_v49  ;;  %3712 = vmatpush.msra.mxu1 %v3573_v31  ;;  %v5988_v49 = vperm.slane %v5980_v55, 0  ;;  %v3638_v31 = vld [vmem:[#allocation13 + $0x228] sm:$0xff] }
0x10ae   : > { %3905 = vmatpush.msra.mxu0 %v5962_v52  ;;  %3876 = vmatpush.msra.mxu3 %v3679_v14 }
0x10af   : > { %3739 = vmatpush.msra.mxu2 %v3591_v4  ;;  %3713 = vmatpush.msra.mxu1 %v3572_v34  ;;  %v5992_v4 = vperm.slane %v5980_v55, 3  ;;  %v3673_v34 = vld [vmem:[#allocation13 + $0x340] sm:$0xff] }
0x10b0   : > { %3906 = vmatpush.msra.mxu0 %v5965_v51  ;;  %3877 = vmatpush.msra.mxu3 %v3678_v59 }
0x10b1   : > { %3714 = vmatpush.msra.mxu1 %v3571_v41  ;;  %3740 = vmatpush.msra.mxu2 %v3590_v5  ;;  %v5997_v41 = vld [vmem:[#allocation13 + $0x3a8] sm:$0xff] }
0x10b2   : > { %3907 = vmatpush.msra.mxu0 %v5968_v21  ;;  %3878 = vmatpush.msra.mxu3 %v3677_v26  ;;  %v3633_v26 = vld [vmem:[#allocation13 + $0x200] sm:$0xff] }
0x10b3   : > { %3443 = vmatmul.f32.gmra.mxu1 %v5928_v48  ;;  %3472 = vmatmul.f32.gmra.mxu2 %v5928_v48 }
0x10b4   : > { %3501 = vmatmul.f32.gmra.mxu3 %v5928_v48  ;;  %3530 = vmatmul.f32.gmra.mxu0 %v5928_v48 }
0x10b5   : > { %3715 = vmatpush.msra.mxu1 %v3570_v46  ;;  %3741 = vmatpush.msra.mxu2 %v3589_v24  ;;  %v3656_v46 = vld [vmem:[#allocation13 + $0x2b8] sm:$0xff] }
0x10b6   : > { %3908 = vmatpush.msra.mxu0 %v5971_v3  ;;  %3879 = vmatpush.msra.mxu3 %v3676_v58  ;;  %v3672_v24 = vld [vmem:[#allocation13 + $0x338] sm:$0xff] }
0x10b7   : > { %3716 = vmatpush.msra.mxu1 %v3569_v60  ;;  %3742 = vmatpush.msra.mxu2 %v3588_v22  ;;  %v6005_v22 = vperm.slane %v5980_v55, 1 }
0x10b8   : > { %3909 = vmatpush.msra.mxu0 %v5974_v28  ;;  %3880 = vmatpush.msra.mxu3 %v3675_v50  ;;  %v3651_v50 = vld [vmem:[#allocation13 + $0x290] sm:$0xff] }
0x10b9   : > { %3743 = vmatpush.msra.mxu2 %v3587_v17  ;;  %3817 = vmatpush.msrb.mxu1 %v3648_v9  ;;  %v3671_v17 = vld [vmem:[#allocation13 + $0x330] sm:$0xff]  ;;  %v3670_v9 = vld [vmem:[#allocation13 + $0x328] sm:$0xff] }
0x10ba   : > { %3910 = vmatpush.msra.mxu0 %v5977_v8  ;;  %3881 = vmatpush.msra.mxu3 %v3674_v20  ;;  %v3667_v20 = vld [vmem:[#allocation13 + $0x310] sm:$0xff] }
0x10bb   : > { %3446 = vmatmul.f32.gmra.mxu1 %v5937_v54  ;;  %3475 = vmatmul.f32.gmra.mxu2 %v5937_v54 }
0x10bc   : > { %3504 = vmatmul.f32.gmra.mxu3 %v5937_v54  ;;  %3533 = vmatmul.f32.gmra.mxu0 %v5937_v54 }
0x10bd   : > { %3744 = vmatpush.msra.mxu2 %v3586_v62  ;;  %3818 = vmatpush.msrb.mxu1 %v3647_v43  ;;  %v6009_v62 = vperm.slane %v5980_v55, 2 }
0x10be   : > { %3911 = vmatpush.msra.mxu0 %v5982_v57  ;;  %3882 = vmatpush.msra.mxu3 %v3673_v34  ;;  %v3666_v34 = vld [vmem:[#allocation13 + $0x308] sm:$0xff] }
0x10bf   : > { %3745 = vmatpush.msra.mxu2 %v3585_v7  ;;  %3819 = vmatpush.msrb.mxu1 %v3646_v61  ;;  %v3635_v7 = vld [vmem:[#allocation13 + $0x210] sm:$0xff] }
0x10c0   : > { %3912 = vmatpush.msra.mxu0 %v5985_v39  ;;  %3883 = vmatpush.msra.mxu3 %v3672_v24  ;;  %v6013_v61 = vld [vmem:[#allocation13 + $0x390] sm:$0xff]  ;;  %v3665_v24 = vld [vmem:[#allocation13 + $0x300] sm:$0xff] }
0x10c1   : > { %3820 = vmatpush.msrb.mxu1 %v3645_v10  ;;  %3846 = vmatpush.msrb.mxu2 %v3664_v11 }
0x10c2   : > { %3913 = vmatpush.msra.mxu0 %v5994_v44  ;;  %3884 = vmatpush.msra.mxu3 %v3671_v17 }
0x10c3   : > { %3821 = vmatpush.msrb.mxu1 %v3644_v18  ;;  %3847 = vmatpush.msrb.mxu2 %v3663_v12  ;;  %v3653_v18 = vld [vmem:[#allocation13 + $0x2a0] sm:$0xff] }
0x10c4   : > { %3914 = vmatpush.msra.mxu0 %v5997_v41  ;;  %v3669_v12 = vld [vmem:[#allocation13 + $0x320] sm:$0xff]  ;;  %3885 = vmatpush.msra.mxu3 %v3670_v9 }
0x10c5   : > { %3822 = vmatpush.msrb.mxu1 %v3643_v36  ;;  %3848 = vmatpush.msrb.mxu2 %v3662_v29  ;;  %v6018_v29 = vld [vmem:[#allocation13 + $0x388] sm:$0xff] }
0x10c6   : > { %3915 = vmatpush.msra.mxu0 %v6002_v47  ;;  %3886 = vmatpush.msra.mxu3 %v3669_v12  ;;  %v3293_v12 = vperm.slane %v5980_v55, 4 }
0x10c7   : > { %3823 = vmatpush.msrb.mxu1 %v3642_v30  ;;  %3849 = vmatpush.msrb.mxu2 %v3661_v23 }
0x10c8   : > { %3916 = vmatpush.msra.mxu0 %v6011_v2 }
0x10c9   : > { %3824 = vmatpush.msrb.mxu1 %v3641_v33  ;;  %3850 = vmatpush.msrb.mxu2 %v3660_v38  ;;  %v3652_v33 = vld [vmem:[#allocation13 + $0x298] sm:$0xff] }
0x10ca   : > { %3917 = vmatpush.msra.mxu0 %v6013_v61 }
0x10cb   : > { %3825 = vmatpush.msrb.mxu1 %v3640_v15  ;;  %3851 = vmatpush.msrb.mxu2 %v3659_v56  ;;  %v3668_v15 = vld [vmem:[#allocation13 + $0x318] sm:$0xff] }
0x10cc   : > { %3918 = vmatpush.msra.mxu0 %v6018_v29  ;;  %3887 = vmatpush.msra.mxu3 %v3668_v15 }
0x10cd   : > { %3826 = vmatpush.msrb.mxu1 %v3639_v63  ;;  %3852 = vmatpush.msrb.mxu2 %v3658_v19  ;;  %v6024_v19 = vld [vmem:[#allocation13 + $0x380] sm:$0xff] }
0x10ce   : > { %3919 = vmatpush.msra.mxu0 %v6024_v19  ;;  %3888 = vmatpush.msra.mxu3 %v3667_v20 }
0x10cf   : > { %3827 = vmatpush.msrb.mxu1 %v3638_v31  ;;  %3853 = vmatpush.msrb.mxu2 %v3657_v37  ;;  %v3650_v31 = vld [vmem:[#allocation13 + $0x288] sm:$0xff] }
0x10d0   : > { %3889 = vmatpush.msra.mxu3 %v3666_v34 }
0x10d1   : > { %3828 = vmatpush.msrb.mxu1 %v3637_v45  ;;  %3854 = vmatpush.msrb.mxu2 %v3656_v46 }
0x10d2   : > { %3890 = vmatpush.msra.mxu3 %v3665_v24 }
0x10d3   : > { %3829 = vmatpush.msrb.mxu1 %v3636_v25  ;;  %3855 = vmatpush.msrb.mxu2 %v3655_v32 }
0x10d5   : > { %3830 = vmatpush.msrb.mxu1 %v3635_v7  ;;  %3856 = vmatpush.msrb.mxu2 %v3654_v6 }
0x10d7   : > { %3831 = vmatpush.msrb.mxu1 %v3634_v13  ;;  %3857 = vmatpush.msrb.mxu2 %v3653_v18 }
0x10d9   : > { %3832 = vmatpush.msrb.mxu1 %v3633_v26  ;;  %3858 = vmatpush.msrb.mxu2 %v3652_v33 }
0x10db   : > { %3859 = vmatpush.msrb.mxu2 %v3651_v50 }
0x10dd   : > { %3860 = vmatpush.msrb.mxu2 %v3650_v31 }
0x10fb   : > { %v3322_v40 = vpop.f32.mrf.mxu1 }
0x10fc   : > { %v3323_v5 = vadd.f32 %v3322_v40, %v5988_v49  ;;  %v3409_v42 = vpop.f32.mrf.mxu0 }
0x10fd   : > { %v3410_v35 = vadd.f32 %v3409_v42, %v5992_v4  ;;  %v3649_v42 = vld [vmem:[#allocation13 + $0x280] sm:$0xff] }
0x10fe   : > { %v3537_v60 = vmax.f32 %v3323_v5, 0.0  ;;  %3861 = vmatpush.msrb.mxu2 %v3649_v42 }
0x10ff   : > { %v3540_v27 = vmax.f32 %v3410_v35, 0.0 }
0x1100   : > { %3717 = vmatmul.f32.vlgmr.msra.gmra.mxu1 %v3537_v60 }
0x1101   : > { %3804 = vmatmul.f32.vlgmr.msrb.gmra.mxu0 %v3540_v27  ;;  %v3351_v43 = vpop.f32.mrf.mxu2  ;;  %4329 = vmatpush.msra.mxu1 %v5959_v1 }
0x1102   : > { %v3352_v10 = vadd.f32 %v3351_v43, %v6005_v22  ;;  %v3380_v11 = vpop.f32.mrf.mxu3 }
0x1103   : > { %v3381_v14 = vadd.f32 %v3380_v11, %v6009_v62  ;;  %v3325_v36 = vpop.f32.mrf.mxu1  ;;  %4330 = vmatpush.msra.mxu1 %v5962_v52 }
0x1104   : > { %v3538_v59 = vmax.f32 %v3352_v10, 0.0  ;;  %v3326_v30 = vadd.f32 %v3325_v36, %v5988_v49  ;;  %v3412_v23 = vpop.f32.mrf.mxu0 }
0x1105   : > { %v3539_v38 = vmax.f32 %v3381_v14, 0.0  ;;  %v3413_v58 = vadd.f32 %v3412_v23, %v5992_v4  ;;  %4331 = vmatpush.msra.mxu1 %v5965_v51  ;;  %v6046_v14 = vperm.slane %v5980_v55, 7 }
0x1106   : > { %v3545_v56 = vmax.f32 %v3326_v30, 0.0  ;;  %3746 = vmatmul.f32.vlgmr.msra.gmra.mxu2 %v3538_v59 }
0x1107   : > { %v3548_v63 = vmax.f32 %v3413_v58, 0.0  ;;  %3775 = vmatmul.f32.vlgmr.msrb.gmra.mxu3 %v3539_v38  ;;  %4332 = vmatpush.msra.mxu1 %v5968_v21 }
0x1108   : > { %3720 = vmatmul.f32.gmra.mxu1 %v3545_v56 }
0x1109   : > { %3807 = vmatmul.f32.gmra.mxu0 %v3548_v63  ;;  %v3354_v37 = vpop.f32.mrf.mxu2  ;;  %4333 = vmatpush.msra.mxu1 %v5971_v3 }
0x110a   : > { %v3355_v40 = vadd.f32 %v3354_v37, %v6005_v22  ;;  %v3383_v5 = vpop.f32.mrf.mxu3 }
0x110b   : > { %v3384_v45 = vadd.f32 %v3383_v5, %v6009_v62  ;;  %v3328_v46 = vpop.f32.mrf.mxu1  ;;  %4334 = vmatpush.msra.mxu1 %v5974_v28 }
0x110c   : > { %v3546_v35 = vmax.f32 %v3355_v40, 0.0  ;;  %v3329_v60 = vadd.f32 %v3328_v46, %v5988_v49  ;;  %v3415_v25 = vpop.f32.mrf.mxu0 }
0x110d   : > { %v3547_v32 = vmax.f32 %v3384_v45, 0.0  ;;  %v3416_v17 = vadd.f32 %v3415_v25, %v5992_v4  ;;  %4335 = vmatpush.msra.mxu1 %v5977_v8 }
0x110e   : > { %v3553_v27 = vmax.f32 %v3329_v60, 0.0  ;;  %3749 = vmatmul.f32.gmra.mxu2 %v3546_v35 }
0x110f   : > { %v3556_v7 = vmax.f32 %v3416_v17, 0.0  ;;  %3778 = vmatmul.f32.gmra.mxu3 %v3547_v32  ;;  %4336 = vmatpush.msra.mxu1 %v5982_v57 }
0x1110   : > { %3723 = vmatmul.f32.gmra.mxu1 %v3553_v27 }
0x1111   : > { %3810 = vmatmul.f32.gmra.mxu0 %v3556_v7  ;;  %v3357_v1 = vpop.f32.mrf.mxu2  ;;  %4337 = vmatpush.msra.mxu1 %v5985_v39 }
0x1112   : > { %v3358_v6 = vadd.f32 %v3357_v1, %v6005_v22  ;;  %v3386_v9 = vpop.f32.mrf.mxu3 }
0x1113   : > { %v3387_v43 = vadd.f32 %v3386_v9, %v6009_v62  ;;  %4338 = vmatpush.msra.mxu1 %v5994_v44  ;;  %v3294_v44 = vperm.slane %v5980_v55, 5 }
0x1114   : > { %v3554_v52 = vmax.f32 %v3358_v6, 0.0 }
0x1115   : > { %v3555_v10 = vmax.f32 %v3387_v43, 0.0  ;;  %4339 = vmatpush.msra.mxu1 %v5997_v41 }
0x1116   : > { %3752 = vmatmul.f32.gmra.mxu2 %v3554_v52 }
0x1117   : > { %3781 = vmatmul.f32.gmra.mxu3 %v3555_v10  ;;  %4340 = vmatpush.msra.mxu1 %v6002_v47 }
0x1118   : > { %v3331_v51 = vpop.f32.mrf.mxu1 }
0x1119   : > { %v3332_v11 = vadd.f32 %v3331_v51, %v5988_v49  ;;  %v3418_v13 = vpop.f32.mrf.mxu0  ;;  %4341 = vmatpush.msra.mxu1 %v6011_v2 }
0x111a   : > { %v3419_v21 = vadd.f32 %v3418_v13, %v5992_v4 }
0x111b   : > { %v3561_v18 = vmax.f32 %v3332_v11, 0.0  ;;  %4342 = vmatpush.msra.mxu1 %v6013_v61 }
0x111c   : > { %v3564_v3 = vmax.f32 %v3419_v21, 0.0 }
0x111d   : > { %3726 = vmatmul.f32.gmra.mxu1 %v3561_v18 }
0x111e   : > { %3813 = vmatmul.f32.gmra.mxu0 %v3564_v3  ;;  %v3360_v28 = vpop.f32.mrf.mxu2  ;;  %4343 = vmatpush.msra.mxu1 %v6018_v29 }
0x111f   : > { %v3361_v8 = vadd.f32 %v3360_v28, %v6005_v22  ;;  %v3389_v49 = vpop.f32.mrf.mxu3  ;;  %v3295_v22 = vperm.slane %v5980_v55, 6 }
0x1120   : > { %v3390_v57 = vadd.f32 %v3389_v49, %v6009_v62  ;;  %v3438_v4 = vpop.f32.mrf.mxu1  ;;  %4344 = vmatpush.msra.mxu1 %v6024_v19 }
0x1121   : > { %v3562_v39 = vmax.f32 %v3361_v8, 0.0  ;;  %v3439_v36 = vadd.f32 %v3438_v4, %v3293_v12  ;;  %v3525_v59 = vpop.f32.mrf.mxu0 }
0x1122   : > { %v3563_v30 = vmax.f32 %v3390_v57, 0.0  ;;  %v3526_v23 = vadd.f32 %v3525_v59, %v6046_v14 }
0x1123   : > { %v3541_v26 = vmax.f32 %v3439_v36, 0.0  ;;  %3755 = vmatmul.f32.gmra.mxu2 %v3562_v39 }
0x1124   : > { %v3544_v33 = vmax.f32 %v3526_v23, 0.0  ;;  %3784 = vmatmul.f32.gmra.mxu3 %v3563_v30  ;;  %v4581_v30 = vld [vmem:[#allocation15] ss:$0 sm:$0xff] }
0x1125   : > { %3833 = vmatmul.f32.vlgmr.msrb.gmra.mxu1 %v3541_v26 }
0x1126   : > { %3920 = vmatmul.f32.vlgmr.msra.gmra.mxu0 %v3544_v33  ;;  %v3467_v41 = vpop.f32.mrf.mxu2 }
0x1127   : > { %v3468_v62 = vadd.f32 %v3467_v41, %v3294_v44  ;;  %v3496_v38 = vpop.f32.mrf.mxu3 }
0x1128   : > { %v3497_v58 = vadd.f32 %v3496_v38, %v3295_v22  ;;  %v3441_v15 = vpop.f32.mrf.mxu1 }
0x1129   : > { %v3542_v47 = vmax.f32 %v3468_v62, 0.0  ;;  %v3442_v56 = vadd.f32 %v3441_v15, %v3293_v12  ;;  %v3528_v50 = vpop.f32.mrf.mxu0 }
0x112a   : > { %v3543_v63 = vmax.f32 %v3497_v58, 0.0  ;;  %v3529_v20 = vadd.f32 %v3528_v50, %v6046_v14 }
0x112b   : > { %v3549_v55 = vmax.f32 %v3442_v56, 0.0  ;;  %3862 = vmatmul.f32.vlgmr.msrb.gmra.mxu2 %v3542_v47 }
0x112c   : > { %v3552_v2 = vmax.f32 %v3529_v20, 0.0  ;;  %3891 = vmatmul.f32.vlgmr.msra.gmra.mxu3 %v3543_v63 }
0x112d   : > { %3836 = vmatmul.f32.gmra.mxu1 %v3549_v55 }
0x112e   : > { %3923 = vmatmul.f32.gmra.mxu0 %v3552_v2  ;;  %v3470_v61 = vpop.f32.mrf.mxu2 }
0x112f   : > { %v3471_v31 = vadd.f32 %v3470_v61, %v3294_v44  ;;  %v3499_v37 = vpop.f32.mrf.mxu3 }
0x1130   : > { %v3500_v34 = vadd.f32 %v3499_v37, %v3295_v22  ;;  %v3444_v40 = vpop.f32.mrf.mxu1 }
0x1131   : > { %v3550_v29 = vmax.f32 %v3471_v31, 0.0  ;;  %v3445_v5 = vadd.f32 %v3444_v40, %v3293_v12  ;;  %v3531_v17 = vpop.f32.mrf.mxu0 }
0x1132   : > { %v3551_v42 = vmax.f32 %v3500_v34, 0.0  ;;  %v3532_v6 = vadd.f32 %v3531_v17, %v6046_v14 }
0x1133   : > { %v3557_v45 = vmax.f32 %v3445_v5, 0.0  ;;  %3865 = vmatmul.f32.gmra.mxu2 %v3550_v29 }
0x1134   : > { %3894 = vmatmul.f32.gmra.mxu3 %v3551_v42  ;;  %v3560_v11 = vmax.f32 %v3532_v6, 0.0 }
0x1135   : > { %3839 = vmatmul.f32.gmra.mxu1 %v3557_v45 }
0x1136   : > { %v3473_v46 = vpop.f32.mrf.mxu2 }
0x1137   : > { %v3474_v19 = vadd.f32 %v3473_v46, %v3294_v44  ;;  %v3502_v24 = vpop.f32.mrf.mxu3 }
0x1138   : > { %v3503_v35 = vadd.f32 %v3502_v24, %v3295_v22  ;;  %v3447_v60 = vpop.f32.mrf.mxu1 }
0x1139   : > { %v3558_v25 = vmax.f32 %v3474_v19, 0.0  ;;  %v3448_v32 = vadd.f32 %v3447_v60, %v3293_v12  ;;  %v3534_v13 = vpop.f32.mrf.mxu0 }
0x113a   : > { %v3559_v27 = vmax.f32 %v3503_v35, 0.0  ;;  %v3535_v21 = vadd.f32 %v3534_v13, %v6046_v14 }
0x113b   : > { %v3565_v7 = vmax.f32 %v3448_v32, 0.0  ;;  %3868 = vmatmul.f32.gmra.mxu2 %v3558_v25 }
0x113c   : > { %3897 = vmatmul.f32.gmra.mxu3 %v3559_v27  ;;  %v3568_v18 = vmax.f32 %v3535_v21, 0.0 }
0x113d   : > { %3842 = vmatmul.f32.gmra.mxu1 %v3565_v7 }
0x113e   : > { %v3476_v1 = vpop.f32.mrf.mxu2 }
0x113f   : > { %v3477_v9 = vadd.f32 %v3476_v1, %v3294_v44  ;;  %v3505_v43 = vpop.f32.mrf.mxu3 }
0x1140   : > { %v3506_v52 = vadd.f32 %v3505_v43, %v3295_v22 }
0x1141   : > { %v3566_v10 = vmax.f32 %v3477_v9, 0.0 }
0x1142   : > { %v3567_v51 = vmax.f32 %v3506_v52, 0.0 }
0x1143   : > { %3871 = vmatmul.f32.gmra.mxu2 %v3566_v10 }
0x1144   : > { %3900 = vmatmul.f32.gmra.mxu3 %v3567_v51 }
0x1145   : > { %3926 = vmatmul.f32.vlgmr.msra.gmra.mxu1 %v3560_v11 }
0x114d   : > { %3929 = vmatmul.f32.gmra.mxu1 %v3568_v18 }
0x117d   : > { %v3718_v3 = vpop.f32.mrf.mxu1 }
0x117e   : > { %v3805_v28 = vpop.f32.mrf.mxu0  ;;  %v3719_v33 = vadd.f32 %v4581_v30, %v3718_v3 }
0x1185   : > { %v3721_v12 = vpop.f32.mrf.mxu1 }
0x1186   : > { %v3808_v4 = vpop.f32.mrf.mxu0  ;;  %v3722_v15 = vadd.f32 %v4581_v30, %v3721_v12 }
0x1189   : > { %v3747_v8 = vpop.f32.mrf.mxu2 }
0x118a   : > { %v3776_v49 = vpop.f32.mrf.mxu3  ;;  %v3748_v41 = vadd.f32 %v3747_v8, %v3719_v33 }
0x118c   : > { %v3777_v38 = vadd.f32 %v3776_v49, %v3748_v41 }
0x118d   : > { %v3724_v57 = vpop.f32.mrf.mxu1 }
0x118e   : > { %v3811_v23 = vpop.f32.mrf.mxu0  ;;  %v3806_v50 = vadd.f32 %v3805_v28, %v3777_v38  ;;  %v3725_v37 = vadd.f32 %v4581_v30, %v3724_v57 }
0x1191   : > { %v3750_v39 = vpop.f32.mrf.mxu2 }
0x1192   : > { %v3779_v36 = vpop.f32.mrf.mxu3  ;;  %v3751_v56 = vadd.f32 %v3750_v39, %v3722_v15 }
0x1194   : > { %v3780_v55 = vadd.f32 %v3779_v36, %v3751_v56 }
0x1196   : > { %v3809_v5 = vadd.f32 %v3808_v4, %v3780_v55 }
0x1199   : > { %v3753_v26 = vpop.f32.mrf.mxu2 }
0x119a   : > { %v3727_v59 = vpop.f32.mrf.mxu1  ;;  %v3782_v44 = vpop.f32.mrf.mxu3  ;;  %v3754_v29 = vadd.f32 %v3753_v26, %v3725_v37 }
0x119b   : > { %v3814_v14 = vpop.f32.mrf.mxu0  ;;  %v3728_v25 = vadd.f32 %v4581_v30, %v3727_v59 }
0x119c   : > { %v3783_v24 = vadd.f32 %v3782_v44, %v3754_v29 }
0x119e   : > { %v3812_v1 = vadd.f32 %v3811_v23, %v3783_v24 }
0x11a2   : > { %v3834_v22 = vpop.f32.mrf.mxu1 }
0x11a3   : > { %v3835_v63 = vadd.f32 %v3834_v22, %v3806_v50  ;;  %v3921_v31 = vpop.f32.mrf.mxu0 }
0x11a6   : > { %v3756_v62 = vpop.f32.mrf.mxu2 }
0x11a7   : > { %v3785_v58 = vpop.f32.mrf.mxu3  ;;  %v3757_v7 = vadd.f32 %v3756_v62, %v3728_v25 }
0x11a9   : > { %v3786_v10 = vadd.f32 %v3785_v58, %v3757_v7 }
0x11aa   : > { %v3837_v47 = vpop.f32.mrf.mxu1 }
0x11ab   : > { %v3838_v45 = vadd.f32 %v3837_v47, %v3809_v5  ;;  %v3924_v17 = vpop.f32.mrf.mxu0  ;;  %v3815_v21 = vadd.f32 %v3814_v14, %v3786_v10 }
0x11ae   : > { %v3863_v20 = vpop.f32.mrf.mxu2 }
0x11af   : > { %v3864_v2 = vadd.f32 %v3863_v20, %v3835_v63  ;;  %v3892_v61 = vpop.f32.mrf.mxu3 }
0x11b1   : > { %v3893_v34 = vadd.f32 %v3892_v61, %v3864_v2 }
0x11b2   : > { %v3840_v40 = vpop.f32.mrf.mxu1 }
0x11b3   : > { %v3922_v42 = vadd.f32 %v3921_v31, %v3893_v34  ;;  %v3841_v9 = vadd.f32 %v3840_v40, %v3812_v1 }
0x11b5   : > { %v3933_v46 = vadd.f32 %v3922_v42, %v5897_v16 }
0x11b6   : > { %v3866_v19 = vpop.f32.mrf.mxu2 }
0x11b7   : > { %v3867_v35 = vadd.f32 %v3866_v19, %v3838_v45  ;;  %v3895_v60 = vpop.f32.mrf.mxu3  ;;  %3939 = vadd.xlane.f32.xlu1 %v3933_v46  ;;  %v4582_v19 = vld [vmem:[#allocation16] ss:$0 sm:$0xff] }
0x11b9   : > { %v3896_v32 = vadd.f32 %v3895_v60, %v3867_v35  ;;  %v4583_v60 = vld [vmem:[#allocation18] ss:$0 sm:$0xff] }
0x11ba   : > { %v3843_v27 = vpop.f32.mrf.mxu1 }
0x11bb   : > { %v3925_v6 = vadd.f32 %v3924_v17, %v3896_v32  ;;  %v3844_v3 = vadd.f32 %v3843_v27, %v3815_v21 }
0x11bd   : > { %v3934_v43 = vadd.f32 %v3925_v6, %v5916_v0 }
0x11be   : > { %v3869_v52 = vpop.f32.mrf.mxu2 }
0x11bf   : > { %v3870_v51 = vadd.f32 %v3869_v52, %v3841_v9  ;;  %v3898_v11 = vpop.f32.mrf.mxu3  ;;  %3941 = vadd.xlane.f32.xlu2 %v3934_v43 }
0x11c1   : > { %v3899_v16 = vadd.f32 %v3898_v11, %v3870_v51 }
0x11c2   : > { %v3927_v13 = vpop.f32.mrf.mxu1 }
0x11c3   : > { %v3928_v18 = vadd.f32 %v3927_v13, %v3899_v16 }
0x11c5   : > { %v3935_v12 = vadd.f32 %v3928_v18, %v5928_v48 }
0x11c6   : > { %v3872_v28 = vpop.f32.mrf.mxu2 }
0x11c7   : > { %v3873_v8 = vadd.f32 %v3872_v28, %v3844_v3  ;;  %3943 = vadd.xlane.f32.xlu0 %v3935_v12  ;;  %v3901_v49 = vpop.f32.mrf.mxu3 }
0x11c9   : > { %v3902_v57 = vadd.f32 %v3901_v49, %v3873_v8 }
0x11ca   : > { %v3930_v4 = vpop.f32.mrf.mxu1 }
0x11cb   : > { %v3931_v39 = vadd.f32 %v3930_v4, %v3902_v57 }
0x11cd   : > { %v3936_v0 = vadd.f32 %v3931_v39, %v5937_v54 }
0x11cf   : > { %3945 = vadd.xlane.f32.xlu1 %v3936_v0 }
0x122a   : > { %v3940_v36 = vpop.xlane.xlu1 %3939 }
0x122b   : > { %v3947_v59 = vmul.f32 %v3940_v36, %v5837_v53 }
0x122d   : > { %v3951_v30 = vsub.f32 %v3933_v46, %v3947_v59 }
0x122f   : > { %v3955_v23 = vmul.f32 %v3951_v30, %v3951_v30 }
0x1231   : > { %3959 = vadd.xlane.f32.xlu2 %v3955_v23 }
0x1232   : > { %v3942_v26 = vpop.xlane.xlu2 %3941 }
0x1233   : > { %v3948_v44 = vmul.f32 %v3942_v26, %v5837_v53 }
0x1235   : > { %v3952_v48 = vsub.f32 %v3934_v43, %v3948_v44 }
0x1237   : > { %v3956_v33 = vmul.f32 %v3952_v48, %v3952_v48 }
0x1239   : > { %3961 = vadd.xlane.f32.xlu0 %v3956_v33 }
0x123a   : > { %v3944_v22 = vpop.xlane.xlu0 %3943 }
0x123b   : > { %v3949_v41 = vmul.f32 %v3944_v22, %v5837_v53 }
0x123d   : > { %v6070_v14 = vsub.f32 %v3935_v12, %v3949_v41 }
0x123f   : > { %v3957_v54 = vmul.f32 %v6070_v14, %v6070_v14 }
0x1241   : > { %3963 = vadd.xlane.f32.xlu1 %v3957_v54 }
0x1242   : > { %v3946_v62 = vpop.xlane.xlu1 %3945 }
0x1243   : > { %v3950_v38 = vmul.f32 %v3946_v62, %v5837_v53 }
0x1245   : > { %v6075_v58 = vsub.f32 %v3936_v0, %v3950_v38 }
0x1247   : > { %v3958_v15 = vmul.f32 %v6075_v58, %v6075_v58 }
0x1249   : > { %3965 = vadd.xlane.f32.xlu2 %v3958_v15 }
0x12a4   : > { %v3960_v47 = vpop.xlane.xlu2 %3959 }
0x12a5   : > { %v3967_v56 = vmul.f32 %v3960_v47, %v5837_v53 }
0x12a7   : > { %v3971_v50 = vadd.f32 1e-05, %v3967_v56 }
0x12a9   : > { %4722 = vrsqrt.f32 %v3971_v50  ;;  %vm3981_vm6 = vweird.f32 %v3971_v50 }
0x12ac   : > { %v3962_v63 = vpop.xlane.xlu0 %3961 }
0x12ad   : > { %v3968_v20 = vmul.f32 %v3962_v63, %v5837_v53 }
0x12af   : > { %v4723_v55 = vpop.eup %4722  ;;  %v3972_v2 = vadd.f32 1e-05, %v3968_v20 }
0x12b0   : > { %v3976_v61 = vmul.f32 %v4723_v55, %v3971_v50  ;;  %vm3982_vm5 = vweird.f32 %v4723_v55 }
0x12b1   : > { %4724 = vrsqrt.f32 %v3972_v2  ;;  %vm3983_vm7 = vmor %vm3981_vm6, %vm3982_vm5  ;;  %vm3991_vm9 = vweird.f32 %v3972_v2 }
0x12b2   : > { %v3977_v31 = vmul.f32 %v4723_v55, %v3976_v61 }
0x12b4   : > { %v3978_v37 = vmul.f32 0.5, %v3977_v31  ;;  %v3964_v34 = vpop.xlane.xlu1 %3963 }
0x12b5   : > { %v3969_v40 = vmul.f32 %v3964_v34, %v5837_v53 }
0x12b6   : > { %v3979_v29 = vsub.f32 1.5, %v3978_v37 }
0x12b7   : > { %v4725_v5 = vpop.eup %4724  ;;  %v3973_v42 = vadd.f32 1e-05, %v3969_v40 }
0x12b8   : > { %v3980_v45 = vmul.f32 %v4723_v55, %v3979_v29  ;;  %v3986_v46 = vmul.f32 %v4725_v5, %v3972_v2  ;;  %vm3992_vm8 = vweird.f32 %v4725_v5 }
0x12b9   : > { %4726 = vrsqrt.f32 %v3973_v42  ;;  %vm3993_vm10 = vmor %vm3991_vm9, %vm3992_vm8  ;;  %vm4001_vm12 = vweird.f32 %v3973_v42 }
0x12ba   : > { %v3984_v24 = vsel %vm3983_vm7, %v4723_v55, %v3980_v45  ;;  %v3987_v35 = vmul.f32 %v4725_v5, %v3986_v46 }
0x12bb   : > { %v4015_v25 = vmul.f32 %v3984_v24, %v3951_v30 }
0x12bc   : > { %v3988_v32 = vmul.f32 0.5, %v3987_v35  ;;  %v3966_v17 = vpop.xlane.xlu2 %3965 }
0x12bd   : > { %v4022_v27 = vmul.f32 %v4582_v19, %v4015_v25  ;;  %v3970_v7 = vmul.f32 %v3966_v17, %v5837_v53 }
0x12be   : > { %v3989_v1 = vsub.f32 1.5, %v3988_v32 }
0x12bf   : > { %v4727_v6 = vpop.eup %4726  ;;  %v4029_v9 = vadd.f32 %v4583_v60, %v4022_v27  ;;  %v3974_v43 = vadd.f32 1e-05, %v3970_v7 }
0x12c0   : > { %v3990_v52 = vmul.f32 %v4725_v5, %v3989_v1  ;;  %v3996_v10 = vmul.f32 %v4727_v6, %v3973_v42  ;;  %vm4002_vm11 = vweird.f32 %v4727_v6 }
0x12c1   : > { %4033 = vst [vmem:[%s6088_s28] sm:$0xff] %v4029_v9  ;;  %4728 = vrsqrt.f32 %v3974_v43  ;;  %vm4003_vm13 = vmor %vm4001_vm12, %vm4002_vm11  ;;  %vm4011_vm15 = vweird.f32 %v3974_v43 }
0x12c2   : > { %v3994_v53 = vsel %vm3993_vm10, %v4725_v5, %v3990_v52  ;;  %v3997_v51 = vmul.f32 %v4727_v6, %v3996_v10 }
0x12c3   : > { %v4016_v11 = vmul.f32 %v3994_v53, %v3952_v48 }
0x12c4   : > { %v3998_v16 = vmul.f32 0.5, %v3997_v51 }
0x12c5   : > { %v4023_v13 = vmul.f32 %v4582_v19, %v4016_v11 }
0x12c6   : > { %v3999_v21 = vsub.f32 1.5, %v3998_v16 }
0x12c7   : > { %v4729_v18 = vpop.eup %4728  ;;  %v4030_v3 = vadd.f32 %v4583_v60, %v4023_v13 }
0x12c8   : > { %v4000_v12 = vmul.f32 %v4727_v6, %v3999_v21  ;;  %v4006_v28 = vmul.f32 %v4729_v18, %v3974_v43  ;;  %vm4012_vm14 = vweird.f32 %v4729_v18 }
0x12c9   : > { %4034 = vst [vmem:[%s6088_s28 + $0x8] sm:$0xff] %v4030_v3  ;;  %vm4013_vm0 = vmor %vm4011_vm15, %vm4012_vm14 }
0x12ca   : > { %v4004_v8 = vsel %vm4003_vm13, %v4727_v6, %v4000_v12  ;;  %v4007_v49 = vmul.f32 %v4729_v18, %v4006_v28 }
0x12cb   : > { %v4017_v57 = vmul.f32 %v4004_v8, %v6070_v14 }
0x12cc   : > { %v4008_v4 = vmul.f32 0.5, %v4007_v49 }
0x12cd   : > { %v4024_v39 = vmul.f32 %v4582_v19, %v4017_v57 }
0x12ce   : > { %v4009_v0 = vsub.f32 1.5, %v4008_v4 }
0x12cf   : > { %v4031_v36 = vadd.f32 %v4583_v60, %v4024_v39 }
0x12d0   : > { %v4010_v59 = vmul.f32 %v4729_v18, %v4009_v0 }
0x12d1   : > { %4035 = vst [vmem:[%s6088_s28 + $0x10] sm:$0xff] %v4031_v36 }
0x12d2   : > { %v4014_v30 = vsel %vm4013_vm0, %v4729_v18, %v4010_v59 }
0x12d3   : > { %v4018_v23 = vmul.f32 %v4014_v30, %v6075_v58 }
0x12d5   : > { %v4025_v26 = vmul.f32 %v4582_v19, %v4018_v23 }
0x12d7   : > { %v4032_v44 = vadd.f32 %v4583_v60, %v4025_v26 }
0x12d9   : > { %4036 = vst [vmem:[%s6088_s28 + $0x18] sm:$0xff] %v4032_v44 }
0x12da PF: > { %s29_s25 = sadd.s32 1, %s5094_s25  }
0x12db   : > { %p26_p7 = scmp.ge.s32.totalorder %s29_s25, 4  }
0x12dd   :  { %28 = sbr.rel (!%p26_p7) target bundleno = 11 (0xb), region = 147 }
0x12e2   :  { %4059 = vsyncpa [#allocation3], 1 }
0x12e3   :  { %4061 = vsyncpa [#allocation3 + $0x1], 1 }
0x12e4   :  { %4062 = vsyncpa [#allocation5], 1 }
0x12e5   :  { %4063 = vsyncpa [#allocation8], 1 }
0x12e6   :  { %4064 = vsyncpa [#allocation11], 1 }
0x12e7   :  { %4065 = vsyncpa [#allocation14], 1 }
0x12e8   :  { %4066 = vsyncpa [#allocation17], 1 }

</bundles_post_ra>
